<compile_context>
chip_gen: v7x
topology: tpu7x:2x2x1
jax: 0.10.0
libtpu: 0.0.40
codegen_flags: <defaults>
</compile_context>

<pallas_src>
import jax
import jax.numpy as jnp
from jax.experimental import pallas as pl
from jax.experimental.pallas import tpu as pltpu


# ------------------------------ fused kernel ------------------------------- #

def _encoder_kernel(x_ref, w1_ref, b1_ref, w2_ref, b2_ref,
                    wfc1_ref, bfc1_ref, wfc2_ref, bfc2_ref,
                    out_ref,
                    xb_ref, h1_ref, p1pad_ref, im2_ref, h2_ref, fin_ref):
    f32 = jnp.float32
    B = x_ref.shape[0]
    C1 = w1_ref.shape[-1]          # 32
    C2 = w2_ref.shape[-1]          # 64

    # ---- Conv2d(1, 32, 3, padding=1): lane-broadcast the zero-padded input
    #      once, then 3 statements of 3 fused full-width tap FMAs (VPU).
    xb_ref[...] = jnp.zeros(xb_ref.shape, f32)
    xb_ref[:, 1:17, 1:17, :] = jnp.broadcast_to(x_ref[...], (B, 16, 16, C1))
    for dy in range(3):
        row = (xb_ref[:, dy:dy + 16, 0:16, :] * w1_ref[3 * dy]
               + xb_ref[:, dy:dy + 16, 1:17, :] * w1_ref[3 * dy + 1]
               + xb_ref[:, dy:dy + 16, 2:18, :] * w1_ref[3 * dy + 2])
        if dy == 0:
            h1_ref[...] = row
        else:
            h1_ref[...] += row

    # ---- MaxPool2d(2) #1 (16x16 -> 8x8), vectorized.  Bias + ReLU after the
    #      pool (exactly equal to ReLU-then-pool for channel-constant bias).
    p1w = jnp.maximum(h1_ref[:, :, pl.ds(0, 8, 2), :],
                      h1_ref[:, :, pl.ds(1, 8, 2), :])               # (B,16,8,32)
    p1 = jnp.max(p1w.reshape(B * 8, 2, 8, C1), axis=1).reshape(B, 8, 8, C1)
    p1 = jnp.maximum(p1 + b1_ref[...], 0.0)
    p1pad_ref[...] = jnp.zeros(p1pad_ref.shape, f32)                  # padding=1 ring
    p1pad_ref[:, 1:9, 1:9, :] = p1

    # ---- Conv2d(32, 64, 3, padding=1): build (B*64, 288) im2col once in a
    #      lane-dense scratch, then ONE K=288 MXU GEMM with f32 accumulation.
    for t in range(9):
        dy, dx = divmod(t, 3)
        im2_ref[:, t * C1:(t + 1) * C1] = (
            p1pad_ref[:, dy:dy + 8, dx:dx + 8, :].reshape(B * 64, C1))
    h2_ref[...] = jnp.dot(im2_ref[...], w2_ref[...],
                          preferred_element_type=f32).reshape(B, 8, 8, C2)

    # ---- MaxPool2d(2) #2 (8x8 -> 4x4) + bias + ReLU, vectorized as above.
    p2w = jnp.maximum(h2_ref[:, :, pl.ds(0, 4, 2), :],
                      h2_ref[:, :, pl.ds(1, 4, 2), :])               # (B,8,4,64)
    p2 = jnp.max(p2w.reshape(B * 4, 2, 4, C2), axis=1).reshape(B, 4, 4, C2)
    p2 = jnp.maximum(p2 + b2_ref[...], 0.0)

    # ---- Flatten into a lane-dense (B, 1024) slab, position-major /
    #      channel-minor (fc1 rows were pre-permuted to this order, absorbing
    #      PyTorch's NCHW nn.Flatten).
    for p in range(16):
        y, x = divmod(p, 4)
        fin_ref[:, p * C2:(p + 1) * C2] = p2[:, y, x, :]

    # ---- Linear(1024, 128) + ReLU and Linear(128, 64): two MXU GEMMs.
    h3 = jnp.maximum(jnp.dot(fin_ref[...], wfc1_ref[...],
                             preferred_element_type=f32) + bfc1_ref[...], 0.0)
    out_ref[...] = (jnp.dot(h3, wfc2_ref[...], preferred_element_type=f32)
                    + bfc2_ref[...])


# ------------------------------ host wrappers ------------------------------ #

def _encoder_pallas(x_nhwc, wp):
    B = x_nhwc.shape[0]

    def full(shape):
        zeros = (0,) * len(shape)
        return pl.BlockSpec(shape, lambda i: zeros)

    return pl.pallas_call(
        _encoder_kernel,
        out_shape=jax.ShapeDtypeStruct((B, 64), jnp.float32),
        grid=(1,),
        in_specs=[
            full((B, 16, 16, 1)),
            full(wp["w1"].shape), full(wp["b1"].shape),
            full(wp["w2"].shape), full(wp["b2"].shape),
            full(wp["wfc1"].shape), full(wp["bfc1"].shape),
            full(wp["wfc2"].shape), full(wp["bfc2"].shape),
        ],
        out_specs=full((B, 64)),
        scratch_shapes=[
            pltpu.VMEM((B, 18, 18, 32), jnp.float32),   # lane-broadcast padded input
            pltpu.VMEM((B, 16, 16, 32), jnp.float32),   # conv1 accumulator / output
            pltpu.VMEM((B, 10, 10, 32), jnp.float32),   # zero-padded pool1 output
            pltpu.VMEM((B * 64, 9 * 32), jnp.float32),  # conv2 im2col (lane-dense)
            pltpu.VMEM((B, 8, 8, 64), jnp.float32),     # conv2 output
            pltpu.VMEM((B, 16 * 64), jnp.float32),      # pooled+flattened fc1 input
        ],
        compiler_params=pltpu.CompilerParams(
            dimension_semantics=("arbitrary",)),
    )(x_nhwc, wp["w1"], wp["b1"], wp["w2"], wp["b2"],
      wp["wfc1"], wp["bfc1"], wp["wfc2"], wp["bfc2"])


def prepare_params(params):
    """One-time weight re-layout, run OUTSIDE the jitted forward.

    - conv1: (co,1,kh,kw) -> (tap, 1, 1, co) for broadcast tap-FMAs.
    - conv2: (co,ci,kh,kw) -> (tap*ci, co) = (288, 64) for ONE im2col GEMM.
    - fc1:   rows permuted/grouped so the kernel's NHWC position-major,
             channel-minor flatten matches PyTorch's NCHW nn.Flatten.
    - fc weights pre-transposed to (in, out).
    """
    w1 = jnp.transpose(params["conv1_w"][:, 0, :, :], (1, 2, 0)).reshape(9, 1, 1, 32)
    b1 = params["conv1_b"].reshape(1, 1, 1, 32)

    w2 = jnp.transpose(params["conv2_w"], (2, 3, 1, 0)).reshape(9 * 32, 64)
    b2 = params["conv2_b"].reshape(1, 1, 1, 64)

    wfc1 = params["fc1_w"].reshape(128, 64, 4, 4)                # (n, c, y, x)
    wfc1 = jnp.transpose(wfc1, (2, 3, 1, 0)).reshape(16 * 64, 128)  # ((y*4+x)*64+c, n)
    bfc1 = params["fc1_b"].reshape(1, 128)

    wfc2 = jnp.transpose(params["fc2_w"], (1, 0))                # (128, 64)
    bfc2 = params["fc2_b"].reshape(1, 64)

    return dict(w1=w1, b1=b1, w2=w2, b2=b2,
                wfc1=wfc1, bfc1=bfc1, wfc2=wfc2, bfc2=bfc2)


def simclr_encoder_forward(prepared, x_nchw):
    B = x_nchw.shape[0]
    # C == 1, so NCHW -> NHWC is a pure (free) reshape, no transpose.
    x_nhwc = x_nchw.reshape(B, 16, 16, 1)
    return _encoder_pallas(x_nhwc, prepared)


def init_params(key):
    # Deterministic synthetic weights, PyTorch parameter shapes.
    ks = jax.random.split(key, 8)
    s = 0.1
    return {
        "conv1_w": s * jax.random.normal(ks[0], (32, 1, 3, 3), jnp.float32),
        "conv1_b": s * jax.random.normal(ks[1], (32,), jnp.float32),
        "conv2_w": s * jax.random.normal(ks[2], (64, 32, 3, 3), jnp.float32),
        "conv2_b": s * jax.random.normal(ks[3], (64,), jnp.float32),
        "fc1_w": s * jax.random.normal(ks[4], (128, 64 * 4 * 4), jnp.float32),
        "fc1_b": s * jax.random.normal(ks[5], (128,), jnp.float32),
        "fc2_w": s * jax.random.normal(ks[6], (64, 128), jnp.float32),
        "fc2_b": s * jax.random.normal(ks[7], (64,), jnp.float32),
    }


def _reference_forward(params, x_nchw):
    """Pure-JAX reference matching the PyTorch module exactly (f32)."""
    dn = ("NCHW", "OIHW", "NCHW")
    y = jax.lax.conv_general_dilated(x_nchw, params["conv1_w"], (1, 1),
                                     ((1, 1), (1, 1)), dimension_numbers=dn)
    y = jax.nn.relu(y + params["conv1_b"].reshape(1, 32, 1, 1))
    y = jax.lax.reduce_window(y, -jnp.inf, jax.lax.max,
                              (1, 1, 2, 2), (1, 1, 2, 2), "VALID")
    y = jax.lax.conv_general_dilated(y, params["conv2_w"], (1, 1),
                                     ((1, 1), (1, 1)), dimension_numbers=dn)
    y = jax.nn.relu(y + params["conv2_b"].reshape(1, 64, 1, 1))
    y = jax.lax.reduce_window(y, -jnp.inf, jax.lax.max,
                              (1, 1, 2, 2), (1, 1, 2, 2), "VALID")
    y = y.reshape(x_nchw.shape[0], -1)                       # NCHW flatten
    y = jax.nn.relu(y @ params["fc1_w"].T + params["fc1_b"])
    return y @ params["fc2_w"].T + params["fc2_b"]


if __name__ == "__main__":
    key = jax.random.PRNGKey(0)
    pkey, xkey = jax.random.split(key)
    params = init_params(pkey)
    prepared = prepare_params(params)        # one-time layout work, outside jit
    x = jax.random.normal(xkey, (2, 1, 16, 16), jnp.float32)  # B=2, NCHW

    fwd = jax.jit(simclr_encoder_forward)
    out = jax.block_until_ready(fwd(prepared, x))
    assert out.shape == (2, 64) and out.dtype == jnp.float32

    ref = jax.block_until_ready(jax.jit(_reference_forward)(params, x))
    assert float(jnp.max(jnp.abs(out - ref))) < 1e-3
    print("KERNEL_OK")
</pallas_src>

<mosaic_0001>
module attributes {stable_mosaic.version = 11 : i64} {
  func.func @_encoder_kernel(%arg0: i32, %arg1: memref<2x16x16x1xf32, #tpu.memory_space<vmem>>, %arg2: memref<9x1x1x32xf32, #tpu.memory_space<vmem>>, %arg3: memref<1x1x1x32xf32, #tpu.memory_space<vmem>>, %arg4: memref<288x64xf32, #tpu.memory_space<vmem>>, %arg5: memref<1x1x1x64xf32, #tpu.memory_space<vmem>>, %arg6: memref<1024x128xf32, #tpu.memory_space<vmem>>, %arg7: memref<1x128xf32, #tpu.memory_space<vmem>>, %arg8: memref<128x64xf32, #tpu.memory_space<vmem>>, %arg9: memref<1x64xf32, #tpu.memory_space<vmem>>, %arg10: memref<2x64xf32, #tpu.memory_space<vmem>>, %arg11: memref<2x18x18x32xf32, #tpu.memory_space<vmem>>, %arg12: memref<2x16x16x32xf32, #tpu.memory_space<vmem>>, %arg13: memref<2x10x10x32xf32, #tpu.memory_space<vmem>>, %arg14: memref<128x288xf32, #tpu.memory_space<vmem>>, %arg15: memref<2x8x8x64xf32, #tpu.memory_space<vmem>>, %arg16: memref<2x1024xf32, #tpu.memory_space<vmem>>) attributes {dimension_semantics = [#tpu.dimension_semantics<arbitrary>], iteration_bounds = array<i64: 1>, scalar_prefetch = 0 : i64, scratch_operands = 6 : i64, tpu.core_type = #tpu.core_type<tc>, window_params = [{pipeline_mode = #tpu.pipeline_mode<synchronous>, transform_indices = @transform_0, window_bounds = array<i64: 2, 16, 16, 1>}, {pipeline_mode = #tpu.pipeline_mode<synchronous>, transform_indices = @transform_1, window_bounds = array<i64: 9, 1, 1, 32>}, {pipeline_mode = #tpu.pipeline_mode<synchronous>, transform_indices = @transform_2, window_bounds = array<i64: 1, 1, 1, 32>}, {pipeline_mode = #tpu.pipeline_mode<synchronous>, transform_indices = @transform_3, window_bounds = array<i64: 288, 64>}, {pipeline_mode = #tpu.pipeline_mode<synchronous>, transform_indices = @transform_4, window_bounds = array<i64: 1, 1, 1, 64>}, {pipeline_mode = #tpu.pipeline_mode<synchronous>, transform_indices = @transform_5, window_bounds = array<i64: 1024, 128>}, {pipeline_mode = #tpu.pipeline_mode<synchronous>, transform_indices = @transform_6, window_bounds = array<i64: 1, 128>}, {pipeline_mode = #tpu.pipeline_mode<synchronous>, transform_indices = @transform_7, window_bounds = array<i64: 128, 64>}, {pipeline_mode = #tpu.pipeline_mode<synchronous>, transform_indices = @transform_8, window_bounds = array<i64: 1, 64>}, {pipeline_mode = #tpu.pipeline_mode<synchronous>, transform_indices = @transform_9, window_bounds = array<i64: 2, 64>}]} {
    %cst = arith.constant 0.000000e+00 : f32
    %0 = vector.broadcast %cst : f32 to vector<2x18x18x32xf32>
    %c0 = arith.constant 0 : index
    %c0_0 = arith.constant 0 : index
    %c0_1 = arith.constant 0 : index
    %c0_2 = arith.constant 0 : index
    %1 = vector.load %arg11[%c0, %c0_0, %c0_1, %c0_2] : memref<2x18x18x32xf32, #tpu.memory_space<vmem>>, vector<2x18x18x32xf32>
    tpu.vector_store %arg11[%c0, %c0_0, %c0_1, %c0_2], %0 {strides = array<i32>} : memref<2x18x18x32xf32, #tpu.memory_space<vmem>>, vector<2x18x18x32xf32>,
    %c0_3 = arith.constant 0 : index
    %c0_4 = arith.constant 0 : index
    %c0_5 = arith.constant 0 : index
    %c0_6 = arith.constant 0 : index
    %2 = vector.load %arg1[%c0_3, %c0_4, %c0_5, %c0_6] : memref<2x16x16x1xf32, #tpu.memory_space<vmem>>, vector<2x16x16x1xf32>
    %3 = vector.shape_cast %2 : vector<2x16x16x1xf32> to vector<2x16x16x1xf32>
    %4 = vector.broadcast %3 : vector<2x16x16x1xf32> to vector<2x16x16x32xf32>
    %c0_7 = arith.constant 0 : index
    %c1 = arith.constant 1 : index
    %c1_8 = arith.constant 1 : index
    %c0_9 = arith.constant 0 : index
    %5 = vector.load %arg11[%c0_7, %c1, %c1_8, %c0_9] : memref<2x18x18x32xf32, #tpu.memory_space<vmem>>, vector<2x16x16x32xf32>
    tpu.vector_store %arg11[%c0_7, %c1, %c1_8, %c0_9], %4 {strides = array<i32>} : memref<2x18x18x32xf32, #tpu.memory_space<vmem>>, vector<2x16x16x32xf32>,
    %c0_10 = arith.constant 0 : index
    %c0_11 = arith.constant 0 : index
    %c0_12 = arith.constant 0 : index
    %c0_13 = arith.constant 0 : index
    %6 = vector.load %arg11[%c0_10, %c0_11, %c0_12, %c0_13] : memref<2x18x18x32xf32, #tpu.memory_space<vmem>>, vector<2x16x16x32xf32>
    %c0_14 = arith.constant 0 : index
    %c0_15 = arith.constant 0 : index
    %c0_16 = arith.constant 0 : index
    %c0_17 = arith.constant 0 : index
    %7 = vector.load %arg2[%c0_14, %c0_15, %c0_16, %c0_17] : memref<9x1x1x32xf32, #tpu.memory_space<vmem>>, vector<1x1x1x32xf32>
    %8 = vector.shape_cast %7 : vector<1x1x1x32xf32> to vector<1x1x32xf32>
    %9 = vector.shape_cast %8 : vector<1x1x32xf32> to vector<1x1x1x32xf32>
    %10 = vector.broadcast %9 : vector<1x1x1x32xf32> to vector<2x16x16x32xf32>
    %11 = arith.mulf %6, %10 : vector<2x16x16x32xf32>
    %c0_18 = arith.constant 0 : index
    %c0_19 = arith.constant 0 : index
    %c1_20 = arith.constant 1 : index
    %c0_21 = arith.constant 0 : index
    %12 = vector.load %arg11[%c0_18, %c0_19, %c1_20, %c0_21] : memref<2x18x18x32xf32, #tpu.memory_space<vmem>>, vector<2x16x16x32xf32>
    %c1_22 = arith.constant 1 : index
    %c0_23 = arith.constant 0 : index
    %c0_24 = arith.constant 0 : index
    %c0_25 = arith.constant 0 : index
    %13 = vector.load %arg2[%c1_22, %c0_23, %c0_24, %c0_25] : memref<9x1x1x32xf32, #tpu.memory_space<vmem>>, vector<1x1x1x32xf32>
    %14 = vector.shape_cast %13 : vector<1x1x1x32xf32> to vector<1x1x32xf32>
    %15 = vector.shape_cast %14 : vector<1x1x32xf32> to vector<1x1x1x32xf32>
    %16 = vector.broadcast %15 : vector<1x1x1x32xf32> to vector<2x16x16x32xf32>
    %17 = arith.mulf %12, %16 : vector<2x16x16x32xf32>
    %18 = arith.addf %11, %17 : vector<2x16x16x32xf32>
    %c0_26 = arith.constant 0 : index
    %c0_27 = arith.constant 0 : index
    %c2 = arith.constant 2 : index
    %c0_28 = arith.constant 0 : index
    %19 = vector.load %arg11[%c0_26, %c0_27, %c2, %c0_28] : memref<2x18x18x32xf32, #tpu.memory_space<vmem>>, vector<2x16x16x32xf32>
    %c2_29 = arith.constant 2 : index
    %c0_30 = arith.constant 0 : index
    %c0_31 = arith.constant 0 : index
    %c0_32 = arith.constant 0 : index
    %20 = vector.load %arg2[%c2_29, %c0_30, %c0_31, %c0_32] : memref<9x1x1x32xf32, #tpu.memory_space<vmem>>, vector<1x1x1x32xf32>
    %21 = vector.shape_cast %20 : vector<1x1x1x32xf32> to vector<1x1x32xf32>
    %22 = vector.shape_cast %21 : vector<1x1x32xf32> to vector<1x1x1x32xf32>
    %23 = vector.broadcast %22 : vector<1x1x1x32xf32> to vector<2x16x16x32xf32>
    %24 = arith.mulf %19, %23 : vector<2x16x16x32xf32>
    %25 = arith.addf %18, %24 : vector<2x16x16x32xf32>
    %c0_33 = arith.constant 0 : index
    %c0_34 = arith.constant 0 : index
    %c0_35 = arith.constant 0 : index
    %c0_36 = arith.constant 0 : index
    %26 = vector.load %arg12[%c0_33, %c0_34, %c0_35, %c0_36] : memref<2x16x16x32xf32, #tpu.memory_space<vmem>>, vector<2x16x16x32xf32>
    tpu.vector_store %arg12[%c0_33, %c0_34, %c0_35, %c0_36], %25 {strides = array<i32>} : memref<2x16x16x32xf32, #tpu.memory_space<vmem>>, vector<2x16x16x32xf32>,
    %c0_37 = arith.constant 0 : index
    %c1_38 = arith.constant 1 : index
    %c0_39 = arith.constant 0 : index
    %c0_40 = arith.constant 0 : index
    %27 = vector.load %arg11[%c0_37, %c1_38, %c0_39, %c0_40] : memref<2x18x18x32xf32, #tpu.memory_space<vmem>>, vector<2x16x16x32xf32>
    %c3 = arith.constant 3 : index
    %c0_41 = arith.constant 0 : index
    %c0_42 = arith.constant 0 : index
    %c0_43 = arith.constant 0 : index
    %28 = vector.load %arg2[%c3, %c0_41, %c0_42, %c0_43] : memref<9x1x1x32xf32, #tpu.memory_space<vmem>>, vector<1x1x1x32xf32>
    %29 = vector.shape_cast %28 : vector<1x1x1x32xf32> to vector<1x1x32xf32>
    %30 = vector.shape_cast %29 : vector<1x1x32xf32> to vector<1x1x1x32xf32>
    %31 = vector.broadcast %30 : vector<1x1x1x32xf32> to vector<2x16x16x32xf32>
    %32 = arith.mulf %27, %31 : vector<2x16x16x32xf32>
    %c0_44 = arith.constant 0 : index
    %c1_45 = arith.constant 1 : index
    %c1_46 = arith.constant 1 : index
    %c0_47 = arith.constant 0 : index
    %33 = vector.load %arg11[%c0_44, %c1_45, %c1_46, %c0_47] : memref<2x18x18x32xf32, #tpu.memory_space<vmem>>, vector<2x16x16x32xf32>
    %c4 = arith.constant 4 : index
    %c0_48 = arith.constant 0 : index
    %c0_49 = arith.constant 0 : index
    %c0_50 = arith.constant 0 : index
    %34 = vector.load %arg2[%c4, %c0_48, %c0_49, %c0_50] : memref<9x1x1x32xf32, #tpu.memory_space<vmem>>, vector<1x1x1x32xf32>
    %35 = vector.shape_cast %34 : vector<1x1x1x32xf32> to vector<1x1x32xf32>
    %36 = vector.shape_cast %35 : vector<1x1x32xf32> to vector<1x1x1x32xf32>
    %37 = vector.broadcast %36 : vector<1x1x1x32xf32> to vector<2x16x16x32xf32>
    %38 = arith.mulf %33, %37 : vector<2x16x16x32xf32>
    %39 = arith.addf %32, %38 : vector<2x16x16x32xf32>
    %c0_51 = arith.constant 0 : index
    %c1_52 = arith.constant 1 : index
    %c2_53 = arith.constant 2 : index
    %c0_54 = arith.constant 0 : index
    %40 = vector.load %arg11[%c0_51, %c1_52, %c2_53, %c0_54] : memref<2x18x18x32xf32, #tpu.memory_space<vmem>>, vector<2x16x16x32xf32>
    %c5 = arith.constant 5 : index
    %c0_55 = arith.constant 0 : index
    %c0_56 = arith.constant 0 : index
    %c0_57 = arith.constant 0 : index
    %41 = vector.load %arg2[%c5, %c0_55, %c0_56, %c0_57] : memref<9x1x1x32xf32, #tpu.memory_space<vmem>>, vector<1x1x1x32xf32>
    %42 = vector.shape_cast %41 : vector<1x1x1x32xf32> to vector<1x1x32xf32>
    %43 = vector.shape_cast %42 : vector<1x1x32xf32> to vector<1x1x1x32xf32>
    %44 = vector.broadcast %43 : vector<1x1x1x32xf32> to vector<2x16x16x32xf32>
    %45 = arith.mulf %40, %44 : vector<2x16x16x32xf32>
    %46 = arith.addf %39, %45 : vector<2x16x16x32xf32>
    %c0_58 = arith.constant 0 : index
    %c0_59 = arith.constant 0 : index
    %c0_60 = arith.constant 0 : index
    %c0_61 = arith.constant 0 : index
    %47 = vector.load %arg12[%c0_58, %c0_59, %c0_60, %c0_61] : memref<2x16x16x32xf32, #tpu.memory_space<vmem>>, vector<2x16x16x32xf32>
    %48 = arith.addf %47, %46 : vector<2x16x16x32xf32>
    %c0_62 = arith.constant 0 : index
    %c0_63 = arith.constant 0 : index
    %c0_64 = arith.constant 0 : index
    %c0_65 = arith.constant 0 : index
    %49 = vector.load %arg12[%c0_62, %c0_63, %c0_64, %c0_65] : memref<2x16x16x32xf32, #tpu.memory_space<vmem>>, vector<2x16x16x32xf32>
    tpu.vector_store %arg12[%c0_62, %c0_63, %c0_64, %c0_65], %48 {strides = array<i32>} : memref<2x16x16x32xf32, #tpu.memory_space<vmem>>, vector<2x16x16x32xf32>,
    %c0_66 = arith.constant 0 : index
    %c2_67 = arith.constant 2 : index
    %c0_68 = arith.constant 0 : index
    %c0_69 = arith.constant 0 : index
    %50 = vector.load %arg11[%c0_66, %c2_67, %c0_68, %c0_69] : memref<2x18x18x32xf32, #tpu.memory_space<vmem>>, vector<2x16x16x32xf32>
    %c6 = arith.constant 6 : index
    %c0_70 = arith.constant 0 : index
    %c0_71 = arith.constant 0 : index
    %c0_72 = arith.constant 0 : index
    %51 = vector.load %arg2[%c6, %c0_70, %c0_71, %c0_72] : memref<9x1x1x32xf32, #tpu.memory_space<vmem>>, vector<1x1x1x32xf32>
    %52 = vector.shape_cast %51 : vector<1x1x1x32xf32> to vector<1x1x32xf32>
    %53 = vector.shape_cast %52 : vector<1x1x32xf32> to vector<1x1x1x32xf32>
    %54 = vector.broadcast %53 : vector<1x1x1x32xf32> to vector<2x16x16x32xf32>
    %55 = arith.mulf %50, %54 : vector<2x16x16x32xf32>
    %c0_73 = arith.constant 0 : index
    %c2_74 = arith.constant 2 : index
    %c1_75 = arith.constant 1 : index
    %c0_76 = arith.constant 0 : index
    %56 = vector.load %arg11[%c0_73, %c2_74, %c1_75, %c0_76] : memref<2x18x18x32xf32, #tpu.memory_space<vmem>>, vector<2x16x16x32xf32>
    %c7 = arith.constant 7 : index
    %c0_77 = arith.constant 0 : index
    %c0_78 = arith.constant 0 : index
    %c0_79 = arith.constant 0 : index
    %57 = vector.load %arg2[%c7, %c0_77, %c0_78, %c0_79] : memref<9x1x1x32xf32, #tpu.memory_space<vmem>>, vector<1x1x1x32xf32>
    %58 = vector.shape_cast %57 : vector<1x1x1x32xf32> to vector<1x1x32xf32>
    %59 = vector.shape_cast %58 : vector<1x1x32xf32> to vector<1x1x1x32xf32>
    %60 = vector.broadcast %59 : vector<1x1x1x32xf32> to vector<2x16x16x32xf32>
    %61 = arith.mulf %56, %60 : vector<2x16x16x32xf32>
    %62 = arith.addf %55, %61 : vector<2x16x16x32xf32>
    %c0_80 = arith.constant 0 : index
    %c2_81 = arith.constant 2 : index
    %c2_82 = arith.constant 2 : index
    %c0_83 = arith.constant 0 : index
    %63 = vector.load %arg11[%c0_80, %c2_81, %c2_82, %c0_83] : memref<2x18x18x32xf32, #tpu.memory_space<vmem>>, vector<2x16x16x32xf32>
    %c8 = arith.constant 8 : index
    %c0_84 = arith.constant 0 : index
    %c0_85 = arith.constant 0 : index
    %c0_86 = arith.constant 0 : index
    %64 = vector.load %arg2[%c8, %c0_84, %c0_85, %c0_86] : memref<9x1x1x32xf32, #tpu.memory_space<vmem>>, vector<1x1x1x32xf32>
    %65 = vector.shape_cast %64 : vector<1x1x1x32xf32> to vector<1x1x32xf32>
    %66 = vector.shape_cast %65 : vector<1x1x32xf32> to vector<1x1x1x32xf32>
    %67 = vector.broadcast %66 : vector<1x1x1x32xf32> to vector<2x16x16x32xf32>
    %68 = arith.mulf %63, %67 : vector<2x16x16x32xf32>
    %69 = arith.addf %62, %68 : vector<2x16x16x32xf32>
    %c0_87 = arith.constant 0 : index
    %c0_88 = arith.constant 0 : index
    %c0_89 = arith.constant 0 : index
    %c0_90 = arith.constant 0 : index
    %70 = vector.load %arg12[%c0_87, %c0_88, %c0_89, %c0_90] : memref<2x16x16x32xf32, #tpu.memory_space<vmem>>, vector<2x16x16x32xf32>
    %71 = arith.addf %70, %69 : vector<2x16x16x32xf32>
    %c0_91 = arith.constant 0 : index
    %c0_92 = arith.constant 0 : index
    %c0_93 = arith.constant 0 : index
    %c0_94 = arith.constant 0 : index
    %72 = vector.load %arg12[%c0_91, %c0_92, %c0_93, %c0_94] : memref<2x16x16x32xf32, #tpu.memory_space<vmem>>, vector<2x16x16x32xf32>
    tpu.vector_store %arg12[%c0_91, %c0_92, %c0_93, %c0_94], %71 {strides = array<i32>} : memref<2x16x16x32xf32, #tpu.memory_space<vmem>>, vector<2x16x16x32xf32>,
    %c0_95 = arith.constant 0 : index
    %c0_96 = arith.constant 0 : index
    %c0_97 = arith.constant 0 : index
    %c0_98 = arith.constant 0 : index
    %73 = tpu.strided_load %arg12[%c0_95, %c0_96, %c0_97, %c0_98] {strides = array<i32: 1, 1, 2, 1>} : memref<2x16x16x32xf32, #tpu.memory_space<vmem>>, vector<2x16x8x32xf32>
    %c0_99 = arith.constant 0 : index
    %c0_100 = arith.constant 0 : index
    %c1_101 = arith.constant 1 : index
    %c0_102 = arith.constant 0 : index
    %74 = tpu.strided_load %arg12[%c0_99, %c0_100, %c1_101, %c0_102] {strides = array<i32: 1, 1, 2, 1>} : memref<2x16x16x32xf32, #tpu.memory_space<vmem>>, vector<2x16x8x32xf32>
    %75 = arith.maximumf %73, %74 : vector<2x16x8x32xf32>
    %76 = vector.shape_cast %75 : vector<2x16x8x32xf32> to vector<16x2x8x32xf32>
    %cst_103 = arith.constant dense<0xFF800000> : vector<16x8x32xf32>
    %77 = vector.multi_reduction <maximumf>, %76, %cst_103 [1] : vector<16x2x8x32xf32> to vector<16x8x32xf32>
    %78 = vector.shape_cast %77 : vector<16x8x32xf32> to vector<2x8x8x32xf32>
    %c0_104 = arith.constant 0 : index
    %c0_105 = arith.constant 0 : index
    %c0_106 = arith.constant 0 : index
    %c0_107 = arith.constant 0 : index
    %79 = vector.load %arg3[%c0_104, %c0_105, %c0_106, %c0_107] : memref<1x1x1x32xf32, #tpu.memory_space<vmem>>, vector<1x1x1x32xf32>
    %80 = vector.broadcast %79 : vector<1x1x1x32xf32> to vector<2x8x8x32xf32>
    %81 = arith.addf %78, %80 : vector<2x8x8x32xf32>
    %cst_108 = arith.constant 0.000000e+00 : f32
    %82 = vector.broadcast %cst_108 : f32 to vector<2x8x8x32xf32>
    %83 = arith.maximumf %81, %82 : vector<2x8x8x32xf32>
    %cst_109 = arith.constant 0.000000e+00 : f32
    %84 = vector.broadcast %cst_109 : f32 to vector<2x10x10x32xf32>
    %c0_110 = arith.constant 0 : index
    %c0_111 = arith.constant 0 : index
    %c0_112 = arith.constant 0 : index
    %c0_113 = arith.constant 0 : index
    %85 = vector.load %arg13[%c0_110, %c0_111, %c0_112, %c0_113] : memref<2x10x10x32xf32, #tpu.memory_space<vmem>>, vector<2x10x10x32xf32>
    tpu.vector_store %arg13[%c0_110, %c0_111, %c0_112, %c0_113], %84 {strides = array<i32>} : memref<2x10x10x32xf32, #tpu.memory_space<vmem>>, vector<2x10x10x32xf32>,
    %c0_114 = arith.constant 0 : index
    %c1_115 = arith.constant 1 : index
    %c1_116 = arith.constant 1 : index
    %c0_117 = arith.constant 0 : index
    %86 = vector.load %arg13[%c0_114, %c1_115, %c1_116, %c0_117] : memref<2x10x10x32xf32, #tpu.memory_space<vmem>>, vector<2x8x8x32xf32>
    tpu.vector_store %arg13[%c0_114, %c1_115, %c1_116, %c0_117], %83 {strides = array<i32>} : memref<2x10x10x32xf32, #tpu.memory_space<vmem>>, vector<2x8x8x32xf32>,
    %c0_118 = arith.constant 0 : index
    %c0_119 = arith.constant 0 : index
    %c0_120 = arith.constant 0 : index
    %c0_121 = arith.constant 0 : index
    %87 = vector.load %arg13[%c0_118, %c0_119, %c0_120, %c0_121] : memref<2x10x10x32xf32, #tpu.memory_space<vmem>>, vector<2x8x8x32xf32>
    %88 = vector.shape_cast %87 : vector<2x8x8x32xf32> to vector<128x32xf32>
    %c0_122 = arith.constant 0 : index
    %c0_123 = arith.constant 0 : index
    %89 = vector.load %arg14[%c0_122, %c0_123] : memref<128x288xf32, #tpu.memory_space<vmem>>, vector<128x32xf32>
    tpu.vector_store %arg14[%c0_122, %c0_123], %88 {strides = array<i32>} : memref<128x288xf32, #tpu.memory_space<vmem>>, vector<128x32xf32>,
    %c0_124 = arith.constant 0 : index
    %c0_125 = arith.constant 0 : index
    %c1_126 = arith.constant 1 : index
    %c0_127 = arith.constant 0 : index
    %90 = vector.load %arg13[%c0_124, %c0_125, %c1_126, %c0_127] : memref<2x10x10x32xf32, #tpu.memory_space<vmem>>, vector<2x8x8x32xf32>
    %91 = vector.shape_cast %90 : vector<2x8x8x32xf32> to vector<128x32xf32>
    %c0_128 = arith.constant 0 : index
    %c32 = arith.constant 32 : index
    %92 = vector.load %arg14[%c0_128, %c32] : memref<128x288xf32, #tpu.memory_space<vmem>>, vector<128x32xf32>
    tpu.vector_store %arg14[%c0_128, %c32], %91 {strides = array<i32>} : memref<128x288xf32, #tpu.memory_space<vmem>>, vector<128x32xf32>,
    %c0_129 = arith.constant 0 : index
    %c0_130 = arith.constant 0 : index
    %c2_131 = arith.constant 2 : index
    %c0_132 = arith.constant 0 : index
    %93 = vector.load %arg13[%c0_129, %c0_130, %c2_131, %c0_132] : memref<2x10x10x32xf32, #tpu.memory_space<vmem>>, vector<2x8x8x32xf32>
    %94 = vector.shape_cast %93 : vector<2x8x8x32xf32> to vector<128x32xf32>
    %c0_133 = arith.constant 0 : index
    %c64 = arith.constant 64 : index
    %95 = vector.load %arg14[%c0_133, %c64] : memref<128x288xf32, #tpu.memory_space<vmem>>, vector<128x32xf32>
    tpu.vector_store %arg14[%c0_133, %c64], %94 {strides = array<i32>} : memref<128x288xf32, #tpu.memory_space<vmem>>, vector<128x32xf32>,
    %c0_134 = arith.constant 0 : index
    %c1_135 = arith.constant 1 : index
    %c0_136 = arith.constant 0 : index
    %c0_137 = arith.constant 0 : index
    %96 = vector.load %arg13[%c0_134, %c1_135, %c0_136, %c0_137] : memref<2x10x10x32xf32, #tpu.memory_space<vmem>>, vector<2x8x8x32xf32>
    %97 = vector.shape_cast %96 : vector<2x8x8x32xf32> to vector<128x32xf32>
    %c0_138 = arith.constant 0 : index
    %c96 = arith.constant 96 : index
    %98 = vector.load %arg14[%c0_138, %c96] : memref<128x288xf32, #tpu.memory_space<vmem>>, vector<128x32xf32>
    tpu.vector_store %arg14[%c0_138, %c96], %97 {strides = array<i32>} : memref<128x288xf32, #tpu.memory_space<vmem>>, vector<128x32xf32>,
    %c0_139 = arith.constant 0 : index
    %c1_140 = arith.constant 1 : index
    %c1_141 = arith.constant 1 : index
    %c0_142 = arith.constant 0 : index
    %99 = vector.load %arg13[%c0_139, %c1_140, %c1_141, %c0_142] : memref<2x10x10x32xf32, #tpu.memory_space<vmem>>, vector<2x8x8x32xf32>
    %100 = vector.shape_cast %99 : vector<2x8x8x32xf32> to vector<128x32xf32>
    %c0_143 = arith.constant 0 : index
    %c128 = arith.constant 128 : index
    %101 = vector.load %arg14[%c0_143, %c128] : memref<128x288xf32, #tpu.memory_space<vmem>>, vector<128x32xf32>
    tpu.vector_store %arg14[%c0_143, %c128], %100 {strides = array<i32>} : memref<128x288xf32, #tpu.memory_space<vmem>>, vector<128x32xf32>,
    %c0_144 = arith.constant 0 : index
    %c1_145 = arith.constant 1 : index
    %c2_146 = arith.constant 2 : index
    %c0_147 = arith.constant 0 : index
    %102 = vector.load %arg13[%c0_144, %c1_145, %c2_146, %c0_147] : memref<2x10x10x32xf32, #tpu.memory_space<vmem>>, vector<2x8x8x32xf32>
    %103 = vector.shape_cast %102 : vector<2x8x8x32xf32> to vector<128x32xf32>
    %c0_148 = arith.constant 0 : index
    %c160 = arith.constant 160 : index
    %104 = vector.load %arg14[%c0_148, %c160] : memref<128x288xf32, #tpu.memory_space<vmem>>, vector<128x32xf32>
    tpu.vector_store %arg14[%c0_148, %c160], %103 {strides = array<i32>} : memref<128x288xf32, #tpu.memory_space<vmem>>, vector<128x32xf32>,
    %c0_149 = arith.constant 0 : index
    %c2_150 = arith.constant 2 : index
    %c0_151 = arith.constant 0 : index
    %c0_152 = arith.constant 0 : index
    %105 = vector.load %arg13[%c0_149, %c2_150, %c0_151, %c0_152] : memref<2x10x10x32xf32, #tpu.memory_space<vmem>>, vector<2x8x8x32xf32>
    %106 = vector.shape_cast %105 : vector<2x8x8x32xf32> to vector<128x32xf32>
    %c0_153 = arith.constant 0 : index
    %c192 = arith.constant 192 : index
    %107 = vector.load %arg14[%c0_153, %c192] : memref<128x288xf32, #tpu.memory_space<vmem>>, vector<128x32xf32>
    tpu.vector_store %arg14[%c0_153, %c192], %106 {strides = array<i32>} : memref<128x288xf32, #tpu.memory_space<vmem>>, vector<128x32xf32>,
    %c0_154 = arith.constant 0 : index
    %c2_155 = arith.constant 2 : index
    %c1_156 = arith.constant 1 : index
    %c0_157 = arith.constant 0 : index
    %108 = vector.load %arg13[%c0_154, %c2_155, %c1_156, %c0_157] : memref<2x10x10x32xf32, #tpu.memory_space<vmem>>, vector<2x8x8x32xf32>
    %109 = vector.shape_cast %108 : vector<2x8x8x32xf32> to vector<128x32xf32>
    %c0_158 = arith.constant 0 : index
    %c224 = arith.constant 224 : index
    %110 = vector.load %arg14[%c0_158, %c224] : memref<128x288xf32, #tpu.memory_space<vmem>>, vector<128x32xf32>
    tpu.vector_store %arg14[%c0_158, %c224], %109 {strides = array<i32>} : memref<128x288xf32, #tpu.memory_space<vmem>>, vector<128x32xf32>,
    %c0_159 = arith.constant 0 : index
    %c2_160 = arith.constant 2 : index
    %c2_161 = arith.constant 2 : index
    %c0_162 = arith.constant 0 : index
    %111 = vector.load %arg13[%c0_159, %c2_160, %c2_161, %c0_162] : memref<2x10x10x32xf32, #tpu.memory_space<vmem>>, vector<2x8x8x32xf32>
    %112 = vector.shape_cast %111 : vector<2x8x8x32xf32> to vector<128x32xf32>
    %c0_163 = arith.constant 0 : index
    %c256 = arith.constant 256 : index
    %113 = vector.load %arg14[%c0_163, %c256] : memref<128x288xf32, #tpu.memory_space<vmem>>, vector<128x32xf32>
    tpu.vector_store %arg14[%c0_163, %c256], %112 {strides = array<i32>} : memref<128x288xf32, #tpu.memory_space<vmem>>, vector<128x32xf32>,
    %c0_164 = arith.constant 0 : index
    %c0_165 = arith.constant 0 : index
    %114 = vector.load %arg14[%c0_164, %c0_165] : memref<128x288xf32, #tpu.memory_space<vmem>>, vector<128x288xf32>
    %c0_166 = arith.constant 0 : index
    %c0_167 = arith.constant 0 : index
    %115 = vector.load %arg4[%c0_166, %c0_167] : memref<288x64xf32, #tpu.memory_space<vmem>>, vector<288x64xf32>
    %cst_168 = arith.constant dense<0.000000e+00> : vector<128x64xf32>
    %116 = tpu.matmul %114, %115, %cst_168 {dimension_numbers = #tpu.dot_dimension_numbers<[1], [0], [0], [1], [0, 0, 1, 1], [], []>} : vector<128x288xf32>, vector<288x64xf32>, vector<128x64xf32> -> vector<128x64xf32>
    %117 = vector.shape_cast %116 : vector<128x64xf32> to vector<2x8x8x64xf32>
    %c0_169 = arith.constant 0 : index
    %c0_170 = arith.constant 0 : index
    %c0_171 = arith.constant 0 : index
    %c0_172 = arith.constant 0 : index
    %118 = vector.load %arg15[%c0_169, %c0_170, %c0_171, %c0_172] : memref<2x8x8x64xf32, #tpu.memory_space<vmem>>, vector<2x8x8x64xf32>
    tpu.vector_store %arg15[%c0_169, %c0_170, %c0_171, %c0_172], %117 {strides = array<i32>} : memref<2x8x8x64xf32, #tpu.memory_space<vmem>>, vector<2x8x8x64xf32>,
    %c0_173 = arith.constant 0 : index
    %c0_174 = arith.constant 0 : index
    %c0_175 = arith.constant 0 : index
    %c0_176 = arith.constant 0 : index
    %119 = tpu.strided_load %arg15[%c0_173, %c0_174, %c0_175, %c0_176] {strides = array<i32: 1, 1, 2, 1>} : memref<2x8x8x64xf32, #tpu.memory_space<vmem>>, vector<2x8x4x64xf32>
    %c0_177 = arith.constant 0 : index
    %c0_178 = arith.constant 0 : index
    %c1_179 = arith.constant 1 : index
    %c0_180 = arith.constant 0 : index
    %120 = tpu.strided_load %arg15[%c0_177, %c0_178, %c1_179, %c0_180] {strides = array<i32: 1, 1, 2, 1>} : memref<2x8x8x64xf32, #tpu.memory_space<vmem>>, vector<2x8x4x64xf32>
    %121 = arith.maximumf %119, %120 : vector<2x8x4x64xf32>
    %122 = vector.shape_cast %121 : vector<2x8x4x64xf32> to vector<8x2x4x64xf32>
    %cst_181 = arith.constant dense<0xFF800000> : vector<8x4x64xf32>
    %123 = vector.multi_reduction <maximumf>, %122, %cst_181 [1] : vector<8x2x4x64xf32> to vector<8x4x64xf32>
    %124 = vector.shape_cast %123 : vector<8x4x64xf32> to vector<2x4x4x64xf32>
    %c0_182 = arith.constant 0 : index
    %c0_183 = arith.constant 0 : index
    %c0_184 = arith.constant 0 : index
    %c0_185 = arith.constant 0 : index
    %125 = vector.load %arg5[%c0_182, %c0_183, %c0_184, %c0_185] : memref<1x1x1x64xf32, #tpu.memory_space<vmem>>, vector<1x1x1x64xf32>
    %126 = vector.broadcast %125 : vector<1x1x1x64xf32> to vector<2x4x4x64xf32>
    %127 = arith.addf %124, %126 : vector<2x4x4x64xf32>
    %cst_186 = arith.constant 0.000000e+00 : f32
    %128 = vector.broadcast %cst_186 : f32 to vector<2x4x4x64xf32>
    %129 = arith.maximumf %127, %128 : vector<2x4x4x64xf32>
    %130 = vector.extract_strided_slice %129 {offsets = [0, 0, 0, 0], sizes = [2, 1, 1, 64], strides = [1, 1, 1, 1]} : vector<2x4x4x64xf32> to vector<2x1x1x64xf32>
    %131 = vector.shape_cast %130 : vector<2x1x1x64xf32> to vector<2x64xf32>
    %c0_187 = arith.constant 0 : index
    %c0_188 = arith.constant 0 : index
    %132 = vector.load %arg16[%c0_187, %c0_188] : memref<2x1024xf32, #tpu.memory_space<vmem>>, vector<2x64xf32>
    tpu.vector_store %arg16[%c0_187, %c0_188], %131 {strides = array<i32>} : memref<2x1024xf32, #tpu.memory_space<vmem>>, vector<2x64xf32>,
    %133 = vector.extract_strided_slice %129 {offsets = [0, 0, 1, 0], sizes = [2, 1, 1, 64], strides = [1, 1, 1, 1]} : vector<2x4x4x64xf32> to vector<2x1x1x64xf32>
    %134 = vector.shape_cast %133 : vector<2x1x1x64xf32> to vector<2x64xf32>
    %c0_189 = arith.constant 0 : index
    %c64_190 = arith.constant 64 : index
    %135 = vector.load %arg16[%c0_189, %c64_190] : memref<2x1024xf32, #tpu.memory_space<vmem>>, vector<2x64xf32>
    tpu.vector_store %arg16[%c0_189, %c64_190], %134 {strides = array<i32>} : memref<2x1024xf32, #tpu.memory_space<vmem>>, vector<2x64xf32>,
    %136 = vector.extract_strided_slice %129 {offsets = [0, 0, 2, 0], sizes = [2, 1, 1, 64], strides = [1, 1, 1, 1]} : vector<2x4x4x64xf32> to vector<2x1x1x64xf32>
    %137 = vector.shape_cast %136 : vector<2x1x1x64xf32> to vector<2x64xf32>
    %c0_191 = arith.constant 0 : index
    %c128_192 = arith.constant 128 : index
    %138 = vector.load %arg16[%c0_191, %c128_192] : memref<2x1024xf32, #tpu.memory_space<vmem>>, vector<2x64xf32>
    tpu.vector_store %arg16[%c0_191, %c128_192], %137 {strides = array<i32>} : memref<2x1024xf32, #tpu.memory_space<vmem>>, vector<2x64xf32>,
    %139 = vector.extract_strided_slice %129 {offsets = [0, 0, 3, 0], sizes = [2, 1, 1, 64], strides = [1, 1, 1, 1]} : vector<2x4x4x64xf32> to vector<2x1x1x64xf32>
    %140 = vector.shape_cast %139 : vector<2x1x1x64xf32> to vector<2x64xf32>
    %c0_193 = arith.constant 0 : index
    %c192_194 = arith.constant 192 : index
    %141 = vector.load %arg16[%c0_193, %c192_194] : memref<2x1024xf32, #tpu.memory_space<vmem>>, vector<2x64xf32>
    tpu.vector_store %arg16[%c0_193, %c192_194], %140 {strides = array<i32>} : memref<2x1024xf32, #tpu.memory_space<vmem>>, vector<2x64xf32>,
    %142 = vector.extract_strided_slice %129 {offsets = [0, 1, 0, 0], sizes = [2, 1, 1, 64], strides = [1, 1, 1, 1]} : vector<2x4x4x64xf32> to vector<2x1x1x64xf32>
    %143 = vector.shape_cast %142 : vector<2x1x1x64xf32> to vector<2x64xf32>
    %c0_195 = arith.constant 0 : index
    %c256_196 = arith.constant 256 : index
    %144 = vector.load %arg16[%c0_195, %c256_196] : memref<2x1024xf32, #tpu.memory_space<vmem>>, vector<2x64xf32>
    tpu.vector_store %arg16[%c0_195, %c256_196], %143 {strides = array<i32>} : memref<2x1024xf32, #tpu.memory_space<vmem>>, vector<2x64xf32>,
    %145 = vector.extract_strided_slice %129 {offsets = [0, 1, 1, 0], sizes = [2, 1, 1, 64], strides = [1, 1, 1, 1]} : vector<2x4x4x64xf32> to vector<2x1x1x64xf32>
    %146 = vector.shape_cast %145 : vector<2x1x1x64xf32> to vector<2x64xf32>
    %c0_197 = arith.constant 0 : index
    %c320 = arith.constant 320 : index
    %147 = vector.load %arg16[%c0_197, %c320] : memref<2x1024xf32, #tpu.memory_space<vmem>>, vector<2x64xf32>
    tpu.vector_store %arg16[%c0_197, %c320], %146 {strides = array<i32>} : memref<2x1024xf32, #tpu.memory_space<vmem>>, vector<2x64xf32>,
    %148 = vector.extract_strided_slice %129 {offsets = [0, 1, 2, 0], sizes = [2, 1, 1, 64], strides = [1, 1, 1, 1]} : vector<2x4x4x64xf32> to vector<2x1x1x64xf32>
    %149 = vector.shape_cast %148 : vector<2x1x1x64xf32> to vector<2x64xf32>
    %c0_198 = arith.constant 0 : index
    %c384 = arith.constant 384 : index
    %150 = vector.load %arg16[%c0_198, %c384] : memref<2x1024xf32, #tpu.memory_space<vmem>>, vector<2x64xf32>
    tpu.vector_store %arg16[%c0_198, %c384], %149 {strides = array<i32>} : memref<2x1024xf32, #tpu.memory_space<vmem>>, vector<2x64xf32>,
    %151 = vector.extract_strided_slice %129 {offsets = [0, 1, 3, 0], sizes = [2, 1, 1, 64], strides = [1, 1, 1, 1]} : vector<2x4x4x64xf32> to vector<2x1x1x64xf32>
    %152 = vector.shape_cast %151 : vector<2x1x1x64xf32> to vector<2x64xf32>
    %c0_199 = arith.constant 0 : index
    %c448 = arith.constant 448 : index
    %153 = vector.load %arg16[%c0_199, %c448] : memref<2x1024xf32, #tpu.memory_space<vmem>>, vector<2x64xf32>
    tpu.vector_store %arg16[%c0_199, %c448], %152 {strides = array<i32>} : memref<2x1024xf32, #tpu.memory_space<vmem>>, vector<2x64xf32>,
    %154 = vector.extract_strided_slice %129 {offsets = [0, 2, 0, 0], sizes = [2, 1, 1, 64], strides = [1, 1, 1, 1]} : vector<2x4x4x64xf32> to vector<2x1x1x64xf32>
    %155 = vector.shape_cast %154 : vector<2x1x1x64xf32> to vector<2x64xf32>
    %c0_200 = arith.constant 0 : index
    %c512 = arith.constant 512 : index
    %156 = vector.load %arg16[%c0_200, %c512] : memref<2x1024xf32, #tpu.memory_space<vmem>>, vector<2x64xf32>
    tpu.vector_store %arg16[%c0_200, %c512], %155 {strides = array<i32>} : memref<2x1024xf32, #tpu.memory_space<vmem>>, vector<2x64xf32>,
    %157 = vector.extract_strided_slice %129 {offsets = [0, 2, 1, 0], sizes = [2, 1, 1, 64], strides = [1, 1, 1, 1]} : vector<2x4x4x64xf32> to vector<2x1x1x64xf32>
    %158 = vector.shape_cast %157 : vector<2x1x1x64xf32> to vector<2x64xf32>
    %c0_201 = arith.constant 0 : index
    %c576 = arith.constant 576 : index
    %159 = vector.load %arg16[%c0_201, %c576] : memref<2x1024xf32, #tpu.memory_space<vmem>>, vector<2x64xf32>
    tpu.vector_store %arg16[%c0_201, %c576], %158 {strides = array<i32>} : memref<2x1024xf32, #tpu.memory_space<vmem>>, vector<2x64xf32>,
    %160 = vector.extract_strided_slice %129 {offsets = [0, 2, 2, 0], sizes = [2, 1, 1, 64], strides = [1, 1, 1, 1]} : vector<2x4x4x64xf32> to vector<2x1x1x64xf32>
    %161 = vector.shape_cast %160 : vector<2x1x1x64xf32> to vector<2x64xf32>
    %c0_202 = arith.constant 0 : index
    %c640 = arith.constant 640 : index
    %162 = vector.load %arg16[%c0_202, %c640] : memref<2x1024xf32, #tpu.memory_space<vmem>>, vector<2x64xf32>
    tpu.vector_store %arg16[%c0_202, %c640], %161 {strides = array<i32>} : memref<2x1024xf32, #tpu.memory_space<vmem>>, vector<2x64xf32>,
    %163 = vector.extract_strided_slice %129 {offsets = [0, 2, 3, 0], sizes = [2, 1, 1, 64], strides = [1, 1, 1, 1]} : vector<2x4x4x64xf32> to vector<2x1x1x64xf32>
    %164 = vector.shape_cast %163 : vector<2x1x1x64xf32> to vector<2x64xf32>
    %c0_203 = arith.constant 0 : index
    %c704 = arith.constant 704 : index
    %165 = vector.load %arg16[%c0_203, %c704] : memref<2x1024xf32, #tpu.memory_space<vmem>>, vector<2x64xf32>
    tpu.vector_store %arg16[%c0_203, %c704], %164 {strides = array<i32>} : memref<2x1024xf32, #tpu.memory_space<vmem>>, vector<2x64xf32>,
    %166 = vector.extract_strided_slice %129 {offsets = [0, 3, 0, 0], sizes = [2, 1, 1, 64], strides = [1, 1, 1, 1]} : vector<2x4x4x64xf32> to vector<2x1x1x64xf32>
    %167 = vector.shape_cast %166 : vector<2x1x1x64xf32> to vector<2x64xf32>
    %c0_204 = arith.constant 0 : index
    %c768 = arith.constant 768 : index
    %168 = vector.load %arg16[%c0_204, %c768] : memref<2x1024xf32, #tpu.memory_space<vmem>>, vector<2x64xf32>
    tpu.vector_store %arg16[%c0_204, %c768], %167 {strides = array<i32>} : memref<2x1024xf32, #tpu.memory_space<vmem>>, vector<2x64xf32>,
    %169 = vector.extract_strided_slice %129 {offsets = [0, 3, 1, 0], sizes = [2, 1, 1, 64], strides = [1, 1, 1, 1]} : vector<2x4x4x64xf32> to vector<2x1x1x64xf32>
    %170 = vector.shape_cast %169 : vector<2x1x1x64xf32> to vector<2x64xf32>
    %c0_205 = arith.constant 0 : index
    %c832 = arith.constant 832 : index
    %171 = vector.load %arg16[%c0_205, %c832] : memref<2x1024xf32, #tpu.memory_space<vmem>>, vector<2x64xf32>
    tpu.vector_store %arg16[%c0_205, %c832], %170 {strides = array<i32>} : memref<2x1024xf32, #tpu.memory_space<vmem>>, vector<2x64xf32>,
    %172 = vector.extract_strided_slice %129 {offsets = [0, 3, 2, 0], sizes = [2, 1, 1, 64], strides = [1, 1, 1, 1]} : vector<2x4x4x64xf32> to vector<2x1x1x64xf32>
    %173 = vector.shape_cast %172 : vector<2x1x1x64xf32> to vector<2x64xf32>
    %c0_206 = arith.constant 0 : index
    %c896 = arith.constant 896 : index
    %174 = vector.load %arg16[%c0_206, %c896] : memref<2x1024xf32, #tpu.memory_space<vmem>>, vector<2x64xf32>
    tpu.vector_store %arg16[%c0_206, %c896], %173 {strides = array<i32>} : memref<2x1024xf32, #tpu.memory_space<vmem>>, vector<2x64xf32>,
    %175 = vector.extract_strided_slice %129 {offsets = [0, 3, 3, 0], sizes = [2, 1, 1, 64], strides = [1, 1, 1, 1]} : vector<2x4x4x64xf32> to vector<2x1x1x64xf32>
    %176 = vector.shape_cast %175 : vector<2x1x1x64xf32> to vector<2x64xf32>
    %c0_207 = arith.constant 0 : index
    %c960 = arith.constant 960 : index
    %177 = vector.load %arg16[%c0_207, %c960] : memref<2x1024xf32, #tpu.memory_space<vmem>>, vector<2x64xf32>
    tpu.vector_store %arg16[%c0_207, %c960], %176 {strides = array<i32>} : memref<2x1024xf32, #tpu.memory_space<vmem>>, vector<2x64xf32>,
    %c0_208 = arith.constant 0 : index
    %c0_209 = arith.constant 0 : index
    %178 = vector.load %arg16[%c0_208, %c0_209] : memref<2x1024xf32, #tpu.memory_space<vmem>>, vector<2x1024xf32>
    %c0_210 = arith.constant 0 : index
    %c0_211 = arith.constant 0 : index
    %179 = vector.load %arg6[%c0_210, %c0_211] : memref<1024x128xf32, #tpu.memory_space<vmem>>, vector<1024x128xf32>
    %cst_212 = arith.constant dense<0.000000e+00> : vector<2x128xf32>
    %180 = tpu.matmul %178, %179, %cst_212 {dimension_numbers = #tpu.dot_dimension_numbers<[1], [0], [0], [1], [0, 0, 1, 1], [], []>} : vector<2x1024xf32>, vector<1024x128xf32>, vector<2x128xf32> -> vector<2x128xf32>
    %c0_213 = arith.constant 0 : index
    %c0_214 = arith.constant 0 : index
    %181 = vector.load %arg7[%c0_213, %c0_214] : memref<1x128xf32, #tpu.memory_space<vmem>>, vector<1x128xf32>
    %182 = vector.broadcast %181 : vector<1x128xf32> to vector<2x128xf32>
    %183 = arith.addf %180, %182 : vector<2x128xf32>
    %cst_215 = arith.constant 0.000000e+00 : f32
    %184 = vector.broadcast %cst_215 : f32 to vector<2x128xf32>
    %185 = arith.maximumf %183, %184 : vector<2x128xf32>
    %c0_216 = arith.constant 0 : index
    %c0_217 = arith.constant 0 : index
    %186 = vector.load %arg8[%c0_216, %c0_217] : memref<128x64xf32, #tpu.memory_space<vmem>>, vector<128x64xf32>
    %cst_218 = arith.constant dense<0.000000e+00> : vector<2x64xf32>
    %187 = tpu.matmul %185, %186, %cst_218 {dimension_numbers = #tpu.dot_dimension_numbers<[1], [0], [0], [1], [0, 0, 1, 1], [], []>} : vector<2x128xf32>, vector<128x64xf32>, vector<2x64xf32> -> vector<2x64xf32>
    %c0_219 = arith.constant 0 : index
    %c0_220 = arith.constant 0 : index
    %188 = vector.load %arg9[%c0_219, %c0_220] : memref<1x64xf32, #tpu.memory_space<vmem>>, vector<1x64xf32>
    %189 = vector.broadcast %188 : vector<1x64xf32> to vector<2x64xf32>
    %190 = arith.addf %187, %189 : vector<2x64xf32>
    %c0_221 = arith.constant 0 : index
    %c0_222 = arith.constant 0 : index
    %191 = vector.load %arg10[%c0_221, %c0_222] : memref<2x64xf32, #tpu.memory_space<vmem>>, vector<2x64xf32>
    tpu.vector_store %arg10[%c0_221, %c0_222], %190 {strides = array<i32>} : memref<2x64xf32, #tpu.memory_space<vmem>>, vector<2x64xf32>,
    return
  }
  func.func @transform_0(%arg0: i32) -> (i32, i32, i32, i32) {
    %c0_i32 = arith.constant 0 : i32
    %c0_i32_0 = arith.constant 0 : i32
    %c0_i32_1 = arith.constant 0 : i32
    %c0_i32_2 = arith.constant 0 : i32
    %c0_i32_3 = arith.constant 0 : i32
    return %c0_i32, %c0_i32_0, %c0_i32_1, %c0_i32_2 : i32, i32, i32, i32
  }
  func.func @transform_1(%arg0: i32) -> (i32, i32, i32, i32) {
    %c0_i32 = arith.constant 0 : i32
    %c0_i32_0 = arith.constant 0 : i32
    %c0_i32_1 = arith.constant 0 : i32
    %c0_i32_2 = arith.constant 0 : i32
    %c0_i32_3 = arith.constant 0 : i32
    return %c0_i32, %c0_i32_0, %c0_i32_1, %c0_i32_2 : i32, i32, i32, i32
  }
  func.func @transform_2(%arg0: i32) -> (i32, i32, i32, i32) {
    %c0_i32 = arith.constant 0 : i32
    %c0_i32_0 = arith.constant 0 : i32
    %c0_i32_1 = arith.constant 0 : i32
    %c0_i32_2 = arith.constant 0 : i32
    %c0_i32_3 = arith.constant 0 : i32
    return %c0_i32, %c0_i32_0, %c0_i32_1, %c0_i32_2 : i32, i32, i32, i32
  }
  func.func @transform_3(%arg0: i32) -> (i32, i32) {
    %c0_i32 = arith.constant 0 : i32
    %c0_i32_0 = arith.constant 0 : i32
    %c0_i32_1 = arith.constant 0 : i32
    return %c0_i32, %c0_i32_0 : i32, i32
  }
  func.func @transform_4(%arg0: i32) -> (i32, i32, i32, i32) {
    %c0_i32 = arith.constant 0 : i32
    %c0_i32_0 = arith.constant 0 : i32
    %c0_i32_1 = arith.constant 0 : i32
    %c0_i32_2 = arith.constant 0 : i32
    %c0_i32_3 = arith.constant 0 : i32
    return %c0_i32, %c0_i32_0, %c0_i32_1, %c0_i32_2 : i32, i32, i32, i32
  }
  func.func @transform_5(%arg0: i32) -> (i32, i32) {
    %c0_i32 = arith.constant 0 : i32
    %c0_i32_0 = arith.constant 0 : i32
    %c0_i32_1 = arith.constant 0 : i32
    return %c0_i32, %c0_i32_0 : i32, i32
  }
  func.func @transform_6(%arg0: i32) -> (i32, i32) {
    %c0_i32 = arith.constant 0 : i32
    %c0_i32_0 = arith.constant 0 : i32
    %c0_i32_1 = arith.constant 0 : i32
    return %c0_i32, %c0_i32_0 : i32, i32
  }
  func.func @transform_7(%arg0: i32) -> (i32, i32) {
    %c0_i32 = arith.constant 0 : i32
    %c0_i32_0 = arith.constant 0 : i32
    %c0_i32_1 = arith.constant 0 : i32
    return %c0_i32, %c0_i32_0 : i32, i32
  }
  func.func @transform_8(%arg0: i32) -> (i32, i32) {
    %c0_i32 = arith.constant 0 : i32
    %c0_i32_0 = arith.constant 0 : i32
    %c0_i32_1 = arith.constant 0 : i32
    return %c0_i32, %c0_i32_0 : i32, i32
  }
  func.func @transform_9(%arg0: i32) -> (i32, i32) {
    %c0_i32 = arith.constant 0 : i32
    %c0_i32_0 = arith.constant 0 : i32
    %c0_i32_1 = arith.constant 0 : i32
    return %c0_i32, %c0_i32_0 : i32, i32
  }
}

</mosaic_0001>

<bundles_post_ra>
// kernel: simclr_encoder_forward.1
= control target key start
LH: loop header
LB: loop body
LE: loop exit
PB: predicated region body
PF: predicated region fallthrough
CT: control target
= control target key end

     0   :  { %vm33_vm0 = vcmask 261120   ;;  %v5622_v2 = vmov 0   ;;  %v8699_v3 = vmov 0.0   ;;  %vm36_vm1 = vcmask 254976   ;;  %s8689_s0 = inlined_call_operand.vmem [shape: f32[2,16,16,1], index: 0, kind: input, shape index: {}]   ;;  %s8690_s1 = inlined_call_operand.vmem [shape: f32[9,1,1,32], index: 1, kind: input, shape index: {}]   ;;  %s8691_s2 = inlined_call_operand.vmem [shape: f32[1,1,1,32], index: 2, kind: input, shape index: {}]   ;;  %s8692_s3 = inlined_call_operand.vmem [shape: f32[288,64], index: 3, kind: input, shape index: {}]   ;;  %s8693_s4 = inlined_call_operand.vmem [shape: f32[1,1,1,64], index: 4, kind: input, shape index: {}]   ;;  %s8694_s5 = inlined_call_operand.vmem [shape: f32[1024,128], index: 5, kind: input, shape index: {}]   ;;  %s8695_s6 = inlined_call_operand.vmem [shape: f32[1,128], index: 6, kind: input, shape index: {}]   ;;  %s8696_s7 = inlined_call_operand.vmem [shape: f32[128,64], index: 7, kind: input, shape index: {}]   ;;  %s8697_s8 = inlined_call_operand.vmem [shape: f32[1,64], index: 8, kind: input, shape index: {}]   ;;  %s8698_s9 = inlined_call_operand.hbm [shape: f32[2,64], index: 9, kind: output, shape index: {}]  }
   0x1   :  { %v5684_v0 = vld [vmem:[%s8689_s0 + $0x10] sm:$0xff]  ;;  %v5689_v1 = vld [vmem:[%s8689_s0] sm:$0xff]  ;;  %5566 = vset.pattern.permute.xlu1 %v5622_v2  ;;  %5565 = vset.pattern.permute.xlu0 %v5622_v2  ;;  %41 = vst.msk [vmem:[#allocation2 + $0x30] sm:$0xff] %vm33_vm0, %v8699_v3  ;;  %42 = vst.msk [vmem:[#allocation2 + $0x38] sm:$0xff] %vm33_vm0, %v8699_v3 }
   0x2   :  { %34 = vst.msk [vmem:[#allocation2] sm:$0xff] %vm33_vm0, %v8699_v3  ;;  %35 = vst.msk [vmem:[#allocation2 + $0x8] sm:$0xff] %vm33_vm0, %v8699_v3  ;;  %219 = vperm.xlu1 %5566, %v5684_v0   ;;  %209 = vperm.xlu0 %5565, %v5689_v1   ;;  %v146_v4 = vld [vmem:[%s8689_s0 + $0x18] sm:$0xff]  ;;  %v144_v5 = vld [vmem:[%s8689_s0 + $0x8] sm:$0xff] }
   0x3   :  { %38 = vst.msk [vmem:[#allocation2 + $0x18] sm:$0xff] %vm33_vm0, %v8699_v3  ;;  %39 = vst.msk [vmem:[#allocation2 + $0x20] sm:$0xff] %vm33_vm0, %v8699_v3  ;;  %v148_v6 = vld [vmem:[%s8689_s0 + $0x28] sm:$0xff]  ;;  %v147_v7 = vld [vmem:[%s8689_s0 + $0x20] sm:$0xff] }
   0x4   :  { %44 = vst.msk [vmem:[#allocation2 + $0x48] sm:$0xff] %vm33_vm0, %v8699_v3  ;;  %45 = vst.msk [vmem:[#allocation2 + $0x50] sm:$0xff] %vm33_vm0, %v8699_v3  ;;  %v150_v8 = vld [vmem:[%s8689_s0 + $0x38] sm:$0xff]  ;;  %v149_v9 = vld [vmem:[%s8689_s0 + $0x30] sm:$0xff] }
   0x5   :  { %47 = vst.msk [vmem:[#allocation2 + $0x60] sm:$0xff] %vm33_vm0, %v8699_v3  ;;  %48 = vst.msk [vmem:[#allocation2 + $0x68] sm:$0xff] %vm33_vm0, %v8699_v3  ;;  %v152_v10 = vld [vmem:[%s8689_s0 + $0x48] sm:$0xff]  ;;  %v151_v11 = vld [vmem:[%s8689_s0 + $0x40] sm:$0xff] }
   0x6   :  { %50 = vst.msk [vmem:[#allocation2 + $0x78] sm:$0xff] %vm33_vm0, %v8699_v3  ;;  %51 = vst.msk [vmem:[#allocation2 + $0x80] sm:$0xff] %vm33_vm0, %v8699_v3  ;;  %224 = vperm.xlu1 %5566, %v146_v4   ;;  %214 = vperm.xlu0 %5565, %v144_v5   ;;  %v154_v12 = vld [vmem:[%s8689_s0 + $0x58] sm:$0xff]  ;;  %v153_v13 = vld [vmem:[%s8689_s0 + $0x50] sm:$0xff] }
   0x7   :  { %53 = vst.msk [vmem:[#allocation2 + $0x90] sm:$0xff] %vm33_vm0, %v8699_v3  ;;  %54 = vst.msk [vmem:[#allocation2 + $0x98] sm:$0xff] %vm33_vm0, %v8699_v3  ;;  %v156_v14 = vld [vmem:[%s8689_s0 + $0x68] sm:$0xff]  ;;  %v6025_v15 = vld [vmem:[%s8690_s1] ss:$0 sm:$0xff] }
   0x8   :  { %56 = vst.msk [vmem:[#allocation2 + $0xa8] sm:$0xff] %vm33_vm0, %v8699_v3  ;;  %57 = vst.msk [vmem:[#allocation2 + $0xb0] sm:$0xff] %vm33_vm0, %v8699_v3  ;;  %v155_v16 = vld [vmem:[%s8689_s0 + $0x60] sm:$0xff] }
   0x9   :  { %59 = vst.msk [vmem:[#allocation2 + $0xc0] sm:$0xff] %vm33_vm0, %v8699_v3  ;;  %60 = vst.msk [vmem:[#allocation2 + $0xc8] sm:$0xff] %vm33_vm0, %v8699_v3  ;;  %v6033_v17 = vld [vmem:[%s8690_s1 + $0x1] ss:$0 sm:$0xff]  ;;  %v6038_v18 = vld [vmem:[%s8690_s1 + $0x2] ss:$0 sm:$0xff] }
   0xa   :  { %62 = vst.msk [vmem:[#allocation2 + $0xd8] sm:$0xff] %vm33_vm0, %v8699_v3  ;;  %63 = vst.msk [vmem:[#allocation2 + $0xe0] sm:$0xff] %vm33_vm0, %v8699_v3  ;;  %234 = vperm.xlu1 %5566, %v148_v6   ;;  %229 = vperm.xlu0 %5565, %v147_v7   ;;  %v592_v19 = vld [vmem:[#allocation2] sm:$0xff]  ;;  %v593_v20 = vld [vmem:[#allocation2 + $0x8] sm:$0xff] }
   0xb   :  { %65 = vst.msk [vmem:[#allocation2 + $0xf0] sm:$0xff] %vm33_vm0, %v8699_v3  ;;  %66 = vst.msk [vmem:[#allocation2 + $0xf8] sm:$0xff] %vm33_vm0, %v8699_v3  ;;  %v663_v21 = vmul.f32 %v6025_v15, %v592_v19  ;;  %v664_v22 = vmul.f32 %v6025_v15, %v593_v20  ;;  %v727_v23 = vld [vmem:[#allocation2 + $0x1] sm:$0xff] }
   0xc   :  { %68 = vst.msk [vmem:[#allocation2 + $0x108] sm:$0xff] %vm33_vm0, %v8699_v3  ;;  %69 = vst.msk [vmem:[#allocation2 + $0x110] sm:$0xff] %vm33_vm0, %v8699_v3  ;;  %v927_v25 = vld [vmem:[#allocation2 + $0x2] sm:$0xff]  ;;  %v799_v26 = vmul.f32 %v6033_v17, %v727_v23 }
   0xd   :  { %71 = vst.msk [vmem:[#allocation2 + $0x120] sm:$0xff] %vm33_vm0, %v8699_v3  ;;  %72 = vst.msk [vmem:[#allocation2 + $0x128] sm:$0xff] %vm33_vm0, %v8699_v3  ;;  %v999_v29 = vmul.f32 %v6038_v18, %v927_v25 }
   0xe   :  { %74 = vst.msk [vmem:[#allocation2 + $0x138] sm:$0xff] %vm33_vm0, %v8699_v3  ;;  %75 = vst.msk [vmem:[#allocation2 + $0x140] sm:$0xff] %vm33_vm0, %v8699_v3  ;;  %244 = vperm.xlu1 %5566, %v150_v8   ;;  %239 = vperm.xlu0 %5565, %v149_v9  }
   0xf   :  { %77 = vst.msk [vmem:[#allocation2 + $0x150] sm:$0xff] %vm33_vm0, %v8699_v3  ;;  %78 = vst.msk [vmem:[#allocation2 + $0x158] sm:$0xff] %vm33_vm0, %v8699_v3 }
  0x10   :  { %80 = vst.msk [vmem:[#allocation2 + $0x168] sm:$0xff] %vm33_vm0, %v8699_v3  ;;  %81 = vst.msk [vmem:[#allocation2 + $0x170] sm:$0xff] %vm33_vm0, %v8699_v3 }
  0x11   :  { %83 = vst.msk [vmem:[#allocation2 + $0x180] sm:$0xff] %vm33_vm0, %v8699_v3  ;;  %84 = vst.msk [vmem:[#allocation2 + $0x188] sm:$0xff] %vm33_vm0, %v8699_v3 }
  0x12   :  { %86 = vst.msk [vmem:[#allocation2 + $0x198] sm:$0xff] %vm33_vm0, %v8699_v3  ;;  %87 = vst.msk [vmem:[#allocation2 + $0x1a0] sm:$0xff] %vm33_vm0, %v8699_v3  ;;  %254 = vperm.xlu1 %5566, %v152_v10   ;;  %249 = vperm.xlu0 %5565, %v151_v11  }
  0x13   :  { %89 = vst.msk [vmem:[#allocation2 + $0x1b0] sm:$0xff] %vm33_vm0, %v8699_v3  ;;  %90 = vst.msk [vmem:[#allocation2 + $0x1b8] sm:$0xff] %vm33_vm0, %v8699_v3 }
  0x14   :  { %92 = vst.msk [vmem:[#allocation2 + $0x1c8] sm:$0xff] %vm33_vm0, %v8699_v3  ;;  %93 = vst.msk [vmem:[#allocation2 + $0x1d0] sm:$0xff] %vm33_vm0, %v8699_v3 }
  0x15   :  { %95 = vst.msk [vmem:[#allocation2 + $0x1e0] sm:$0xff] %vm33_vm0, %v8699_v3  ;;  %96 = vst.msk [vmem:[#allocation2 + $0x1e8] sm:$0xff] %vm33_vm0, %v8699_v3 }
  0x16   :  { %98 = vst.msk [vmem:[#allocation2 + $0x1f8] sm:$0xff] %vm33_vm0, %v8699_v3  ;;  %99 = vst.msk [vmem:[#allocation2 + $0x200] sm:$0xff] %vm33_vm0, %v8699_v3  ;;  %264 = vperm.xlu1 %5566, %v154_v12   ;;  %259 = vperm.xlu0 %5565, %v153_v13  }
  0x17   :  { %101 = vst.msk [vmem:[#allocation2 + $0x210] sm:$0xff] %vm33_vm0, %v8699_v3  ;;  %102 = vst.msk [vmem:[#allocation2 + $0x218] sm:$0xff] %vm33_vm0, %v8699_v3 }
  0x18   :  { %104 = vst.msk [vmem:[#allocation2 + $0x228] sm:$0xff] %vm33_vm0, %v8699_v3  ;;  %105 = vst.msk [vmem:[#allocation2 + $0x230] sm:$0xff] %vm33_vm0, %v8699_v3 }
  0x19   :  { %107 = vst.msk [vmem:[#allocation2 + $0x240] sm:$0xff] %vm33_vm0, %v8699_v3  ;;  %108 = vst.msk [vmem:[#allocation2 + $0x248] sm:$0xff] %vm33_vm0, %v8699_v3 }
  0x1a   :  { %110 = vst.msk [vmem:[#allocation2 + $0x258] sm:$0xff] %vm33_vm0, %v8699_v3  ;;  %111 = vst.msk [vmem:[#allocation2 + $0x260] sm:$0xff] %vm33_vm0, %v8699_v3  ;;  %274 = vperm.xlu1 %5566, %v156_v14   ;;  %269 = vperm.xlu0 %5565, %v155_v16  }
  0x1b   :  { %113 = vst.msk [vmem:[#allocation2 + $0x270] sm:$0xff] %vm33_vm0, %v8699_v3  ;;  %114 = vst.msk [vmem:[#allocation2 + $0x278] sm:$0xff] %vm33_vm0, %v8699_v3 }
  0x1c   :  { %116 = vst.msk [vmem:[#allocation2 + $0x288] sm:$0xff] %vm33_vm0, %v8699_v3  ;;  %117 = vst.msk [vmem:[#allocation2 + $0x290] sm:$0xff] %vm33_vm0, %v8699_v3 }
  0x1d   :  { %119 = vst.msk [vmem:[#allocation2 + $0x2a0] sm:$0xff] %vm33_vm0, %v8699_v3  ;;  %120 = vst.msk [vmem:[#allocation2 + $0x2a8] sm:$0xff] %vm33_vm0, %v8699_v3 }
  0x1e   :  { %122 = vst.msk [vmem:[#allocation2 + $0x2b8] sm:$0xff] %vm33_vm0, %v8699_v3  ;;  %123 = vst.msk [vmem:[#allocation2 + $0x2c0] sm:$0xff] %vm33_vm0, %v8699_v3 }
  0x1f   :  { %125 = vst.msk [vmem:[#allocation2 + $0x2d0] sm:$0xff] %vm33_vm0, %v8699_v3  ;;  %126 = vst.msk [vmem:[#allocation2 + $0x2d8] sm:$0xff] %vm33_vm0, %v8699_v3 }
  0x20   :  { %128 = vst.msk [vmem:[#allocation2 + $0x2e8] sm:$0xff] %vm33_vm0, %v8699_v3  ;;  %129 = vst.msk [vmem:[#allocation2 + $0x2f0] sm:$0xff] %vm33_vm0, %v8699_v3 }
  0x21   :  { %131 = vst.msk [vmem:[#allocation2 + $0x300] sm:$0xff] %vm33_vm0, %v8699_v3  ;;  %132 = vst.msk [vmem:[#allocation2 + $0x308] sm:$0xff] %vm33_vm0, %v8699_v3 }
  0x22   :  { %134 = vst.msk [vmem:[#allocation2 + $0x318] sm:$0xff] %vm33_vm0, %v8699_v3  ;;  %135 = vst.msk [vmem:[#allocation2 + $0x320] sm:$0xff] %vm33_vm0, %v8699_v3 }
  0x23   :  { %137 = vst.msk [vmem:[#allocation2 + $0x330] sm:$0xff] %vm33_vm0, %v8699_v3  ;;  %138 = vst.msk [vmem:[#allocation2 + $0x338] sm:$0xff] %vm33_vm0, %v8699_v3 }
  0x24   :  { %140 = vst.msk [vmem:[#allocation2 + $0x348] sm:$0xff] %vm33_vm0, %v8699_v3  ;;  %141 = vst.msk [vmem:[#allocation2 + $0x350] sm:$0xff] %vm33_vm0, %v8699_v3 }
  0x25   :  { %2894 = vst.msk [vmem:[#allocation4] sm:$0xff] %vm33_vm0, %v8699_v3  ;;  %2896 = vst.msk [vmem:[#allocation4 + $0x10] sm:$0xff] %vm33_vm0, %v8699_v3 }
  0x26   :  { %2898 = vst.msk [vmem:[#allocation4 + $0x20] sm:$0xff] %vm33_vm0, %v8699_v3  ;;  %2900 = vst.msk [vmem:[#allocation4 + $0x30] sm:$0xff] %vm33_vm0, %v8699_v3 }
  0x27   :  { %2902 = vst.msk [vmem:[#allocation4 + $0x40] sm:$0xff] %vm33_vm0, %v8699_v3  ;;  %2904 = vst.msk [vmem:[#allocation4 + $0x50] sm:$0xff] %vm33_vm0, %v8699_v3 }
  0x28   :  { %2906 = vst.msk [vmem:[#allocation4 + $0x60] sm:$0xff] %vm33_vm0, %v8699_v3  ;;  %2908 = vst.msk [vmem:[#allocation4 + $0x70] sm:$0xff] %vm33_vm0, %v8699_v3 }
  0x29   :  { %2910 = vst.msk [vmem:[#allocation4 + $0x80] sm:$0xff] %vm33_vm0, %v8699_v3  ;;  %2912 = vst.msk [vmem:[#allocation4 + $0x90] sm:$0xff] %vm33_vm0, %v8699_v3 }
  0x2a   :  { %2914 = vst.msk [vmem:[#allocation4 + $0xa0] sm:$0xff] %vm33_vm0, %v8699_v3  ;;  %2916 = vst.msk [vmem:[#allocation4 + $0xb0] sm:$0xff] %vm33_vm0, %v8699_v3 }
  0x2b   :  { %2918 = vst.msk [vmem:[#allocation4 + $0xc0] sm:$0xff] %vm33_vm0, %v8699_v3  ;;  %2920 = vst.msk [vmem:[#allocation4 + $0xd0] sm:$0xff] %vm33_vm0, %v8699_v3 }
  0x2c   :  { %2922 = vst.msk [vmem:[#allocation4 + $0xe0] sm:$0xff] %vm33_vm0, %v8699_v3  ;;  %2924 = vst.msk [vmem:[#allocation4 + $0xf0] sm:$0xff] %vm33_vm0, %v8699_v3 }
  0x2d   :  { %2926 = vst.msk [vmem:[#allocation4 + $0x100] sm:$0xff] %vm33_vm0, %v8699_v3  ;;  %2928 = vst.msk [vmem:[#allocation4 + $0x110] sm:$0xff] %vm33_vm0, %v8699_v3 }
  0x2e   :  { %2930 = vst.msk [vmem:[#allocation4 + $0x120] sm:$0xff] %vm33_vm0, %v8699_v3  ;;  %2932 = vst.msk [vmem:[#allocation4 + $0x130] sm:$0xff] %vm33_vm0, %v8699_v3 }
  0x2f   :  { %43 = vst.msk [vmem:[#allocation2 + $0x40] sm:$0x3] %vm36_vm1, %v8699_v3  ;;  %37 = vst.msk [vmem:[#allocation2 + $0x10] sm:$0x3] %vm36_vm1, %v8699_v3 }
  0x30   :  { %40 = vst.msk [vmem:[#allocation2 + $0x28] sm:$0x3] %vm36_vm1, %v8699_v3  ;;  %46 = vst.msk [vmem:[#allocation2 + $0x58] sm:$0x3] %vm36_vm1, %v8699_v3 }
  0x31   :  { %49 = vst.msk [vmem:[#allocation2 + $0x70] sm:$0x3] %vm36_vm1, %v8699_v3  ;;  %52 = vst.msk [vmem:[#allocation2 + $0x88] sm:$0x3] %vm36_vm1, %v8699_v3 }
  0x32   :  { %55 = vst.msk [vmem:[#allocation2 + $0xa0] sm:$0x3] %vm36_vm1, %v8699_v3  ;;  %58 = vst.msk [vmem:[#allocation2 + $0xb8] sm:$0x3] %vm36_vm1, %v8699_v3 }
  0x33   :  { %61 = vst.msk [vmem:[#allocation2 + $0xd0] sm:$0x3] %vm36_vm1, %v8699_v3  ;;  %64 = vst.msk [vmem:[#allocation2 + $0xe8] sm:$0x3] %vm36_vm1, %v8699_v3 }
  0x34   :  { %67 = vst.msk [vmem:[#allocation2 + $0x100] sm:$0x3] %vm36_vm1, %v8699_v3  ;;  %70 = vst.msk [vmem:[#allocation2 + $0x118] sm:$0x3] %vm36_vm1, %v8699_v3 }
  0x35   :  { %73 = vst.msk [vmem:[#allocation2 + $0x130] sm:$0x3] %vm36_vm1, %v8699_v3  ;;  %76 = vst.msk [vmem:[#allocation2 + $0x148] sm:$0x3] %vm36_vm1, %v8699_v3 }
  0x36   :  { %79 = vst.msk [vmem:[#allocation2 + $0x160] sm:$0x3] %vm36_vm1, %v8699_v3  ;;  %82 = vst.msk [vmem:[#allocation2 + $0x178] sm:$0x3] %vm36_vm1, %v8699_v3  ;;  %v728_v24 = vld [vmem:[#allocation2 + $0x9] sm:$0xff] }
  0x37   :  { %85 = vst.msk [vmem:[#allocation2 + $0x190] sm:$0x3] %vm36_vm1, %v8699_v3  ;;  %88 = vst.msk [vmem:[#allocation2 + $0x1a8] sm:$0x3] %vm36_vm1, %v8699_v3  ;;  %v800_v27 = vmul.f32 %v6033_v17, %v728_v24  ;;  %v928_v28 = vld [vmem:[#allocation2 + $0xa] sm:$0xff] }
  0x38   :  { %91 = vst.msk [vmem:[#allocation2 + $0x1c0] sm:$0x3] %vm36_vm1, %v8699_v3  ;;  %94 = vst.msk [vmem:[#allocation2 + $0x1d8] sm:$0x3] %vm36_vm1, %v8699_v3 }
  0x39   :  { %97 = vst.msk [vmem:[#allocation2 + $0x1f0] sm:$0x3] %vm36_vm1, %v8699_v3  ;;  %100 = vst.msk [vmem:[#allocation2 + $0x208] sm:$0x3] %vm36_vm1, %v8699_v3 }
  0x3a   :  { %103 = vst.msk [vmem:[#allocation2 + $0x220] sm:$0x3] %vm36_vm1, %v8699_v3  ;;  %106 = vst.msk [vmem:[#allocation2 + $0x238] sm:$0x3] %vm36_vm1, %v8699_v3 }
  0x3b   :  { %109 = vst.msk [vmem:[#allocation2 + $0x250] sm:$0x3] %vm36_vm1, %v8699_v3  ;;  %112 = vst.msk [vmem:[#allocation2 + $0x268] sm:$0x3] %vm36_vm1, %v8699_v3 }
  0x3c   :  { %115 = vst.msk [vmem:[#allocation2 + $0x280] sm:$0x3] %vm36_vm1, %v8699_v3  ;;  %118 = vst.msk [vmem:[#allocation2 + $0x298] sm:$0x3] %vm36_vm1, %v8699_v3 }
  0x3d   :  { %121 = vst.msk [vmem:[#allocation2 + $0x2b0] sm:$0x3] %vm36_vm1, %v8699_v3  ;;  %124 = vst.msk [vmem:[#allocation2 + $0x2c8] sm:$0x3] %vm36_vm1, %v8699_v3 }
  0x3e   :  { %127 = vst.msk [vmem:[#allocation2 + $0x2e0] sm:$0x3] %vm36_vm1, %v8699_v3  ;;  %130 = vst.msk [vmem:[#allocation2 + $0x2f8] sm:$0x3] %vm36_vm1, %v8699_v3 }
  0x3f   :  { %133 = vst.msk [vmem:[#allocation2 + $0x310] sm:$0x3] %vm36_vm1, %v8699_v3  ;;  %136 = vst.msk [vmem:[#allocation2 + $0x328] sm:$0x3] %vm36_vm1, %v8699_v3 }
  0x40   :  { %139 = vst.msk [vmem:[#allocation2 + $0x340] sm:$0x3] %vm36_vm1, %v8699_v3  ;;  %142 = vst.msk [vmem:[#allocation2 + $0x358] sm:$0x3] %vm36_vm1, %v8699_v3 }
  0x41   :  { %2895 = vst.msk [vmem:[#allocation4 + $0x8] sm:$0x3] %vm36_vm1, %v8699_v3  ;;  %2897 = vst.msk [vmem:[#allocation4 + $0x18] sm:$0x3] %vm36_vm1, %v8699_v3 }
  0x42   :  { %2899 = vst.msk [vmem:[#allocation4 + $0x28] sm:$0x3] %vm36_vm1, %v8699_v3  ;;  %2901 = vst.msk [vmem:[#allocation4 + $0x38] sm:$0x3] %vm36_vm1, %v8699_v3 }
  0x43   :  { %2903 = vst.msk [vmem:[#allocation4 + $0x48] sm:$0x3] %vm36_vm1, %v8699_v3  ;;  %2905 = vst.msk [vmem:[#allocation4 + $0x58] sm:$0x3] %vm36_vm1, %v8699_v3 }
  0x44   :  { %2907 = vst.msk [vmem:[#allocation4 + $0x68] sm:$0x3] %vm36_vm1, %v8699_v3  ;;  %2909 = vst.msk [vmem:[#allocation4 + $0x78] sm:$0x3] %vm36_vm1, %v8699_v3 }
  0x45   :  { %2911 = vst.msk [vmem:[#allocation4 + $0x88] sm:$0x3] %vm36_vm1, %v8699_v3  ;;  %2913 = vst.msk [vmem:[#allocation4 + $0x98] sm:$0x3] %vm36_vm1, %v8699_v3 }
  0x46   :  { %2915 = vst.msk [vmem:[#allocation4 + $0xa8] sm:$0x3] %vm36_vm1, %v8699_v3  ;;  %2917 = vst.msk [vmem:[#allocation4 + $0xb8] sm:$0x3] %vm36_vm1, %v8699_v3 }
  0x47   :  { %2919 = vst.msk [vmem:[#allocation4 + $0xc8] sm:$0x3] %vm36_vm1, %v8699_v3  ;;  %2921 = vst.msk [vmem:[#allocation4 + $0xd8] sm:$0x3] %vm36_vm1, %v8699_v3 }
  0x48   :  { %2923 = vst.msk [vmem:[#allocation4 + $0xe8] sm:$0x3] %vm36_vm1, %v8699_v3  ;;  %2925 = vst.msk [vmem:[#allocation4 + $0xf8] sm:$0x3] %vm36_vm1, %v8699_v3 }
  0x49   :  { %2927 = vst.msk [vmem:[#allocation4 + $0x108] sm:$0x3] %vm36_vm1, %v8699_v3  ;;  %2929 = vst.msk [vmem:[#allocation4 + $0x118] sm:$0x3] %vm36_vm1, %v8699_v3 }
  0x4a   :  { %2931 = vst.msk [vmem:[#allocation4 + $0x128] sm:$0x3] %vm36_vm1, %v8699_v3  ;;  %2933 = vst.msk [vmem:[#allocation4 + $0x138] sm:$0x3] %vm36_vm1, %v8699_v3 }
  0x4b   :  { %14 = vsyncpa [#allocation9], 0  ;;  %v158_v30 = vld [vmem:[%s8689_s0 + $0x78] sm:$0xff]  ;;  %v157_v31 = vld [vmem:[%s8689_s0 + $0x70] sm:$0xff]  ;;  %v1000_v32 = vmul.f32 %v6038_v18, %v928_v28  ;;  %v863_v33 = vadd.f32 %v799_v26, %v663_v21  ;;  %v864_v34 = vadd.f32 %v800_v27, %v664_v22  ;;  %s5625_s17 = smov 64   ;;  %s5626_s30 = smov 96  }
  0x4c   :  { %284 = vperm.xlu1 %5566, %v158_v30   ;;  %279 = vperm.xlu0 %5565, %v157_v31   ;;  %v160_v37 = vld [vmem:[%s8689_s0 + $0x88] sm:$0xff]  ;;  %v159_v38 = vld [vmem:[%s8689_s0 + $0x80] sm:$0xff]  ;;  %v162_v39 = vld [vmem:[%s8689_s0 + $0x98] sm:$0xff]  ;;  %vm3063_vm2 = vcmask 523520   ;;  %vm3160_vm3 = vcmask 785920   ;;  %vm3257_vm4 = vcmask 1048320  }
  0x4d   :  { %v1063_v35 = vadd.f32 %v999_v29, %v863_v33  ;;  %v1064_v36 = vadd.f32 %v1000_v32, %v864_v34  ;;  %v161_v40 = vld [vmem:[%s8689_s0 + $0x90] sm:$0xff]  ;;  %v164_v41 = vld [vmem:[%s8689_s0 + $0xa8] sm:$0xff]  ;;  %v163_v42 = vld [vmem:[%s8689_s0 + $0xa0] sm:$0xff]  ;;  %vm4049_vm5 = vcmask 523264   ;;  %vm4145_vm6 = vcmask 519168  }
  0x4e   :  { %v166_v43 = vld [vmem:[%s8689_s0 + $0xb8] sm:$0xff]  ;;  %v165_v44 = vld [vmem:[%s8689_s0 + $0xb0] sm:$0xff]  ;;  %v168_v45 = vld [vmem:[%s8689_s0 + $0xc8] sm:$0xff]  ;;  %vm4214_vm7 = vcmask 1041409   ;;  %vm4216_vm8 = vcmask 1043459   ;;  %vm4218_vm9 = vcmask 1045509  }
  0x4f   :  { %1127 = vst.msk [vmem:[#allocation3] sm:$0xff] %vm33_vm0, %v1063_v35  ;;  %1128 = vst.msk [vmem:[#allocation3 + $0x8] sm:$0xff] %vm33_vm0, %v1064_v36  ;;  %v167_v46 = vld [vmem:[%s8689_s0 + $0xc0] sm:$0xff]  ;;  %v170_v47 = vld [vmem:[%s8689_s0 + $0xd8] sm:$0xff]  ;;  %vm4220_vm10 = vcmask 1047559   ;;  %vm4223_vm11 = vcmask 517120  }
  0x50   :  { %294 = vperm.xlu1 %5566, %v160_v37   ;;  %289 = vperm.xlu0 %5565, %v159_v38   ;;  %v169_v48 = vld [vmem:[%s8689_s0 + $0xd0] sm:$0xff]  ;;  %v172_v49 = vld [vmem:[%s8689_s0 + $0xe8] sm:$0xff]  ;;  %v171_v50 = vld [vmem:[%s8689_s0 + $0xe0] sm:$0xff]  ;;  %vm4235_vm12 = vcmask 1041920   ;;  %vm5629_vm13 = vmmov 0  }
  0x51   :  { %v176_v51 = vld [vmem:[%s8689_s0 + $0x108] sm:$0xff]  ;;  %v175_v52 = vld [vmem:[%s8689_s0 + $0x100] sm:$0xff]  ;;  %v174_v53 = vld [vmem:[%s8689_s0 + $0xf8] sm:$0xff] }
  0x52   :  { %v173_v54 = vld [vmem:[%s8689_s0 + $0xf0] sm:$0xff]  ;;  %v178_v55 = vld [vmem:[%s8689_s0 + $0x118] sm:$0xff]  ;;  %v180_v57 = vld [vmem:[%s8689_s0 + $0x128] sm:$0xff] }
  0x53   :  { %v177_v56 = vld [vmem:[%s8689_s0 + $0x110] sm:$0xff]  ;;  %v179_v58 = vld [vmem:[%s8689_s0 + $0x120] sm:$0xff]  ;;  %v182_v59 = vld [vmem:[%s8689_s0 + $0x138] sm:$0xff] }
  0x54   :  { %304 = vperm.xlu1 %5566, %v162_v39   ;;  %299 = vperm.xlu0 %5565, %v161_v40   ;;  %v181_v60 = vld [vmem:[%s8689_s0 + $0x130] sm:$0xff]  ;;  %v184_v61 = vld [vmem:[%s8689_s0 + $0x148] sm:$0xff]  ;;  %v183_v62 = vld [vmem:[%s8689_s0 + $0x140] sm:$0xff] }
  0x55   :  { %v186_v63 = vld [vmem:[%s8689_s0 + $0x158] sm:$0xff]  ;;  %v185_v0 = vld [vmem:[%s8689_s0 + $0x150] sm:$0xff]  ;;  %v188_v1 = vld [vmem:[%s8689_s0 + $0x168] sm:$0xff] }
  0x56   :  { %v187_v2 = vld [vmem:[%s8689_s0 + $0x160] sm:$0xff]  ;;  %v190_v4 = vld [vmem:[%s8689_s0 + $0x178] sm:$0xff]  ;;  %v189_v5 = vld [vmem:[%s8689_s0 + $0x170] sm:$0xff] }
  0x57   :  { %v192_v6 = vld [vmem:[%s8689_s0 + $0x188] sm:$0xff]  ;;  %v191_v7 = vld [vmem:[%s8689_s0 + $0x180] sm:$0xff]  ;;  %v194_v8 = vld [vmem:[%s8689_s0 + $0x198] sm:$0xff] }
  0x58   :  { %314 = vperm.xlu1 %5566, %v164_v41   ;;  %309 = vperm.xlu0 %5565, %v163_v42   ;;  %v193_v9 = vld [vmem:[%s8689_s0 + $0x190] sm:$0xff]  ;;  %v196_v10 = vld [vmem:[%s8689_s0 + $0x1a8] sm:$0xff]  ;;  %v195_v11 = vld [vmem:[%s8689_s0 + $0x1a0] sm:$0xff] }
  0x59   :  { %v198_v12 = vld [vmem:[%s8689_s0 + $0x1b8] sm:$0xff]  ;;  %v197_v13 = vld [vmem:[%s8689_s0 + $0x1b0] sm:$0xff]  ;;  %v200_v14 = vld [vmem:[%s8689_s0 + $0x1c8] sm:$0xff] }
  0x5a   :  { %v199_v16 = vld [vmem:[%s8689_s0 + $0x1c0] sm:$0xff]  ;;  %v202_v19 = vld [vmem:[%s8689_s0 + $0x1d8] sm:$0xff]  ;;  %v201_v20 = vld [vmem:[%s8689_s0 + $0x1d0] sm:$0xff] }
  0x5b   :  { %v204_v21 = vld [vmem:[%s8689_s0 + $0x1e8] sm:$0xff]  ;;  %v203_v22 = vld [vmem:[%s8689_s0 + $0x1e0] sm:$0xff]  ;;  %v206_v23 = vld [vmem:[%s8689_s0 + $0x1f8] sm:$0xff] }
  0x5c   :  { %324 = vperm.xlu1 %5566, %v166_v43   ;;  %319 = vperm.xlu0 %5565, %v165_v44   ;;  %v205_v24 = vld [vmem:[%s8689_s0 + $0x1f0] sm:$0xff]  ;;  %v2983_v25 = vld [vmem:[#allocation4 + $0x1] sm:$0xff]  ;;  %v625_v27 = vld [vmem:[#allocation2 + $0x1b8] sm:$0xff]  ;;  %s5624_s0 = smov 32  }
  0x5d   :  { %v624_v26 = vld [vmem:[#allocation2 + $0x1b0] sm:$0xff]  ;;  %v696_v32 = vmul.f32 %v6025_v15, %v625_v27  ;;  %v760_v33 = vld [vmem:[#allocation2 + $0x1b9] sm:$0xff]  ;;  %v3080_v41 = vld [vmem:[#allocation4 + $0x2] sm:$0xff] }
  0x5e   :  { %v759_v28 = vld [vmem:[#allocation2 + $0x1b1] sm:$0xff]  ;;  %v695_v31 = vmul.f32 %v6025_v15, %v624_v26  ;;  %v832_v35 = vmul.f32 %v6033_v17, %v760_v33  ;;  %v960_v37 = vld [vmem:[#allocation2 + $0x1ba] sm:$0xff] }
  0x5f   :  { %v831_v34 = vmul.f32 %v6033_v17, %v759_v28  ;;  %v959_v36 = vld [vmem:[#allocation2 + $0x1b2] sm:$0xff]  ;;  %v1032_v40 = vmul.f32 %v6038_v18, %v960_v37 }
  0x60   :  { %334 = vperm.xlu1 %5566, %v168_v45   ;;  %329 = vperm.xlu0 %5565, %v167_v46   ;;  %v1031_v39 = vmul.f32 %v6038_v18, %v959_v36  ;;  %v896_v42 = vadd.f32 %v832_v35, %v696_v32 }
  0x61   :  { %v895_v38 = vadd.f32 %v831_v34, %v695_v31 }
  0x62   :  { %v1096_v46 = vadd.f32 %v1032_v40, %v896_v42 }
  0x63   :  { %v1095_v45 = vadd.f32 %v1031_v39, %v895_v38 }
  0x64   :  { %344 = vperm.xlu1 %5566, %v170_v47   ;;  %339 = vperm.xlu0 %5565, %v169_v48   ;;  %v6213_v47 = vld [vmem:[%s8690_s1 + $0x3] ss:$0 sm:$0xff]  ;;  %v6218_v48 = vld [vmem:[%s8690_s1 + $0x4] ss:$0 sm:$0xff]  ;;  %1160 = vst.msk [vmem:[#allocation3 + $0x108] sm:$0xff] %vm33_vm0, %v1096_v46 }
  0x65   :  { %1159 = vst.msk [vmem:[#allocation3 + $0x100] sm:$0xff] %vm33_vm0, %v1095_v45 }
  0x68   :  { %354 = vperm.xlu1 %5566, %v172_v49   ;;  %349 = vperm.xlu0 %5565, %v171_v50   ;;  %v6224_v49 = vld [vmem:[%s8690_s1 + $0x6] ss:$0 sm:$0xff]  ;;  %v6229_v50 = vld [vmem:[%s8690_s1 + $0x7] ss:$0 sm:$0xff] }
  0x6c   :  { %374 = vperm.xlu1 %5566, %v176_v51   ;;  %369 = vperm.xlu0 %5565, %v175_v52  }
  0x70   :  { %364 = vperm.xlu1 %5566, %v174_v53   ;;  %359 = vperm.xlu0 %5565, %v173_v54  }
  0x74   :  { %384 = vperm.xlu1 %5566, %v178_v55   ;;  %379 = vperm.xlu0 %5565, %v177_v56  }
  0x78   :  { %394 = vperm.xlu1 %5566, %v180_v57   ;;  %389 = vperm.xlu0 %5565, %v179_v58  }
  0x7c   :  { %404 = vperm.xlu1 %5566, %v182_v59   ;;  %399 = vperm.xlu0 %5565, %v181_v60  }
  0x80   :  { %414 = vperm.xlu1 %5566, %v184_v61   ;;  %409 = vperm.xlu0 %5565, %v183_v62  }
  0x81   :  { %v220_v29 = vpop.permute.xlu1 %219  ;;  %v210_v30 = vpop.permute.xlu0 %209 }
  0x82   :  { %530 = vst.msk [vmem:[#allocation2 + $0x31] sm:$0xff] %vm33_vm0, %v220_v29  ;;  %528 = vst.msk [vmem:[#allocation2 + $0x19] sm:$0xff] %vm33_vm0, %v210_v30 }
  0x84   :  { %424 = vperm.xlu1 %5566, %v186_v63   ;;  %419 = vperm.xlu0 %5565, %v185_v0  }
  0x85   :  { %v225_v43 = vpop.permute.xlu1 %224  ;;  %v215_v44 = vpop.permute.xlu0 %214 }
  0x86   :  { %531 = vst.msk [vmem:[#allocation2 + $0x39] sm:$0xff] %vm33_vm0, %v225_v43  ;;  %529 = vst.msk [vmem:[#allocation2 + $0x21] sm:$0xff] %vm33_vm0, %v215_v44 }
  0x88   :  { %434 = vperm.xlu1 %5566, %v188_v1   ;;  %429 = vperm.xlu0 %5565, %v187_v2  }
  0x89   :  { %v596_v51 = vld [vmem:[#allocation2 + $0x30] sm:$0xff]  ;;  %v594_v53 = vld [vmem:[#allocation2 + $0x18] sm:$0xff]  ;;  %v235_v54 = vpop.permute.xlu1 %234  ;;  %v230_v55 = vpop.permute.xlu0 %229 }
  0x8a   :  { %v731_v52 = vld [vmem:[#allocation2 + $0x31] sm:$0xff]  ;;  %v667_v56 = vmul.f32 %v6025_v15, %v596_v51  ;;  %v1265_v58 = vmul.f32 %v6213_v47, %v596_v51  ;;  %v729_v60 = vld [vmem:[#allocation2 + $0x19] sm:$0xff]  ;;  %533 = vst.msk [vmem:[#allocation2 + $0x51] sm:$0xff] %vm33_vm0, %v235_v54  ;;  %532 = vst.msk [vmem:[#allocation2 + $0x49] sm:$0xff] %vm33_vm0, %v230_v55  ;;  %v1992_v61 = vmul.f32 %v6224_v49, %v596_v51 }
  0x8b   :  { %v803_v57 = vmul.f32 %v6033_v17, %v731_v52  ;;  %v1401_v59 = vmul.f32 %v6218_v48, %v731_v52  ;;  %v2128_v62 = vmul.f32 %v6229_v50, %v731_v52  ;;  %v665_v63 = vmul.f32 %v6025_v15, %v594_v53 }
  0x8c   :  { %444 = vperm.xlu1 %5566, %v190_v4   ;;  %439 = vperm.xlu0 %5565, %v189_v5   ;;  %v801_v0 = vmul.f32 %v6033_v17, %v729_v60  ;;  %v1263_v1 = vmul.f32 %v6213_v47, %v594_v53  ;;  %v1399_v2 = vmul.f32 %v6218_v48, %v729_v60  ;;  %v6247_v4 = vld [vmem:[%s8690_s1 + $0x5] ss:$0 sm:$0xff] }
  0x8d   :  { %v867_v5 = vadd.f32 %v803_v57, %v667_v56  ;;  %v595_v27 = vld [vmem:[#allocation2 + $0x20] sm:$0xff] }
  0x8e   :  { %v730_v28 = vld [vmem:[#allocation2 + $0x21] sm:$0xff]  ;;  %v666_v43 = vmul.f32 %v6025_v15, %v595_v27  ;;  %v1264_v57 = vmul.f32 %v6213_v47, %v595_v27 }
  0x8f   :  { %v929_v33 = vld [vmem:[#allocation2 + $0x1a] sm:$0xff]  ;;  %v930_v38 = vld [vmem:[#allocation2 + $0x22] sm:$0xff]  ;;  %v802_v44 = vmul.f32 %v6033_v17, %v730_v28 }
  0x90   :  { %454 = vperm.xlu1 %5566, %v192_v6   ;;  %449 = vperm.xlu0 %5565, %v191_v7   ;;  %v1465_v6 = vadd.f32 %v1401_v59, %v1265_v58  ;;  %v2192_v7 = vadd.f32 %v2128_v62, %v1992_v61  ;;  %v1001_v52 = vmul.f32 %v6038_v18, %v929_v33 }
  0x91   :  { %v734_v53 = vld [vmem:[#allocation2 + $0x51] sm:$0xff]  ;;  %v866_v55 = vadd.f32 %v802_v44, %v666_v43  ;;  %v1002_v56 = vmul.f32 %v6038_v18, %v930_v38  ;;  %v1400_v58 = vmul.f32 %v6218_v48, %v730_v28  ;;  %v1599_v61 = vmul.f32 %v6247_v4, %v929_v33 }
  0x92   :  { %v934_v54 = vld [vmem:[#allocation2 + $0x52] sm:$0xff]  ;;  %v1600_v62 = vmul.f32 %v6247_v4, %v930_v38 }
  0x94   :  { %464 = vperm.xlu1 %5566, %v194_v8   ;;  %459 = vperm.xlu0 %5565, %v193_v9   ;;  %v865_v8 = vadd.f32 %v801_v0, %v665_v63  ;;  %v597_v9 = vld [vmem:[#allocation2 + $0x38] sm:$0xff]  ;;  %v598_v63 = vld [vmem:[#allocation2 + $0x48] sm:$0xff]  ;;  %v599_v0 = vld [vmem:[#allocation2 + $0x50] sm:$0xff] }
  0x95   :  { %v1993_v32 = vmul.f32 %v6224_v49, %v597_v9  ;;  %v1267_v28 = vmul.f32 %v6213_v47, %v598_v63  ;;  %v1268_v33 = vmul.f32 %v6213_v47, %v599_v0 }
  0x96   :  { %v1065_v60 = vadd.f32 %v1001_v52, %v865_v8 }
  0x98   :  { %474 = vperm.xlu1 %5566, %v196_v10   ;;  %469 = vperm.xlu0 %5565, %v195_v11   ;;  %v732_v10 = vld [vmem:[#allocation2 + $0x39] sm:$0xff]  ;;  %1129 = vst.msk [vmem:[#allocation3 + $0x10] sm:$0xff] %vm33_vm0, %v1065_v60 }
  0x99   :  { %v931_v11 = vld [vmem:[#allocation2 + $0x32] sm:$0xff]  ;;  %v2129_v36 = vmul.f32 %v6229_v50, %v732_v10 }
  0x9a   :  { %v1601_v26 = vmul.f32 %v6247_v4, %v931_v11 }
  0x9b   :  { %v2193_v46 = vadd.f32 %v2129_v36, %v1993_v32 }
  0x9c   :  { %484 = vperm.xlu1 %5566, %v198_v12   ;;  %479 = vperm.xlu0 %5565, %v197_v13   ;;  %v245_v12 = vpop.permute.xlu1 %244  ;;  %v240_v13 = vpop.permute.xlu0 %239  ;;  %v6265_v35 = vadd.f32 %v1601_v26, %v1465_v6  ;;  %v1464_v6 = vadd.f32 %v1400_v58, %v1264_v57 }
  0x9d   :  { %535 = vst.msk [vmem:[#allocation2 + $0x69] sm:$0xff] %vm33_vm0, %v245_v12  ;;  %534 = vst.msk [vmem:[#allocation2 + $0x61] sm:$0xff] %vm33_vm0, %v240_v13  ;;  %v933_v12 = vld [vmem:[#allocation2 + $0x4a] sm:$0xff] }
  0x9e   :  { %v1728_v13 = vld [vmem:[#allocation3 + $0x8] sm:$0xff]  ;;  %v1603_v38 = vmul.f32 %v6247_v4, %v933_v12 }
  0xa0   :  { %494 = vperm.xlu1 %5566, %v200_v14   ;;  %489 = vperm.xlu0 %5565, %v199_v16   ;;  %v1463_v14 = vadd.f32 %v1399_v2, %v1263_v1  ;;  %v6252_v16 = vld [vmem:[%s8690_s1 + $0x8] ss:$0 sm:$0xff]  ;;  %v255_v39 = vpop.permute.xlu1 %254  ;;  %v250_v40 = vpop.permute.xlu0 %249 }
  0xa1   :  { %v2328_v37 = vmul.f32 %v6252_v16, %v931_v11  ;;  %537 = vst.msk [vmem:[#allocation2 + $0x81] sm:$0xff] %vm33_vm0, %v255_v39  ;;  %536 = vst.msk [vmem:[#allocation2 + $0x79] sm:$0xff] %vm33_vm0, %v250_v40  ;;  %v1994_v39 = vmul.f32 %v6224_v49, %v598_v63  ;;  %v1995_v40 = vmul.f32 %v6224_v49, %v599_v0 }
  0xa2   :  { %v1663_v8 = vadd.f32 %v1599_v61, %v1463_v14  ;;  %v1005_v14 = vmul.f32 %v6038_v18, %v933_v12  ;;  %v1729_v61 = vld [vmem:[#allocation3 + $0x10] sm:$0xff] }
  0xa3   :  { %v6277_v51 = vadd.f32 %v2328_v37, %v2192_v7  ;;  %v1727_v7 = vld [vmem:[#allocation3] sm:$0xff] }
  0xa4   :  { %504 = vperm.xlu1 %5566, %v202_v19   ;;  %499 = vperm.xlu0 %5565, %v201_v20   ;;  %v668_v19 = vmul.f32 %v6025_v15, %v597_v9  ;;  %v804_v20 = vmul.f32 %v6033_v17, %v732_v10  ;;  %v265_v1 = vpop.permute.xlu1 %264  ;;  %v260_v2 = vpop.permute.xlu0 %259  ;;  %v1791_v26 = vadd.f32 %v1727_v7, %v1663_v8  ;;  %v736_v36 = vld [vmem:[#allocation2 + $0x69] sm:$0xff] }
  0xa5   :  { %539 = vst.msk [vmem:[#allocation2 + $0x99] sm:$0xff] %vm33_vm0, %v265_v1  ;;  %538 = vst.msk [vmem:[#allocation2 + $0x91] sm:$0xff] %vm33_vm0, %v260_v2  ;;  %v808_v57 = vmul.f32 %v6033_v17, %v736_v36  ;;  %v600_v2 = vld [vmem:[#allocation2 + $0x60] sm:$0xff]  ;;  %v1793_v7 = vadd.f32 %v1729_v61, %v6265_v35 }
  0xa6   :  { %v868_v29 = vadd.f32 %v804_v20, %v668_v19  ;;  %v1404_v19 = vmul.f32 %v6218_v48, %v734_v53  ;;  %v1604_v20 = vmul.f32 %v6247_v4, %v934_v54  ;;  %1855 = vst.msk [vmem:[#allocation3] sm:$0xff] %vm33_vm0, %v1791_v26  ;;  %v935_v8 = vld [vmem:[#allocation2 + $0x62] sm:$0xff] }
  0xa7   :  { %1857 = vst.msk [vmem:[#allocation3 + $0x10] sm:$0xff] %vm33_vm0, %v1793_v7 }
  0xa8   :  { %514 = vperm.xlu1 %5566, %v204_v21   ;;  %509 = vperm.xlu0 %5565, %v203_v22   ;;  %v932_v21 = vld [vmem:[#allocation2 + $0x3a] sm:$0xff]  ;;  %v1003_v22 = vmul.f32 %v6038_v18, %v931_v11  ;;  %v733_v11 = vld [vmem:[#allocation2 + $0x49] sm:$0xff]  ;;  %v1468_v44 = vadd.f32 %v1404_v19, %v1268_v33 }
  0xa9   :  { %v1602_v31 = vmul.f32 %v6247_v4, %v932_v21  ;;  %v2329_v42 = vmul.f32 %v6252_v16, %v932_v21  ;;  %v805_v27 = vmul.f32 %v6033_v17, %v733_v11 }
  0xaa   :  { %v1067_v30 = vadd.f32 %v1003_v22, %v867_v5  ;;  %v1066_v5 = vadd.f32 %v1002_v56, %v866_v55  ;;  %v1664_v22 = vadd.f32 %v1600_v62, %v1464_v6  ;;  %v2330_v56 = vmul.f32 %v6252_v16, %v933_v12  ;;  %v735_v12 = vld [vmem:[#allocation2 + $0x61] sm:$0xff] }
  0xab   :  { %v6284_v59 = vadd.f32 %v2329_v42, %v2193_v46  ;;  %v2130_v46 = vmul.f32 %v6229_v50, %v733_v11  ;;  %v1405_v33 = vmul.f32 %v6218_v48, %v735_v12 }
  0xac   :  { %524 = vperm.xlu1 %5566, %v206_v23   ;;  %519 = vperm.xlu0 %5565, %v205_v24   ;;  %v1004_v23 = vmul.f32 %v6038_v18, %v932_v21  ;;  %v1266_v24 = vmul.f32 %v6213_v47, %v597_v9  ;;  %1131 = vst.msk [vmem:[#allocation3 + $0x20] sm:$0xff] %vm33_vm0, %v1067_v30  ;;  %1130 = vst.msk [vmem:[#allocation3 + $0x18] sm:$0xff] %vm33_vm0, %v1066_v5  ;;  %v270_v30 = vpop.permute.xlu0 %269  ;;  %v601_v5 = vld [vmem:[#allocation2 + $0x68] sm:$0xff] }
  0xad   :  { %v806_v9 = vmul.f32 %v6033_v17, %v734_v53  ;;  %v2131_v21 = vmul.f32 %v6229_v50, %v734_v53  ;;  %540 = vst.msk [vmem:[#allocation2 + $0xa9] sm:$0xff] %vm33_vm0, %v270_v30 }
  0xaf   :  { %v2195_v55 = vadd.f32 %v2131_v21, %v1995_v40  ;;  %v1996_v40 = vmul.f32 %v6224_v49, %v600_v2 }
  0xb0   :  { %3015 = vrot.lane.b32.xlu1 %v2983_v25, %s5624_s0  ;;  %v1402_v25 = vmul.f32 %v6218_v48, %v732_v10  ;;  %v1006_v10 = vmul.f32 %v6038_v18, %v934_v54 }
  0xb2   :  { %v1466_v34 = vadd.f32 %v1402_v25, %v1266_v24  ;;  %v669_v24 = vmul.f32 %v6025_v15, %v598_v63  ;;  %v670_v25 = vmul.f32 %v6025_v15, %v599_v0  ;;  %v1668_v63 = vadd.f32 %v1604_v20, %v1468_v44 }
  0xb3   :  { %v1731_v53 = vld [vmem:[#allocation3 + $0x20] sm:$0xff]  ;;  %v2194_v0 = vadd.f32 %v2130_v46, %v1994_v39  ;;  %v1730_v6 = vld [vmem:[#allocation3 + $0x18] sm:$0xff]  ;;  %v2132_v46 = vmul.f32 %v6229_v50, %v735_v12 }
  0xb4   :  { %3112 = vrot.lane.b32.xlu1 %v3080_v41, %s5625_s17  ;;  %v1068_v41 = vadd.f32 %v1004_v23, %v868_v29  ;;  %v6275_v45 = vadd.f32 %v1602_v31, %v1466_v34  ;;  %v2331_v23 = vmul.f32 %v6252_v16, %v934_v54  ;;  %v275_v29 = vpop.permute.xlu1 %274  ;;  %v1792_v31 = vadd.f32 %v1728_v13, %v1664_v22 }
  0xb5   :  { %v870_v32 = vadd.f32 %v806_v9, %v670_v25  ;;  %v1403_v34 = vmul.f32 %v6218_v48, %v733_v11  ;;  %541 = vst.msk [vmem:[#allocation2 + $0xb1] sm:$0xff] %vm33_vm0, %v275_v29  ;;  %v869_v37 = vadd.f32 %v805_v27, %v669_v24  ;;  %v2394_v21 = vadd.f32 %v2330_v56, %v2194_v0  ;;  %v2456_v27 = vld [vmem:[#allocation3] sm:$0xff] }
  0xb6   :  { %1132 = vst.msk [vmem:[#allocation3 + $0x28] sm:$0xff] %vm33_vm0, %v1068_v41  ;;  %v936_v41 = vld [vmem:[#allocation2 + $0x6a] sm:$0xff]  ;;  %1856 = vst.msk [vmem:[#allocation3 + $0x8] sm:$0xff] %vm33_vm0, %v1792_v31  ;;  %v6321_v9 = vadd.f32 %v2331_v23, %v2195_v55  ;;  %v1794_v13 = vadd.f32 %v1730_v6, %v6275_v45  ;;  %v2133_v22 = vmul.f32 %v6229_v50, %v736_v36  ;;  %v603_v0 = vld [vmem:[#allocation2 + $0x80] sm:$0xff] }
  0xb7   :  { %v1070_v42 = vadd.f32 %v1006_v10, %v870_v32  ;;  %v1467_v43 = vadd.f32 %v1403_v34, %v1267_v28  ;;  %v1069_v52 = vadd.f32 %v1005_v14, %v869_v37  ;;  %v1008_v1 = vmul.f32 %v6038_v18, %v936_v41 }
  0xb8   :  { %v1406_v10 = vmul.f32 %v6218_v48, %v736_v36  ;;  %v1606_v11 = vmul.f32 %v6247_v4, %v936_v41  ;;  %v2333_v35 = vmul.f32 %v6252_v16, %v936_v41  ;;  %v671_v23 = vmul.f32 %v6025_v15, %v600_v2  ;;  %1858 = vst.msk [vmem:[#allocation3 + $0x18] sm:$0xff] %vm33_vm0, %v1794_v13  ;;  %v738_v36 = vld [vmem:[#allocation2 + $0x81] sm:$0xff] }
  0xb9   :  { %1134 = vst.msk [vmem:[#allocation3 + $0x38] sm:$0xff] %vm33_vm0, %v1070_v42  ;;  %v1667_v62 = vadd.f32 %v1603_v38, %v1467_v43  ;;  %1133 = vst.msk [vmem:[#allocation3 + $0x30] sm:$0xff] %vm33_vm0, %v1069_v52  ;;  %v672_v24 = vmul.f32 %v6025_v15, %v601_v5  ;;  %v807_v45 = vmul.f32 %v6033_v17, %v735_v12  ;;  %v938_v41 = vld [vmem:[#allocation2 + $0x82] sm:$0xff] }
  0xba   :  { %v1007_v14 = vmul.f32 %v6038_v18, %v935_v8  ;;  %v1269_v28 = vmul.f32 %v6213_v47, %v600_v2  ;;  %v1270_v29 = vmul.f32 %v6213_v47, %v601_v5  ;;  %v2520_v31 = vadd.f32 %v2456_v27, %v6277_v51 }
  0xbb   :  { %v1795_v19 = vadd.f32 %v1731_v53, %v1667_v62  ;;  %v872_v32 = vadd.f32 %v808_v57, %v672_v24  ;;  %v1605_v34 = vmul.f32 %v6247_v4, %v935_v8  ;;  %v871_v38 = vadd.f32 %v807_v45, %v671_v23 }
  0xbc   :  { %v1470_v39 = vadd.f32 %v1406_v10, %v1270_v29  ;;  %2584 = vst.msk [vmem:[#allocation3] sm:$0xff] %vm33_vm0, %v2520_v31  ;;  %v1469_v43 = vadd.f32 %v1405_v33, %v1269_v28  ;;  %v1997_v51 = vmul.f32 %v6224_v49, %v601_v5  ;;  %v2332_v56 = vmul.f32 %v6252_v16, %v935_v8  ;;  %v737_v10 = vld [vmem:[#allocation2 + $0x79] sm:$0xff] }
  0xbd   :  { %v1732_v54 = vld [vmem:[#allocation3 + $0x28] sm:$0xff]  ;;  %1859 = vst.msk [vmem:[#allocation3 + $0x20] sm:$0xff] %vm33_vm0, %v1795_v19  ;;  %v1072_v42 = vadd.f32 %v1008_v1, %v872_v32  ;;  %v810_v57 = vmul.f32 %v6033_v17, %v738_v36  ;;  %v1010_v62 = vmul.f32 %v6038_v18, %v938_v41  ;;  %v2458_v1 = vld [vmem:[#allocation3 + $0x10] sm:$0xff]  ;;  %v1408_v5 = vmul.f32 %v6218_v48, %v738_v36  ;;  %v740_v33 = vld [vmem:[#allocation2 + $0x99] sm:$0xff] }
  0xbe   :  { %v1796_v20 = vadd.f32 %v1732_v54, %v1668_v63  ;;  %v2457_v30 = vld [vmem:[#allocation3 + $0x8] sm:$0xff]  ;;  %v1071_v54 = vadd.f32 %v1007_v14, %v871_v38  ;;  %v2197_v61 = vadd.f32 %v2133_v22, %v1997_v51  ;;  %v602_v63 = vld [vmem:[#allocation2 + $0x78] sm:$0xff]  ;;  %v1608_v6 = vmul.f32 %v6247_v4, %v938_v41 }
  0xbf   :  { %v2521_v37 = vadd.f32 %v2457_v30, %v6284_v59  ;;  %v1670_v59 = vadd.f32 %v1606_v11, %v1470_v39  ;;  %1136 = vst.msk [vmem:[#allocation3 + $0x48] sm:$0xff] %vm33_vm0, %v1072_v42  ;;  %v2135_v7 = vmul.f32 %v6229_v50, %v738_v36  ;;  %v937_v11 = vld [vmem:[#allocation2 + $0x7a] sm:$0xff]  ;;  %v2522_v8 = vadd.f32 %v2458_v1, %v2394_v21 }
  0xc0   :  { %1860 = vst.msk [vmem:[#allocation3 + $0x28] sm:$0xff] %vm33_vm0, %v1796_v20  ;;  %v1734_v44 = vld [vmem:[#allocation3 + $0x38] sm:$0xff]  ;;  %v1733_v55 = vld [vmem:[#allocation3 + $0x30] sm:$0xff]  ;;  %1135 = vst.msk [vmem:[#allocation3 + $0x40] sm:$0xff] %vm33_vm0, %v1071_v54  ;;  %v2397_v20 = vadd.f32 %v2333_v35, %v2197_v61  ;;  %v2335_v27 = vmul.f32 %v6252_v16, %v938_v41  ;;  %v673_v45 = vmul.f32 %v6025_v15, %v602_v63 }
  0xc1   :  { %2585 = vst.msk [vmem:[#allocation3 + $0x8] sm:$0xff] %vm33_vm0, %v2521_v37  ;;  %v1798_v2 = vadd.f32 %v1734_v44, %v1670_v59  ;;  %v2459_v12 = vld [vmem:[#allocation3 + $0x18] sm:$0xff]  ;;  %v674_v14 = vmul.f32 %v6025_v15, %v603_v0  ;;  %2586 = vst.msk [vmem:[#allocation3 + $0x10] sm:$0xff] %vm33_vm0, %v2522_v8  ;;  %v1009_v28 = vmul.f32 %v6038_v18, %v937_v11  ;;  %v604_v61 = vld [vmem:[#allocation2 + $0x90] sm:$0xff] }
  0xc2   :  { %v1271_v30 = vmul.f32 %v6213_v47, %v602_v63  ;;  %v1272_v31 = vmul.f32 %v6213_v47, %v603_v0  ;;  %v1407_v32 = vmul.f32 %v6218_v48, %v737_v10  ;;  %v1607_v36 = vmul.f32 %v6247_v4, %v937_v11  ;;  %v940_v39 = vld [vmem:[#allocation2 + $0x9a] sm:$0xff] }
  0xc3   :  { %1862 = vst.msk [vmem:[#allocation3 + $0x38] sm:$0xff] %vm33_vm0, %v1798_v2  ;;  %v874_v29 = vadd.f32 %v810_v57, %v674_v14  ;;  %v1998_v37 = vmul.f32 %v6224_v49, %v602_v63  ;;  %v1999_v38 = vmul.f32 %v6224_v49, %v603_v0  ;;  %v2134_v51 = vmul.f32 %v6229_v50, %v737_v10  ;;  %v739_v63 = vld [vmem:[#allocation2 + $0x91] sm:$0xff] }
  0xc4   :  { %v2460_v22 = vld [vmem:[#allocation3 + $0x20] sm:$0xff]  ;;  %v1472_v44 = vadd.f32 %v1408_v5, %v1272_v31  ;;  %v2334_v59 = vmul.f32 %v6252_v16, %v937_v11  ;;  %v1410_v2 = vmul.f32 %v6218_v48, %v740_v33  ;;  %v1610_v5 = vmul.f32 %v6247_v4, %v940_v39 }
  0xc5   :  { %v1074_v42 = vadd.f32 %v1010_v62, %v874_v29  ;;  %v2199_v54 = vadd.f32 %v2135_v7, %v1999_v38  ;;  %v605_v62 = vld [vmem:[#allocation2 + $0x98] sm:$0xff]  ;;  %v2137_v7 = vmul.f32 %v6229_v50, %v740_v33 }
  0xc6   :  { %v1672_v57 = vadd.f32 %v1608_v6, %v1472_v44  ;;  %v1274_v14 = vmul.f32 %v6213_v47, %v605_v62  ;;  %v742_v29 = vld [vmem:[#allocation2 + $0xb1] sm:$0xff] }
  0xc7   :  { %v2461_v23 = vld [vmem:[#allocation3 + $0x28] sm:$0xff]  ;;  %1138 = vst.msk [vmem:[#allocation3 + $0x58] sm:$0xff] %vm33_vm0, %v1074_v42  ;;  %v2399_v0 = vadd.f32 %v2335_v27, %v2199_v54  ;;  %v607_v54 = vld [vmem:[#allocation2 + $0xb0] sm:$0xff] }
  0xc8   :  { %v2525_v35 = vadd.f32 %v2461_v23, %v2397_v20  ;;  %v2337_v20 = vmul.f32 %v6252_v16, %v940_v39  ;;  %v675_v23 = vmul.f32 %v6025_v15, %v604_v61 }
  0xca   :  { %2589 = vst.msk [vmem:[#allocation3 + $0x28] sm:$0xff] %vm33_vm0, %v2525_v35  ;;  %v2463_v1 = vld [vmem:[#allocation3 + $0x38] sm:$0xff] }
  0xcb   :  { %v285_v58 = vpop.permute.xlu1 %284  ;;  %v280_v60 = vpop.permute.xlu0 %279 }
  0xcc   :  { %543 = vst.msk [vmem:[#allocation2 + $0xc9] sm:$0xff] %vm33_vm0, %v285_v58  ;;  %542 = vst.msk [vmem:[#allocation2 + $0xc1] sm:$0xff] %vm33_vm0, %v280_v60  ;;  %v1669_v58 = vadd.f32 %v1605_v34, %v1469_v43  ;;  %v2196_v60 = vadd.f32 %v2132_v46, %v1996_v40  ;;  %v1471_v43 = vadd.f32 %v1407_v32, %v1271_v30 }
  0xcd   :  { %v1474_v32 = vadd.f32 %v1410_v2, %v1274_v14  ;;  %v2139_v2 = vmul.f32 %v6229_v50, %v742_v29  ;;  %v2003_v14 = vmul.f32 %v6224_v49, %v607_v54 }
  0xce   :  { %v1797_v13 = vadd.f32 %v1733_v55, %v1669_v58  ;;  %v2396_v19 = vadd.f32 %v2332_v56, %v2196_v60  ;;  %v812_v55 = vmul.f32 %v6033_v17, %v740_v33  ;;  %v1671_v56 = vadd.f32 %v1607_v36, %v1471_v43 }
  0xcf   :  { %v295_v25 = vpop.permute.xlu1 %294  ;;  %v290_v26 = vpop.permute.xlu0 %289  ;;  %v2198_v58 = vadd.f32 %v2134_v51, %v1998_v37  ;;  %v1012_v60 = vmul.f32 %v6038_v18, %v940_v39  ;;  %v2000_v33 = vmul.f32 %v6224_v49, %v604_v61  ;;  %v2136_v36 = vmul.f32 %v6229_v50, %v739_v63  ;;  %v942_v37 = vld [vmem:[#allocation2 + $0xb2] sm:$0xff] }
  0xd0   :  { %545 = vst.msk [vmem:[#allocation2 + $0xe1] sm:$0xff] %vm33_vm0, %v295_v25  ;;  %544 = vst.msk [vmem:[#allocation2 + $0xd9] sm:$0xff] %vm33_vm0, %v290_v26  ;;  %v2523_v26 = vadd.f32 %v2459_v12, %v6321_v9  ;;  %v2524_v21 = vadd.f32 %v2460_v22, %v2396_v19  ;;  %v809_v9 = vmul.f32 %v6033_v17, %v737_v10  ;;  %v939_v10 = vld [vmem:[#allocation2 + $0x92] sm:$0xff] }
  0xd1   :  { %1861 = vst.msk [vmem:[#allocation3 + $0x30] sm:$0xff] %vm33_vm0, %v1797_v13  ;;  %v2398_v13 = vadd.f32 %v2334_v59, %v2198_v58  ;;  %v2527_v22 = vadd.f32 %v2463_v1, %v2399_v0  ;;  %v1011_v27 = vmul.f32 %v6038_v18, %v939_v10  ;;  %v2336_v42 = vmul.f32 %v6252_v16, %v939_v10  ;;  %v741_v58 = vld [vmem:[#allocation2 + $0xa9] sm:$0xff] }
  0xd2   :  { %2587 = vst.msk [vmem:[#allocation3 + $0x18] sm:$0xff] %vm33_vm0, %v2523_v26  ;;  %2588 = vst.msk [vmem:[#allocation3 + $0x20] sm:$0xff] %vm33_vm0, %v2524_v21  ;;  %v873_v34 = vadd.f32 %v809_v9, %v673_v45  ;;  %v1273_v45 = vmul.f32 %v6213_v47, %v604_v61  ;;  %v1409_v9 = vmul.f32 %v6218_v48, %v739_v63 }
  0xd3   :  { %v305_v52 = vpop.permute.xlu1 %304  ;;  %v300_v53 = vpop.permute.xlu0 %299  ;;  %2591 = vst.msk [vmem:[#allocation3 + $0x38] sm:$0xff] %vm33_vm0, %v2527_v22  ;;  %v1674_v43 = vadd.f32 %v1610_v5, %v1474_v32  ;;  %v2200_v51 = vadd.f32 %v2136_v36, %v2000_v33  ;;  %v2203_v33 = vadd.f32 %v2139_v2, %v2003_v14  ;;  %v6442_v36 = vld [vmem:[%s8690_s1 + $0x1] ss:$0 sm:$0xff] }
  0xd4   :  { %547 = vst.msk [vmem:[#allocation2 + $0xf9] sm:$0xff] %vm33_vm0, %v305_v52  ;;  %546 = vst.msk [vmem:[#allocation2 + $0xf1] sm:$0xff] %vm33_vm0, %v300_v53  ;;  %v1073_v46 = vadd.f32 %v1009_v28, %v873_v34  ;;  %v1735_v52 = vld [vmem:[#allocation3 + $0x40] sm:$0xff]  ;;  %v1736_v53 = vld [vmem:[#allocation3 + $0x48] sm:$0xff]  ;;  %v1609_v28 = vmul.f32 %v6247_v4, %v939_v10  ;;  %v2001_v34 = vmul.f32 %v6224_v49, %v605_v62 }
  0xd5   :  { %v1799_v6 = vadd.f32 %v1735_v52, %v1671_v56  ;;  %v1800_v8 = vadd.f32 %v1736_v53, %v1672_v57  ;;  %v814_v52 = vmul.f32 %v6033_v17, %v742_v29  ;;  %v606_v53 = vld [vmem:[#allocation2 + $0xa8] sm:$0xff]  ;;  %v1412_v56 = vmul.f32 %v6218_v48, %v742_v29 }
  0xd6   :  { %1137 = vst.msk [vmem:[#allocation3 + $0x50] sm:$0xff] %vm33_vm0, %v1073_v46  ;;  %v2201_v46 = vadd.f32 %v2137_v7, %v2001_v34  ;;  %v1612_v57 = vmul.f32 %v6247_v4, %v942_v37  ;;  %v2400_v0 = vadd.f32 %v2336_v42, %v2200_v51  ;;  %v2138_v29 = vmul.f32 %v6229_v50, %v741_v58  ;;  %v743_v51 = vld [vmem:[#allocation2 + $0xc1] sm:$0xff] }
  0xd7   :  { %v315_v24 = vpop.permute.xlu1 %314  ;;  %v310_v25 = vpop.permute.xlu0 %309  ;;  %1863 = vst.msk [vmem:[#allocation3 + $0x40] sm:$0xff] %vm33_vm0, %v1799_v6  ;;  %1864 = vst.msk [vmem:[#allocation3 + $0x48] sm:$0xff] %vm33_vm0, %v1800_v8  ;;  %v678_v6 = vmul.f32 %v6025_v15, %v607_v54 }
  0xd8   :  { %549 = vst.msk [vmem:[#allocation2 + $0x111] sm:$0xff] %vm33_vm0, %v315_v24  ;;  %548 = vst.msk [vmem:[#allocation2 + $0x109] sm:$0xff] %vm33_vm0, %v310_v25  ;;  %v2462_v19 = vld [vmem:[#allocation3 + $0x30] sm:$0xff]  ;;  %v676_v24 = vmul.f32 %v6025_v15, %v605_v62  ;;  %v811_v25 = vmul.f32 %v6033_v17, %v739_v63  ;;  %v2401_v1 = vadd.f32 %v2337_v20, %v2201_v46 }
  0xd9   :  { %v2526_v26 = vadd.f32 %v2462_v19, %v2398_v13  ;;  %v813_v19 = vmul.f32 %v6033_v17, %v741_v58  ;;  %v878_v22 = vadd.f32 %v814_v52, %v678_v6 }
  0xda   :  { %v875_v21 = vadd.f32 %v811_v25, %v675_v23  ;;  %v876_v35 = vadd.f32 %v812_v55, %v676_v24  ;;  %v1014_v55 = vmul.f32 %v6038_v18, %v942_v37  ;;  %v1275_v23 = vmul.f32 %v6213_v47, %v606_v53 }
  0xdb   :  { %v325_v40 = vpop.permute.xlu1 %324  ;;  %v320_v41 = vpop.permute.xlu0 %319  ;;  %2590 = vst.msk [vmem:[#allocation3 + $0x30] sm:$0xff] %vm33_vm0, %v2526_v26  ;;  %v1276_v24 = vmul.f32 %v6213_v47, %v607_v54  ;;  %v1411_v25 = vmul.f32 %v6218_v48, %v741_v58  ;;  %v744_v26 = vld [vmem:[#allocation2 + $0xc9] sm:$0xff] }
  0xdc   :  { %551 = vst.msk [vmem:[#allocation2 + $0x129] sm:$0xff] %vm33_vm0, %v325_v40  ;;  %550 = vst.msk [vmem:[#allocation2 + $0x121] sm:$0xff] %vm33_vm0, %v320_v41  ;;  %v1075_v38 = vadd.f32 %v1011_v27, %v875_v21  ;;  %v1076_v39 = vadd.f32 %v1012_v60, %v876_v35  ;;  %v1473_v40 = vadd.f32 %v1409_v9, %v1273_v45  ;;  %v1738_v41 = vld [vmem:[#allocation3 + $0x58] sm:$0xff]  ;;  %v941_v60 = vld [vmem:[#allocation2 + $0xaa] sm:$0xff] }
  0xdd   :  { %v1737_v44 = vld [vmem:[#allocation3 + $0x50] sm:$0xff]  ;;  %v1802_v63 = vadd.f32 %v1738_v41, %v1674_v43  ;;  %v1013_v20 = vmul.f32 %v6038_v18, %v941_v60  ;;  %v1611_v17 = vmul.f32 %v6247_v4, %v941_v60  ;;  %v2002_v18 = vmul.f32 %v6224_v49, %v606_v53  ;;  %v6449_v41 = vld [vmem:[%s8690_s1 + $0x2] ss:$0 sm:$0xff] }
  0xde   :  { %1139 = vst.msk [vmem:[#allocation3 + $0x60] sm:$0xff] %vm33_vm0, %v1075_v38  ;;  %1140 = vst.msk [vmem:[#allocation3 + $0x68] sm:$0xff] %vm33_vm0, %v1076_v39  ;;  %v1673_v59 = vadd.f32 %v1609_v28, %v1473_v40  ;;  %v2464_v7 = vld [vmem:[#allocation3 + $0x40] sm:$0xff]  ;;  %v2465_v10 = vld [vmem:[#allocation3 + $0x48] sm:$0xff]  ;;  %v1078_v35 = vadd.f32 %v1014_v55, %v878_v22  ;;  %v1475_v9 = vadd.f32 %v1411_v25, %v1275_v23 }
  0xdf   :  { %v335_v11 = vpop.permute.xlu1 %334  ;;  %v330_v12 = vpop.permute.xlu0 %329  ;;  %1866 = vst.msk [vmem:[#allocation3 + $0x58] sm:$0xff] %vm33_vm0, %v1802_v63  ;;  %v2528_v8 = vadd.f32 %v2464_v7, %v2400_v0  ;;  %v2529_v13 = vadd.f32 %v2465_v10, %v2401_v1  ;;  %v944_v21 = vld [vmem:[#allocation2 + $0xca] sm:$0xff]  ;;  %v1476_v28 = vadd.f32 %v1412_v56, %v1276_v24  ;;  %v2338_v34 = vmul.f32 %v6252_v16, %v941_v60  ;;  %v608_v43 = vld [vmem:[#allocation2 + $0xc0] sm:$0xff] }
  0xe0   :  { %553 = vst.msk [vmem:[#allocation2 + $0x141] sm:$0xff] %vm33_vm0, %v335_v11  ;;  %552 = vst.msk [vmem:[#allocation2 + $0x139] sm:$0xff] %vm33_vm0, %v330_v12  ;;  %v1801_v5 = vadd.f32 %v1737_v44, %v1673_v59  ;;  %v2339_v11 = vmul.f32 %v6252_v16, %v942_v37  ;;  %v677_v12 = vmul.f32 %v6025_v15, %v606_v53  ;;  %v609_v44 = vld [vmem:[#allocation2 + $0xc8] sm:$0xff]  ;;  %v6462_v1 = vld [vmem:[%s8690_s1] ss:$0 sm:$0xff] }
  0xe1   :  { %2592 = vst.msk [vmem:[#allocation3 + $0x40] sm:$0xff] %vm33_vm0, %v2528_v8  ;;  %2593 = vst.msk [vmem:[#allocation3 + $0x48] sm:$0xff] %vm33_vm0, %v2529_v13  ;;  %v816_v37 = vmul.f32 %v6442_v36, %v744_v26  ;;  %v1675_v38 = vadd.f32 %v1611_v17, %v1475_v9  ;;  %v1676_v39 = vadd.f32 %v1612_v57, %v1476_v28  ;;  %v943_v56 = vld [vmem:[#allocation2 + $0xc2] sm:$0xff] }
  0xe2   :  { %1865 = vst.msk [vmem:[#allocation3 + $0x50] sm:$0xff] %vm33_vm0, %v1801_v5  ;;  %v877_v45 = vadd.f32 %v813_v19, %v677_v12  ;;  %1142 = vst.msk [vmem:[#allocation3 + $0x78] sm:$0xff] %vm33_vm0, %v1078_v35  ;;  %v2202_v40 = vadd.f32 %v2138_v29, %v2002_v18  ;;  %v1016_v42 = vmul.f32 %v6449_v41, %v944_v21  ;;  %v746_v24 = vld [vmem:[#allocation2 + $0xe1] sm:$0xff] }
  0xe3   :  { %v345_v30 = vpop.permute.xlu1 %344  ;;  %v340_v31 = vpop.permute.xlu0 %339  ;;  %v2403_v53 = vadd.f32 %v2339_v11, %v2203_v33  ;;  %v1414_v54 = vmul.f32 %v6218_v48, %v744_v26  ;;  %v1614_v59 = vmul.f32 %v6247_v4, %v944_v21  ;;  %v2141_v55 = vmul.f32 %v6229_v50, %v744_v26  ;;  %v611_v33 = vld [vmem:[#allocation2 + $0xe0] sm:$0xff] }
  0xe4   :  { %555 = vst.msk [vmem:[#allocation2 + $0x159] sm:$0xff] %vm33_vm0, %v345_v30  ;;  %554 = vst.msk [vmem:[#allocation2 + $0x151] sm:$0xff] %vm33_vm0, %v340_v31  ;;  %v1077_v30 = vadd.f32 %v1013_v20, %v877_v45  ;;  %v2402_v60 = vadd.f32 %v2338_v34, %v2202_v40  ;;  %v679_v2 = vmul.f32 %v6462_v1, %v608_v43  ;;  %v946_v45 = vld [vmem:[#allocation2 + $0xe2] sm:$0xff] }
  0xe5   :  { %v1739_v31 = vld [vmem:[#allocation3 + $0x60] sm:$0xff]  ;;  %v1740_v32 = vld [vmem:[#allocation3 + $0x68] sm:$0xff]  ;;  %v680_v5 = vmul.f32 %v6462_v1, %v609_v44  ;;  %v815_v7 = vmul.f32 %v6442_v36, %v743_v51  ;;  %v1015_v11 = vmul.f32 %v6449_v41, %v943_v56  ;;  %v1277_v12 = vmul.f32 %v6213_v47, %v608_v43 }
  0xe6   :  { %1141 = vst.msk [vmem:[#allocation3 + $0x70] sm:$0xff] %vm33_vm0, %v1077_v30  ;;  %v1803_v57 = vadd.f32 %v1739_v31, %v1675_v38  ;;  %v1804_v58 = vadd.f32 %v1740_v32, %v1676_v39  ;;  %v1278_v6 = vmul.f32 %v6213_v47, %v609_v44  ;;  %v1413_v22 = vmul.f32 %v6218_v48, %v743_v51  ;;  %v610_v32 = vld [vmem:[#allocation2 + $0xd8] sm:$0xff] }
  0xe7   :  { %v355_v61 = vpop.permute.xlu1 %354  ;;  %v350_v62 = vpop.permute.xlu0 %349  ;;  %v879_v19 = vadd.f32 %v815_v7, %v679_v2  ;;  %v880_v20 = vadd.f32 %v816_v37, %v680_v5  ;;  %v1613_v23 = vmul.f32 %v6247_v4, %v943_v56  ;;  %v2004_v26 = vmul.f32 %v6224_v49, %v608_v43  ;;  %v745_v43 = vld [vmem:[#allocation2 + $0xd9] sm:$0xff] }
  0xe8   :  { %557 = vst.msk [vmem:[#allocation2 + $0x171] sm:$0xff] %vm33_vm0, %v355_v61  ;;  %556 = vst.msk [vmem:[#allocation2 + $0x169] sm:$0xff] %vm33_vm0, %v350_v62  ;;  %v2467_v61 = vld [vmem:[#allocation3 + $0x58] sm:$0xff]  ;;  %v2341_v62 = vmul.f32 %v6252_v16, %v944_v21  ;;  %v1478_v25 = vadd.f32 %v1414_v54, %v1278_v6  ;;  %v1477_v14 = vadd.f32 %v1413_v22, %v1277_v12 }
  0xe9   :  { %v2466_v63 = vld [vmem:[#allocation3 + $0x50] sm:$0xff]  ;;  %v2531_v0 = vadd.f32 %v2467_v61, %v2403_v53  ;;  %1867 = vst.msk [vmem:[#allocation3 + $0x60] sm:$0xff] %vm33_vm0, %v1803_v57  ;;  %1868 = vst.msk [vmem:[#allocation3 + $0x68] sm:$0xff] %vm33_vm0, %v1804_v58  ;;  %v1079_v17 = vadd.f32 %v1015_v11, %v879_v19  ;;  %v1080_v18 = vadd.f32 %v1016_v42, %v880_v20  ;;  %v1742_v21 = vld [vmem:[#allocation3 + $0x78] sm:$0xff] }
  0xea   :  { %v2530_v10 = vadd.f32 %v2466_v63, %v2402_v60  ;;  %v2340_v35 = vmul.f32 %v6252_v16, %v943_v56  ;;  %v1678_v9 = vadd.f32 %v1614_v59, %v1478_v25  ;;  %v818_v31 = vmul.f32 %v6442_v36, %v746_v24  ;;  %v748_v12 = vld [vmem:[#allocation2 + $0xf9] sm:$0xff] }
  0xeb   :  { %v375_v27 = vpop.permute.xlu1 %374  ;;  %v370_v15 = vpop.permute.xlu0 %369  ;;  %2595 = vst.msk [vmem:[#allocation3 + $0x58] sm:$0xff] %vm33_vm0, %v2531_v0  ;;  %1143 = vst.msk [vmem:[#allocation3 + $0x80] sm:$0xff] %vm33_vm0, %v1079_v17  ;;  %v1677_v38 = vadd.f32 %v1613_v23, %v1477_v14  ;;  %v1018_v39 = vmul.f32 %v6449_v41, %v946_v45  ;;  %v1416_v40 = vmul.f32 %v6218_v48, %v746_v24  ;;  %v948_v20 = vld [vmem:[#allocation2 + $0xfa] sm:$0xff] }
  0xec   :  { %561 = vst.msk [vmem:[#allocation2 + $0x1d1] sm:$0xff] %vm33_vm0, %v375_v27  ;;  %560 = vst.msk [vmem:[#allocation2 + $0x1c9] sm:$0xff] %vm33_vm0, %v370_v15  ;;  %v2005_v27 = vmul.f32 %v6224_v49, %v609_v44  ;;  %v2140_v15 = vmul.f32 %v6229_v50, %v743_v51  ;;  %v1616_v42 = vmul.f32 %v6247_v4, %v946_v45  ;;  %v945_v44 = vld [vmem:[#allocation2 + $0xda] sm:$0xff] }
  0xed   :  { %2594 = vst.msk [vmem:[#allocation3 + $0x50] sm:$0xff] %vm33_vm0, %v2530_v10  ;;  %v1741_v28 = vld [vmem:[#allocation3 + $0x70] sm:$0xff]  ;;  %1144 = vst.msk [vmem:[#allocation3 + $0x88] sm:$0xff] %vm33_vm0, %v1080_v18  ;;  %v1806_v51 = vadd.f32 %v1742_v21, %v1678_v9  ;;  %v2143_v53 = vmul.f32 %v6229_v50, %v746_v24  ;;  %v2343_v56 = vmul.f32 %v6252_v16, %v946_v45 }
  0xee   :  { %v2204_v29 = vadd.f32 %v2140_v15, %v2004_v26  ;;  %v2205_v30 = vadd.f32 %v2141_v55, %v2005_v27  ;;  %v1805_v54 = vadd.f32 %v1741_v28, %v1677_v38  ;;  %v681_v57 = vmul.f32 %v6462_v1, %v610_v32  ;;  %v612_v9 = vld [vmem:[#allocation2 + $0xf0] sm:$0xff]  ;;  %v613_v28 = vld [vmem:[#allocation2 + $0xf8] sm:$0xff] }
  0xef   :  { %v365_v46 = vpop.permute.xlu1 %364  ;;  %v360_v52 = vpop.permute.xlu0 %359  ;;  %v682_v58 = vmul.f32 %v6462_v1, %v611_v33  ;;  %1870 = vst.msk [vmem:[#allocation3 + $0x78] sm:$0xff] %vm33_vm0, %v1806_v51  ;;  %v817_v63 = vmul.f32 %v6442_v36, %v745_v43  ;;  %v1017_v0 = vmul.f32 %v6449_v41, %v945_v44  ;;  %v1279_v7 = vmul.f32 %v6213_v47, %v610_v32 }
  0xf0   :  { %559 = vst.msk [vmem:[#allocation2 + $0x189] sm:$0xff] %vm33_vm0, %v365_v46  ;;  %558 = vst.msk [vmem:[#allocation2 + $0x181] sm:$0xff] %vm33_vm0, %v360_v52  ;;  %v2404_v46 = vadd.f32 %v2340_v35, %v2204_v29  ;;  %v2405_v52 = vadd.f32 %v2341_v62, %v2205_v30  ;;  %v2468_v59 = vld [vmem:[#allocation3 + $0x60] sm:$0xff]  ;;  %v2469_v55 = vld [vmem:[#allocation3 + $0x68] sm:$0xff]  ;;  %v1280_v10 = vmul.f32 %v6213_v47, %v611_v33 }
  0xf1   :  { %1869 = vst.msk [vmem:[#allocation3 + $0x70] sm:$0xff] %vm33_vm0, %v1805_v54  ;;  %v882_v5 = vadd.f32 %v818_v31, %v682_v58  ;;  %v1415_v11 = vmul.f32 %v6218_v48, %v745_v43  ;;  %v881_v6 = vadd.f32 %v817_v63, %v681_v57  ;;  %v2007_v19 = vmul.f32 %v6224_v49, %v611_v33  ;;  %v6519_v30 = vld [vmem:[%s8690_s1 + $0x4] ss:$0 sm:$0xff]  ;;  %v6526_v33 = vld [vmem:[%s8690_s1 + $0x7] ss:$0 sm:$0xff] }
  0xf2   :  { %v2532_v60 = vadd.f32 %v2468_v59, %v2404_v46  ;;  %v2533_v61 = vadd.f32 %v2469_v55, %v2405_v52  ;;  %v1480_v48 = vadd.f32 %v1416_v40, %v1280_v10  ;;  %v2142_v23 = vmul.f32 %v6229_v50, %v745_v43  ;;  %v1743_v25 = vld [vmem:[#allocation3 + $0x80] sm:$0xff]  ;;  %v747_v50 = vld [vmem:[#allocation2 + $0xf1] sm:$0xff] }
  0xf3   :  { %v385_v8 = vpop.permute.xlu1 %384  ;;  %v380_v13 = vpop.permute.xlu0 %379  ;;  %v1082_v47 = vadd.f32 %v1018_v39, %v882_v5  ;;  %v1479_v22 = vadd.f32 %v1415_v11, %v1279_v7  ;;  %v1081_v24 = vadd.f32 %v1017_v0, %v881_v6  ;;  %v2207_v27 = vadd.f32 %v2143_v53, %v2007_v19  ;;  %v6543_v57 = vld [vmem:[%s8690_s1 + $0x3] ss:$0 sm:$0xff]  ;;  %v6557_v7 = vld [vmem:[%s8690_s1 + $0x5] ss:$0 sm:$0xff]  ;;  %v6563_v11 = vld [vmem:[%s8690_s1 + $0x6] ss:$0 sm:$0xff] }
  0xf4   :  { %563 = vst.msk [vmem:[#allocation2 + $0x1e9] sm:$0xff] %vm33_vm0, %v385_v8  ;;  %562 = vst.msk [vmem:[#allocation2 + $0x1e1] sm:$0xff] %vm33_vm0, %v380_v13  ;;  %v1615_v8 = vmul.f32 %v6247_v4, %v945_v44  ;;  %v2006_v13 = vmul.f32 %v6224_v49, %v610_v32  ;;  %v1744_v26 = vld [vmem:[#allocation3 + $0x88] sm:$0xff]  ;;  %v2342_v15 = vmul.f32 %v6252_v16, %v945_v44 }
  0xf5   :  { %2596 = vst.msk [vmem:[#allocation3 + $0x60] sm:$0xff] %vm33_vm0, %v2532_v60  ;;  %2597 = vst.msk [vmem:[#allocation3 + $0x68] sm:$0xff] %vm33_vm0, %v2533_v61  ;;  %v820_v45 = vmul.f32 %v6442_v36, %v748_v12  ;;  %v1680_v49 = vadd.f32 %v1616_v42, %v1480_v48  ;;  %v1020_v35 = vmul.f32 %v6449_v41, %v948_v20 }
  0xf6   :  { %1146 = vst.msk [vmem:[#allocation3 + $0x98] sm:$0xff] %vm33_vm0, %v1082_v47  ;;  %v1679_v14 = vadd.f32 %v1615_v8, %v1479_v22  ;;  %v2206_v21 = vadd.f32 %v2142_v23, %v2006_v13  ;;  %1145 = vst.msk [vmem:[#allocation3 + $0x90] sm:$0xff] %vm33_vm0, %v1081_v24  ;;  %v2407_v29 = vadd.f32 %v2343_v56, %v2207_v27  ;;  %v2471_v42 = vld [vmem:[#allocation3 + $0x78] sm:$0xff]  ;;  %v6571_v27 = vld [vmem:[%s8690_s1 + $0x8] ss:$0 sm:$0xff] }
  0xf7   :  { %v395_v34 = vpop.permute.xlu1 %394  ;;  %v390_v37 = vpop.permute.xlu0 %389  ;;  %v1418_v31 = vmul.f32 %v6519_v30, %v748_v12  ;;  %v1618_v32 = vmul.f32 %v6247_v4, %v948_v20  ;;  %v1808_v39 = vadd.f32 %v1744_v26, %v1680_v49  ;;  %v2345_v43 = vmul.f32 %v6252_v16, %v948_v20  ;;  %v950_v8 = vld [vmem:[#allocation2 + $0x112] sm:$0xff] }
  0xf8   :  { %565 = vst.msk [vmem:[#allocation2 + $0x201] sm:$0xff] %vm33_vm0, %v395_v34  ;;  %564 = vst.msk [vmem:[#allocation2 + $0x1f9] sm:$0xff] %vm33_vm0, %v390_v37  ;;  %v2145_v34 = vmul.f32 %v6526_v33, %v748_v12  ;;  %v947_v37 = vld [vmem:[#allocation2 + $0xf2] sm:$0xff]  ;;  %v1807_v38 = vadd.f32 %v1743_v25, %v1679_v14  ;;  %v2406_v40 = vadd.f32 %v2342_v15, %v2206_v21 }
  0xf9   :  { %v2470_v44 = vld [vmem:[#allocation3 + $0x70] sm:$0xff]  ;;  %v2535_v51 = vadd.f32 %v2471_v42, %v2407_v29  ;;  %v683_v46 = vmul.f32 %v6462_v1, %v612_v9  ;;  %v684_v4 = vmul.f32 %v6462_v1, %v613_v28  ;;  %v819_v52 = vmul.f32 %v6442_v36, %v747_v50  ;;  %1872 = vst.msk [vmem:[#allocation3 + $0x88] sm:$0xff] %vm33_vm0, %v1808_v39 }
  0xfa   :  { %1871 = vst.msk [vmem:[#allocation3 + $0x80] sm:$0xff] %vm33_vm0, %v1807_v38  ;;  %v2534_v56 = vadd.f32 %v2470_v44, %v2406_v40  ;;  %v1019_v16 = vmul.f32 %v6449_v41, %v947_v37  ;;  %v1281_v58 = vmul.f32 %v6543_v57, %v612_v9  ;;  %v1282_v60 = vmul.f32 %v6543_v57, %v613_v28 }
  0xfb   :  { %v405_v62 = vpop.permute.xlu1 %404  ;;  %v400_v2 = vpop.permute.xlu0 %399  ;;  %2599 = vst.msk [vmem:[#allocation3 + $0x78] sm:$0xff] %vm33_vm0, %v2535_v51  ;;  %v883_v63 = vadd.f32 %v819_v52, %v683_v46  ;;  %v884_v0 = vadd.f32 %v820_v45, %v684_v4  ;;  %v1617_v10 = vmul.f32 %v6557_v7, %v947_v37  ;;  %v2008_v12 = vmul.f32 %v6563_v11, %v612_v9  ;;  %v749_v9 = vld [vmem:[#allocation2 + $0x109] sm:$0xff] }
  0xfc   :  { %567 = vst.msk [vmem:[#allocation2 + $0x219] sm:$0xff] %vm33_vm0, %v405_v62  ;;  %566 = vst.msk [vmem:[#allocation2 + $0x211] sm:$0xff] %vm33_vm0, %v400_v2  ;;  %v6533_v59 = vld [vmem:[#allocation3 + $0x60] ss:$2 sm:$0xff]  ;;  %v6535_v55 = vld [vmem:[#allocation3 + $0x61] ss:$2 sm:$0xff]  ;;  %v1417_v62 = vmul.f32 %v6519_v30, %v747_v50  ;;  %v1482_v5 = vadd.f32 %v1418_v31, %v1282_v60  ;;  %v2009_v6 = vmul.f32 %v6563_v11, %v613_v28 }
  0xfd   :  { %v2781_v61 = vmax.f32 %v6533_v59, %v6535_v55  ;;  %v750_v2 = vld [vmem:[#allocation2 + $0x111] sm:$0xff]  ;;  %2598 = vst.msk [vmem:[#allocation3 + $0x70] sm:$0xff] %vm33_vm0, %v2534_v56  ;;  %v1083_v13 = vadd.f32 %v1019_v16, %v883_v63  ;;  %v1084_v19 = vadd.f32 %v1020_v35, %v884_v0  ;;  %v2144_v22 = vmul.f32 %v6526_v33, %v747_v50 }
  0xfe   :  { %v1481_v20 = vadd.f32 %v1417_v62, %v1281_v58  ;;  %v1746_v47 = vld [vmem:[#allocation3 + $0x98] sm:$0xff]  ;;  %v1682_v24 = vadd.f32 %v1618_v32, %v1482_v5  ;;  %v1745_v25 = vld [vmem:[#allocation3 + $0x90] sm:$0xff]  ;;  %v2209_v26 = vadd.f32 %v2145_v34, %v2009_v6  ;;  %v2344_v15 = vmul.f32 %v6571_v27, %v947_v37 }
  0xff   :  { %v415_v17 = vpop.permute.xlu1 %414  ;;  %v410_v18 = vpop.permute.xlu0 %409  ;;  %v822_v45 = vmul.f32 %v6442_v36, %v750_v2  ;;  %1147 = vst.msk [vmem:[#allocation3 + $0xa0] sm:$0xff] %vm33_vm0, %v1083_v13  ;;  %1148 = vst.msk [vmem:[#allocation3 + $0xa8] sm:$0xff] %vm33_vm0, %v1084_v19  ;;  %v2208_v14 = vadd.f32 %v2144_v22, %v2008_v12  ;;  %v1022_v49 = vmul.f32 %v6449_v41, %v950_v8  ;;  %v615_v35 = vld [vmem:[#allocation2 + $0x110] sm:$0xff] }
 0x100   :  { %569 = vst.msk [vmem:[#allocation2 + $0x231] sm:$0xff] %vm33_vm0, %v415_v17  ;;  %568 = vst.msk [vmem:[#allocation2 + $0x229] sm:$0xff] %vm33_vm0, %v410_v18  ;;  %v614_v17 = vld [vmem:[#allocation2 + $0x108] sm:$0xff]  ;;  %v1681_v18 = vadd.f32 %v1617_v10, %v1481_v20  ;;  %v1420_v21 = vmul.f32 %v6519_v30, %v750_v2  ;;  %v1810_v50 = vadd.f32 %v1746_v47, %v1682_v24 }
 0x101   :  { %v949_v28 = vld [vmem:[#allocation2 + $0x10a] sm:$0xff]  ;;  %v2409_v29 = vadd.f32 %v2345_v43, %v2209_v26  ;;  %v1620_v31 = vmul.f32 %v6557_v7, %v950_v8  ;;  %v2147_v32 = vmul.f32 %v6526_v33, %v750_v2  ;;  %v2408_v37 = vadd.f32 %v2344_v15, %v2208_v14  ;;  %v2472_v38 = vld [vmem:[#allocation3 + $0x80] sm:$0xff] }
 0x102   :  { %v1809_v34 = vadd.f32 %v1745_v25, %v1681_v18  ;;  %v2473_v39 = vld [vmem:[#allocation3 + $0x88] sm:$0xff]  ;;  %v2347_v40 = vmul.f32 %v6571_v27, %v950_v8  ;;  %v685_v42 = vmul.f32 %v6462_v1, %v614_v17  ;;  %1874 = vst.msk [vmem:[#allocation3 + $0x98] sm:$0xff] %vm33_vm0, %v1810_v50  ;;  %v686_v51 = vmul.f32 %v6462_v1, %v615_v35 }
 0x103   :  { %v425_v53 = vpop.permute.xlu1 %424  ;;  %v420_v54 = vpop.permute.xlu0 %419  ;;  %v2537_v44 = vadd.f32 %v2473_v39, %v2409_v29  ;;  %v821_v46 = vmul.f32 %v6442_v36, %v749_v9  ;;  %v1021_v43 = vmul.f32 %v6449_v41, %v949_v28  ;;  %v2536_v56 = vadd.f32 %v2472_v38, %v2408_v37  ;;  %v752_v5 = vld [vmem:[#allocation2 + $0x129] sm:$0xff] }
 0x104   :  { %571 = vst.msk [vmem:[#allocation2 + $0x249] sm:$0xff] %vm33_vm0, %v425_v53  ;;  %570 = vst.msk [vmem:[#allocation2 + $0x241] sm:$0xff] %vm33_vm0, %v420_v54  ;;  %v6589_v53 = vld [vmem:[#allocation3 + $0x70] ss:$2 sm:$0xff]  ;;  %v6591_v54 = vld [vmem:[#allocation3 + $0x71] ss:$2 sm:$0xff]  ;;  %v1283_v16 = vmul.f32 %v6543_v57, %v614_v17  ;;  %v1284_v58 = vmul.f32 %v6543_v57, %v615_v35  ;;  %v1419_v60 = vmul.f32 %v6519_v30, %v749_v9 }
 0x105   :  { %1873 = vst.msk [vmem:[#allocation3 + $0x90] sm:$0xff] %vm33_vm0, %v1809_v34  ;;  %v2782_v63 = vmax.f32 %v6589_v53, %v6591_v54  ;;  %2601 = vst.msk [vmem:[#allocation3 + $0x88] sm:$0xff] %vm33_vm0, %v2537_v44  ;;  %v885_v0 = vadd.f32 %v821_v46, %v685_v42  ;;  %v886_v62 = vadd.f32 %v822_v45, %v686_v51  ;;  %v952_v13 = vld [vmem:[#allocation2 + $0x12a] sm:$0xff]  ;;  %v616_v45 = vld [vmem:[#allocation2 + $0x120] sm:$0xff] }
 0x106   :  { %v1619_v2 = vmul.f32 %v6557_v7, %v949_v28  ;;  %2600 = vst.msk [vmem:[#allocation3 + $0x80] sm:$0xff] %vm33_vm0, %v2536_v56  ;;  %v1483_v10 = vadd.f32 %v1419_v60, %v1283_v16  ;;  %v1484_v12 = vadd.f32 %v1420_v21, %v1284_v58  ;;  %v2010_v6 = vmul.f32 %v6563_v11, %v614_v17  ;;  %v1747_v47 = vld [vmem:[#allocation3 + $0xa0] sm:$0xff]  ;;  %v1748_v22 = vld [vmem:[#allocation3 + $0xa8] sm:$0xff] }
 0x107   :  { %v435_v48 = vpop.permute.xlu1 %434  ;;  %v430_v23 = vpop.permute.xlu0 %429  ;;  %v2011_v8 = vmul.f32 %v6563_v11, %v615_v35  ;;  %v1085_v19 = vadd.f32 %v1021_v43, %v885_v0  ;;  %v1086_v20 = vadd.f32 %v1022_v49, %v886_v62  ;;  %v824_v15 = vmul.f32 %v6442_v36, %v752_v5  ;;  %v617_v18 = vld [vmem:[#allocation2 + $0x128] sm:$0xff] }
 0x108   :  { %573 = vst.msk [vmem:[#allocation2 + $0x261] sm:$0xff] %vm33_vm0, %v435_v48  ;;  %572 = vst.msk [vmem:[#allocation2 + $0x259] sm:$0xff] %vm33_vm0, %v430_v23  ;;  %v2146_v48 = vmul.f32 %v6526_v33, %v749_v9  ;;  %v2346_v23 = vmul.f32 %v6571_v27, %v949_v28  ;;  %v1683_v24 = vadd.f32 %v1619_v2, %v1483_v10  ;;  %v751_v35 = vld [vmem:[#allocation2 + $0x121] sm:$0xff] }
 0x109   :  { %v1684_v25 = vadd.f32 %v1620_v31, %v1484_v12  ;;  %v2211_v26 = vadd.f32 %v2147_v32, %v2011_v8  ;;  %1149 = vst.msk [vmem:[#allocation3 + $0xb0] sm:$0xff] %vm33_vm0, %v1085_v19  ;;  %1150 = vst.msk [vmem:[#allocation3 + $0xb8] sm:$0xff] %vm33_vm0, %v1086_v20  ;;  %v1024_v14 = vmul.f32 %v6449_v41, %v952_v13  ;;  %v951_v9 = vld [vmem:[#allocation2 + $0x122] sm:$0xff]  ;;  %v2475_v31 = vld [vmem:[#allocation3 + $0x98] sm:$0xff] }
 0x10a   :  { %v2210_v17 = vadd.f32 %v2146_v48, %v2010_v6  ;;  %v1422_v49 = vmul.f32 %v6519_v30, %v752_v5  ;;  %v1622_v21 = vmul.f32 %v6557_v7, %v952_v13  ;;  %v1811_v28 = vadd.f32 %v1747_v47, %v1683_v24  ;;  %v754_v60 = vld [vmem:[#allocation2 + $0x141] sm:$0xff] }
 0x10b   :  { %v445_v4 = vpop.permute.xlu1 %444  ;;  %v440_v52 = vpop.permute.xlu0 %439  ;;  %v1812_v50 = vadd.f32 %v1748_v22, %v1684_v25  ;;  %v2411_v29 = vadd.f32 %v2347_v40, %v2211_v26  ;;  %v2149_v32 = vmul.f32 %v6526_v33, %v752_v5  ;;  %v2349_v38 = vmul.f32 %v6571_v27, %v952_v13  ;;  %v954_v10 = vld [vmem:[#allocation2 + $0x142] sm:$0xff] }
 0x10c   :  { %575 = vst.msk [vmem:[#allocation2 + $0x279] sm:$0xff] %vm33_vm0, %v445_v4  ;;  %574 = vst.msk [vmem:[#allocation2 + $0x271] sm:$0xff] %vm33_vm0, %v440_v52  ;;  %v2410_v34 = vadd.f32 %v2346_v23, %v2210_v17  ;;  %v2474_v37 = vld [vmem:[#allocation3 + $0x90] sm:$0xff]  ;;  %v687_v39 = vmul.f32 %v6462_v1, %v616_v45  ;;  %v688_v42 = vmul.f32 %v6462_v1, %v617_v18  ;;  %v619_v17 = vld [vmem:[#allocation2 + $0x140] sm:$0xff] }
 0x10d   :  { %1875 = vst.msk [vmem:[#allocation3 + $0xa0] sm:$0xff] %vm33_vm0, %v1811_v28  ;;  %1876 = vst.msk [vmem:[#allocation3 + $0xa8] sm:$0xff] %vm33_vm0, %v1812_v50  ;;  %v2539_v44 = vadd.f32 %v2475_v31, %v2411_v29  ;;  %v823_v51 = vmul.f32 %v6442_v36, %v751_v35  ;;  %v1023_v40 = vmul.f32 %v6449_v41, %v951_v9  ;;  %v6623_v43 = vld [vmem:[#allocation3 + $0x80] ss:$2 sm:$0xff]  ;;  %v6625_v4 = vld [vmem:[#allocation3 + $0x81] ss:$2 sm:$0xff] }
 0x10e   :  { %v1285_v46 = vmul.f32 %v6543_v57, %v616_v45  ;;  %v2538_v52 = vadd.f32 %v2474_v37, %v2410_v34  ;;  %v888_v56 = vadd.f32 %v824_v15, %v688_v42  ;;  %v1286_v16 = vmul.f32 %v6543_v57, %v617_v18  ;;  %v953_v28 = vld [vmem:[#allocation2 + $0x13a] sm:$0xff] }
 0x10f   :  { %v1421_v58 = vmul.f32 %v6519_v30, %v751_v35  ;;  %v2783_v0 = vmax.f32 %v6623_v43, %v6625_v4  ;;  %2603 = vst.msk [vmem:[#allocation3 + $0x98] sm:$0xff] %vm33_vm0, %v2539_v44  ;;  %v887_v62 = vadd.f32 %v823_v51, %v687_v39  ;;  %v1621_v2 = vmul.f32 %v6557_v7, %v951_v9  ;;  %v455_v37 = vpop.permute.xlu1 %454  ;;  %v450_v39 = vpop.permute.xlu0 %449  ;;  %v972_v43 = vld [vmem:[#allocation2 + $0x24a] sm:$0xff] }
 0x110   :  { %v2012_v5 = vmul.f32 %v6563_v11, %v616_v45  ;;  %2602 = vst.msk [vmem:[#allocation3 + $0x90] sm:$0xff] %vm33_vm0, %v2538_v52  ;;  %v1088_v12 = vadd.f32 %v1024_v14, %v888_v56  ;;  %v1486_v8 = vadd.f32 %v1422_v49, %v1286_v16  ;;  %v2013_v13 = vmul.f32 %v6563_v11, %v617_v18  ;;  %v1749_v20 = vld [vmem:[#allocation3 + $0xb0] sm:$0xff]  ;;  %v1750_v47 = vld [vmem:[#allocation3 + $0xb8] sm:$0xff] }
 0x111   :  { %v1485_v6 = vadd.f32 %v1421_v58, %v1285_v46  ;;  %v1087_v19 = vadd.f32 %v1023_v40, %v887_v62  ;;  %v2148_v22 = vmul.f32 %v6526_v33, %v751_v35  ;;  %v2348_v48 = vmul.f32 %v6571_v27, %v951_v9  ;;  %v618_v45 = vld [vmem:[#allocation2 + $0x138] sm:$0xff]  ;;  %577 = vst.msk [vmem:[#allocation2 + $0x291] sm:$0xff] %vm33_vm0, %v455_v37 }
 0x112   :  { %v826_v23 = vmul.f32 %v6442_v36, %v754_v60  ;;  %1152 = vst.msk [vmem:[#allocation3 + $0xc8] sm:$0xff] %vm33_vm0, %v1088_v12  ;;  %v1686_v25 = vadd.f32 %v1622_v21, %v1486_v8  ;;  %v2213_v26 = vadd.f32 %v2149_v32, %v2013_v13  ;;  %v1026_v15 = vmul.f32 %v6449_v41, %v954_v10  ;;  %v753_v14 = vld [vmem:[#allocation2 + $0x139] sm:$0xff] }
 0x113   :  { %v1685_v24 = vadd.f32 %v1621_v2, %v1485_v6  ;;  %1151 = vst.msk [vmem:[#allocation3 + $0xc0] sm:$0xff] %vm33_vm0, %v1087_v19  ;;  %v2212_v18 = vadd.f32 %v2148_v22, %v2012_v5  ;;  %v1424_v49 = vmul.f32 %v6519_v30, %v754_v60  ;;  %v1624_v35 = vmul.f32 %v6557_v7, %v954_v10  ;;  %v956_v19 = vld [vmem:[#allocation2 + $0x15a] sm:$0xff]  ;;  %v955_v37 = vld [vmem:[#allocation2 + $0x152] sm:$0xff] }
 0x114   :  { %v2151_v9 = vmul.f32 %v6526_v33, %v754_v60  ;;  %v1814_v29 = vadd.f32 %v1750_v47, %v1686_v25  ;;  %v2413_v31 = vadd.f32 %v2349_v38, %v2213_v26  ;;  %v2476_v21 = vld [vmem:[#allocation3 + $0xa0] sm:$0xff]  ;;  %v2477_v32 = vld [vmem:[#allocation3 + $0xa8] sm:$0xff]  ;;  %v2351_v34 = vmul.f32 %v6571_v27, %v954_v10  ;;  %576 = vst.msk [vmem:[#allocation2 + $0x289] sm:$0xff] %vm33_vm0, %v450_v39  ;;  %v460_v47 = vpop.permute.xlu0 %459 }
 0x115   :  { %v1813_v50 = vadd.f32 %v1749_v20, %v1685_v24  ;;  %v2412_v42 = vadd.f32 %v2348_v48, %v2212_v18  ;;  %v689_v44 = vmul.f32 %v6462_v1, %v618_v45  ;;  %v690_v51 = vmul.f32 %v6462_v1, %v619_v17  ;;  %v756_v10 = vld [vmem:[#allocation2 + $0x159] sm:$0xff]  ;;  %v465_v20 = vpop.permute.xlu1 %464  ;;  %578 = vst.msk [vmem:[#allocation2 + $0x2a1] sm:$0xff] %vm33_vm0, %v460_v47 }
 0x116   :  { %v825_v40 = vmul.f32 %v6442_v36, %v753_v14  ;;  %1878 = vst.msk [vmem:[#allocation3 + $0xb8] sm:$0xff] %vm33_vm0, %v1814_v29  ;;  %v2541_v38 = vadd.f32 %v2477_v32, %v2413_v31  ;;  %v1025_v46 = vmul.f32 %v6449_v41, %v953_v28  ;;  %v1287_v52 = vmul.f32 %v6543_v57, %v618_v45  ;;  %v620_v29 = vld [vmem:[#allocation2 + $0x150] sm:$0xff]  ;;  %v621_v32 = vld [vmem:[#allocation2 + $0x158] sm:$0xff] }
 0x117   :  { %1877 = vst.msk [vmem:[#allocation3 + $0xb0] sm:$0xff] %vm33_vm0, %v1813_v50  ;;  %v1288_v56 = vmul.f32 %v6543_v57, %v619_v17  ;;  %v6656_v16 = vld [vmem:[#allocation3 + $0x90] ss:$2 sm:$0xff]  ;;  %v6658_v58 = vld [vmem:[#allocation3 + $0x91] ss:$2 sm:$0xff]  ;;  %v2540_v60 = vadd.f32 %v2476_v21, %v2412_v42  ;;  %v890_v2 = vadd.f32 %v826_v23, %v690_v51  ;;  %v1423_v5 = vmul.f32 %v6519_v30, %v753_v14 }
 0x118   :  { %v889_v62 = vadd.f32 %v825_v40, %v689_v44  ;;  %2605 = vst.msk [vmem:[#allocation3 + $0xa8] sm:$0xff] %vm33_vm0, %v2541_v38  ;;  %v1623_v8 = vmul.f32 %v6557_v7, %v953_v28  ;;  %v2014_v13 = vmul.f32 %v6563_v11, %v618_v45  ;;  %v2015_v25 = vmul.f32 %v6563_v11, %v619_v17 }
 0x119   :  { %v1488_v6 = vadd.f32 %v1424_v49, %v1288_v56  ;;  %2604 = vst.msk [vmem:[#allocation3 + $0xa0] sm:$0xff] %vm33_vm0, %v2540_v60  ;;  %v1090_v48 = vadd.f32 %v1026_v15, %v890_v2  ;;  %v1487_v23 = vadd.f32 %v1423_v5, %v1287_v52  ;;  %v1752_v24 = vld [vmem:[#allocation3 + $0xc8] sm:$0xff]  ;;  %579 = vst.msk [vmem:[#allocation2 + $0x2a9] sm:$0xff] %vm33_vm0, %v465_v20 }
 0x11a   :  { %v1089_v22 = vadd.f32 %v1025_v46, %v889_v62  ;;  %v1751_v18 = vld [vmem:[#allocation3 + $0xc0] sm:$0xff]  ;;  %v2150_v49 = vmul.f32 %v6526_v33, %v753_v14  ;;  %v2350_v45 = vmul.f32 %v6571_v27, %v953_v28  ;;  %v828_v50 = vmul.f32 %v6442_v36, %v756_v10 }
 0x11b   :  { %v1688_v26 = vadd.f32 %v1624_v35, %v1488_v6  ;;  %1154 = vst.msk [vmem:[#allocation3 + $0xd8] sm:$0xff] %vm33_vm0, %v1090_v48  ;;  %v1687_v15 = vadd.f32 %v1623_v8, %v1487_v23  ;;  %v2215_v31 = vadd.f32 %v2151_v9, %v2015_v25  ;;  %v1028_v17 = vmul.f32 %v6449_v41, %v956_v19  ;;  %v755_v35 = vld [vmem:[#allocation2 + $0x151] sm:$0xff] }
 0x11c   :  { %1153 = vst.msk [vmem:[#allocation3 + $0xd0] sm:$0xff] %vm33_vm0, %v1089_v22  ;;  %v1426_v21 = vmul.f32 %v6519_v30, %v756_v10  ;;  %v2214_v14 = vadd.f32 %v2150_v49, %v2014_v13  ;;  %v1626_v28 = vmul.f32 %v6557_v7, %v956_v19  ;;  %v2153_v42 = vmul.f32 %v6526_v33, %v756_v10  ;;  %v758_v22 = vld [vmem:[#allocation2 + $0x171] sm:$0xff] }
 0x11d   :  { %v1816_v39 = vadd.f32 %v1752_v24, %v1688_v26  ;;  %v1815_v44 = vadd.f32 %v1751_v18, %v1687_v15  ;;  %v2415_v51 = vadd.f32 %v2351_v34, %v2215_v31  ;;  %v2479_v38 = vld [vmem:[#allocation3 + $0xb8] sm:$0xff]  ;;  %v2353_v46 = vmul.f32 %v6571_v27, %v956_v19 }
 0x11e   :  { %v2478_v40 = vld [vmem:[#allocation3 + $0xb0] sm:$0xff]  ;;  %v691_v9 = vmul.f32 %v6462_v1, %v620_v29  ;;  %v2414_v52 = vadd.f32 %v2350_v45, %v2214_v14  ;;  %v692_v56 = vmul.f32 %v6462_v1, %v621_v32  ;;  %v827_v60 = vmul.f32 %v6442_v36, %v755_v35 }
 0x11f   :  { %1880 = vst.msk [vmem:[#allocation3 + $0xc8] sm:$0xff] %vm33_vm0, %v1816_v39  ;;  %v1027_v62 = vmul.f32 %v6449_v41, %v955_v37  ;;  %1879 = vst.msk [vmem:[#allocation3 + $0xc0] sm:$0xff] %vm33_vm0, %v1815_v44  ;;  %v2543_v2 = vadd.f32 %v2479_v38, %v2415_v51  ;;  %v1289_v34 = vmul.f32 %v6543_v57, %v620_v29  ;;  %v958_v26 = vld [vmem:[#allocation2 + $0x172] sm:$0xff] }
 0x120   :  { %v1290_v5 = vmul.f32 %v6543_v57, %v621_v32  ;;  %v1425_v10 = vmul.f32 %v6519_v30, %v755_v35  ;;  %v6689_v6 = vld [vmem:[#allocation3 + $0xa0] ss:$2 sm:$0xff]  ;;  %v6691_v8 = vld [vmem:[#allocation3 + $0xa1] ss:$2 sm:$0xff]  ;;  %v2542_v13 = vadd.f32 %v2478_v40, %v2414_v52  ;;  %v891_v19 = vadd.f32 %v827_v60, %v691_v9 }
 0x121   :  { %v892_v20 = vadd.f32 %v828_v50, %v692_v56  ;;  %v1625_v47 = vmul.f32 %v6557_v7, %v955_v37  ;;  %2607 = vst.msk [vmem:[#allocation3 + $0xb8] sm:$0xff] %vm33_vm0, %v2543_v2  ;;  %v2016_v25 = vmul.f32 %v6563_v11, %v620_v29  ;;  %v2017_v50 = vmul.f32 %v6563_v11, %v621_v32  ;;  %v623_v32 = vld [vmem:[#allocation2 + $0x170] sm:$0xff] }
 0x122   :  { %v1489_v23 = vadd.f32 %v1425_v10, %v1289_v34  ;;  %v1490_v24 = vadd.f32 %v1426_v21, %v1290_v5  ;;  %2606 = vst.msk [vmem:[#allocation3 + $0xb0] sm:$0xff] %vm33_vm0, %v2542_v13  ;;  %v1091_v18 = vadd.f32 %v1027_v62, %v891_v19  ;;  %v1754_v15 = vld [vmem:[#allocation3 + $0xd8] sm:$0xff]  ;;  %v2152_v31 = vmul.f32 %v6526_v33, %v755_v35  ;;  %v622_v21 = vld [vmem:[#allocation2 + $0x168] sm:$0xff]  ;;  %v475_v10 = vpop.permute.xlu1 %474  ;;  %v470_v13 = vpop.permute.xlu0 %469 }
 0x123   :  { %v1092_v49 = vadd.f32 %v1028_v17, %v892_v20  ;;  %v1753_v45 = vld [vmem:[#allocation3 + $0xd0] sm:$0xff]  ;;  %v2352_v44 = vmul.f32 %v6571_v27, %v955_v37  ;;  %v830_v51 = vmul.f32 %v6442_v36, %v758_v22  ;;  %v2217_v40 = vadd.f32 %v2153_v42, %v2017_v50  ;;  %581 = vst.msk [vmem:[#allocation2 + $0x2c1] sm:$0xff] %vm33_vm0, %v475_v10 }
 0x124   :  { %v1689_v39 = vadd.f32 %v1625_v47, %v1489_v23  ;;  %v1690_v14 = vadd.f32 %v1626_v28, %v1490_v24  ;;  %1155 = vst.msk [vmem:[#allocation3 + $0xe0] sm:$0xff] %vm33_vm0, %v1091_v18  ;;  %v2216_v29 = vadd.f32 %v2152_v31, %v2016_v25  ;;  %v1030_v17 = vmul.f32 %v6449_v41, %v958_v26  ;;  %v757_v9 = vld [vmem:[#allocation2 + $0x169] sm:$0xff]  ;;  %v762_v31 = vld [vmem:[#allocation2 + $0x1d1] sm:$0xff] }
 0x125   :  { %1156 = vst.msk [vmem:[#allocation3 + $0xe8] sm:$0xff] %vm33_vm0, %v1092_v49  ;;  %v1428_v38 = vmul.f32 %v6519_v30, %v758_v22  ;;  %v957_v35 = vld [vmem:[#allocation2 + $0x16a] sm:$0xff]  ;;  %v1628_v37 = vmul.f32 %v6557_v7, %v958_v26  ;;  %v2155_v60 = vmul.f32 %v6526_v33, %v758_v22  ;;  %v2417_v2 = vadd.f32 %v2353_v46, %v2217_v40  ;;  %v962_v40 = vld [vmem:[#allocation2 + $0x1d2] sm:$0xff] }
 0x126   :  { %v1817_v52 = vadd.f32 %v1753_v45, %v1689_v39  ;;  %v1818_v28 = vadd.f32 %v1754_v15, %v1690_v14  ;;  %v2481_v56 = vld [vmem:[#allocation3 + $0xc8] sm:$0xff]  ;;  %v2416_v62 = vadd.f32 %v2352_v44, %v2216_v29  ;;  %v2480_v34 = vld [vmem:[#allocation3 + $0xc0] sm:$0xff]  ;;  %v2355_v5 = vmul.f32 %v6571_v27, %v958_v26  ;;  %580 = vst.msk [vmem:[#allocation2 + $0x2b9] sm:$0xff] %vm33_vm0, %v470_v13 }
 0x127   :  { %v693_v42 = vmul.f32 %v6462_v1, %v622_v21  ;;  %v694_v19 = vmul.f32 %v6462_v1, %v623_v32  ;;  %v829_v20 = vmul.f32 %v6442_v36, %v757_v9  ;;  %v1029_v47 = vmul.f32 %v6449_v41, %v957_v35 }
 0x128   :  { %1881 = vst.msk [vmem:[#allocation3 + $0xd0] sm:$0xff] %vm33_vm0, %v1817_v52  ;;  %1882 = vst.msk [vmem:[#allocation3 + $0xd8] sm:$0xff] %vm33_vm0, %v1818_v28  ;;  %v1291_v22 = vmul.f32 %v6543_v57, %v622_v21  ;;  %v2544_v46 = vadd.f32 %v2480_v34, %v2416_v62  ;;  %v2545_v23 = vadd.f32 %v2481_v56, %v2417_v2  ;;  %v485_v52 = vpop.permute.xlu1 %484  ;;  %v480_v28 = vpop.permute.xlu0 %479 }
 0x129   :  { %v1292_v24 = vmul.f32 %v6543_v57, %v623_v32  ;;  %v1427_v25 = vmul.f32 %v6519_v30, %v757_v9  ;;  %v6721_v26 = vld [vmem:[#allocation3 + $0xb0] ss:$2 sm:$0xff]  ;;  %v6723_v18 = vld [vmem:[#allocation3 + $0xb1] ss:$2 sm:$0xff]  ;;  %v893_v49 = vadd.f32 %v829_v20, %v693_v42  ;;  %v894_v45 = vadd.f32 %v830_v51, %v694_v19  ;;  %v626_v42 = vld [vmem:[#allocation2 + $0x1c8] sm:$0xff]  ;;  %583 = vst.msk [vmem:[#allocation2 + $0x2d9] sm:$0xff] %vm33_vm0, %v485_v52 }
 0x12a   :  { %v1627_v15 = vmul.f32 %v6557_v7, %v957_v35  ;;  %v2018_v50 = vmul.f32 %v6563_v11, %v622_v21  ;;  %2608 = vst.msk [vmem:[#allocation3 + $0xc0] sm:$0xff] %vm33_vm0, %v2544_v46  ;;  %2609 = vst.msk [vmem:[#allocation3 + $0xc8] sm:$0xff] %vm33_vm0, %v2545_v23  ;;  %v2019_v29 = vmul.f32 %v6563_v11, %v623_v32  ;;  %v627_v19 = vld [vmem:[#allocation2 + $0x1d0] sm:$0xff] }
 0x12b   :  { %v1491_v14 = vadd.f32 %v1427_v25, %v1291_v22  ;;  %v1492_v44 = vadd.f32 %v1428_v38, %v1292_v24  ;;  %v1093_v51 = vadd.f32 %v1029_v47, %v893_v49  ;;  %v1094_v56 = vadd.f32 %v1030_v17, %v894_v45  ;;  %v1755_v62 = vld [vmem:[#allocation3 + $0xe0] sm:$0xff]  ;;  %582 = vst.msk [vmem:[#allocation2 + $0x2d1] sm:$0xff] %vm33_vm0, %v480_v28  ;;  %v761_v20 = vld [vmem:[#allocation2 + $0x1c9] sm:$0xff] }
 0x12c   :  { %v1756_v2 = vld [vmem:[#allocation3 + $0xe8] sm:$0xff]  ;;  %v2154_v21 = vmul.f32 %v6526_v33, %v757_v9  ;;  %v2354_v34 = vmul.f32 %v6571_v27, %v957_v35  ;;  %v2219_v13 = vadd.f32 %v2155_v60, %v2019_v29  ;;  %v834_v32 = vmul.f32 %v6442_v36, %v762_v31  ;;  %v490_v3 = vpop.permute.xlu0 %489 }
 0x12d   :  { %v1691_v10 = vadd.f32 %v1627_v15, %v1491_v14  ;;  %v1692_v38 = vadd.f32 %v1628_v37, %v1492_v44  ;;  %v961_v47 = vld [vmem:[#allocation2 + $0x1ca] sm:$0xff]  ;;  %1157 = vst.msk [vmem:[#allocation3 + $0xf0] sm:$0xff] %vm33_vm0, %v1093_v51  ;;  %1158 = vst.msk [vmem:[#allocation3 + $0xf8] sm:$0xff] %vm33_vm0, %v1094_v56  ;;  %v1034_v9 = vmul.f32 %v6449_v41, %v962_v40  ;;  %v1221_v56 = vld [vmem:[#allocation2 + $0x180] sm:$0xff] }
 0x12e   :  { %v2218_v17 = vadd.f32 %v2154_v21, %v2018_v50  ;;  %v1432_v35 = vmul.f32 %v6519_v30, %v762_v31  ;;  %v1632_v22 = vmul.f32 %v6557_v7, %v962_v40  ;;  %v2419_v37 = vadd.f32 %v2355_v5, %v2219_v13  ;;  %v1358_v14 = vld [vmem:[#allocation2 + $0x189] sm:$0xff]  ;;  %584 = vst.msk [vmem:[#allocation2 + $0x2e9] sm:$0xff] %vm33_vm0, %v490_v3  ;;  %v6801_v3 = vld [vmem:[%s8690_s1 + $0x2] ss:$0 sm:$0xff] }
 0x12f   :  { %v1819_v46 = vadd.f32 %v1755_v62, %v1691_v10  ;;  %v1820_v23 = vadd.f32 %v1756_v2, %v1692_v38  ;;  %v2482_v60 = vld [vmem:[#allocation3 + $0xd0] sm:$0xff]  ;;  %v2483_v24 = vld [vmem:[#allocation3 + $0xd8] sm:$0xff]  ;;  %v697_v25 = vmul.f32 %v6462_v1, %v626_v42  ;;  %v698_v45 = vmul.f32 %v6462_v1, %v627_v19  ;;  %v1357_v10 = vld [vmem:[#allocation2 + $0x181] sm:$0xff] }
 0x130   :  { %v2418_v49 = vadd.f32 %v2354_v34, %v2218_v17  ;;  %v833_v15 = vmul.f32 %v6442_v36, %v761_v20  ;;  %v1033_v50 = vmul.f32 %v6449_v41, %v961_v47  ;;  %v2547_v31 = vadd.f32 %v2483_v24, %v2419_v37  ;;  %v1558_v40 = vld [vmem:[#allocation2 + $0x18a] sm:$0xff]  ;;  %v1557_v38 = vld [vmem:[#allocation2 + $0x182] sm:$0xff] }
 0x131   :  { %1883 = vst.msk [vmem:[#allocation3 + $0xe0] sm:$0xff] %vm33_vm0, %v1819_v46  ;;  %1884 = vst.msk [vmem:[#allocation3 + $0xe8] sm:$0xff] %vm33_vm0, %v1820_v23  ;;  %v1295_v44 = vmul.f32 %v6543_v57, %v626_v42  ;;  %v1296_v5 = vmul.f32 %v6543_v57, %v627_v19  ;;  %v1431_v29 = vmul.f32 %v6519_v30, %v761_v20  ;;  %v6751_v52 = vld [vmem:[#allocation3 + $0xc0] ss:$2 sm:$0xff]  ;;  %v6753_v1 = vld [vmem:[#allocation3 + $0xc1] ss:$2 sm:$0xff] }
 0x132   :  { %v2546_v36 = vadd.f32 %v2482_v60, %v2418_v49  ;;  %v897_v28 = vadd.f32 %v833_v15, %v697_v25  ;;  %v898_v41 = vadd.f32 %v834_v32, %v698_v45  ;;  %v1631_v51 = vmul.f32 %v6557_v7, %v961_v47  ;;  %2611 = vst.msk [vmem:[#allocation3 + $0xd8] sm:$0xff] %vm33_vm0, %v2547_v31  ;;  %v1222_v42 = vld [vmem:[#allocation2 + $0x188] sm:$0xff]  ;;  %v1759_v32 = vld [vmem:[#allocation3 + $0x100] sm:$0xff]  ;;  %v1950_v46 = vld [vmem:[#allocation2 + $0x198] sm:$0xff] }
 0x133   :  { %v1495_v2 = vadd.f32 %v1431_v29, %v1295_v44  ;;  %v1496_v21 = vadd.f32 %v1432_v35, %v1296_v5  ;;  %v1430_v34 = vmul.f32 %v6519_v30, %v1358_v14  ;;  %v1760_v20 = vld [vmem:[#allocation3 + $0x108] sm:$0xff]  ;;  %v1630_v47 = vmul.f32 %v6557_v7, %v1558_v40  ;;  %v1951_v24 = vld [vmem:[#allocation2 + $0x1a0] sm:$0xff] }
 0x134   :  { %2610 = vst.msk [vmem:[#allocation3 + $0xd0] sm:$0xff] %vm33_vm0, %v2546_v36  ;;  %v1097_v13 = vadd.f32 %v1033_v50, %v897_v28  ;;  %v1098_v19 = vadd.f32 %v1034_v9, %v898_v41  ;;  %v2157_v17 = vmul.f32 %v6526_v33, %v1358_v14  ;;  %v2357_v35 = vmul.f32 %v6571_v27, %v1558_v40  ;;  %v2086_v15 = vld [vmem:[#allocation2 + $0x199] sm:$0xff]  ;;  %v2087_v50 = vld [vmem:[#allocation2 + $0x1a1] sm:$0xff] }
 0x135   :  { %v1695_v23 = vadd.f32 %v1631_v51, %v1495_v2  ;;  %v1696_v37 = vadd.f32 %v1632_v22, %v1496_v21  ;;  %v1293_v60 = vmul.f32 %v6543_v57, %v1221_v56  ;;  %v1294_v9 = vmul.f32 %v6543_v57, %v1222_v42  ;;  %v2286_v5 = vld [vmem:[#allocation2 + $0x19a] sm:$0xff]  ;;  %v2287_v41 = vld [vmem:[#allocation2 + $0x1a2] sm:$0xff] }
 0x136   :  { %1161 = vst.msk [vmem:[#allocation3 + $0x110] sm:$0xff] %vm33_vm0, %v1097_v13  ;;  %1162 = vst.msk [vmem:[#allocation3 + $0x118] sm:$0xff] %vm33_vm0, %v1098_v19  ;;  %v1429_v25 = vmul.f32 %v6519_v30, %v1357_v10  ;;  %v1629_v49 = vmul.f32 %v6557_v7, %v1557_v38  ;;  %v2020_v45 = vmul.f32 %v6563_v11, %v1221_v56  ;;  %v2648_v51 = vld [vmem:[#allocation3] ss:$2 sm:$0xff]  ;;  %v2712_v2 = vld [vmem:[#allocation3 + $0x1] ss:$2 sm:$0xff] }
 0x137   :  { %v1823_v22 = vadd.f32 %v1759_v32, %v1695_v23  ;;  %v1824_v14 = vadd.f32 %v1760_v20, %v1696_v37  ;;  %v2021_v31 = vmul.f32 %v6563_v11, %v1222_v42  ;;  %v2022_v44 = vmul.f32 %v6563_v11, %v1950_v46  ;;  %v1757_v56 = vld [vmem:[#allocation3 + $0xf0] sm:$0xff]  ;;  %v1758_v21 = vld [vmem:[#allocation3 + $0xf8] sm:$0xff] }
 0x138   :  { %v1493_v29 = vadd.f32 %v1429_v25, %v1293_v60  ;;  %v1494_v40 = vadd.f32 %v1430_v34, %v1294_v9  ;;  %v2023_v36 = vmul.f32 %v6563_v11, %v1951_v24  ;;  %v2156_v28 = vmul.f32 %v6526_v33, %v1357_v10  ;;  %v2650_v32 = vld [vmem:[#allocation3 + $0x10] ss:$2 sm:$0xff]  ;;  %v2714_v20 = vld [vmem:[#allocation3 + $0x11] ss:$2 sm:$0xff]  ;;  %v2485_v60 = vld [vmem:[#allocation3 + $0xe8] sm:$0xff] }
 0x139   :  { %1887 = vst.msk [vmem:[#allocation3 + $0x100] sm:$0xff] %vm33_vm0, %v1823_v22  ;;  %1888 = vst.msk [vmem:[#allocation3 + $0x108] sm:$0xff] %vm33_vm0, %v1824_v14  ;;  %v2158_v42 = vmul.f32 %v6526_v33, %v2086_v15  ;;  %v2159_v13 = vmul.f32 %v6526_v33, %v2087_v50  ;;  %v2221_v19 = vadd.f32 %v2157_v17, %v2021_v31  ;;  %v764_v24 = vld [vmem:[#allocation2 + $0x1e9] sm:$0xff]  ;;  %v495_v31 = vpop.permute.xlu1 %494 }
 0x13a   :  { %v2356_v34 = vmul.f32 %v6571_v27, %v1557_v38  ;;  %v1693_v46 = vadd.f32 %v1629_v49, %v1493_v29  ;;  %v1694_v10 = vadd.f32 %v1630_v47, %v1494_v40  ;;  %v2220_v23 = vadd.f32 %v2156_v28, %v2020_v45  ;;  %v964_v9 = vld [vmem:[#allocation2 + $0x1ea] sm:$0xff]  ;;  %v2484_v38 = vld [vmem:[#allocation3 + $0xe0] sm:$0xff]  ;;  %585 = vst.msk [vmem:[#allocation2 + $0x2f1] sm:$0xff] %vm33_vm0, %v495_v31 }
 0x13b   :  { %v2358_v37 = vmul.f32 %v6571_v27, %v2286_v5  ;;  %v6781_v25 = vld [vmem:[#allocation3 + $0xd0] ss:$2 sm:$0xff]  ;;  %v6783_v22 = vld [vmem:[#allocation3 + $0xd1] ss:$2 sm:$0xff]  ;;  %v2222_v15 = vadd.f32 %v2158_v42, %v2022_v44  ;;  %v2223_v14 = vadd.f32 %v2159_v13, %v2023_v36  ;;  %v2359_v17 = vmul.f32 %v6571_v27, %v2287_v41  ;;  %v628_v28 = vld [vmem:[#allocation2 + $0x1e0] sm:$0xff] }
 0x13c   :  { %v2421_v50 = vadd.f32 %v2357_v35, %v2221_v19  ;;  %v1821_v49 = vadd.f32 %v1757_v56, %v1693_v46  ;;  %v1822_v45 = vadd.f32 %v1758_v21, %v1694_v10  ;;  %v2420_v5 = vadd.f32 %v2356_v34, %v2220_v23  ;;  %v629_v41 = vld [vmem:[#allocation2 + $0x1e8] sm:$0xff]  ;;  %v6795_v56 = vld [vmem:[%s8690_s1 + $0x1] ss:$0 sm:$0xff]  ;;  %v500_v10 = vpop.permute.xlu0 %499 }
 0x13d   :  { %v2422_v29 = vadd.f32 %v2358_v37, %v2222_v15  ;;  %v2423_v40 = vadd.f32 %v2359_v17, %v2223_v14  ;;  %v2775_v36 = vmax.f32 %v2648_v51, %v2712_v2  ;;  %v2776_v42 = vmax.f32 %v2650_v32, %v2714_v20  ;;  %v763_v2 = vld [vmem:[#allocation2 + $0x1e1] sm:$0xff]  ;;  %v505_v46 = vpop.permute.xlu1 %504  ;;  %v6814_v37 = vld [vmem:[%s8691_s2] ss:$0 sm:$0xff]  ;;  %586 = vst.msk [vmem:[#allocation2 + $0x301] sm:$0xff] %vm33_vm0, %v500_v10 }
 0x13e   :  { %v2549_v44 = vadd.f32 %v2485_v60, %v2421_v50  ;;  %1885 = vst.msk [vmem:[#allocation3 + $0xf0] sm:$0xff] %vm33_vm0, %v1821_v49  ;;  %1886 = vst.msk [vmem:[#allocation3 + $0xf8] sm:$0xff] %vm33_vm0, %v1822_v45  ;;  %v2548_v35 = vadd.f32 %v2484_v38, %v2420_v5  ;;  %v836_v21 = vmul.f32 %v6795_v56, %v764_v24  ;;  %v963_v13 = vld [vmem:[#allocation2 + $0x1e2] sm:$0xff]  ;;  %v6820_v15 = vld [vmem:[%s8690_s1] ss:$0 sm:$0xff] }
 0x13f   :  { %v1036_v51 = vmul.f32 %v6801_v3, %v964_v9  ;;  %v2807_v19 = vsel %vm33_vm0, %v2775_v36, -inf  ;;  %v1434_v34 = vmul.f32 %v6519_v30, %v764_v24  ;;  %v1634_v32 = vmul.f32 %v6557_v7, %v964_v9  ;;  %587 = vst.msk [vmem:[#allocation2 + $0x309] sm:$0xff] %vm33_vm0, %v505_v46  ;;  %v2654_v46 = vld [vmem:[#allocation3 + $0x30] ss:$2 sm:$0xff]  ;;  %v2716_v10 = vld [vmem:[#allocation3 + $0x21] ss:$2 sm:$0xff] }
 0x140   :  { %2613 = vst.msk [vmem:[#allocation3 + $0xe8] sm:$0xff] %vm33_vm0, %v2549_v44  ;;  %v2161_v20 = vmul.f32 %v6526_v33, %v764_v24  ;;  %2612 = vst.msk [vmem:[#allocation3 + $0xe0] sm:$0xff] %vm33_vm0, %v2548_v35  ;;  %v2808_v23 = vsel %vm33_vm0, %v2776_v42, -inf  ;;  %v2361_v60 = vmul.f32 %v6571_v27, %v964_v9  ;;  %v699_v24 = vmul.f32 %v6820_v15, %v628_v28 }
 0x141   :  { %v700_v14 = vmul.f32 %v6820_v15, %v629_v41  ;;  %v2809_v17 = vmax.f32 %v2807_v19, %v2808_v23  ;;  %v835_v50 = vmul.f32 %v6795_v56, %v763_v2  ;;  %v1035_v38 = vmul.f32 %v6801_v3, %v963_v13  ;;  %v2652_v19 = vld [vmem:[#allocation3 + $0x20] ss:$2 sm:$0xff] }
 0x142   :  { %v1297_v9 = vmul.f32 %v6543_v57, %v628_v28  ;;  %v1298_v49 = vmul.f32 %v6543_v57, %v629_v41  ;;  %v1433_v45 = vmul.f32 %v6519_v30, %v763_v2  ;;  %v1633_v5 = vmul.f32 %v6557_v7, %v963_v13  ;;  %v766_v30 = vld [vmem:[#allocation2 + $0x201] sm:$0xff] }
 0x143   :  { %v900_v31 = vadd.f32 %v836_v21, %v700_v14  ;;  %v2862_v44 = vadd.f32 %v6814_v37, %v2809_v17  ;;  %v899_v36 = vadd.f32 %v835_v50, %v699_v24  ;;  %v2024_v35 = vmul.f32 %v6563_v11, %v628_v28  ;;  %v1761_v21 = vld [vmem:[#allocation3 + $0x110] sm:$0xff]  ;;  %v1762_v24 = vld [vmem:[#allocation3 + $0x118] sm:$0xff] }
 0x144   :  { %v2025_v42 = vmul.f32 %v6563_v11, %v629_v41  ;;  %v1497_v47 = vadd.f32 %v1433_v45, %v1297_v9  ;;  %v1498_v62 = vadd.f32 %v1434_v34, %v1298_v49  ;;  %v2160_v57 = vmul.f32 %v6526_v33, %v763_v2  ;;  %v2718_v14 = vld [vmem:[#allocation3 + $0x31] ss:$2 sm:$0xff]  ;;  %v2489_v34 = vld [vmem:[#allocation3 + $0x108] sm:$0xff] }
 0x145   :  { %v1100_v23 = vadd.f32 %v1036_v51, %v900_v31  ;;  %v2486_v39 = vld [vmem:[#allocation3 + $0xf0] sm:$0xff]  ;;  %v2487_v48 = vld [vmem:[#allocation3 + $0xf8] sm:$0xff]  ;;  %v2878_v12 = vmax.f32 %v2862_v44, 0.0  ;;  %v1099_v17 = vadd.f32 %v1035_v38, %v899_v36  ;;  %v2360_v28 = vmul.f32 %v6571_v27, %v963_v13  ;;  %v966_v13 = vld [vmem:[#allocation2 + $0x202] sm:$0xff] }
 0x146   :  { %v2225_v50 = vadd.f32 %v2161_v20, %v2025_v42  ;;  %v2550_v11 = vadd.f32 %v2486_v39, %v2422_v29  ;;  %v2551_v41 = vadd.f32 %v2487_v48, %v2423_v40  ;;  %v1697_v51 = vadd.f32 %v1633_v5, %v1497_v47  ;;  %v2488_v47 = vld [vmem:[#allocation3 + $0x100] sm:$0xff]  ;;  %v635_v48 = vld [vmem:[#allocation2 + $0x230] sm:$0xff] }
 0x147   :  { %1164 = vst.msk [vmem:[#allocation3 + $0x128] sm:$0xff] %vm33_vm0, %v1100_v23  ;;  %v1698_v9 = vadd.f32 %v1634_v32, %v1498_v62  ;;  %v6838_v31 = vld [vmem:[#allocation3 + $0xe0] ss:$2 sm:$0xff]  ;;  %v6840_v33 = vld [vmem:[#allocation3 + $0xe1] ss:$2 sm:$0xff]  ;;  %2935 = vst.msk [vmem:[#allocation4 + $0x11] sm:$0xff] %vm33_vm0, %v2878_v12  ;;  %v2224_v2 = vadd.f32 %v2160_v57, %v2024_v35  ;;  %v2777_v20 = vmax.f32 %v2652_v19, %v2716_v10 }
 0x148   :  { %1163 = vst.msk [vmem:[#allocation3 + $0x120] sm:$0xff] %vm33_vm0, %v1099_v17  ;;  %v2425_v38 = vadd.f32 %v2361_v60, %v2225_v50  ;;  %v2778_v49 = vmax.f32 %v2654_v46, %v2718_v14  ;;  %2614 = vst.msk [vmem:[#allocation3 + $0xf0] sm:$0xff] %vm33_vm0, %v2550_v11  ;;  %v1825_v39 = vadd.f32 %v1761_v21, %v1697_v51  ;;  %v630_v12 = vld [vmem:[#allocation2 + $0x1f8] sm:$0xff]  ;;  %v631_v5 = vld [vmem:[#allocation2 + $0x200] sm:$0xff] }
 0x149   :  { %2615 = vst.msk [vmem:[#allocation3 + $0xf8] sm:$0xff] %vm33_vm0, %v2551_v41  ;;  %v1826_v62 = vadd.f32 %v1762_v24, %v1698_v9  ;;  %v838_v29 = vmul.f32 %v6795_v56, %v766_v30  ;;  %v2424_v40 = vadd.f32 %v2360_v28, %v2224_v2  ;;  %v2810_v60 = vsel %vm33_vm0, %v2777_v20, -inf  ;;  %v765_v44 = vld [vmem:[#allocation2 + $0x1f9] sm:$0xff]  ;;  %v6857_v19 = vld [vmem:[%s8690_s1 + $0x4] ss:$0 sm:$0xff] }
 0x14a   :  { %v2553_v32 = vadd.f32 %v2489_v34, %v2425_v38  ;;  %v2811_v45 = vsel %vm33_vm0, %v2778_v49, -inf  ;;  %v965_v36 = vld [vmem:[#allocation2 + $0x1fa] sm:$0xff]  ;;  %1889 = vst.msk [vmem:[#allocation3 + $0x110] sm:$0xff] %vm33_vm0, %v1825_v39  ;;  %v1038_v42 = vmul.f32 %v6801_v3, %v966_v13  ;;  %v1436_v46 = vmul.f32 %v6857_v19, %v766_v30  ;;  %v6865_v21 = vld [vmem:[%s8690_s1 + $0x7] ss:$0 sm:$0xff] }
 0x14b   :  { %1890 = vst.msk [vmem:[#allocation3 + $0x118] sm:$0xff] %vm33_vm0, %v1826_v62  ;;  %v2812_v35 = vmax.f32 %v2810_v60, %v2811_v45  ;;  %v1636_v10 = vmul.f32 %v6557_v7, %v966_v13  ;;  %v2552_v23 = vadd.f32 %v2488_v47, %v2424_v40  ;;  %v2163_v57 = vmul.f32 %v6865_v21, %v766_v30  ;;  %v6880_v11 = vld [vmem:[%s8690_s1 + $0x3] ss:$0 sm:$0xff]  ;;  %v6888_v51 = vld [vmem:[%s8690_s1 + $0x5] ss:$0 sm:$0xff]  ;;  %v3708_v47 = vld [vmem:[%s8692_s3 + $0x108] sm:$0xff]  ;;  %v515_v40 = vpop.permute.xlu1 %514 }
 0x14c   :  { %2617 = vst.msk [vmem:[#allocation3 + $0x108] sm:$0xff] %vm33_vm0, %v2553_v32  ;;  %v6869_v14 = vmul.f32 %v6571_v27, %v966_v13  ;;  %v701_v17 = vmul.f32 %v6820_v15, %v630_v12  ;;  %v702_v50 = vmul.f32 %v6820_v15, %v631_v5  ;;  %v837_v7 = vmul.f32 %v6795_v56, %v765_v44  ;;  %v3707_v34 = vld [vmem:[%s8692_s3 + $0x100] sm:$0xff]  ;;  %v510_v32 = vpop.permute.xlu0 %509 }
 0x14d   :  { %v2863_v24 = vadd.f32 %v6814_v37, %v2812_v35  ;;  %v1037_v28 = vmul.f32 %v6801_v3, %v965_v36  ;;  %2616 = vst.msk [vmem:[#allocation3 + $0x100] sm:$0xff] %vm33_vm0, %v2552_v23  ;;  %v1299_v27 = vmul.f32 %v6880_v11, %v630_v12  ;;  %v1300_v30 = vmul.f32 %v6880_v11, %v631_v5  ;;  %v6899_v39 = vld [vmem:[%s8690_s1 + $0x6] ss:$0 sm:$0xff]  ;;  %v768_v35 = vld [vmem:[#allocation2 + $0x219] sm:$0xff] }
 0x14e   :  { %v1435_v41 = vmul.f32 %v6857_v19, %v765_v44  ;;  %v1635_v9 = vmul.f32 %v6888_v51, %v965_v36  ;;  %v6894_v2 = vld [vmem:[#allocation4 + $0x12] sm:$0xff]  ;;  %v901_v49 = vadd.f32 %v837_v7, %v701_v17  ;;  %v902_v13 = vadd.f32 %v838_v29, %v702_v50  ;;  %v968_v23 = vld [vmem:[#allocation2 + $0x21a] sm:$0xff]  ;;  %589 = vst.msk [vmem:[#allocation2 + $0x321] sm:$0xff] %vm33_vm0, %v515_v40  ;;  %v1764_v50 = vld [vmem:[#allocation3 + $0x128] sm:$0xff] }
 0x14f   :  { %v3177_v38 = vld [vmem:[#allocation4 + $0x10] sm:$0xff]  ;;  %v2879_v20 = vmax.f32 %v2863_v24, 0.0  ;;  %v2026_v62 = vmul.f32 %v6899_v39, %v630_v12  ;;  %3338 = vrot.lane.b32.xlu0 %v6894_v2, %s5624_s0  ;;  %v1500_v60 = vadd.f32 %v1436_v46, %v1300_v30  ;;  %v2027_v45 = vmul.f32 %v6899_v39, %v631_v5  ;;  %588 = vst.msk [vmem:[#allocation2 + $0x319] sm:$0xff] %vm33_vm0, %v510_v32  ;;  %v1763_v24 = vld [vmem:[#allocation3 + $0x120] sm:$0xff]  ;;  %v6916_v46 = vld [vmem:[%s8690_s1 + $0x8] ss:$0 sm:$0xff] }
 0x150   :  { %3209 = vrot.lane.b32.xlu1 %v3177_v38, %s5626_s30  ;;  %v1499_v29 = vadd.f32 %v1435_v41, %v1299_v27  ;;  %v1101_v12 = vadd.f32 %v1037_v28, %v901_v49  ;;  %v1102_v17 = vadd.f32 %v1038_v42, %v902_v13  ;;  %v2162_v7 = vmul.f32 %v6865_v21, %v765_v44  ;;  %v632_v40 = vld [vmem:[#allocation2 + $0x210] sm:$0xff]  ;;  %v633_v32 = vld [vmem:[#allocation2 + $0x218] sm:$0xff] }
 0x151   :  { %2936 = vst.msk [vmem:[#allocation4 + $0x21] sm:$0xff] %vm33_vm0, %v2879_v20  ;;  %v2362_v5 = vmul.f32 %v6916_v46, %v965_v36  ;;  %v1700_v30 = vadd.f32 %v1636_v10, %v1500_v60  ;;  %v2227_v41 = vadd.f32 %v2163_v57, %v2027_v45  ;;  %v5396_v38 = vpack.c.bf16 %v3708_v47, %v3707_v34  ;;  %v767_v20 = vld [vmem:[#allocation2 + $0x211] sm:$0xff]  ;;  %v520_v10 = vpop.permute.xlu0 %519 }
 0x152   :  { %v1699_v27 = vadd.f32 %v1635_v9, %v1499_v29  ;;  %v2984_v28 = vld [vmem:[#allocation4 + $0x11] sm:$0xff]  ;;  %1165 = vst.msk [vmem:[#allocation3 + $0x130] sm:$0xff] %vm33_vm0, %v1101_v12  ;;  %1166 = vst.msk [vmem:[#allocation3 + $0x138] sm:$0xff] %vm33_vm0, %v1102_v17  ;;  %v2226_v44 = vadd.f32 %v2162_v7, %v2026_v62  ;;  %v840_v49 = vmul.f32 %v6795_v56, %v768_v35  ;;  %v525_v9 = vpop.permute.xlu1 %524  ;;  %v6930_v62 = vsel %vm33_vm0, %v2781_v61, -inf }
 0x153   :  { %v2491_v42 = vld [vmem:[#allocation3 + $0x118] sm:$0xff]  ;;  %v1040_v13 = vmul.f32 %v6801_v3, %v968_v23  ;;  %v1438_v36 = vmul.f32 %v6857_v19, %v768_v35  ;;  %v1828_v47 = vadd.f32 %v1764_v50, %v1700_v30  ;;  %v2427_v29 = vadd.f32 %v6869_v14, %v2227_v41  ;;  %v2490_v60 = vld [vmem:[#allocation3 + $0x110] sm:$0xff]  ;;  %5397 = vmatprep.subr.bf16.mxu1 %v5396_v38 }
 0x154   :  { %v3274_v57 = vld [vmem:[#allocation4 + $0x11] sm:$0xff]  ;;  %3017 = vrot.lane.b32.xlu1 %v2984_v28, %s5624_s0  ;;  %v1827_v34 = vadd.f32 %v1763_v24, %v1699_v27  ;;  %591 = vst.msk [vmem:[#allocation2 + $0x339] sm:$0xff] %vm33_vm0, %v525_v9  ;;  %590 = vst.msk [vmem:[#allocation2 + $0x331] sm:$0xff] %vm33_vm0, %v520_v10  ;;  %v2426_v17 = vadd.f32 %v2362_v5, %v2226_v44  ;;  %v1638_v24 = vmul.f32 %v6888_v51, %v968_v23 }
 0x155   :  { %v967_v45 = vld [vmem:[#allocation2 + $0x212] sm:$0xff]  ;;  %3290 = vst.msk [vmem:[#allocation5 + $0x8] sm:$0xff] %vm33_vm0, %v3274_v57  ;;  %v2165_v14 = vmul.f32 %v6865_v21, %v768_v35  ;;  %v2365_v50 = vmul.f32 %v6916_v46, %v968_v23  ;;  %5399 = vmatpush3.bf16.msra.mxu1 %v5396_v38  ;;  %1892 = vst.msk [vmem:[#allocation3 + $0x128] sm:$0xff] %vm33_vm0, %v1828_v47  ;;  %v2555_v59 = vadd.f32 %v2491_v42, %v2427_v29 }
 0x156   :  { %v2952_v12 = vld [vmem:[#allocation4 + $0x10] sm:$0xff]  ;;  %1891 = vst.msk [vmem:[#allocation3 + $0x120] sm:$0xff] %vm33_vm0, %v1827_v34  ;;  %v703_v55 = vmul.f32 %v6820_v15, %v632_v40  ;;  %v704_v61 = vmul.f32 %v6820_v15, %v633_v32  ;;  %v839_v7 = vmul.f32 %v6795_v56, %v767_v20  ;;  %v2554_v5 = vadd.f32 %v2490_v60, %v2426_v17  ;;  %v3710_v10 = vld [vmem:[%s8692_s3 + $0x118] sm:$0xff] }
 0x157   :  { %2968 = vst.msk [vmem:[#allocation5 + $0x18] sm:$0xff] %vm33_vm0, %v2952_v12  ;;  %v1039_v27 = vmul.f32 %v6801_v3, %v967_v45  ;;  %v1301_v35 = vmul.f32 %v6880_v11, %v632_v40  ;;  %v1302_v23 = vmul.f32 %v6880_v11, %v633_v32  ;;  %v3709_v30 = vld [vmem:[%s8692_s3 + $0x110] sm:$0xff]  ;;  %2619 = vst.msk [vmem:[#allocation3 + $0x118] sm:$0xff] %vm33_vm0, %v2555_v59 }
 0x158   :  { %v3403_v41 = vld [vmem:[#allocation4 + $0x20] sm:$0xff]  ;;  %3114 = vrot.lane.b32.xlu1 %v6894_v2, %s5625_s17  ;;  %v903_v38 = vadd.f32 %v839_v7, %v703_v55  ;;  %v904_v28 = vadd.f32 %v840_v49, %v704_v61  ;;  %v1437_v44 = vmul.f32 %v6857_v19, %v767_v20  ;;  %v1637_v42 = vmul.f32 %v6888_v51, %v967_v45  ;;  %v770_v47 = vld [vmem:[#allocation2 + $0x231] sm:$0xff] }
 0x159   :  { %v6955_v9 = vld [vmem:[#allocation4 + $0x22] sm:$0xff]  ;;  %3435 = vrot.lane.b32.xlu0 %v3403_v41, %s5625_s17  ;;  %2618 = vst.msk [vmem:[#allocation3 + $0x110] sm:$0xff] %vm33_vm0, %v2554_v5  ;;  %v1502_v57 = vadd.f32 %v1438_v36, %v1302_v23  ;;  %v2028_v34 = vmul.f32 %v6899_v39, %v632_v40  ;;  %v2029_v2 = vmul.f32 %v6899_v39, %v633_v32  ;;  %v970_v29 = vld [vmem:[#allocation2 + $0x232] sm:$0xff] }
 0x15a   :  { %v2164_v49 = vmul.f32 %v6865_v21, %v767_v20  ;;  %3611 = vst.msk [vmem:[#allocation5 + $0x10] sm:$0xff] %vm33_vm0, %v6955_v9  ;;  %v1103_v60 = vadd.f32 %v1039_v27, %v903_v38  ;;  %v1104_v12 = vadd.f32 %v1040_v13, %v904_v28  ;;  %v1501_v17 = vadd.f32 %v1437_v44, %v1301_v35  ;;  %v1766_v59 = vld [vmem:[#allocation3 + $0x138] sm:$0xff]  ;;  %v3275_v61 = vld [vmem:[#allocation4 + $0x21] sm:$0xff]  ;;  %v1765_v36 = vld [vmem:[#allocation3 + $0x130] sm:$0xff] }
 0x15b   :  { %v2364_v55 = vmul.f32 %v6916_v46, %v967_v45  ;;  %v1702_v7 = vadd.f32 %v1638_v24, %v1502_v57  ;;  %v2229_v40 = vadd.f32 %v2165_v14, %v2029_v2  ;;  %v5400_v23 = vpack.c.bf16 %v3710_v10, %v3709_v30  ;;  %v634_v32 = vld [vmem:[#allocation2 + $0x228] sm:$0xff]  ;;  %3291 = vst.msk [vmem:[#allocation5 + $0x20] sm:$0xff] %vm33_vm0, %v3275_v61 }
 0x15c   :  { %v2228_v5 = vadd.f32 %v2164_v49, %v2028_v34  ;;  %v3499_v20 = vld [vmem:[#allocation4 + $0x21] sm:$0xff]  ;;  %1167 = vst.msk [vmem:[#allocation3 + $0x140] sm:$0xff] %vm33_vm0, %v1103_v60  ;;  %1168 = vst.msk [vmem:[#allocation3 + $0x148] sm:$0xff] %vm33_vm0, %v1104_v12  ;;  %v1701_v13 = vadd.f32 %v1637_v42, %v1501_v17  ;;  %3211 = vrot.lane.b32.xlu1 %v3403_v41, %s5626_s30  ;;  %v842_v45 = vmul.f32 %v6795_v56, %v770_v47  ;;  %v769_v14 = vld [vmem:[#allocation2 + $0x229] sm:$0xff] }
 0x15d   :  { %v1042_v24 = vmul.f32 %v6801_v3, %v970_v29  ;;  %v1440_v27 = vmul.f32 %v6857_v19, %v770_v47  ;;  %v969_v35 = vld [vmem:[#allocation2 + $0x22a] sm:$0xff]  ;;  %3531 = vrot.lane.b32.xlu0 %v3499_v20, %s5626_s30  ;;  %v1830_v30 = vadd.f32 %v1766_v59, %v1702_v7  ;;  %v2429_v28 = vadd.f32 %v2365_v50, %v2229_v40  ;;  %v2492_v44 = vld [vmem:[#allocation3 + $0x120] sm:$0xff] }
 0x15e   :  { %v2428_v38 = vadd.f32 %v2364_v55, %v2228_v5  ;;  %v2493_v10 = vld [vmem:[#allocation3 + $0x128] sm:$0xff]  ;;  %5401 = vmatprep.subr.bf16.mxu1 %v5400_v23  ;;  %v6980_v41 = vsel %vm33_vm0, %v2782_v63, -inf  ;;  %v2953_v42 = vld [vmem:[#allocation4 + $0x20] sm:$0xff]  ;;  %v1829_v57 = vadd.f32 %v1765_v36, %v1701_v13  ;;  %v1640_v34 = vmul.f32 %v6888_v51, %v970_v29 }
 0x15f   :  { %v2167_v2 = vmul.f32 %v6865_v21, %v770_v47  ;;  %v2367_v49 = vmul.f32 %v6916_v46, %v970_v29  ;;  %5403 = vmatpush3.bf16.msra.mxu1 %v5400_v23  ;;  %2969 = vst.msk [vmem:[#allocation5 + $0x30] sm:$0xff] %vm33_vm0, %v2953_v42  ;;  %1894 = vst.msk [vmem:[#allocation3 + $0x138] sm:$0xff] %vm33_vm0, %v1830_v30  ;;  %v2557_v60 = vadd.f32 %v2493_v10, %v2429_v28  ;;  %v2656_v7 = vld [vmem:[#allocation3 + $0x40] ss:$2 sm:$0xff]  ;;  %v2720_v36 = vld [vmem:[#allocation3 + $0x41] ss:$2 sm:$0xff] }
 0x160   :  { %v2556_v50 = vadd.f32 %v2492_v44, %v2428_v38  ;;  %v705_v53 = vmul.f32 %v6820_v15, %v634_v32  ;;  %v706_v54 = vmul.f32 %v6820_v15, %v635_v48  ;;  %1893 = vst.msk [vmem:[#allocation3 + $0x130] sm:$0xff] %vm33_vm0, %v1829_v57  ;;  %v841_v12 = vmul.f32 %v6795_v56, %v769_v14  ;;  %v2658_v30 = vld [vmem:[#allocation3 + $0x50] ss:$2 sm:$0xff] }
 0x161   :  { %v3629_v63 = vld [vmem:[#allocation5 + $0x10] sm:$0xff]  ;;  %v1041_v47 = vmul.f32 %v6801_v3, %v969_v35  ;;  %v1303_v29 = vmul.f32 %v6880_v11, %v634_v32  ;;  %v1304_v17 = vmul.f32 %v6880_v11, %v635_v48  ;;  %3019 = vrot.lane.b32.xlu1 %v3499_v20, %s5624_s0  ;;  %2621 = vst.msk [vmem:[#allocation3 + $0x128] sm:$0xff] %vm33_vm0, %v2557_v60  ;;  %v7006_v5 = vsel %vm33_vm0, %v2783_v0, -inf }
 0x162   :  { %2620 = vst.msk [vmem:[#allocation3 + $0x120] sm:$0xff] %vm33_vm0, %v2556_v50  ;;  %5305 = vmatprep.mubr.msk.f32.mxu1 %vm33_vm0, %v3629_v63  ;;  %3340 = vrot.lane.b32.xlu0 %v6955_v9, %s5624_s0  ;;  %v906_v59 = vadd.f32 %v842_v45, %v706_v54  ;;  %v1439_v55 = vmul.f32 %v6857_v19, %v769_v14  ;;  %v2722_v45 = vld [vmem:[#allocation3 + $0x51] ss:$2 sm:$0xff]  ;;  %v772_v38 = vld [vmem:[#allocation2 + $0x249] sm:$0xff] }
 0x163   :  { %v1639_v61 = vmul.f32 %v6888_v51, %v969_v35  ;;  %v905_v40 = vadd.f32 %v841_v12, %v705_v53  ;;  %v1504_v23 = vadd.f32 %v1440_v27, %v1304_v17  ;;  %v2030_v20 = vmul.f32 %v6899_v39, %v634_v32  ;;  %v1768_v10 = vld [vmem:[#allocation3 + $0x148] sm:$0xff]  ;;  %v1767_v50 = vld [vmem:[#allocation3 + $0x140] sm:$0xff] }
 0x164   :  { %v2031_v13 = vmul.f32 %v6899_v39, %v635_v48  ;;  %v1106_v28 = vadd.f32 %v1042_v24, %v906_v59  ;;  %v1503_v44 = vadd.f32 %v1439_v55, %v1303_v29  ;;  %v2166_v42 = vmul.f32 %v6865_v21, %v769_v14  ;;  %v3602_v48 = vld [vmem:[#allocation4 + $0x92] sm:$0xff]  ;;  %v637_v12 = vld [vmem:[#allocation2 + $0x248] sm:$0xff] }
 0x165   :  { %v2366_v57 = vmul.f32 %v6916_v46, %v969_v35  ;;  %v1105_v4 = vadd.f32 %v1041_v47, %v905_v40  ;;  %v1704_v0 = vadd.f32 %v1640_v34, %v1504_v23  ;;  %v2779_v27 = vmax.f32 %v2656_v7, %v2720_v36  ;;  %3116 = vrot.lane.b32.xlu1 %v6955_v9, %s5625_s17  ;;  %v636_v9 = vld [vmem:[#allocation2 + $0x240] sm:$0xff] }
 0x166   :  { %v2231_v60 = vadd.f32 %v2167_v2, %v2031_v13  ;;  %1170 = vst.msk [vmem:[#allocation3 + $0x158] sm:$0xff] %vm33_vm0, %v1106_v28  ;;  %v1703_v32 = vadd.f32 %v1639_v61, %v1503_v44  ;;  %v2230_v24 = vadd.f32 %v2166_v42, %v2030_v20  ;;  %v2780_v53 = vmax.f32 %v2658_v30, %v2722_v45  ;;  %v2495_v34 = vld [vmem:[#allocation3 + $0x138] sm:$0xff]  ;;  %v771_v61 = vld [vmem:[#allocation2 + $0x241] sm:$0xff] }
 0x167   :  { %v844_v54 = vmul.f32 %v6795_v56, %v772_v38  ;;  %3618 = vst.msk [vmem:[#allocation5 + $0xb8] sm:$0xff] %vm33_vm0, %v3602_v48  ;;  %1169 = vst.msk [vmem:[#allocation3 + $0x150] sm:$0xff] %vm33_vm0, %v1105_v4  ;;  %v1832_v14 = vadd.f32 %v1768_v10, %v1704_v0  ;;  %v2813_v2 = vsel %vm33_vm0, %v2779_v27, -inf  ;;  %v1044_v63 = vmul.f32 %v6801_v3, %v972_v43  ;;  %v2494_v17 = vld [vmem:[#allocation3 + $0x130] sm:$0xff]  ;;  %v971_v7 = vld [vmem:[#allocation2 + $0x242] sm:$0xff] }
 0x168   :  { %v2431_v35 = vadd.f32 %v2367_v49, %v2231_v60  ;;  %v1831_v47 = vadd.f32 %v1767_v50, %v1703_v32  ;;  %v2430_v29 = vadd.f32 %v2366_v57, %v2230_v24  ;;  %v2814_v59 = vsel %vm33_vm0, %v2780_v53, -inf  ;;  %v774_v60 = vld [vmem:[#allocation2 + $0x261] sm:$0xff] }
 0x169   :  { %v1442_v55 = vmul.f32 %v6857_v19, %v772_v38  ;;  %v7022_v36 = vld [vmem:[#allocation3 + $0x120] ss:$2 sm:$0xff]  ;;  %v7024_v40 = vld [vmem:[#allocation3 + $0x121] ss:$2 sm:$0xff]  ;;  %1896 = vst.msk [vmem:[#allocation3 + $0x148] sm:$0xff] %vm33_vm0, %v1832_v14  ;;  %v2815_v23 = vmax.f32 %v2813_v2, %v2814_v59  ;;  %v1642_v20 = vmul.f32 %v6888_v51, %v972_v43  ;;  %v2169_v13 = vmul.f32 %v6865_v21, %v772_v38 }
 0x16a   :  { %v2559_v49 = vadd.f32 %v2495_v34, %v2431_v35  ;;  %1895 = vst.msk [vmem:[#allocation3 + $0x140] sm:$0xff] %vm33_vm0, %v1831_v47  ;;  %v2558_v45 = vadd.f32 %v2494_v17, %v2430_v29  ;;  %v2369_v28 = vmul.f32 %v6916_v46, %v972_v43  ;;  %v707_v44 = vmul.f32 %v6820_v15, %v636_v9  ;;  %v974_v2 = vld [vmem:[#allocation2 + $0x262] sm:$0xff] }
 0x16b   :  { %v2864_v10 = vadd.f32 %v6814_v37, %v2815_v23  ;;  %v708_v42 = vmul.f32 %v6820_v15, %v637_v12  ;;  %v843_v57 = vmul.f32 %v6795_v56, %v771_v61  ;;  %v1043_v38 = vmul.f32 %v6801_v3, %v971_v7 }
 0x16c   :  { %2623 = vst.msk [vmem:[#allocation3 + $0x138] sm:$0xff] %vm33_vm0, %v2559_v49  ;;  %2622 = vst.msk [vmem:[#allocation3 + $0x130] sm:$0xff] %vm33_vm0, %v2558_v45  ;;  %v1305_v4 = vmul.f32 %v6880_v11, %v636_v9  ;;  %v1306_v0 = vmul.f32 %v6880_v11, %v637_v12  ;;  %v1441_v43 = vmul.f32 %v6857_v19, %v771_v61 }
 0x16d   :  { %v1641_v50 = vmul.f32 %v6888_v51, %v971_v7  ;;  %v2880_v27 = vmax.f32 %v2864_v10, 0.0  ;;  %v907_v48 = vadd.f32 %v843_v57, %v707_v44  ;;  %v908_v32 = vadd.f32 %v844_v54, %v708_v42  ;;  %v1770_v59 = vld [vmem:[#allocation3 + $0x158] sm:$0xff]  ;;  %v639_v10 = vld [vmem:[#allocation2 + $0x260] sm:$0xff] }
 0x16e   :  { %v2032_v24 = vmul.f32 %v6899_v39, %v636_v9  ;;  %v1505_v53 = vadd.f32 %v1441_v43, %v1305_v4  ;;  %v1506_v14 = vadd.f32 %v1442_v55, %v1306_v0  ;;  %v2033_v35 = vmul.f32 %v6899_v39, %v637_v12  ;;  %v1769_v17 = vld [vmem:[#allocation3 + $0x150] sm:$0xff]  ;;  %v638_v55 = vld [vmem:[#allocation2 + $0x258] sm:$0xff] }
 0x16f   :  { %v2168_v34 = vmul.f32 %v6865_v21, %v771_v61  ;;  %2937 = vst.msk [vmem:[#allocation4 + $0x31] sm:$0xff] %vm33_vm0, %v2880_v27  ;;  %v1107_v47 = vadd.f32 %v1043_v38, %v907_v48  ;;  %v1108_v29 = vadd.f32 %v1044_v63, %v908_v32  ;;  %v2368_v49 = vmul.f32 %v6916_v46, %v971_v7  ;;  %v773_v12 = vld [vmem:[#allocation2 + $0x259] sm:$0xff] }
 0x170   :  { %v846_v23 = vmul.f32 %v6795_v56, %v774_v60  ;;  %v1705_v54 = vadd.f32 %v1641_v50, %v1505_v53  ;;  %v1706_v45 = vadd.f32 %v1642_v20, %v1506_v14  ;;  %v2233_v44 = vadd.f32 %v2169_v13, %v2033_v35  ;;  %v2497_v42 = vld [vmem:[#allocation3 + $0x148] sm:$0xff]  ;;  %v973_v20 = vld [vmem:[#allocation2 + $0x25a] sm:$0xff] }
 0x171   :  { %v2232_v9 = vadd.f32 %v2168_v34, %v2032_v24  ;;  %1171 = vst.msk [vmem:[#allocation3 + $0x160] sm:$0xff] %vm33_vm0, %v1107_v47  ;;  %1172 = vst.msk [vmem:[#allocation3 + $0x168] sm:$0xff] %vm33_vm0, %v1108_v29  ;;  %v2496_v61 = vld [vmem:[#allocation3 + $0x140] sm:$0xff]  ;;  %v1046_v63 = vmul.f32 %v6801_v3, %v974_v2  ;;  %v1444_v57 = vmul.f32 %v6857_v19, %v774_v60 }
 0x172   :  { %v1644_v7 = vmul.f32 %v6888_v51, %v974_v2  ;;  %v2171_v38 = vmul.f32 %v6865_v21, %v774_v60  ;;  %v1833_v4 = vadd.f32 %v1769_v17, %v1705_v54  ;;  %v1834_v13 = vadd.f32 %v1770_v59, %v1706_v45  ;;  %v776_v17 = vld [vmem:[#allocation2 + $0x279] sm:$0xff] }
 0x173   :  { %v2432_v0 = vadd.f32 %v2368_v49, %v2232_v9  ;;  %v2433_v43 = vadd.f32 %v2369_v28, %v2233_v44  ;;  %v7056_v50 = vld [vmem:[#allocation3 + $0x130] ss:$2 sm:$0xff]  ;;  %v7058_v27 = vld [vmem:[#allocation3 + $0x131] ss:$2 sm:$0xff]  ;;  %v2371_v48 = vmul.f32 %v6916_v46, %v974_v2  ;;  %v709_v32 = vmul.f32 %v6820_v15, %v638_v55 }
 0x174   :  { %v710_v24 = vmul.f32 %v6820_v15, %v639_v10  ;;  %v845_v53 = vmul.f32 %v6795_v56, %v773_v12  ;;  %1897 = vst.msk [vmem:[#allocation3 + $0x150] sm:$0xff] %vm33_vm0, %v1833_v4  ;;  %1898 = vst.msk [vmem:[#allocation3 + $0x158] sm:$0xff] %vm33_vm0, %v1834_v13  ;;  %v1045_v35 = vmul.f32 %v6801_v3, %v973_v20  ;;  %v976_v44 = vld [vmem:[#allocation2 + $0x27a] sm:$0xff] }
 0x175   :  { %v2560_v28 = vadd.f32 %v2496_v61, %v2432_v0  ;;  %v2561_v14 = vadd.f32 %v2497_v42, %v2433_v43  ;;  %v1307_v2 = vmul.f32 %v6880_v11, %v638_v55  ;;  %v1308_v29 = vmul.f32 %v6880_v11, %v639_v10 }
 0x176   :  { %v909_v34 = vadd.f32 %v845_v53, %v709_v32  ;;  %v910_v47 = vadd.f32 %v846_v23, %v710_v24  ;;  %v3404_v59 = vld [vmem:[#allocation4 + $0x30] sm:$0xff]  ;;  %v1443_v54 = vmul.f32 %v6857_v19, %v773_v12  ;;  %v1643_v45 = vmul.f32 %v6888_v51, %v973_v20 }
 0x177   :  { %2624 = vst.msk [vmem:[#allocation3 + $0x140] sm:$0xff] %vm33_vm0, %v2560_v28  ;;  %2625 = vst.msk [vmem:[#allocation3 + $0x148] sm:$0xff] %vm33_vm0, %v2561_v14  ;;  %v7073_v49 = vld [vmem:[#allocation4 + $0x32] sm:$0xff]  ;;  %v2034_v9 = vmul.f32 %v6899_v39, %v638_v55  ;;  %v2035_v23 = vmul.f32 %v6899_v39, %v639_v10  ;;  %3437 = vrot.lane.b32.xlu0 %v3404_v59, %s5625_s17  ;;  %v1508_v4 = vadd.f32 %v1444_v57, %v1308_v29 }
 0x178   :  { %3612 = vst.msk [vmem:[#allocation5 + $0x28] sm:$0xff] %vm33_vm0, %v7073_v49  ;;  %v1109_v61 = vadd.f32 %v1045_v35, %v909_v34  ;;  %v1110_v42 = vadd.f32 %v1046_v63, %v910_v47  ;;  %v2170_v13 = vmul.f32 %v6865_v21, %v773_v12  ;;  %v3276_v0 = vld [vmem:[#allocation4 + $0x31] sm:$0xff]  ;;  %v1507_v32 = vadd.f32 %v1443_v54, %v1307_v2  ;;  %v1772_v24 = vld [vmem:[#allocation3 + $0x168] sm:$0xff]  ;;  %v1771_v63 = vld [vmem:[#allocation3 + $0x160] sm:$0xff] }
 0x179   :  { %v2954_v43 = vld [vmem:[#allocation4 + $0x30] sm:$0xff]  ;;  %v2235_v53 = vadd.f32 %v2171_v38, %v2035_v23  ;;  %v2370_v55 = vmul.f32 %v6916_v46, %v973_v20  ;;  %3213 = vrot.lane.b32.xlu1 %v3404_v59, %s5626_s30  ;;  %v848_v10 = vmul.f32 %v6795_v56, %v776_v17  ;;  %v641_v14 = vld [vmem:[#allocation2 + $0x278] sm:$0xff]  ;;  %3292 = vst.msk [vmem:[#allocation5 + $0x38] sm:$0xff] %vm33_vm0, %v3276_v0  ;;  %v2951_v34 = vld [vmem:[#allocation4] sm:$0xff] }
 0x17a   :  { %v640_v28 = vld [vmem:[#allocation2 + $0x270] sm:$0xff]  ;;  %2970 = vst.msk [vmem:[#allocation5 + $0x48] sm:$0xff] %vm33_vm0, %v2954_v43  ;;  %1173 = vst.msk [vmem:[#allocation3 + $0x170] sm:$0xff] %vm33_vm0, %v1109_v61  ;;  %v1708_v12 = vadd.f32 %v1644_v7, %v1508_v4  ;;  %v2234_v57 = vadd.f32 %v2170_v13, %v2034_v9  ;;  %v1048_v38 = vmul.f32 %v6801_v3, %v976_v44 }
 0x17b   :  { %1174 = vst.msk [vmem:[#allocation3 + $0x178] sm:$0xff] %vm33_vm0, %v1110_v42  ;;  %v1446_v20 = vmul.f32 %v6857_v19, %v776_v17  ;;  %v775_v35 = vld [vmem:[#allocation2 + $0x271] sm:$0xff]  ;;  %v1707_v2 = vadd.f32 %v1643_v45, %v1507_v32  ;;  %v2435_v29 = vadd.f32 %v2371_v48, %v2235_v53  ;;  %v1646_v59 = vmul.f32 %v6888_v51, %v976_v44 }
 0x17c   :  { %v3500_v47 = vld [vmem:[#allocation4 + $0x31] sm:$0xff]  ;;  %v2173_v54 = vmul.f32 %v6865_v21, %v776_v17  ;;  %2967 = vst.msk [vmem:[#allocation5] sm:$0xff] %vm33_vm0, %v2951_v34  ;;  %v1836_v7 = vadd.f32 %v1772_v24, %v1708_v12  ;;  %v2434_v9 = vadd.f32 %v2370_v55, %v2234_v57  ;;  %v2373_v4 = vmul.f32 %v6916_v46, %v976_v44 }
 0x17d   :  { %v975_v23 = vld [vmem:[#allocation2 + $0x272] sm:$0xff]  ;;  %3533 = vrot.lane.b32.xlu0 %v3500_v47, %s5626_s30  ;;  %v711_v13 = vmul.f32 %v6820_v15, %v640_v28  ;;  %v1835_v0 = vadd.f32 %v1771_v63, %v1707_v2  ;;  %v712_v48 = vmul.f32 %v6820_v15, %v641_v14  ;;  %v847_v43 = vmul.f32 %v6795_v56, %v775_v35 }
 0x17e   :  { %v2498_v61 = vld [vmem:[#allocation3 + $0x150] sm:$0xff]  ;;  %v2499_v42 = vld [vmem:[#allocation3 + $0x158] sm:$0xff]  ;;  %3021 = vrot.lane.b32.xlu1 %v3500_v47, %s5624_s0  ;;  %v7101_v17 = vld [vmem:[#allocation3 + $0x140] ss:$2 sm:$0xff]  ;;  %1900 = vst.msk [vmem:[#allocation3 + $0x168] sm:$0xff] %vm33_vm0, %v1836_v7  ;;  %v1047_v53 = vmul.f32 %v6801_v3, %v975_v23  ;;  %v1309_v44 = vmul.f32 %v6880_v11, %v640_v28  ;;  %v1310_v55 = vmul.f32 %v6880_v11, %v641_v14 }
 0x17f   :  { %v2563_v45 = vadd.f32 %v2499_v42, %v2435_v29  ;;  %v7103_v32 = vld [vmem:[#allocation3 + $0x141] ss:$2 sm:$0xff]  ;;  %v2562_v24 = vadd.f32 %v2498_v61, %v2434_v9  ;;  %1899 = vst.msk [vmem:[#allocation3 + $0x160] sm:$0xff] %vm33_vm0, %v1835_v0  ;;  %v911_v57 = vadd.f32 %v847_v43, %v711_v13  ;;  %v912_v34 = vadd.f32 %v848_v10, %v712_v48  ;;  %v778_v9 = vld [vmem:[#allocation2 + $0x291] sm:$0xff] }
 0x180   :  { %v3632_v63 = vld [vmem:[#allocation5 + $0x28] sm:$0xff]  ;;  %v1445_v47 = vmul.f32 %v6857_v19, %v775_v35  ;;  %v1510_v2 = vadd.f32 %v1446_v20, %v1310_v55  ;;  %v1645_v29 = vmul.f32 %v6888_v51, %v975_v23  ;;  %v2036_v7 = vmul.f32 %v6899_v39, %v640_v28  ;;  %v978_v43 = vld [vmem:[#allocation2 + $0x292] sm:$0xff] }
 0x181   :  { %2627 = vst.msk [vmem:[#allocation3 + $0x158] sm:$0xff] %vm33_vm0, %v2563_v45  ;;  %5306 = vmatmul.mubr.msk.f32.vlgmr.msra.gmra.mrb[0].mxu1 %vm33_vm0, %v3632_v63  ;;  %2626 = vst.msk [vmem:[#allocation3 + $0x150] sm:$0xff] %vm33_vm0, %v2562_v24  ;;  %3342 = vrot.lane.b32.xlu0 %v7073_v49, %s5624_s0  ;;  %v8701_v61 = vmax.f32 %v6656_v16, %v6658_v58  ;;  %v1111_v42 = vadd.f32 %v1047_v53, %v911_v57  ;;  %v1773_v24 = vld [vmem:[#allocation3 + $0x170] sm:$0xff] }
 0x182   :  { %v1112_v13 = vadd.f32 %v1048_v38, %v912_v34  ;;  %v1509_v0 = vadd.f32 %v1445_v47, %v1309_v44  ;;  %v1774_v45 = vld [vmem:[#allocation3 + $0x178] sm:$0xff]  ;;  %v2037_v48 = vmul.f32 %v6899_v39, %v641_v14  ;;  %3118 = vrot.lane.b32.xlu1 %v7073_v49, %s5625_s17  ;;  %v1710_v20 = vadd.f32 %v1646_v59, %v1510_v2  ;;  %v977_v2 = vld [vmem:[#allocation2 + $0x28a] sm:$0xff] }
 0x183   :  { %v7124_v10 = vsel %vm33_vm0, %v8701_v61, -inf  ;;  %v2172_v28 = vmul.f32 %v6865_v21, %v775_v35  ;;  %v2818_v16 = vmax.f32 %v6930_v62, %v6980_v41  ;;  %v8702_v58 = vmax.f32 %v6689_v6, %v6691_v8  ;;  %1175 = vst.msk [vmem:[#allocation3 + $0x180] sm:$0xff] %vm33_vm0, %v1111_v42  ;;  %v642_v35 = vld [vmem:[#allocation2 + $0x288] sm:$0xff]  ;;  %v643_v8 = vld [vmem:[#allocation2 + $0x290] sm:$0xff] }
 0x184   :  { %1176 = vst.msk [vmem:[#allocation3 + $0x188] sm:$0xff] %vm33_vm0, %v1112_v13  ;;  %v1709_v14 = vadd.f32 %v1645_v29, %v1509_v0  ;;  %v2237_v53 = vadd.f32 %v2173_v54, %v2037_v48  ;;  %v2372_v49 = vmul.f32 %v6916_v46, %v975_v23  ;;  %v850_v59 = vmul.f32 %v6795_v56, %v778_v9  ;;  %v777_v41 = vld [vmem:[#allocation2 + $0x289] sm:$0xff] }
 0x185   :  { %v7136_v38 = vsel %vm33_vm0, %v8702_v58, -inf  ;;  %v1838_v44 = vadd.f32 %v1774_v45, %v1710_v20  ;;  %v2236_v55 = vadd.f32 %v2172_v28, %v2036_v7  ;;  %v2865_v62 = vadd.f32 %v6814_v37, %v2818_v16  ;;  %v2501_v34 = vld [vmem:[#allocation3 + $0x168] sm:$0xff] }
 0x186   :  { %v1050_v6 = vmul.f32 %v6801_v3, %v978_v43  ;;  %v1837_v63 = vadd.f32 %v1773_v24, %v1709_v14  ;;  %v2437_v57 = vadd.f32 %v2373_v4, %v2237_v53  ;;  %v1448_v47 = vmul.f32 %v6857_v19, %v778_v9  ;;  %v2500_v29 = vld [vmem:[#allocation3 + $0x160] sm:$0xff] }
 0x187   :  { %v1648_v54 = vmul.f32 %v6888_v51, %v978_v43  ;;  %1902 = vst.msk [vmem:[#allocation3 + $0x178] sm:$0xff] %vm33_vm0, %v1838_v44  ;;  %v2436_v23 = vadd.f32 %v2372_v49, %v2236_v55  ;;  %v2881_v61 = vmax.f32 %v2865_v62, 0.0  ;;  %v2175_v7 = vmul.f32 %v6865_v21, %v778_v9  ;;  %v780_v49 = vld [vmem:[#allocation2 + $0x2a9] sm:$0xff] }
 0x188   :  { %v713_v37 = vmul.f32 %v6820_v15, %v642_v35  ;;  %v7149_v42 = vld [vmem:[#allocation3 + $0x150] ss:$2 sm:$0xff]  ;;  %v7151_v13 = vld [vmem:[#allocation3 + $0x151] ss:$2 sm:$0xff]  ;;  %1901 = vst.msk [vmem:[#allocation3 + $0x170] sm:$0xff] %vm33_vm0, %v1837_v63  ;;  %v2565_v4 = vadd.f32 %v2501_v34, %v2437_v57  ;;  %v2375_v0 = vmul.f32 %v6916_v46, %v978_v43  ;;  %v714_v45 = vmul.f32 %v6820_v15, %v643_v8 }
 0x189   :  { %v849_v48 = vmul.f32 %v6795_v56, %v777_v41  ;;  %v2564_v20 = vadd.f32 %v2500_v29, %v2436_v23  ;;  %2938 = vst.msk [vmem:[#allocation4 + $0x41] sm:$0xff] %vm33_vm0, %v2881_v61  ;;  %v1049_v9 = vmul.f32 %v6801_v3, %v977_v2  ;;  %v1311_v24 = vmul.f32 %v6880_v11, %v642_v35  ;;  %v980_v44 = vld [vmem:[#allocation2 + $0x2aa] sm:$0xff] }
 0x18a   :  { %v1312_v28 = vmul.f32 %v6880_v11, %v643_v8  ;;  %2629 = vst.msk [vmem:[#allocation3 + $0x168] sm:$0xff] %vm33_vm0, %v2565_v4  ;;  %v914_v43 = vadd.f32 %v850_v59, %v714_v45  ;;  %v1447_v15 = vmul.f32 %v6857_v19, %v777_v41  ;;  %v2038_v14 = vmul.f32 %v6899_v39, %v642_v35  ;;  %v1775_v23 = vld [vmem:[#allocation3 + $0x180] sm:$0xff]  ;;  %v645_v35 = vld [vmem:[#allocation2 + $0x2a8] sm:$0xff] }
 0x18b   :  { %v913_v58 = vadd.f32 %v849_v48, %v713_v37  ;;  %2628 = vst.msk [vmem:[#allocation3 + $0x160] sm:$0xff] %vm33_vm0, %v2564_v20  ;;  %v2039_v3 = vmul.f32 %v6899_v39, %v643_v8  ;;  %v2174_v53 = vmul.f32 %v6865_v21, %v777_v41  ;;  %v1647_v57 = vmul.f32 %v6888_v51, %v977_v2  ;;  %v1776_v34 = vld [vmem:[#allocation3 + $0x188] sm:$0xff]  ;;  %v644_v37 = vld [vmem:[#allocation2 + $0x2a0] sm:$0xff] }
 0x18c   :  { %v1512_v56 = vadd.f32 %v1448_v47, %v1312_v28  ;;  %v1114_v62 = vadd.f32 %v1050_v6, %v914_v43  ;;  %v1511_v63 = vadd.f32 %v1447_v15, %v1311_v24  ;;  %v2374_v47 = vmul.f32 %v6916_v46, %v977_v2  ;;  %v7176_v6 = vld [vmem:[%s8690_s1 + $0x1] ss:$0 sm:$0xff] }
 0x18d   :  { %v1113_v55 = vadd.f32 %v1049_v9, %v913_v58  ;;  %v2238_v29 = vadd.f32 %v2174_v53, %v2038_v14  ;;  %v2239_v61 = vadd.f32 %v2175_v7, %v2039_v3  ;;  %v7182_v7 = vld [vmem:[%s8690_s1 + $0x2] ss:$0 sm:$0xff]  ;;  %v1450_v4 = vmul.f32 %v6857_v19, %v780_v49  ;;  %v7193_v14 = vld [vmem:[%s8690_s1] ss:$0 sm:$0xff] }
 0x18e   :  { %v1712_v59 = vadd.f32 %v1648_v54, %v1512_v56  ;;  %1178 = vst.msk [vmem:[#allocation3 + $0x198] sm:$0xff] %vm33_vm0, %v1114_v62  ;;  %v1711_v8 = vadd.f32 %v1647_v57, %v1511_v63  ;;  %v2503_v41 = vld [vmem:[#allocation3 + $0x178] sm:$0xff]  ;;  %v852_v54 = vmul.f32 %v7176_v6, %v780_v49  ;;  %v1052_v2 = vmul.f32 %v7182_v7, %v980_v44  ;;  %v779_v45 = vld [vmem:[#allocation2 + $0x2a1] sm:$0xff] }
 0x18f   :  { %1177 = vst.msk [vmem:[#allocation3 + $0x190] sm:$0xff] %vm33_vm0, %v1113_v55  ;;  %v2438_v20 = vadd.f32 %v2374_v47, %v2238_v29  ;;  %v2439_v9 = vadd.f32 %v2375_v0, %v2239_v61  ;;  %v2502_v24 = vld [vmem:[#allocation3 + $0x170] sm:$0xff]  ;;  %v1650_v28 = vmul.f32 %v6888_v51, %v980_v44  ;;  %v2177_v56 = vmul.f32 %v6865_v21, %v780_v49  ;;  %v979_v55 = vld [vmem:[#allocation2 + $0x2a2] sm:$0xff] }
 0x190   :  { %v1840_v48 = vadd.f32 %v1776_v34, %v1712_v59  ;;  %v7187_v58 = vld [vmem:[#allocation4 + $0x42] sm:$0xff]  ;;  %v1839_v15 = vadd.f32 %v1775_v23, %v1711_v8  ;;  %v715_v3 = vmul.f32 %v7193_v14, %v644_v37  ;;  %v716_v53 = vmul.f32 %v7193_v14, %v645_v35 }
 0x191   :  { %v3405_v43 = vld [vmem:[#allocation4 + $0x40] sm:$0xff]  ;;  %3613 = vst.msk [vmem:[#allocation5 + $0x40] sm:$0xff] %vm33_vm0, %v7187_v58  ;;  %v2566_v0 = vadd.f32 %v2502_v24, %v2438_v20  ;;  %v2567_v62 = vadd.f32 %v2503_v41, %v2439_v9  ;;  %v2377_v49 = vmul.f32 %v6916_v46, %v980_v44  ;;  %v851_v63 = vmul.f32 %v7176_v6, %v779_v45 }
 0x192   :  { %3439 = vrot.lane.b32.xlu0 %v3405_v43, %s5625_s17  ;;  %1904 = vst.msk [vmem:[#allocation3 + $0x188] sm:$0xff] %vm33_vm0, %v1840_v48  ;;  %v3277_v57 = vld [vmem:[#allocation4 + $0x41] sm:$0xff]  ;;  %1903 = vst.msk [vmem:[#allocation3 + $0x180] sm:$0xff] %vm33_vm0, %v1839_v15  ;;  %v916_v23 = vadd.f32 %v852_v54, %v716_v53  ;;  %v1313_v29 = vmul.f32 %v6880_v11, %v644_v37  ;;  %v1314_v61 = vmul.f32 %v6880_v11, %v645_v35 }
 0x193   :  { %v7203_v34 = vld [vmem:[#allocation3 + $0x160] ss:$2 sm:$0xff]  ;;  %v7205_v59 = vld [vmem:[#allocation3 + $0x161] ss:$2 sm:$0xff]  ;;  %v1449_v47 = vmul.f32 %v6857_v19, %v779_v45  ;;  %3215 = vrot.lane.b32.xlu1 %v3405_v43, %s5626_s30  ;;  %3293 = vst.msk [vmem:[#allocation5 + $0x50] sm:$0xff] %vm33_vm0, %v3277_v57  ;;  %2630 = vst.msk [vmem:[#allocation3 + $0x170] sm:$0xff] %vm33_vm0, %v2566_v0  ;;  %v915_v8 = vadd.f32 %v851_v63, %v715_v3  ;;  %v1051_v41 = vmul.f32 %v7182_v7, %v979_v55 }
 0x194   :  { %v2955_v44 = vld [vmem:[#allocation4 + $0x40] sm:$0xff]  ;;  %2631 = vst.msk [vmem:[#allocation3 + $0x178] sm:$0xff] %vm33_vm0, %v2567_v62  ;;  %v1649_v54 = vmul.f32 %v6888_v51, %v979_v55  ;;  %v2040_v48 = vmul.f32 %v6899_v39, %v644_v37  ;;  %v1116_v19 = vadd.f32 %v1052_v2, %v916_v23  ;;  %v1514_v9 = vadd.f32 %v1450_v4, %v1314_v61 }
 0x195   :  { %2971 = vst.msk [vmem:[#allocation5 + $0x60] sm:$0xff] %vm33_vm0, %v2955_v44  ;;  %v3501_v11 = vld [vmem:[#allocation4 + $0x41] sm:$0xff]  ;;  %v1513_v20 = vadd.f32 %v1449_v47, %v1313_v29  ;;  %v2041_v24 = vmul.f32 %v6899_v39, %v645_v35  ;;  %v1115_v3 = vadd.f32 %v1051_v41, %v915_v8  ;;  %v1778_v62 = vld [vmem:[#allocation3 + $0x198] sm:$0xff]  ;;  %v2176_v37 = vmul.f32 %v6865_v21, %v779_v45  ;;  %v7233_v23 = vld [vmem:[%s8691_s2] ss:$0 sm:$0xff] }
 0x196   :  { %v782_v43 = vld [vmem:[#allocation2 + $0x2c1] sm:$0xff]  ;;  %3535 = vrot.lane.b32.xlu0 %v3501_v11, %s5626_s30  ;;  %v1777_v0 = vld [vmem:[#allocation3 + $0x190] sm:$0xff]  ;;  %v2821_v63 = vmax.f32 %v7006_v5, %v7124_v10  ;;  %1180 = vst.msk [vmem:[#allocation3 + $0x1a8] sm:$0xff] %vm33_vm0, %v1116_v19  ;;  %v1714_v4 = vadd.f32 %v1650_v28, %v1514_v9  ;;  %v2376_v35 = vmul.f32 %v6916_v46, %v979_v55  ;;  %v646_v45 = vld [vmem:[#allocation2 + $0x2b8] sm:$0xff] }
 0x197   :  { %v982_v15 = vld [vmem:[#allocation2 + $0x2c2] sm:$0xff]  ;;  %v1713_v2 = vadd.f32 %v1649_v54, %v1513_v20  ;;  %v2241_v39 = vadd.f32 %v2177_v56, %v2041_v24  ;;  %3023 = vrot.lane.b32.xlu1 %v3501_v11, %s5624_s0  ;;  %1179 = vst.msk [vmem:[#allocation3 + $0x1a0] sm:$0xff] %vm33_vm0, %v1115_v3  ;;  %v2240_v57 = vadd.f32 %v2176_v37, %v2040_v48  ;;  %v781_v56 = vld [vmem:[#allocation2 + $0x2b9] sm:$0xff] }
 0x198   :  { %v2866_v21 = vadd.f32 %v7233_v23, %v2821_v63  ;;  %v854_v5 = vmul.f32 %v7176_v6, %v782_v43  ;;  %v1054_v10 = vmul.f32 %v7182_v7, %v982_v15  ;;  %v647_v28 = vld [vmem:[#allocation2 + $0x2c0] sm:$0xff]  ;;  %v1842_v61 = vadd.f32 %v1778_v62, %v1714_v4 }
 0x199   :  { %v3635_v55 = vld [vmem:[#allocation5 + $0x40] sm:$0xff]  ;;  %v1841_v29 = vadd.f32 %v1777_v0, %v1713_v2  ;;  %v2441_v47 = vadd.f32 %v2377_v49, %v2241_v39  ;;  %v2505_v44 = vld [vmem:[#allocation3 + $0x188] sm:$0xff]  ;;  %v2440_v48 = vadd.f32 %v2376_v35, %v2240_v57  ;;  %v1652_v20 = vmul.f32 %v6888_v51, %v982_v15 }
 0x19a   :  { %v7241_v8 = vld [vmem:[%s8690_s1 + $0x4] ss:$0 sm:$0xff]  ;;  %v981_v54 = vld [vmem:[#allocation2 + $0x2ba] sm:$0xff]  ;;  %5308 = vmatprep.mubr.msk.f32.mxu1 %vm33_vm0, %v3635_v55  ;;  %v2882_v19 = vmax.f32 %v2866_v21, 0.0  ;;  %3344 = vrot.lane.b32.xlu0 %v7187_v58, %s5624_s0  ;;  %v7251_v49 = vld [vmem:[%s8690_s1 + $0x7] ss:$0 sm:$0xff]  ;;  %v717_v3 = vmul.f32 %v7193_v14, %v646_v45  ;;  %v718_v0 = vmul.f32 %v7193_v14, %v647_v28  ;;  %v853_v62 = vmul.f32 %v7176_v6, %v781_v56 }
 0x19b   :  { %v1452_v41 = vmul.f32 %v7241_v8, %v782_v43  ;;  %v2504_v11 = vld [vmem:[#allocation3 + $0x180] sm:$0xff]  ;;  %v2179_v9 = vmul.f32 %v7251_v49, %v782_v43  ;;  %1905 = vst.msk [vmem:[#allocation3 + $0x190] sm:$0xff] %vm33_vm0, %v1841_v29  ;;  %1906 = vst.msk [vmem:[#allocation3 + $0x198] sm:$0xff] %vm33_vm0, %v1842_v61  ;;  %v2569_v24 = vadd.f32 %v2505_v44, %v2441_v47  ;;  %3120 = vrot.lane.b32.xlu1 %v7187_v58, %s5625_s17  ;;  %v7270_v4 = vld [vmem:[#allocation3 + $0x170] ss:$2 sm:$0xff] }
 0x19c   :  { %v2568_v51 = vadd.f32 %v2504_v11, %v2440_v48  ;;  %2939 = vst.msk [vmem:[#allocation4 + $0x51] sm:$0xff] %vm33_vm0, %v2882_v19  ;;  %v2379_v37 = vmul.f32 %v6916_v46, %v982_v15  ;;  %v1053_v43 = vmul.f32 %v7182_v7, %v981_v54  ;;  %v7267_v63 = vld [vmem:[%s8690_s1 + $0x3] ss:$0 sm:$0xff]  ;;  %v7272_v39 = vld [vmem:[#allocation3 + $0x171] ss:$2 sm:$0xff]  ;;  %v917_v58 = vadd.f32 %v853_v62, %v717_v3 }
 0x19d   :  { %v1315_v2 = vmul.f32 %v7267_v63, %v646_v45  ;;  %2633 = vst.msk [vmem:[#allocation3 + $0x188] sm:$0xff] %vm33_vm0, %v2569_v24  ;;  %v918_v35 = vadd.f32 %v854_v5, %v718_v0  ;;  %v1316_v57 = vmul.f32 %v7267_v63, %v647_v28  ;;  %v1451_v46 = vmul.f32 %v7241_v8, %v781_v56  ;;  %v7281_v15 = vld [vmem:[%s8690_s1 + $0x5] ss:$0 sm:$0xff]  ;;  %v7287_v55 = vld [vmem:[%s8690_s1 + $0x6] ss:$0 sm:$0xff]  ;;  %v784_v47 = vld [vmem:[#allocation2 + $0x2d9] sm:$0xff] }
 0x19e   :  { %2632 = vst.msk [vmem:[#allocation3 + $0x180] sm:$0xff] %vm33_vm0, %v2568_v51  ;;  %v1651_v21 = vmul.f32 %v7281_v15, %v981_v54  ;;  %v2042_v5 = vmul.f32 %v7287_v55, %v646_v45  ;;  %v2043_v29 = vmul.f32 %v7287_v55, %v647_v28  ;;  %v2178_v61 = vmul.f32 %v7251_v49, %v781_v56  ;;  %v984_v44 = vld [vmem:[#allocation2 + $0x2da] sm:$0xff]  ;;  %v1780_v62 = vld [vmem:[#allocation3 + $0x1a8] sm:$0xff]  ;;  %v648_v56 = vld [vmem:[#allocation2 + $0x2d0] sm:$0xff] }
 0x19f   :  { %v1117_v48 = vadd.f32 %v1053_v43, %v917_v58  ;;  %v1118_v11 = vadd.f32 %v1054_v10, %v918_v35  ;;  %v1515_v19 = vadd.f32 %v1451_v46, %v1315_v2  ;;  %v1516_v24 = vadd.f32 %v1452_v41, %v1316_v57  ;;  %v1779_v0 = vld [vmem:[#allocation3 + $0x1a0] sm:$0xff]  ;;  %v7297_v45 = vld [vmem:[%s8690_s1 + $0x8] ss:$0 sm:$0xff]  ;;  %v649_v58 = vld [vmem:[#allocation2 + $0x2d8] sm:$0xff] }
 0x1a0   :  { %v2242_v51 = vadd.f32 %v2178_v61, %v2042_v5  ;;  %v2243_v53 = vadd.f32 %v2179_v9, %v2043_v29  ;;  %v2378_v28 = vmul.f32 %v7297_v45, %v981_v54  ;;  %v856_v43 = vmul.f32 %v7176_v6, %v784_v47  ;;  %v783_v9 = vld [vmem:[#allocation2 + $0x2d1] sm:$0xff] }
 0x1a1   :  { %1181 = vst.msk [vmem:[#allocation3 + $0x1b0] sm:$0xff] %vm33_vm0, %v1117_v48  ;;  %1182 = vst.msk [vmem:[#allocation3 + $0x1b8] sm:$0xff] %vm33_vm0, %v1118_v11  ;;  %v1715_v10 = vadd.f32 %v1651_v21, %v1515_v19  ;;  %v1716_v41 = vadd.f32 %v1652_v20, %v1516_v24  ;;  %v1056_v2 = vmul.f32 %v7182_v7, %v984_v44  ;;  %v983_v24 = vld [vmem:[#allocation2 + $0x2d2] sm:$0xff] }
 0x1a2   :  { %v2442_v35 = vadd.f32 %v2378_v28, %v2242_v51  ;;  %v2443_v57 = vadd.f32 %v2379_v37, %v2243_v53  ;;  %v2506_v46 = vld [vmem:[#allocation3 + $0x190] sm:$0xff]  ;;  %v2507_v5 = vld [vmem:[#allocation3 + $0x198] sm:$0xff]  ;;  %v1454_v29 = vmul.f32 %v7241_v8, %v784_v47  ;;  %v1654_v54 = vmul.f32 %v7281_v15, %v984_v44 }
 0x1a3   :  { %v7306_v61 = vld [vmem:[#allocation4 + $0x52] sm:$0xff]  ;;  %v1843_v48 = vadd.f32 %v1779_v0, %v1715_v10  ;;  %v1844_v11 = vadd.f32 %v1780_v62, %v1716_v41  ;;  %v2181_v20 = vmul.f32 %v7251_v49, %v784_v47  ;;  %v719_v19 = vmul.f32 %v7193_v14, %v648_v56 }
 0x1a4   :  { %v3406_v21 = vld [vmem:[#allocation4 + $0x50] sm:$0xff]  ;;  %3614 = vst.msk [vmem:[#allocation5 + $0x58] sm:$0xff] %vm33_vm0, %v7306_v61  ;;  %v2570_v53 = vadd.f32 %v2506_v46, %v2442_v35  ;;  %v2571_v37 = vadd.f32 %v2507_v5, %v2443_v57  ;;  %v720_v51 = vmul.f32 %v7193_v14, %v649_v58  ;;  %v855_v28 = vmul.f32 %v7176_v6, %v783_v9 }
 0x1a5   :  { %3441 = vrot.lane.b32.xlu0 %v3406_v21, %s5625_s17  ;;  %v3278_v3 = vld [vmem:[#allocation4 + $0x51] sm:$0xff]  ;;  %v7315_v62 = vld [vmem:[#allocation3 + $0x180] ss:$2 sm:$0xff]  ;;  %v7317_v10 = vld [vmem:[#allocation3 + $0x181] ss:$2 sm:$0xff]  ;;  %1907 = vst.msk [vmem:[#allocation3 + $0x1a0] sm:$0xff] %vm33_vm0, %v1843_v48  ;;  %v2381_v47 = vmul.f32 %v7297_v45, %v984_v44  ;;  %v1317_v41 = vmul.f32 %v7267_v63, %v648_v56  ;;  %v1318_v35 = vmul.f32 %v7267_v63, %v649_v58 }
 0x1a6   :  { %v2956_v0 = vld [vmem:[#allocation4 + $0x50] sm:$0xff]  ;;  %1908 = vst.msk [vmem:[#allocation3 + $0x1a8] sm:$0xff] %vm33_vm0, %v1844_v11  ;;  %v1453_v57 = vmul.f32 %v7241_v8, %v783_v9  ;;  %3217 = vrot.lane.b32.xlu1 %v3406_v21, %s5626_s30  ;;  %3294 = vst.msk [vmem:[#allocation5 + $0x68] sm:$0xff] %vm33_vm0, %v3278_v3  ;;  %v919_v46 = vadd.f32 %v855_v28, %v719_v19  ;;  %v920_v5 = vadd.f32 %v856_v43, %v720_v51 }
 0x1a7   :  { %2972 = vst.msk [vmem:[#allocation5 + $0x78] sm:$0xff] %vm33_vm0, %v2956_v0  ;;  %2634 = vst.msk [vmem:[#allocation3 + $0x190] sm:$0xff] %vm33_vm0, %v2570_v53  ;;  %v1055_v44 = vmul.f32 %v7182_v7, %v983_v24  ;;  %v1653_v48 = vmul.f32 %v7281_v15, %v983_v24  ;;  %v1518_v16 = vadd.f32 %v1454_v29, %v1318_v35  ;;  %v3502_v60 = vld [vmem:[#allocation4 + $0x51] sm:$0xff] }
 0x1a8   :  { %2635 = vst.msk [vmem:[#allocation3 + $0x198] sm:$0xff] %vm33_vm0, %v2571_v37  ;;  %v1517_v11 = vadd.f32 %v1453_v57, %v1317_v41  ;;  %v2044_v12 = vmul.f32 %v7287_v55, %v648_v56  ;;  %v2045_v21 = vmul.f32 %v7287_v55, %v649_v58  ;;  %v786_v3 = vld [vmem:[#allocation2 + $0x2f1] sm:$0xff]  ;;  %v1120_v30 = vadd.f32 %v1056_v2, %v920_v5 }
 0x1a9   :  { %v1119_v53 = vadd.f32 %v1055_v44, %v919_v46  ;;  %v1781_v37 = vld [vmem:[#allocation3 + $0x1b0] sm:$0xff]  ;;  %v1782_v19 = vld [vmem:[#allocation3 + $0x1b8] sm:$0xff]  ;;  %v2180_v43 = vmul.f32 %v7251_v49, %v783_v9  ;;  %3537 = vrot.lane.b32.xlu0 %v3502_v60, %s5626_s30  ;;  %v1718_v29 = vadd.f32 %v1654_v54, %v1518_v16  ;;  %v8703_v56 = vmax.f32 %v6721_v26, %v6723_v18  ;;  %v650_v16 = vld [vmem:[#allocation2 + $0x2e8] sm:$0xff] }
 0x1aa   :  { %v986_v51 = vld [vmem:[#allocation2 + $0x2f2] sm:$0xff]  ;;  %v1717_v28 = vadd.f32 %v1653_v48, %v1517_v11  ;;  %v2245_v41 = vadd.f32 %v2181_v20, %v2045_v21  ;;  %3025 = vrot.lane.b32.xlu1 %v3502_v60, %s5624_s0  ;;  %1184 = vst.msk [vmem:[#allocation3 + $0x1c8] sm:$0xff] %vm33_vm0, %v1120_v30  ;;  %v2380_v9 = vmul.f32 %v7297_v45, %v983_v24  ;;  %v785_v60 = vld [vmem:[#allocation2 + $0x2e9] sm:$0xff] }
 0x1ab   :  { %v2823_v58 = vsel %vm33_vm0, %v8703_v56, -inf  ;;  %1183 = vst.msk [vmem:[#allocation3 + $0x1c0] sm:$0xff] %vm33_vm0, %v1119_v53  ;;  %v2244_v2 = vadd.f32 %v2180_v43, %v2044_v12  ;;  %v858_v57 = vmul.f32 %v7176_v6, %v786_v3  ;;  %v651_v54 = vld [vmem:[#allocation2 + $0x2f0] sm:$0xff]  ;;  %v3638_v20 = vld [vmem:[#allocation5 + $0x58] sm:$0xff]  ;;  %v1846_v26 = vadd.f32 %v1782_v19, %v1718_v29 }
 0x1ac   :  { %v2824_v35 = vmax.f32 %v7136_v38, %v2823_v58  ;;  %v1845_v46 = vadd.f32 %v1781_v37, %v1717_v28  ;;  %v2445_v18 = vadd.f32 %v2381_v47, %v2245_v41  ;;  %v1058_v5 = vmul.f32 %v7182_v7, %v986_v51  ;;  %5309 = vmatmul.mubr.msk.f32.gmra.mrb[2].mxu1 %vm33_vm0, %v3638_v20  ;;  %v2508_v30 = vld [vmem:[#allocation3 + $0x1a0] sm:$0xff]  ;;  %v985_v43 = vld [vmem:[#allocation2 + $0x2ea] sm:$0xff] }
 0x1ad   :  { %v2444_v44 = vadd.f32 %v2380_v9, %v2244_v2  ;;  %v2509_v12 = vld [vmem:[#allocation3 + $0x1a8] sm:$0xff]  ;;  %v1456_v38 = vmul.f32 %v7241_v8, %v786_v3  ;;  %v1656_v48 = vmul.f32 %v7281_v15, %v986_v51  ;;  %1910 = vst.msk [vmem:[#allocation3 + $0x1b8] sm:$0xff] %vm33_vm0, %v1846_v26  ;;  %v2183_v53 = vmul.f32 %v7251_v49, %v786_v3 }
 0x1ae   :  { %v2867_v24 = vadd.f32 %v7233_v23, %v2824_v35  ;;  %1909 = vst.msk [vmem:[#allocation3 + $0x1b0] sm:$0xff] %vm33_vm0, %v1845_v46  ;;  %v2573_v47 = vadd.f32 %v2509_v12, %v2445_v18  ;;  %v721_v37 = vmul.f32 %v7193_v14, %v650_v16  ;;  %v722_v19 = vmul.f32 %v7193_v14, %v651_v54  ;;  %v788_v46 = vld [vmem:[#allocation2 + $0x309] sm:$0xff] }
 0x1af   :  { %v7353_v11 = vld [vmem:[#allocation3 + $0x190] ss:$2 sm:$0xff]  ;;  %v7355_v21 = vld [vmem:[#allocation3 + $0x191] ss:$2 sm:$0xff]  ;;  %3346 = vrot.lane.b32.xlu0 %v7306_v61, %s5624_s0  ;;  %v2572_v28 = vadd.f32 %v2508_v30, %v2444_v44  ;;  %v2383_v41 = vmul.f32 %v7297_v45, %v986_v51  ;;  %v857_v56 = vmul.f32 %v7176_v6, %v785_v60  ;;  %3122 = vrot.lane.b32.xlu1 %v7306_v61, %s5625_s17 }
 0x1b0   :  { %v2883_v29 = vmax.f32 %v2867_v24, 0.0  ;;  %2637 = vst.msk [vmem:[#allocation3 + $0x1a8] sm:$0xff] %vm33_vm0, %v2573_v47  ;;  %v922_v58 = vadd.f32 %v858_v57, %v722_v19  ;;  %v1319_v2 = vmul.f32 %v7267_v63, %v650_v16  ;;  %v1320_v9 = vmul.f32 %v7267_v63, %v651_v54  ;;  %v988_v30 = vld [vmem:[#allocation2 + $0x30a] sm:$0xff] }
 0x1b1   :  { %2636 = vst.msk [vmem:[#allocation3 + $0x1a0] sm:$0xff] %vm33_vm0, %v2572_v28  ;;  %v921_v51 = vadd.f32 %v857_v56, %v721_v37  ;;  %v1057_v35 = vmul.f32 %v7182_v7, %v985_v43  ;;  %v1455_v20 = vmul.f32 %v7241_v8, %v785_v60  ;;  %v2046_v61 = vmul.f32 %v7287_v55, %v650_v16  ;;  %v1784_v19 = vld [vmem:[#allocation3 + $0x1c8] sm:$0xff]  ;;  %v652_v28 = vld [vmem:[#allocation2 + $0x300] sm:$0xff] }
 0x1b2   :  { %2940 = vst.msk [vmem:[#allocation4 + $0x61] sm:$0xff] %vm33_vm0, %v2883_v29  ;;  %v1122_v26 = vadd.f32 %v1058_v5, %v922_v58  ;;  %v1520_v18 = vadd.f32 %v1456_v38, %v1320_v9  ;;  %v2047_v57 = vmul.f32 %v7287_v55, %v651_v54  ;;  %v2182_v44 = vmul.f32 %v7251_v49, %v785_v60  ;;  %v1783_v16 = vld [vmem:[#allocation3 + $0x1c0] sm:$0xff]  ;;  %v653_v54 = vld [vmem:[#allocation2 + $0x308] sm:$0xff] }
 0x1b3   :  { %v1121_v12 = vadd.f32 %v1057_v35, %v921_v51  ;;  %v1519_v24 = vadd.f32 %v1455_v20, %v1319_v2  ;;  %v1655_v47 = vmul.f32 %v7281_v15, %v985_v43  ;;  %v2382_v37 = vmul.f32 %v7297_v45, %v985_v43  ;;  %v787_v58 = vld [vmem:[#allocation2 + $0x301] sm:$0xff] }
 0x1b4   :  { %1186 = vst.msk [vmem:[#allocation3 + $0x1d8] sm:$0xff] %vm33_vm0, %v1122_v26  ;;  %v1720_v29 = vadd.f32 %v1656_v48, %v1520_v18  ;;  %v2246_v56 = vadd.f32 %v2182_v44, %v2046_v61  ;;  %v2247_v5 = vadd.f32 %v2183_v53, %v2047_v57  ;;  %v860_v38 = vmul.f32 %v7176_v6, %v788_v46  ;;  %v2511_v9 = vld [vmem:[#allocation3 + $0x1b8] sm:$0xff]  ;;  %v987_v61 = vld [vmem:[#allocation2 + $0x302] sm:$0xff] }
 0x1b5   :  { %1185 = vst.msk [vmem:[#allocation3 + $0x1d0] sm:$0xff] %vm33_vm0, %v1121_v12  ;;  %v1719_v60 = vadd.f32 %v1655_v47, %v1519_v24  ;;  %v2510_v2 = vld [vmem:[#allocation3 + $0x1b0] sm:$0xff]  ;;  %v1060_v51 = vmul.f32 %v7182_v7, %v988_v30  ;;  %v1458_v43 = vmul.f32 %v7241_v8, %v788_v46  ;;  %v1658_v35 = vmul.f32 %v7281_v15, %v988_v30 }
 0x1b6   :  { %v1848_v20 = vadd.f32 %v1784_v19, %v1720_v29  ;;  %v2446_v48 = vadd.f32 %v2382_v37, %v2246_v56  ;;  %v2447_v26 = vadd.f32 %v2383_v41, %v2247_v5  ;;  %v2185_v53 = vmul.f32 %v7251_v49, %v788_v46 }
 0x1b7   :  { %v1847_v18 = vadd.f32 %v1783_v16, %v1719_v60  ;;  %v723_v57 = vmul.f32 %v7193_v14, %v652_v28  ;;  %v724_v44 = vmul.f32 %v7193_v14, %v653_v54  ;;  %v859_v12 = vmul.f32 %v7176_v6, %v787_v58 }
 0x1b8   :  { %v7392_v24 = vld [vmem:[#allocation3 + $0x1a0] ss:$2 sm:$0xff]  ;;  %v7394_v47 = vld [vmem:[#allocation3 + $0x1a1] ss:$2 sm:$0xff]  ;;  %1912 = vst.msk [vmem:[#allocation3 + $0x1c8] sm:$0xff] %vm33_vm0, %v1848_v20  ;;  %v2574_v19 = vadd.f32 %v2510_v2, %v2446_v48  ;;  %v2575_v41 = vadd.f32 %v2511_v9, %v2447_v26  ;;  %v2385_v46 = vmul.f32 %v7297_v45, %v988_v30  ;;  %v1321_v37 = vmul.f32 %v7267_v63, %v652_v28 }
 0x1b9   :  { %8704 = vst [vmem:[#allocation11_spill] sm:$0xff] %v7394_v47  ;;  %v7396_v3 = vld [vmem:[#allocation4 + $0x62] sm:$0xff]  ;;  %1911 = vst.msk [vmem:[#allocation3 + $0x1c0] sm:$0xff] %vm33_vm0, %v1847_v18  ;;  %v923_v29 = vadd.f32 %v859_v12, %v723_v57  ;;  %v924_v16 = vadd.f32 %v860_v38, %v724_v44  ;;  %v1059_v56 = vmul.f32 %v7182_v7, %v987_v61  ;;  %v7418_v12 = vpop.permute.xlu1 %3015 }
 0x1ba   :  { %3615 = vst.msk [vmem:[#allocation5 + $0x70] sm:$0xff] %vm33_vm0, %v7396_v3  ;;  %v1322_v5 = vmul.f32 %v7267_v63, %v653_v54  ;;  %v3407_v60 = vld [vmem:[#allocation4 + $0x60] sm:$0xff]  ;;  %2638 = vst.msk [vmem:[#allocation3 + $0x1b0] sm:$0xff] %vm33_vm0, %v2574_v19  ;;  %v1457_v30 = vmul.f32 %v7241_v8, %v787_v58  ;;  %v2048_v9 = vmul.f32 %v7287_v55, %v652_v28 }
 0x1bb   :  { %v3503_v0 = vld [vmem:[#allocation4 + $0x61] sm:$0xff]  ;;  %2639 = vst.msk [vmem:[#allocation3 + $0x1b8] sm:$0xff] %vm33_vm0, %v2575_v41  ;;  %v2049_v38 = vmul.f32 %v7287_v55, %v653_v54  ;;  %3443 = vrot.lane.b32.xlu0 %v3407_v60, %s5625_s17  ;;  %v1123_v48 = vadd.f32 %v1059_v56, %v923_v29  ;;  %v1124_v26 = vadd.f32 %v1060_v51, %v924_v16  ;;  %v1786_v54 = vld [vmem:[#allocation3 + $0x1d8] sm:$0xff] }
 0x1bc   :  { %v2957_v20 = vld [vmem:[#allocation4 + $0x60] sm:$0xff]  ;;  %3295 = vst.msk [vmem:[#allocation5 + $0x80] sm:$0xff] %vm33_vm0, %v3503_v0  ;;  %v1522_v18 = vadd.f32 %v1458_v43, %v1322_v5  ;;  %v2184_v57 = vmul.f32 %v7251_v49, %v787_v58  ;;  %3219 = vrot.lane.b32.xlu1 %v3407_v60, %s5626_s30  ;;  %v1521_v19 = vadd.f32 %v1457_v30, %v1321_v37  ;;  %v1785_v43 = vld [vmem:[#allocation3 + $0x1d0] sm:$0xff] }
 0x1bd   :  { %2973 = vst.msk [vmem:[#allocation5 + $0x90] sm:$0xff] %vm33_vm0, %v2957_v20  ;;  %v790_v44 = vld [vmem:[#allocation2 + $0x321] sm:$0xff]  ;;  %v1657_v28 = vmul.f32 %v7281_v15, %v987_v61  ;;  %v2249_v41 = vadd.f32 %v2185_v53, %v2049_v38  ;;  %v2384_v2 = vmul.f32 %v7297_v45, %v987_v61  ;;  %1187 = vst.msk [vmem:[#allocation3 + $0x1e0] sm:$0xff] %vm33_vm0, %v1123_v48  ;;  %v654_v20 = vld [vmem:[#allocation2 + $0x318] sm:$0xff] }
 0x1be   :  { %v990_v47 = vld [vmem:[#allocation2 + $0x322] sm:$0xff]  ;;  %1188 = vst.msk [vmem:[#allocation3 + $0x1e8] sm:$0xff] %vm33_vm0, %v1124_v26  ;;  %v1722_v51 = vadd.f32 %v1658_v35, %v1522_v18  ;;  %v2248_v58 = vadd.f32 %v2184_v57, %v2048_v9  ;;  %v8705_v29 = vmax.f32 %v6751_v52, %v6753_v1  ;;  %v8706_v37 = vmax.f32 %v6781_v25, %v6783_v22  ;;  %v789_v48 = vld [vmem:[#allocation2 + $0x319] sm:$0xff] }
 0x1bf   :  { %v1721_v56 = vadd.f32 %v1657_v28, %v1521_v19  ;;  %v2449_v61 = vadd.f32 %v2385_v46, %v2249_v41  ;;  %v862_v60 = vmul.f32 %v7176_v6, %v790_v44  ;;  %v655_v30 = vld [vmem:[#allocation2 + $0x320] sm:$0xff]  ;;  %3539 = vrot.lane.b32.xlu0 %v3503_v0, %s5626_s30  ;;  %v2513_v38 = vld [vmem:[#allocation3 + $0x1c8] sm:$0xff]  ;;  %v1062_v52 = vmul.f32 %v7182_v7, %v990_v47 }
 0x1c0   :  { %v2825_v16 = vsel %vm33_vm0, %v8705_v29, -inf  ;;  %v2826_v53 = vsel %vm33_vm0, %v8706_v37, -inf  ;;  %v1850_v35 = vadd.f32 %v1786_v54, %v1722_v51  ;;  %v2448_v9 = vadd.f32 %v2384_v2, %v2248_v58  ;;  %v989_v25 = vld [vmem:[#allocation2 + $0x31a] sm:$0xff]  ;;  %3027 = vrot.lane.b32.xlu1 %v3503_v0, %s5624_s0  ;;  %v7444_v0 = vpop.permute.xlu1 %3112  ;;  %3064 = vst.msk [vmem:[#allocation5] sm:$0xff] %vm3063_vm2, %v7418_v12 }
 0x1c1   :  { %v2827_v5 = vmax.f32 %v2825_v16, %v2826_v53  ;;  %v1460_v1 = vmul.f32 %v7241_v8, %v790_v44  ;;  %v3641_v22 = vld [vmem:[#allocation5 + $0x70] sm:$0xff]  ;;  %v1849_v46 = vadd.f32 %v1785_v43, %v1721_v56  ;;  %v2512_v26 = vld [vmem:[#allocation3 + $0x1c0] sm:$0xff]  ;;  %v2577_v18 = vadd.f32 %v2513_v38, %v2449_v61  ;;  %3161 = vst.msk [vmem:[#allocation5] sm:$0xff] %vm3160_vm3, %v7444_v0 }
 0x1c2   :  { %v1660_v19 = vmul.f32 %v7281_v15, %v990_v47  ;;  %5311 = vmatprep.mubr.msk.f32.mxu1 %vm33_vm0, %v3641_v22  ;;  %1914 = vst.msk [vmem:[#allocation3 + $0x1d8] sm:$0xff] %vm33_vm0, %v1850_v35  ;;  %v2576_v2 = vadd.f32 %v2512_v26, %v2448_v9  ;;  %v2187_v28 = vmul.f32 %v7251_v49, %v790_v44  ;;  %v7453_v44 = vld [vmem:[#allocation3 + $0x1b0] ss:$2 sm:$0xff]  ;;  %v7455_v16 = vld [vmem:[#allocation3 + $0x1b1] ss:$2 sm:$0xff]  ;;  %v7675_v0 = vld [vmem:[%s8692_s3 + $0xc0] sm:$0xff] }
 0x1c3   :  { %v2868_v57 = vadd.f32 %v7233_v23, %v2827_v5  ;;  %v725_v54 = vmul.f32 %v7193_v14, %v654_v20  ;;  %v726_v41 = vmul.f32 %v7193_v14, %v655_v30  ;;  %1913 = vst.msk [vmem:[#allocation3 + $0x1d0] sm:$0xff] %vm33_vm0, %v1849_v46  ;;  %2641 = vst.msk [vmem:[#allocation3 + $0x1c8] sm:$0xff] %vm33_vm0, %v2577_v18  ;;  %3348 = vrot.lane.b32.xlu0 %v7396_v3, %s5624_s0  ;;  %v1390_v5 = vld [vmem:[#allocation2 + $0x339] sm:$0xff]  ;;  %v1253_v46 = vld [vmem:[#allocation2 + $0x330] sm:$0xff] }
 0x1c4   :  { %v2387_v43 = vmul.f32 %v7297_v45, %v990_v47  ;;  %v861_v58 = vmul.f32 %v7176_v6, %v789_v48  ;;  %v1061_v29 = vmul.f32 %v7182_v7, %v989_v25  ;;  %2640 = vst.msk [vmem:[#allocation3 + $0x1c0] sm:$0xff] %vm33_vm0, %v2576_v2  ;;  %v1323_v37 = vmul.f32 %v7267_v63, %v654_v20  ;;  %v1590_v22 = vld [vmem:[#allocation2 + $0x33a] sm:$0xff] }
 0x1c5   :  { %v2884_v51 = vmax.f32 %v2868_v57, 0.0  ;;  %v926_v14 = vadd.f32 %v862_v60, %v726_v41  ;;  %v1324_v53 = vmul.f32 %v7267_v63, %v655_v30  ;;  %v1459_v47 = vmul.f32 %v7241_v8, %v789_v48  ;;  %3124 = vrot.lane.b32.xlu1 %v7396_v3, %s5625_s17  ;;  %v1787_v18 = vld [vmem:[#allocation3 + $0x1e0] sm:$0xff]  ;;  %v1788_v57 = vld [vmem:[#allocation3 + $0x1e8] sm:$0xff] }
 0x1c6   :  { %v925_v6 = vadd.f32 %v861_v58, %v725_v54  ;;  %v1659_v7 = vmul.f32 %v7281_v15, %v989_v25  ;;  %v2050_v56 = vmul.f32 %v7287_v55, %v654_v20  ;;  %v2051_v61 = vmul.f32 %v7287_v55, %v655_v30  ;;  %v1254_v20 = vld [vmem:[#allocation2 + $0x338] sm:$0xff] }
 0x1c7   :  { %2941 = vst.msk [vmem:[#allocation4 + $0x71] sm:$0xff] %vm33_vm0, %v2884_v51  ;;  %v1126_v60 = vadd.f32 %v1062_v52, %v926_v14  ;;  %v1523_v35 = vadd.f32 %v1459_v47, %v1323_v37  ;;  %v1524_v9 = vadd.f32 %v1460_v1, %v1324_v53  ;;  %v2186_v38 = vmul.f32 %v7251_v49, %v789_v48  ;;  %v1389_v48 = vld [vmem:[#allocation2 + $0x331] sm:$0xff]  ;;  %v7473_v51 = vpop.permute.xlu1 %3209 }
 0x1c8   :  { %v1125_v26 = vadd.f32 %v1061_v29, %v925_v6  ;;  %v2251_v2 = vadd.f32 %v2187_v28, %v2051_v61  ;;  %v2386_v54 = vmul.f32 %v7297_v45, %v989_v25  ;;  %v1462_v1 = vmul.f32 %v7241_v8, %v1390_v5  ;;  %v1589_v37 = vld [vmem:[#allocation2 + $0x332] sm:$0xff]  ;;  %3258 = vst.msk [vmem:[#allocation5] sm:$0xff] %vm3257_vm4, %v7473_v51 }
 0x1c9   :  { %1190 = vst.msk [vmem:[#allocation3 + $0x1f8] sm:$0xff] %vm33_vm0, %v1126_v60  ;;  %v1723_v30 = vadd.f32 %v1659_v7, %v1523_v35  ;;  %v1724_v52 = vadd.f32 %v1660_v19, %v1524_v9  ;;  %v2250_v41 = vadd.f32 %v2186_v38, %v2050_v56  ;;  %v2515_v29 = vld [vmem:[#allocation3 + $0x1d8] sm:$0xff]  ;;  %v1662_v14 = vmul.f32 %v7281_v15, %v1590_v22  ;;  %v1982_v56 = vld [vmem:[#allocation2 + $0x348] sm:$0xff]  ;;  %v1983_v61 = vld [vmem:[#allocation2 + $0x350] sm:$0xff] }
 0x1ca   :  { %1189 = vst.msk [vmem:[#allocation3 + $0x1f0] sm:$0xff] %vm33_vm0, %v1125_v26  ;;  %v2451_v58 = vadd.f32 %v2387_v43, %v2251_v2  ;;  %v2189_v28 = vmul.f32 %v7251_v49, %v1390_v5  ;;  %v1325_v25 = vmul.f32 %v7267_v63, %v1253_v46  ;;  %v2514_v6 = vld [vmem:[#allocation3 + $0x1d0] sm:$0xff]  ;;  %v1326_v7 = vmul.f32 %v7267_v63, %v1254_v20  ;;  %v7483_v2 = vpop.permute.xlu0 %3338 }
 0x1cb   :  { %v1851_v53 = vadd.f32 %v1787_v18, %v1723_v30  ;;  %v1852_v47 = vadd.f32 %v1788_v57, %v1724_v52  ;;  %v2450_v19 = vadd.f32 %v2386_v54, %v2250_v41  ;;  %v2389_v35 = vmul.f32 %v7297_v45, %v1590_v22  ;;  %v2118_v38 = vld [vmem:[#allocation2 + $0x349] sm:$0xff]  ;;  %v2119_v5 = vld [vmem:[#allocation2 + $0x351] sm:$0xff]  ;;  %3386 = vst.msk [vmem:[#allocation5 + $0x8] sm:$0xff] %vm3063_vm2, %v7483_v2 }
 0x1cc   :  { %v2579_v60 = vadd.f32 %v2515_v29, %v2451_v58  ;;  %v1461_v43 = vmul.f32 %v7241_v8, %v1389_v48  ;;  %v2052_v9 = vmul.f32 %v7287_v55, %v1253_v46  ;;  %v2318_v26 = vld [vmem:[#allocation2 + $0x34a] sm:$0xff]  ;;  %v1526_v57 = vadd.f32 %v1462_v1, %v1326_v7  ;;  %v7491_v46 = vpop.permute.xlu1 %3017  ;;  %v2319_v7 = vld [vmem:[#allocation2 + $0x352] sm:$0xff] }
 0x1cd   :  { %1915 = vst.msk [vmem:[#allocation3 + $0x1e0] sm:$0xff] %vm33_vm0, %v1851_v53  ;;  %1916 = vst.msk [vmem:[#allocation3 + $0x1e8] sm:$0xff] %vm33_vm0, %v1852_v47  ;;  %v2578_v63 = vadd.f32 %v2514_v6, %v2450_v19  ;;  %v1661_v54 = vmul.f32 %v7281_v15, %v1589_v37  ;;  %v2053_v22 = vmul.f32 %v7287_v55, %v1254_v20  ;;  %v7493_v52 = vld [vmem:[#allocation3 + $0x1c0] ss:$2 sm:$0xff]  ;;  %v7495_v41 = vld [vmem:[#allocation3 + $0x1c1] ss:$2 sm:$0xff] }
 0x1ce   :  { %v7485_v18 = vld [vmem:[#allocation4 + $0x72] sm:$0xff]  ;;  %2643 = vst.msk [vmem:[#allocation3 + $0x1d8] sm:$0xff] %vm33_vm0, %v2579_v60  ;;  %v1525_v58 = vadd.f32 %v1461_v43, %v1325_v25  ;;  %v2054_v1 = vmul.f32 %v7287_v55, %v1982_v56  ;;  %v2055_v15 = vmul.f32 %v7287_v55, %v1983_v61  ;;  %v2188_v20 = vmul.f32 %v7251_v49, %v1389_v48 }
 0x1cf   :  { %v3408_v8 = vld [vmem:[#allocation4 + $0x70] sm:$0xff]  ;;  %3616 = vst.msk [vmem:[#allocation5 + $0x88] sm:$0xff] %vm33_vm0, %v7485_v18  ;;  %2642 = vst.msk [vmem:[#allocation3 + $0x1d0] sm:$0xff] %vm33_vm0, %v2578_v63  ;;  %v1726_v47 = vadd.f32 %v1662_v14, %v1526_v57  ;;  %v2190_v19 = vmul.f32 %v7251_v49, %v2118_v38  ;;  %v2191_v25 = vmul.f32 %v7251_v49, %v2119_v5 }
 0x1d0   :  { %v3504_v30 = vld [vmem:[#allocation4 + $0x71] sm:$0xff]  ;;  %3445 = vrot.lane.b32.xlu0 %v3408_v8, %s5625_s17  ;;  %2974 = vst.msk [vmem:[#allocation5 + $0xa8] sm:$0xff] %vm33_vm0, %v3408_v8  ;;  %v2253_v6 = vadd.f32 %v2189_v28, %v2053_v22  ;;  %3221 = vrot.lane.b32.xlu1 %v3408_v8, %s5626_s30  ;;  %v1725_v55 = vadd.f32 %v1661_v54, %v1525_v58  ;;  %v7514_v3 = vpop.permute.xlu1 %3114  ;;  %v7518_v22 = vpop.permute.xlu0 %3435 }
 0x1d1   :  { %3296 = vst.msk [vmem:[#allocation5 + $0x98] sm:$0xff] %vm33_vm0, %v3504_v30  ;;  %v2678_v29 = vld [vmem:[#allocation3 + $0xf0] ss:$2 sm:$0xff]  ;;  %v2742_v53 = vld [vmem:[#allocation3 + $0xf1] ss:$2 sm:$0xff]  ;;  %v2252_v56 = vadd.f32 %v2188_v20, %v2052_v9  ;;  %v2388_v61 = vmul.f32 %v7297_v45, %v1589_v37  ;;  %v2390_v60 = vmul.f32 %v7297_v45, %v2318_v26  ;;  %v2803_v43 = vmax.f32 %v7493_v52, %v7495_v41 }
 0x1d2   :  { %v1790_v48 = vld [vmem:[#allocation3 + $0x1f8] sm:$0xff]  ;;  %v1789_v63 = vld [vmem:[#allocation3 + $0x1f0] sm:$0xff]  ;;  %v2254_v57 = vadd.f32 %v2190_v19, %v2054_v1  ;;  %v2255_v38 = vadd.f32 %v2191_v25, %v2055_v15  ;;  %v2391_v28 = vmul.f32 %v7297_v45, %v2319_v7  ;;  %v2790_v54 = vmax.f32 %v2678_v29, %v2742_v53  ;;  %v2680_v9 = vld [vmem:[#allocation3 + $0x100] ss:$2 sm:$0xff]  ;;  %3065 = vst.msk [vmem:[#allocation5 + $0x18] sm:$0xff] %vm3063_vm2, %v7491_v46 }
 0x1d3   :  { %v1854_v14 = vadd.f32 %v1790_v48, %v1726_v47  ;;  %v1853_v49 = vadd.f32 %v1789_v63, %v1725_v55  ;;  %v2452_v5 = vadd.f32 %v2388_v61, %v2252_v56  ;;  %v2744_v37 = vld [vmem:[#allocation3 + $0x101] ss:$2 sm:$0xff]  ;;  %v2453_v26 = vadd.f32 %v2389_v35, %v2253_v6  ;;  %v2682_v20 = vld [vmem:[#allocation3 + $0x110] ss:$2 sm:$0xff]  ;;  %v2746_v29 = vld [vmem:[#allocation3 + $0x111] ss:$2 sm:$0xff] }
 0x1d4   :  { %3541 = vrot.lane.b32.xlu0 %v3504_v30, %s5626_s30  ;;  %v7521_v8 = vadd.f32 %v2390_v60, %v2254_v57  ;;  %v8707_v58 = vmax.f32 %v6838_v31, %v6840_v33  ;;  %v8708_v45 = vmax.f32 %v7022_v36, %v7024_v40  ;;  %3029 = vrot.lane.b32.xlu1 %v3504_v30, %s5624_s0  ;;  %v2516_v53 = vld [vmem:[#allocation3 + $0x1e0] sm:$0xff]  ;;  %v2517_v35 = vld [vmem:[#allocation3 + $0x1e8] sm:$0xff]  ;;  %v2829_v47 = vsel %vm33_vm0, %v2790_v54, -inf  ;;  %v3697_v46 = vld [vmem:[%s8692_s3 + $0xb0] sm:$0xff] }
 0x1d5   :  { %1918 = vst.msk [vmem:[#allocation3 + $0x1f8] sm:$0xff] %vm33_vm0, %v1854_v14  ;;  %1917 = vst.msk [vmem:[#allocation3 + $0x1f0] sm:$0xff] %vm33_vm0, %v1853_v49  ;;  %v8709_v31 = vmax.f32 %v7056_v50, %v7058_v27  ;;  %v8710_v36 = vmax.f32 %v7101_v17, %v7103_v32  ;;  %v8711_v30 = vmax.f32 %v7149_v42, %v7151_v13  ;;  %v3691_v50 = vld [vmem:[%s8692_s3 + $0x80] sm:$0xff]  ;;  %v3692_v27 = vld [vmem:[%s8692_s3 + $0x88] sm:$0xff]  ;;  %v7552_v17 = vpop.permute.xlu1 %3211  ;;  %v7568_v14 = vpop.permute.xlu0 %3531 }
 0x1d6   :  { %v2828_v1 = vsel %vm33_vm0, %v8707_v58, -inf  ;;  %v2834_v15 = vsel %vm33_vm0, %v8708_v45, -inf  ;;  %v3644_v25 = vld [vmem:[#allocation5 + $0x88] sm:$0xff]  ;;  %v2580_v6 = vadd.f32 %v2516_v53, %v2452_v5  ;;  %v2581_v7 = vadd.f32 %v2517_v35, %v2453_v26  ;;  %v3675_v63 = vld [vmem:[%s8692_s3] sm:$0xff]  ;;  %v3694_v49 = vld [vmem:[%s8692_s3 + $0x98] sm:$0xff]  ;;  %3483 = vst.msk [vmem:[#allocation5 + $0x8] sm:$0xff] %vm3160_vm3, %v7518_v22 }
 0x1d7   :  { %v2835_v33 = vsel %vm33_vm0, %v8709_v31, -inf  ;;  %v2837_v40 = vsel %vm33_vm0, %v8710_v36, -inf  ;;  %v2838_v19 = vsel %vm33_vm0, %v8711_v30, -inf  ;;  %v2830_v55 = vmax.f32 %v2828_v1, %v2829_v47  ;;  %5312 = vmatmul.mubr.msk.f32.gmra.mrb[4].mxu1 %vm33_vm0, %v3644_v25  ;;  %v7596_v26 = vld [vmem:[%s8692_s3 + $0xa0] sm:$0xff]  ;;  %v7598_v58 = vld [vmem:[#allocation3 + $0x1d0] ss:$2 sm:$0xff] }
 0x1d8   :  { %v2836_v48 = vmax.f32 %v2834_v15, %v2835_v33  ;;  %3350 = vrot.lane.b32.xlu0 %v7485_v18, %s5624_s0  ;;  %v2839_v32 = vmax.f32 %v2837_v40, %v2838_v19  ;;  %v8712_v42 = vmax.f32 %v7203_v34, %v7205_v59  ;;  %v8713_v56 = vmax.f32 %v7270_v4, %v7272_v39  ;;  %v3676_v39 = vld [vmem:[%s8692_s3 + $0x8] sm:$0xff]  ;;  %v7608_v47 = vld [vmem:[#allocation3 + $0x1d1] ss:$2 sm:$0xff] }
 0x1d9   :  { %v2791_v60 = vmax.f32 %v2680_v9, %v2744_v37  ;;  %v2455_v57 = vadd.f32 %v2391_v28, %v2255_v38  ;;  %2644 = vst.msk [vmem:[#allocation3 + $0x1e0] sm:$0xff] %vm33_vm0, %v2580_v6  ;;  %2645 = vst.msk [vmem:[#allocation3 + $0x1e8] sm:$0xff] %vm33_vm0, %v2581_v7  ;;  %v2869_v34 = vadd.f32 %v7233_v23, %v2830_v55  ;;  %3126 = vrot.lane.b32.xlu1 %v7485_v18, %s5625_s17  ;;  %v3693_v38 = vld [vmem:[%s8692_s3 + $0x90] sm:$0xff]  ;;  %v3678_v37 = vld [vmem:[%s8692_s3 + $0x18] sm:$0xff]  ;;  %v3020_v35 = vpop.permute.xlu1 %3019 }
 0x1da   :  { %v2840_v13 = vsel %vm33_vm0, %v8712_v42, -inf  ;;  %v2841_v61 = vsel %vm33_vm0, %v8713_v56, -inf  ;;  %v2871_v59 = vadd.f32 %v7233_v23, %v2836_v48  ;;  %v2872_v28 = vadd.f32 %v7233_v23, %v2839_v32  ;;  %v3677_v18 = vld [vmem:[%s8692_s3 + $0x10] sm:$0xff]  ;;  %v3696_v53 = vld [vmem:[%s8692_s3 + $0xa8] sm:$0xff]  ;;  %v3679_v42 = vld [vmem:[%s8692_s3 + $0x20] sm:$0xff]  ;;  %3066 = vst.msk [vmem:[#allocation5 + $0x30] sm:$0xff] %vm3063_vm2, %v3020_v35 }
 0x1db   :  { %v2842_v4 = vmax.f32 %v2840_v13, %v2841_v61  ;;  %v2792_v5 = vmax.f32 %v2682_v20, %v2746_v29  ;;  %v2831_v54 = vsel %vm33_vm0, %v2791_v60, -inf  ;;  %v5364_v9 = vpack.c.bf16 %v3692_v27, %v3691_v50  ;;  %v3680_v13 = vld [vmem:[%s8692_s3 + $0x28] sm:$0xff]  ;;  %v8716_v56 = vld [vmem:[#allocation11_spill] sm:$0xff]  ;;  %3162 = vst.msk [vmem:[#allocation5 + $0x18] sm:$0xff] %vm3160_vm3, %v7514_v3 }
 0x1dc   :  { %v2885_v1 = vmax.f32 %v2869_v34, 0.0  ;;  %v2887_v45 = vmax.f32 %v2871_v59, 0.0  ;;  %v8714_v20 = vmax.f32 %v7315_v62, %v7317_v10  ;;  %v2519_v31 = vld [vmem:[#allocation3 + $0x1f8] sm:$0xff]  ;;  %v2888_v33 = vmax.f32 %v2872_v28, 0.0  ;;  %v3341_v10 = vpop.permute.xlu0 %3340  ;;  %v2518_v19 = vld [vmem:[#allocation3 + $0x1f0] sm:$0xff]  ;;  %v7680_v22 = vld [vmem:[%s8692_s3 + $0xc8] sm:$0xff] }
 0x1dd   :  { %v2873_v15 = vadd.f32 %v7233_v23, %v2842_v4  ;;  %v2832_v36 = vsel %vm33_vm0, %v2792_v5, -inf  ;;  %5365 = vmatprep.subr.bf16.mxu0 %v5364_v9  ;;  %v8715_v40 = vmax.f32 %v7353_v11, %v7355_v21  ;;  %v5366_v62 = vpack.c.bf16 %v3676_v39, %v3675_v63  ;;  %3387 = vst.msk [vmem:[#allocation5 + $0x20] sm:$0xff] %vm3063_vm2, %v3341_v10  ;;  %v3117_v12 = vpop.permute.xlu1 %3116  ;;  %v3650_v10 = vld [vmem:[#allocation5 + $0xb8] sm:$0xff] }
 0x1de   :  { %v2843_v29 = vsel %vm33_vm0, %v8714_v20, -inf  ;;  %v2583_v25 = vadd.f32 %v2519_v31, %v2455_v57  ;;  %2942 = vst.msk [vmem:[#allocation4 + $0x81] sm:$0xff] %vm33_vm0, %v2885_v1  ;;  %2944 = vst.msk [vmem:[#allocation4 + $0xc1] sm:$0xff] %vm33_vm0, %v2887_v45  ;;  %v2833_v7 = vmax.f32 %v2831_v54, %v2832_v36  ;;  %v2582_v48 = vadd.f32 %v2518_v19, %v7521_v8  ;;  %v3698_v57 = vld [vmem:[%s8692_s3 + $0xb8] sm:$0xff]  ;;  %v5597_v45 = vld [vmem:[%s8691_s2] ss:$0 sm:$0xff] }
 0x1df   :  { %v2844_v30 = vsel %vm33_vm0, %v8715_v40, -inf  ;;  %v2889_v6 = vmax.f32 %v2873_v15, 0.0  ;;  %2945 = vst.msk [vmem:[#allocation4 + $0xd1] sm:$0xff] %vm33_vm0, %v2888_v33  ;;  %5367 = vmatpush3.bf16.msra.mxu0 %v5366_v62  ;;  %v5368_v50 = vpack.c.bf16 %v3694_v49, %v3693_v38  ;;  %v5370_v11 = vpack.c.bf16 %v3678_v37, %v3677_v18  ;;  %v2991_v18 = vld [vmem:[#allocation4 + $0xa1] sm:$0xff] }
 0x1e0   :  { %v2845_v55 = vmax.f32 %v2843_v29, %v2844_v30  ;;  %v2804_v21 = vmax.f32 %v7598_v58, %v7608_v47  ;;  %2647 = vst.msk [vmem:[#allocation3 + $0x1f8] sm:$0xff] %vm33_vm0, %v2583_v25  ;;  %v2870_v27 = vadd.f32 %v7233_v23, %v2833_v7  ;;  %v5372_v8 = vpack.c.bf16 %v3696_v53, %v7596_v26  ;;  %v7682_v3 = vld [vmem:[#allocation3 + $0x1e0] ss:$2 sm:$0xff]  ;;  %v7684_v39 = vld [vmem:[#allocation3 + $0x1e1] ss:$2 sm:$0xff]  ;;  %v3701_v25 = vld [vmem:[%s8692_s3 + $0xd0] sm:$0xff] }
 0x1e1   :  { %2946 = vst.msk [vmem:[#allocation4 + $0xe1] sm:$0xff] %vm33_vm0, %v2889_v6  ;;  %2646 = vst.msk [vmem:[#allocation3 + $0x1f0] sm:$0xff] %vm33_vm0, %v2582_v48  ;;  %5369 = vmatprep.subr.bf16.mxu0 %v5368_v50  ;;  %v8717_v61 = vmax.f32 %v7392_v24, %v8716_v56  ;;  %v8718_v63 = vmax.f32 %v7453_v44, %v7455_v16  ;;  %v7660_v24 = vld [vmem:[%s8692_s3 + $0x30] sm:$0xff]  ;;  %v5374_v44 = vpack.c.bf16 %v3680_v13, %v3679_v42  ;;  %v7670_v16 = vld [vmem:[%s8692_s3 + $0x38] sm:$0xff] }
 0x1e2   :  { %v2874_v32 = vadd.f32 %v7233_v23, %v2845_v55  ;;  %v2886_v34 = vmax.f32 %v2870_v27, 0.0  ;;  %3163 = vst.msk [vmem:[#allocation5 + $0x30] sm:$0xff] %vm3160_vm3, %v3117_v12  ;;  %v5376_v49 = vpack.c.bf16 %v3698_v57, %v3697_v46  ;;  %v2849_v28 = vsel %vm33_vm0, %v2803_v43, -inf  ;;  %v7732_v20 = vld [vmem:[%s8692_s3 + $0x40] sm:$0xff]  ;;  %v7737_v29 = vld [vmem:[%s8692_s3 + $0x48] sm:$0xff]  ;;  %v3702_v6 = vld [vmem:[%s8692_s3 + $0xd8] sm:$0xff] }
 0x1e3   :  { %v2846_v60 = vsel %vm33_vm0, %v8717_v61, -inf  ;;  %v2847_v2 = vsel %vm33_vm0, %v8718_v63, -inf  ;;  %5371 = vmatpush3.bf16.msra.mxu0 %v5370_v11  ;;  %v2850_v5 = vsel %vm33_vm0, %v2804_v21, -inf  ;;  %3579 = vst.msk [vmem:[#allocation5 + $0x8] sm:$0xff] %vm3257_vm4, %v7568_v14  ;;  %3259 = vst.msk [vmem:[#allocation5 + $0x18] sm:$0xff] %vm3257_vm4, %v7552_v17  ;;  %v2805_v14 = vmax.f32 %v7682_v3, %v7684_v39  ;;  %v2959_v62 = vld [vmem:[#allocation4 + $0xa0] sm:$0xff] }
 0x1e4   :  { %v2890_v59 = vmax.f32 %v2874_v32, 0.0  ;;  %v2848_v4 = vmax.f32 %v2846_v60, %v2847_v2  ;;  %2943 = vst.msk [vmem:[#allocation4 + $0xb1] sm:$0xff] %vm33_vm0, %v2886_v34  ;;  %5373 = vmatprep.subr.bf16.mxu0 %v5372_v8  ;;  %v2851_v51 = vmax.f32 %v2849_v28, %v2850_v5  ;;  %v5378_v1 = vpack.c.bf16 %v7670_v16, %v7660_v24  ;;  %v3088_v19 = vld [vmem:[#allocation4 + $0xa2] sm:$0xff]  ;;  %v3685_v48 = vld [vmem:[%s8692_s3 + $0x50] sm:$0xff]  ;;  %v3686_v32 = vld [vmem:[%s8692_s3 + $0x58] sm:$0xff] }
 0x1e5   :  { %v7700_v54 = vld [vmem:[#allocation4 + $0x82] sm:$0xff]  ;;  %v5380_v47 = vpack.c.bf16 %v7680_v22, %v7675_v0  ;;  %2975 = vst.msk [vmem:[#allocation5 + $0xc0] sm:$0xff] %vm33_vm0, %v2959_v62  ;;  %v2852_v50 = vsel %vm33_vm0, %v2805_v14, -inf  ;;  %v5382_v27 = vpack.c.bf16 %v7737_v29, %v7732_v20  ;;  %v3410_v56 = vld [vmem:[#allocation4 + $0x90] sm:$0xff]  ;;  %v5384_v61 = vpack.c.bf16 %v3702_v6, %v3701_v25 }
 0x1e6   :  { %2947 = vst.msk [vmem:[#allocation4 + $0xf1] sm:$0xff] %vm33_vm0, %v2890_v59  ;;  %v2875_v38 = vadd.f32 %v7233_v23, %v2848_v4  ;;  %v7702_v23 = vld [vmem:[#allocation4 + $0xc2] sm:$0xff]  ;;  %3617 = vst.msk [vmem:[#allocation5 + $0xa0] sm:$0xff] %vm33_vm0, %v7700_v54  ;;  %v7709_v41 = vld [vmem:[#allocation4 + $0xd2] sm:$0xff]  ;;  %v2876_v15 = vadd.f32 %v5597_v45, %v2851_v51 }
 0x1e7   :  { %v3409_v9 = vld [vmem:[#allocation4 + $0x80] sm:$0xff]  ;;  %3619 = vst.msk [vmem:[#allocation5 + $0xd0] sm:$0xff] %vm33_vm0, %v7702_v23  ;;  %3620 = vst.msk [vmem:[#allocation5 + $0xe8] sm:$0xff] %vm33_vm0, %v7709_v41  ;;  %5375 = vmatpush3.bf16.msra.mxu0 %v5374_v44  ;;  %v7722_v58 = vld [vmem:[#allocation4 + $0xd0] sm:$0xff]  ;;  %v5386_v44 = vpack.c.bf16 %v3686_v32, %v3685_v48 }
 0x1e8   :  { %3447 = vrot.lane.b32.xlu0 %v3409_v9, %s5625_s17  ;;  %v3505_v52 = vld [vmem:[#allocation4 + $0x81] sm:$0xff]  ;;  %3223 = vrot.lane.b32.xlu1 %v3409_v9, %s5626_s30  ;;  %v2891_v17 = vmax.f32 %v2875_v38, 0.0  ;;  %v2710_v53 = vld [vmem:[#allocation3 + $0x1f0] ss:$2 sm:$0xff]  ;;  %v2774_v35 = vld [vmem:[#allocation3 + $0x1f1] ss:$2 sm:$0xff] }
 0x1e9   :  { %v7712_v43 = vld [vmem:[#allocation4 + $0xc0] sm:$0xff]  ;;  %3297 = vst.msk [vmem:[#allocation5 + $0xb0] sm:$0xff] %vm33_vm0, %v3505_v52  ;;  %5377 = vmatprep.subr.bf16.mxu0 %v5376_v49  ;;  %v7747_v31 = vld [vmem:[#allocation4 + $0xd1] sm:$0xff]  ;;  %2978 = vst.msk [vmem:[#allocation5 + $0x108] sm:$0xff] %vm33_vm0, %v7722_v58  ;;  %v2892_v33 = vmax.f32 %v2876_v15, 0.0  ;;  %v2806_v36 = vmax.f32 %v2710_v53, %v2774_v35  ;;  %v3438_v5 = vpop.permute.xlu0 %3437 }
 0x1ea   :  { %v7718_v37 = vld [vmem:[#allocation4 + $0xe2] sm:$0xff]  ;;  %2977 = vst.msk [vmem:[#allocation5 + $0xf0] sm:$0xff] %vm33_vm0, %v7712_v43  ;;  %2948 = vst.msk [vmem:[#allocation4 + $0x101] sm:$0xff] %vm33_vm0, %v2891_v17  ;;  %v3705_v38 = vld [vmem:[%s8692_s3 + $0xf0] sm:$0xff] }
 0x1eb   :  { %v7720_v26 = vld [vmem:[#allocation4 + $0xc1] sm:$0xff]  ;;  %3621 = vst.msk [vmem:[#allocation5 + $0x100] sm:$0xff] %vm33_vm0, %v7718_v37  ;;  %3300 = vst.msk [vmem:[#allocation5 + $0xf8] sm:$0xff] %vm33_vm0, %v7747_v31  ;;  %v3185_v7 = vld [vmem:[#allocation4 + $0xb0] sm:$0xff]  ;;  %5379 = vmatpush3.bf16.msra.mxu0 %v5378_v1  ;;  %v2853_v11 = vsel %vm33_vm0, %v2806_v36, -inf  ;;  %v3214_v51 = vpop.permute.xlu1 %3213 }
 0x1ec   :  { %3299 = vst.msk [vmem:[#allocation5 + $0xe0] sm:$0xff] %vm33_vm0, %v7720_v26  ;;  %v7753_v40 = vld [vmem:[#allocation4 + $0xe0] sm:$0xff]  ;;  %3543 = vrot.lane.b32.xlu0 %v3505_v52, %s5626_s30  ;;  %3031 = vrot.lane.b32.xlu1 %v2991_v18, %s5624_s0  ;;  %2949 = vst.msk [vmem:[#allocation4 + $0x111] sm:$0xff] %vm33_vm0, %v2892_v33  ;;  %v7782_v21 = vld [vmem:[#allocation4 + $0xb1] sm:$0xff]  ;;  %v2854_v8 = vmax.f32 %v2852_v50, %v2853_v11 }
 0x1ed   :  { %v7755_v30 = vld [vmem:[#allocation4 + $0xe1] sm:$0xff]  ;;  %2979 = vst.msk [vmem:[#allocation5 + $0x120] sm:$0xff] %vm33_vm0, %v7753_v40  ;;  %v7772_v55 = vld [vmem:[#allocation4 + $0xf2] sm:$0xff]  ;;  %5381 = vmatprep.subr.bf16.mxu0 %v5380_v47  ;;  %2976 = vst.msk [vmem:[#allocation5 + $0xd8] sm:$0xff] %vm33_vm0, %v3185_v7 }
 0x1ee   :  { %3301 = vst.msk [vmem:[#allocation5 + $0x110] sm:$0xff] %vm33_vm0, %v7755_v30  ;;  %3622 = vst.msk [vmem:[#allocation5 + $0x118] sm:$0xff] %vm33_vm0, %v7772_v55  ;;  %v3628_v42 = vld [vmem:[#allocation5 + $0x8] sm:$0xff]  ;;  %v3647_v13 = vld [vmem:[#allocation5 + $0xa0] sm:$0xff]  ;;  %v2877_v46 = vadd.f32 %v5597_v45, %v2854_v8 }
 0x1ef   :  { %v3653_v12 = vld [vmem:[#allocation5 + $0xd0] sm:$0xff]  ;;  %3823 = vmatprep.mubr.f32.mxu0 %v3628_v42  ;;  %3298 = vst.msk [vmem:[#allocation5 + $0xc8] sm:$0xff] %vm33_vm0, %v7782_v21  ;;  %5314 = vmatprep.mubr.msk.f32.mxu1 %vm33_vm0, %v3647_v13  ;;  %v3703_v63 = vld [vmem:[%s8692_s3 + $0xe0] sm:$0xff]  ;;  %v3704_v2 = vld [vmem:[%s8692_s3 + $0xe8] sm:$0xff]  ;;  %v3534_v15 = vpop.permute.xlu0 %3533 }
 0x1f0   :  { %v7790_v60 = vld [vmem:[#allocation4 + $0xf0] sm:$0xff]  ;;  %3352 = vrot.lane.b32.xlu0 %v7700_v54, %s5624_s0  ;;  %5315 = vmatmul.mubr.msk.f32.gmra.mrb[6].mxu1 %vm33_vm0, %v3650_v10  ;;  %v3687_v59 = vld [vmem:[%s8692_s3 + $0x60] sm:$0xff]  ;;  %v3656_v24 = vld [vmem:[#allocation5 + $0xe8] sm:$0xff]  ;;  %v2893_v16 = vmax.f32 %v2877_v46, 0.0  ;;  %v5388_v39 = vpack.c.bf16 %v3704_v2, %v3703_v63  ;;  %3484 = vst.msk [vmem:[#allocation5 + $0x20] sm:$0xff] %vm3160_vm3, %v3438_v5  ;;  %v3022_v29 = vpop.permute.xlu1 %3021 }
 0x1f1   :  { %v7803_v57 = vld [vmem:[#allocation4 + $0xf1] sm:$0xff]  ;;  %2980 = vst.msk [vmem:[#allocation5 + $0x138] sm:$0xff] %vm33_vm0, %v7790_v60  ;;  %3128 = vrot.lane.b32.xlu1 %v3088_v19, %s5625_s17  ;;  %v7809_v34 = vld [vmem:[#allocation4 + $0x102] sm:$0xff]  ;;  %5317 = vmatprep.mubr.msk.f32.mxu1 %vm33_vm0, %v3653_v12 }
 0x1f2   :  { %v7814_v4 = vld [vmem:[#allocation4 + $0x100] sm:$0xff]  ;;  %3302 = vst.msk [vmem:[#allocation5 + $0x128] sm:$0xff] %vm33_vm0, %v7803_v57  ;;  %3623 = vst.msk [vmem:[#allocation5 + $0x130] sm:$0xff] %vm33_vm0, %v7809_v34  ;;  %5383 = vmatpush3.bf16.msra.mxu0 %v5382_v27  ;;  %v3688_v0 = vld [vmem:[%s8692_s3 + $0x68] sm:$0xff] }
 0x1f3   :  { %v7824_v22 = vld [vmem:[#allocation4 + $0x101] sm:$0xff]  ;;  %2981 = vst.msk [vmem:[#allocation5 + $0x150] sm:$0xff] %vm33_vm0, %v7814_v4  ;;  %5385 = vmatprep.subr.bf16.mxu0 %v5384_v61  ;;  %v3706_v49 = vld [vmem:[%s8692_s3 + $0xf8] sm:$0xff]  ;;  %2950 = vst.msk [vmem:[#allocation4 + $0x121] sm:$0xff] %vm33_vm0, %v2893_v16  ;;  %v5390_v17 = vpack.c.bf16 %v3688_v0, %v3687_v59  ;;  %v3343_v62 = vpop.permute.xlu0 %3342 }
 0x1f4   :  { %v3659_v3 = vld [vmem:[#allocation5 + $0x100] sm:$0xff]  ;;  %3303 = vst.msk [vmem:[#allocation5 + $0x140] sm:$0xff] %vm33_vm0, %v7824_v22  ;;  %3449 = vrot.lane.b32.xlu0 %v3410_v56, %s5625_s17  ;;  %v7837_v28 = vld [vmem:[#allocation4 + $0x112] sm:$0xff]  ;;  %5318 = vmatmul.mubr.msk.f32.gmra.mrb[8].mxu1 %vm33_vm0, %v3656_v24  ;;  %v5392_v14 = vpack.c.bf16 %v3706_v49, %v3705_v38  ;;  %v3119_v10 = vpop.permute.xlu1 %3118 }
 0x1f5   :  { %v7840_v54 = vld [vmem:[#allocation4 + $0x110] sm:$0xff]  ;;  %3225 = vrot.lane.b32.xlu1 %v3185_v7, %s5626_s30  ;;  %3624 = vst.msk [vmem:[#allocation5 + $0x148] sm:$0xff] %vm33_vm0, %v7837_v28  ;;  %5320 = vmatprep.mubr.msk.f32.mxu1 %vm33_vm0, %v3659_v3  ;;  %v3662_v52 = vld [vmem:[#allocation5 + $0x118] sm:$0xff]  ;;  %v3627_v19 = vld [vmem:[#allocation5] sm:$0xff] }
 0x1f6   :  { %v7842_v9 = vld [vmem:[#allocation4 + $0x111] sm:$0xff]  ;;  %2982 = vst.msk [vmem:[#allocation5 + $0x168] sm:$0xff] %vm33_vm0, %v7840_v54  ;;  %5387 = vmatpush3.bf16.msra.mxu0 %v5386_v44 }
 0x1f7   :  { %v3506_v18 = vld [vmem:[#allocation4 + $0x91] sm:$0xff]  ;;  %3304 = vst.msk [vmem:[#allocation5 + $0x158] sm:$0xff] %vm33_vm0, %v7842_v9  ;;  %5389 = vmatprep.subr.bf16.mxu0 %v5388_v39 }
 0x1f8   :  { %3260 = vst.msk [vmem:[#allocation5 + $0x30] sm:$0xff] %vm3257_vm4, %v3214_v51  ;;  %v3689_v1 = vld [vmem:[%s8692_s3 + $0x70] sm:$0xff]  ;;  %v3690_v45 = vld [vmem:[%s8692_s3 + $0x78] sm:$0xff]  ;;  %3545 = vrot.lane.b32.xlu0 %v3506_v18, %s5626_s30  ;;  %5321 = vmatmul.mubr.msk.f32.gmra.mrb[10].mxu1 %vm33_vm0, %v3662_v52  ;;  %3580 = vst.msk [vmem:[#allocation5 + $0x20] sm:$0xff] %vm3257_vm4, %v3534_v15 }
 0x1f9   :  { %3033 = vrot.lane.b32.xlu1 %v7782_v21, %s5624_s0  ;;  %v3665_v20 = vld [vmem:[#allocation5 + $0x130] sm:$0xff]  ;;  %v5394_v53 = vpack.c.bf16 %v3690_v45, %v3689_v1  ;;  %3067 = vst.msk [vmem:[#allocation5 + $0x48] sm:$0xff] %vm3063_vm2, %v3022_v29  ;;  %3388 = vst.msk [vmem:[#allocation5 + $0x38] sm:$0xff] %vm3063_vm2, %v3343_v62  ;;  %v3630_v7 = vld [vmem:[#allocation5 + $0x18] sm:$0xff] }
 0x1fa   :  { %5323 = vmatprep.mubr.msk.f32.mxu1 %vm33_vm0, %v3665_v20  ;;  %5391 = vmatpush3.bf16.msra.mxu0 %v5390_v17  ;;  %v3314_v35 = vld [vmem:[#allocation4 + $0xb2] sm:$0xff]  ;;  %v7868_v47 = vld [vmem:[#allocation4 + $0x122] sm:$0xff]  ;;  %3164 = vst.msk [vmem:[#allocation5 + $0x48] sm:$0xff] %vm3160_vm3, %v3119_v10 }
 0x1fb   :  { %5393 = vmatprep.subr.bf16.mxu0 %v5392_v14  ;;  %v7870_v33 = vld [vmem:[#allocation4 + $0x121] sm:$0xff]  ;;  %3625 = vst.msk [vmem:[#allocation5 + $0x160] sm:$0xff] %vm33_vm0, %v7868_v47  ;;  %v3610_v59 = vld [vmem:[#allocation4 + $0x132] sm:$0xff] }
 0x1fc   :  { %3354 = vrot.lane.b32.xlu0 %v3314_v35, %s5624_s0  ;;  %v3668_v36 = vld [vmem:[#allocation5 + $0x148] sm:$0xff]  ;;  %3305 = vst.msk [vmem:[#allocation5 + $0x170] sm:$0xff] %vm33_vm0, %v7870_v33  ;;  %3626 = vst.msk [vmem:[#allocation5 + $0x178] sm:$0xff] %vm33_vm0, %v3610_v59  ;;  %v3418_v16 = vld [vmem:[#allocation4 + $0x130] sm:$0xff] }
 0x1fd   :  { %3130 = vrot.lane.b32.xlu1 %v3314_v35, %s5625_s17  ;;  %5324 = vmatmul.mubr.msk.f32.gmra.mrb[12].mxu1 %vm33_vm0, %v3668_v36  ;;  %v3514_v39 = vld [vmem:[#allocation4 + $0x131] sm:$0xff] }
 0x1fe   :  { %5395 = vmatpush3.bf16.msra.mxu0 %v5394_v53 }
 0x1ff   :  { %v3631_v25 = vld [vmem:[#allocation5 + $0x20] sm:$0xff]  ;;  %v3633_v11 = vld [vmem:[#allocation5 + $0x30] sm:$0xff] }
 0x200   :  { %3451 = vrot.lane.b32.xlu0 %v7712_v43, %s5625_s17 }
 0x201   :  { %3227 = vrot.lane.b32.xlu1 %v7712_v43, %s5626_s30  ;;  %3824 = vmatmul.mubr.f32.vlgmr.msra.gmra.mrb[0].mxu0 %v3627_v19 }
 0x202   :  { %3828 = vmatprep.mubr.f32.mxu0 %v3631_v25  ;;  %v3671_v6 = vld [vmem:[#allocation5 + $0x160] sm:$0xff] }
 0x203   :  { %5326 = vmatprep.mubr.msk.f32.mxu1 %vm33_vm0, %v3671_v6 }
 0x204   :  { %3547 = vrot.lane.b32.xlu0 %v7720_v26, %s5626_s30  ;;  %v3440_v43 = vpop.permute.xlu0 %3439 }
 0x205   :  { %3035 = vrot.lane.b32.xlu1 %v7720_v26, %s5624_s0  ;;  %3829 = vmatmul.mubr.f32.gmra.mrb[2].mxu0 %v3630_v7  ;;  %3485 = vst.msk [vmem:[#allocation5 + $0x38] sm:$0xff] %vm3160_vm3, %v3440_v43  ;;  %v3216_v48 = vpop.permute.xlu1 %3215 }
 0x206   :  { %3261 = vst.msk [vmem:[#allocation5 + $0x48] sm:$0xff] %vm3257_vm4, %v3216_v48 }
 0x208   :  { %3356 = vrot.lane.b32.xlu0 %v7702_v23, %s5624_s0  ;;  %v3536_v26 = vpop.permute.xlu0 %3535 }
 0x209   :  { %3132 = vrot.lane.b32.xlu1 %v7702_v23, %s5625_s17  ;;  %3581 = vst.msk [vmem:[#allocation5 + $0x38] sm:$0xff] %vm3257_vm4, %v3536_v26  ;;  %v3024_v23 = vpop.permute.xlu1 %3023 }
 0x20a   :  { %3068 = vst.msk [vmem:[#allocation5 + $0x60] sm:$0xff] %vm3063_vm2, %v3024_v23 }
 0x20c   :  { %3453 = vrot.lane.b32.xlu0 %v7722_v58, %s5625_s17 }
 0x20d   :  { %3229 = vrot.lane.b32.xlu1 %v7722_v58, %s5626_s30  ;;  %v3345_v58 = vpop.permute.xlu0 %3344  ;;  %v3121_v50 = vpop.permute.xlu1 %3120  ;;  %v3636_v8 = vld [vmem:[#allocation5 + $0x48] sm:$0xff] }
 0x20e   :  { %3389 = vst.msk [vmem:[#allocation5 + $0x50] sm:$0xff] %vm3063_vm2, %v3345_v58 }
 0x20f   :  { %3165 = vst.msk [vmem:[#allocation5 + $0x60] sm:$0xff] %vm3160_vm3, %v3121_v50 }
 0x210   :  { %3549 = vrot.lane.b32.xlu0 %v7747_v31, %s5626_s30 }
 0x211   :  { %3037 = vrot.lane.b32.xlu1 %v7747_v31, %s5624_s0  ;;  %v3634_v31 = vld [vmem:[#allocation5 + $0x38] sm:$0xff] }
 0x212   :  { %3833 = vmatprep.mubr.f32.mxu0 %v3634_v31 }
 0x213   :  { %3834 = vmatmul.mubr.f32.gmra.mrb[4].mxu0 %v3633_v11 }
 0x214   :  { %3358 = vrot.lane.b32.xlu0 %v7709_v41, %s5624_s0 }
 0x215   :  { %3134 = vrot.lane.b32.xlu1 %v7709_v41, %s5625_s17 }
 0x217   :  { %v3442_v41 = vpop.permute.xlu0 %3441 }
 0x218   :  { %3455 = vrot.lane.b32.xlu0 %v7753_v40, %s5625_s17  ;;  %3486 = vst.msk [vmem:[#allocation5 + $0x50] sm:$0xff] %vm3160_vm3, %v3442_v41  ;;  %v3218_v21 = vpop.permute.xlu1 %3217 }
 0x219   :  { %3231 = vrot.lane.b32.xlu1 %v7753_v40, %s5626_s30  ;;  %3262 = vst.msk [vmem:[#allocation5 + $0x60] sm:$0xff] %vm3257_vm4, %v3218_v21 }
 0x21b   :  { %v3538_v40 = vpop.permute.xlu0 %3537 }
 0x21c   :  { %3551 = vrot.lane.b32.xlu0 %v7755_v30, %s5626_s30  ;;  %3582 = vst.msk [vmem:[#allocation5 + $0x50] sm:$0xff] %vm3257_vm4, %v3538_v40  ;;  %v3026_v27 = vpop.permute.xlu1 %3025 }
 0x21d   :  { %3039 = vrot.lane.b32.xlu1 %v7755_v30, %s5624_s0  ;;  %3069 = vst.msk [vmem:[#allocation5 + $0x78] sm:$0xff] %vm3063_vm2, %v3026_v27 }
 0x220   :  { %3360 = vrot.lane.b32.xlu0 %v7718_v37, %s5624_s0  ;;  %v3639_v63 = vld [vmem:[#allocation5 + $0x60] sm:$0xff] }
 0x221   :  { %3136 = vrot.lane.b32.xlu1 %v7718_v37, %s5625_s17  ;;  %v3347_v30 = vpop.permute.xlu0 %3346  ;;  %v3123_v32 = vpop.permute.xlu1 %3122 }
 0x222   :  { %3390 = vst.msk [vmem:[#allocation5 + $0x68] sm:$0xff] %vm3063_vm2, %v3347_v30 }
 0x223   :  { %3166 = vst.msk [vmem:[#allocation5 + $0x78] sm:$0xff] %vm3160_vm3, %v3123_v32  ;;  %v3637_v37 = vld [vmem:[#allocation5 + $0x50] sm:$0xff] }
 0x224   :  { %3457 = vrot.lane.b32.xlu0 %v7790_v60, %s5625_s17  ;;  %3838 = vmatprep.mubr.f32.mxu0 %v3637_v37 }
 0x225   :  { %3233 = vrot.lane.b32.xlu1 %v7790_v60, %s5626_s30  ;;  %3839 = vmatmul.mubr.f32.gmra.mrb[6].mxu0 %v3636_v8 }
 0x228   :  { %3553 = vrot.lane.b32.xlu0 %v7803_v57, %s5626_s30 }
 0x229   :  { %3041 = vrot.lane.b32.xlu1 %v7803_v57, %s5624_s0  ;;  %v3417_v57 = vld [vmem:[#allocation4 + $0x120] sm:$0xff] }
 0x22c   :  { %3362 = vrot.lane.b32.xlu0 %v7772_v55, %s5624_s0 }
 0x22d   :  { %3138 = vrot.lane.b32.xlu1 %v7772_v55, %s5625_s17  ;;  %v3444_v42 = vpop.permute.xlu0 %3443 }
 0x22e   :  { %3487 = vst.msk [vmem:[#allocation5 + $0x68] sm:$0xff] %vm3160_vm3, %v3444_v42  ;;  %v3220_v13 = vpop.permute.xlu1 %3219 }
 0x22f   :  { %3263 = vst.msk [vmem:[#allocation5 + $0x78] sm:$0xff] %vm3257_vm4, %v3220_v13 }
 0x230   :  { %3459 = vrot.lane.b32.xlu0 %v7814_v4, %s5625_s17 }
 0x231   :  { %3235 = vrot.lane.b32.xlu1 %v7814_v4, %s5626_s30  ;;  %v3540_v12 = vpop.permute.xlu0 %3539 }
 0x232   :  { %3583 = vst.msk [vmem:[#allocation5 + $0x68] sm:$0xff] %vm3257_vm4, %v3540_v12  ;;  %v3028_v55 = vpop.permute.xlu1 %3027 }
 0x233   :  { %3070 = vst.msk [vmem:[#allocation5 + $0x90] sm:$0xff] %vm3063_vm2, %v3028_v55 }
 0x234   :  { %3555 = vrot.lane.b32.xlu0 %v7824_v22, %s5626_s30 }
 0x235   :  { %3043 = vrot.lane.b32.xlu1 %v7824_v22, %s5624_s0  ;;  %v3349_v56 = vpop.permute.xlu0 %3348  ;;  %v3674_v22 = vld [vmem:[#allocation5 + $0x178] sm:$0xff] }
 0x236   :  { %3391 = vst.msk [vmem:[#allocation5 + $0x80] sm:$0xff] %vm3063_vm2, %v3349_v56  ;;  %v3642_v3 = vld [vmem:[#allocation5 + $0x78] sm:$0xff]  ;;  %5327 = vmatmul.mubr.msk.f32.gmra.mrb[14].mxu1 %vm33_vm0, %v3674_v22 }
 0x237   :  { %v3125_v61 = vpop.permute.xlu1 %3124 }
 0x238   :  { %3364 = vrot.lane.b32.xlu0 %v7809_v34, %s5624_s0  ;;  %3167 = vst.msk [vmem:[#allocation5 + $0x90] sm:$0xff] %vm3160_vm3, %v3125_v61 }
 0x239   :  { %3140 = vrot.lane.b32.xlu1 %v7809_v34, %s5625_s17  ;;  %v3640_v60 = vld [vmem:[#allocation5 + $0x68] sm:$0xff] }
 0x23a   :  { %3843 = vmatprep.mubr.f32.mxu0 %v3640_v60 }
 0x23b   :  { %3844 = vmatmul.mubr.f32.gmra.mrb[8].mxu0 %v3639_v63 }
 0x23c   :  { %3461 = vrot.lane.b32.xlu0 %v7840_v54, %s5625_s17 }
 0x23d   :  { %3237 = vrot.lane.b32.xlu1 %v7840_v54, %s5626_s30 }
 0x240   :  { %3557 = vrot.lane.b32.xlu0 %v7842_v9, %s5626_s30 }
 0x241   :  { %3045 = vrot.lane.b32.xlu1 %v7842_v9, %s5624_s0 }
 0x242   :  { %v3446_v2 = vpop.permute.xlu0 %3445  ;;  %v3222_v46 = vpop.permute.xlu1 %3221 }
 0x243   :  { %3488 = vst.msk [vmem:[#allocation5 + $0x80] sm:$0xff] %vm3160_vm3, %v3446_v2 }
 0x244   :  { %3366 = vrot.lane.b32.xlu0 %v7837_v28, %s5624_s0  ;;  %3264 = vst.msk [vmem:[#allocation5 + $0x90] sm:$0xff] %vm3257_vm4, %v3222_v46 }
 0x245   :  { %3142 = vrot.lane.b32.xlu1 %v7837_v28, %s5625_s17 }
 0x246   :  { %v3542_v34 = vpop.permute.xlu0 %3541  ;;  %v3030_v4 = vpop.permute.xlu1 %3029 }
 0x247   :  { %3584 = vst.msk [vmem:[#allocation5 + $0x80] sm:$0xff] %vm3257_vm4, %v3542_v34 }
 0x248   :  { %3463 = vrot.lane.b32.xlu0 %v3417_v57, %s5625_s17  ;;  %3071 = vst.msk [vmem:[#allocation5 + $0xa8] sm:$0xff] %vm3063_vm2, %v3030_v4 }
 0x249   :  { %3239 = vrot.lane.b32.xlu1 %v3417_v57, %s5626_s30 }
 0x24a   :  { %v3351_v24 = vpop.permute.xlu0 %3350 }
 0x24b   :  { %3392 = vst.msk [vmem:[#allocation5 + $0x98] sm:$0xff] %vm3063_vm2, %v3351_v24  ;;  %v3127_v44 = vpop.permute.xlu1 %3126  ;;  %v3645_v14 = vld [vmem:[#allocation5 + $0x90] sm:$0xff] }
 0x24c   :  { %3559 = vrot.lane.b32.xlu0 %v7870_v33, %s5626_s30  ;;  %3168 = vst.msk [vmem:[#allocation5 + $0xa8] sm:$0xff] %vm3160_vm3, %v3127_v44 }
 0x24e   :  { %v3643_v0 = vld [vmem:[#allocation5 + $0x80] sm:$0xff] }
 0x24f   :  { %3848 = vmatprep.mubr.f32.mxu0 %v3643_v0 }
 0x250   :  { %3368 = vrot.lane.b32.xlu0 %v7868_v47, %s5624_s0  ;;  %3849 = vmatmul.mubr.f32.gmra.mrb[10].mxu0 %v3642_v3 }
 0x254   :  { %3465 = vrot.lane.b32.xlu0 %v3418_v16, %s5625_s17  ;;  %v7990_v28 = vpop.f32.mrb[0].mxu1 }
 0x255   :  { %v7994_v9 = vpop.f32.mrb[1].mxu1 }
 0x258   :  { %3561 = vrot.lane.b32.xlu0 %v3514_v39, %s5626_s30 }
 0x25a   :  { %v3448_v38 = vpop.permute.xlu0 %3447  ;;  %v3224_v49 = vpop.permute.xlu1 %3223 }
 0x25b   :  { %3489 = vst.msk [vmem:[#allocation5 + $0x98] sm:$0xff] %vm3160_vm3, %v3448_v38 }
 0x25c   :  { %3265 = vst.msk [vmem:[#allocation5 + $0xa8] sm:$0xff] %vm3257_vm4, %v3224_v49 }
 0x25e   :  { %v3544_v5 = vpop.permute.xlu0 %3543  ;;  %v3032_v54 = vpop.permute.xlu1 %3031 }
 0x25f   :  { %3585 = vst.msk [vmem:[#allocation5 + $0x98] sm:$0xff] %vm3257_vm4, %v3544_v5 }
 0x260   :  { %3072 = vst.msk [vmem:[#allocation5 + $0xc0] sm:$0xff] %vm3063_vm2, %v3032_v54 }
 0x262   :  { %v3353_v18 = vpop.permute.xlu0 %3352 }
 0x263   :  { %3393 = vst.msk [vmem:[#allocation5 + $0xb0] sm:$0xff] %vm3063_vm2, %v3353_v18  ;;  %v3129_v51 = vpop.permute.xlu1 %3128  ;;  %v3648_v47 = vld [vmem:[#allocation5 + $0xa8] sm:$0xff] }
 0x264   :  { %3169 = vst.msk [vmem:[#allocation5 + $0xc0] sm:$0xff] %vm3160_vm3, %v3129_v51 }
 0x266   :  { %v3450_v52 = vpop.permute.xlu0 %3449  ;;  %v3646_v17 = vld [vmem:[#allocation5 + $0x98] sm:$0xff] }
 0x267   :  { %3490 = vst.msk [vmem:[#allocation5 + $0xb0] sm:$0xff] %vm3160_vm3, %v3450_v52  ;;  %3853 = vmatprep.mubr.f32.mxu0 %v3646_v17  ;;  %v3226_v1 = vpop.permute.xlu1 %3225 }
 0x268   :  { %3854 = vmatmul.mubr.f32.gmra.mrb[12].mxu0 %v3645_v14  ;;  %3266 = vst.msk [vmem:[#allocation5 + $0xc0] sm:$0xff] %vm3257_vm4, %v3226_v1 }
 0x26a   :  { %v3546_v45 = vpop.permute.xlu0 %3545 }
 0x26b   :  { %3586 = vst.msk [vmem:[#allocation5 + $0xb0] sm:$0xff] %vm3257_vm4, %v3546_v45  ;;  %v3034_v15 = vpop.permute.xlu1 %3033 }
 0x26c   :  { %3073 = vst.msk [vmem:[#allocation5 + $0xd8] sm:$0xff] %vm3063_vm2, %v3034_v15 }
 0x26e   :  { %v3355_v20 = vpop.permute.xlu0 %3354 }
 0x26f   :  { %3394 = vst.msk [vmem:[#allocation5 + $0xc8] sm:$0xff] %vm3063_vm2, %v3355_v20  ;;  %v3131_v29 = vpop.permute.xlu1 %3130  ;;  %v3651_v7 = vld [vmem:[#allocation5 + $0xc0] sm:$0xff] }
 0x270   :  { %3170 = vst.msk [vmem:[#allocation5 + $0xd8] sm:$0xff] %vm3160_vm3, %v3131_v29 }
 0x272   :  { %v3452_v53 = vpop.permute.xlu0 %3451  ;;  %v3649_v35 = vld [vmem:[#allocation5 + $0xb0] sm:$0xff] }
 0x273   :  { %3491 = vst.msk [vmem:[#allocation5 + $0xc8] sm:$0xff] %vm3160_vm3, %v3452_v53  ;;  %3858 = vmatprep.mubr.f32.mxu0 %v3649_v35  ;;  %v3228_v33 = vpop.permute.xlu1 %3227 }
 0x274   :  { %3859 = vmatmul.mubr.f32.gmra.mrb[14].mxu0 %v3648_v47  ;;  %3267 = vst.msk [vmem:[#allocation5 + $0xd8] sm:$0xff] %vm3257_vm4, %v3228_v33 }
 0x276   :  { %v3548_v36 = vpop.permute.xlu0 %3547 }
 0x277   :  { %3587 = vst.msk [vmem:[#allocation5 + $0xc8] sm:$0xff] %vm3257_vm4, %v3548_v36  ;;  %v3036_v62 = vpop.permute.xlu1 %3035 }
 0x278   :  { %3074 = vst.msk [vmem:[#allocation5 + $0xf0] sm:$0xff] %vm3063_vm2, %v3036_v62 }
 0x27a   :  { %v3357_v10 = vpop.permute.xlu0 %3356 }
 0x27b   :  { %3395 = vst.msk [vmem:[#allocation5 + $0xe0] sm:$0xff] %vm3063_vm2, %v3357_v10  ;;  %v3133_v19 = vpop.permute.xlu1 %3132  ;;  %v3654_v21 = vld [vmem:[#allocation5 + $0xd8] sm:$0xff] }
 0x27c   :  { %3171 = vst.msk [vmem:[#allocation5 + $0xf0] sm:$0xff] %vm3160_vm3, %v3133_v19 }
 0x27e   :  { %v3454_v25 = vpop.permute.xlu0 %3453  ;;  %v3652_v6 = vld [vmem:[#allocation5 + $0xc8] sm:$0xff] }
 0x27f   :  { %3492 = vst.msk [vmem:[#allocation5 + $0xe0] sm:$0xff] %vm3160_vm3, %v3454_v25  ;;  %3863 = vmatprep.mubr.f32.mxu0 %v3652_v6  ;;  %v3230_v43 = vpop.permute.xlu1 %3229  ;;  %v8015_v50 = vpop.f32.mrb[2].mxu1 }
 0x280   :  { %3864 = vmatmul.mubr.f32.gmra.mrb[16].mxu0 %v3651_v7  ;;  %3268 = vst.msk [vmem:[#allocation5 + $0xf0] sm:$0xff] %vm3257_vm4, %v3230_v43  ;;  %v8018_v31 = vpop.f32.mrb[3].mxu1 }
 0x282   :  { %v3550_v48 = vpop.permute.xlu0 %3549 }
 0x283   :  { %3588 = vst.msk [vmem:[#allocation5 + $0xe0] sm:$0xff] %vm3257_vm4, %v3550_v48  ;;  %v3038_v26 = vpop.permute.xlu1 %3037 }
 0x284   :  { %3075 = vst.msk [vmem:[#allocation5 + $0x108] sm:$0xff] %vm3063_vm2, %v3038_v26 }
 0x286   :  { %v3359_v23 = vpop.permute.xlu0 %3358 }
 0x287   :  { %3396 = vst.msk [vmem:[#allocation5 + $0xf8] sm:$0xff] %vm3063_vm2, %v3359_v23  ;;  %v3135_v58 = vpop.permute.xlu1 %3134  ;;  %v3657_v13 = vld [vmem:[#allocation5 + $0xf0] sm:$0xff] }
 0x288   :  { %3172 = vst.msk [vmem:[#allocation5 + $0x108] sm:$0xff] %vm3160_vm3, %v3135_v58 }
 0x28a   :  { %v3456_v11 = vpop.permute.xlu0 %3455  ;;  %v3655_v41 = vld [vmem:[#allocation5 + $0xe0] sm:$0xff] }
 0x28b   :  { %3493 = vst.msk [vmem:[#allocation5 + $0xf8] sm:$0xff] %vm3160_vm3, %v3456_v11  ;;  %3868 = vmatprep.mubr.f32.mxu0 %v3655_v41  ;;  %v3232_v40 = vpop.permute.xlu1 %3231 }
 0x28c   :  { %3869 = vmatmul.mubr.f32.gmra.mrb[18].mxu0 %v3654_v21  ;;  %3269 = vst.msk [vmem:[#allocation5 + $0x108] sm:$0xff] %vm3257_vm4, %v3232_v40 }
 0x28e   :  { %v3552_v27 = vpop.permute.xlu0 %3551 }
 0x28f   :  { %3589 = vst.msk [vmem:[#allocation5 + $0xf8] sm:$0xff] %vm3257_vm4, %v3552_v27  ;;  %v3040_v30 = vpop.permute.xlu1 %3039 }
 0x290   :  { %3076 = vst.msk [vmem:[#allocation5 + $0x120] sm:$0xff] %vm3063_vm2, %v3040_v30 }
 0x292   :  { %v3361_v32 = vpop.permute.xlu0 %3360 }
 0x293   :  { %3397 = vst.msk [vmem:[#allocation5 + $0x110] sm:$0xff] %vm3063_vm2, %v3361_v32  ;;  %v3137_v37 = vpop.permute.xlu1 %3136  ;;  %v3660_v46 = vld [vmem:[#allocation5 + $0x108] sm:$0xff] }
 0x294   :  { %3173 = vst.msk [vmem:[#allocation5 + $0x120] sm:$0xff] %vm3160_vm3, %v3137_v37 }
 0x296   :  { %v3458_v8 = vpop.permute.xlu0 %3457  ;;  %v3658_v42 = vld [vmem:[#allocation5 + $0xf8] sm:$0xff] }
 0x297   :  { %3494 = vst.msk [vmem:[#allocation5 + $0x110] sm:$0xff] %vm3160_vm3, %v3458_v8  ;;  %3873 = vmatprep.mubr.f32.mxu0 %v3658_v42  ;;  %v3234_v12 = vpop.permute.xlu1 %3233 }
 0x298   :  { %3874 = vmatmul.mubr.f32.gmra.mrb[20].mxu0 %v3657_v13  ;;  %3270 = vst.msk [vmem:[#allocation5 + $0x120] sm:$0xff] %vm3257_vm4, %v3234_v12 }
 0x29a   :  { %v3554_v55 = vpop.permute.xlu0 %3553 }
 0x29b   :  { %3590 = vst.msk [vmem:[#allocation5 + $0x110] sm:$0xff] %vm3257_vm4, %v3554_v55  ;;  %v3042_v56 = vpop.permute.xlu1 %3041 }
 0x29c   :  { %3077 = vst.msk [vmem:[#allocation5 + $0x138] sm:$0xff] %vm3063_vm2, %v3042_v56 }
 0x29e   :  { %v3363_v61 = vpop.permute.xlu0 %3362 }
 0x29f   :  { %3398 = vst.msk [vmem:[#allocation5 + $0x128] sm:$0xff] %vm3063_vm2, %v3363_v61  ;;  %v3139_v60 = vpop.permute.xlu1 %3138  ;;  %v3663_v3 = vld [vmem:[#allocation5 + $0x120] sm:$0xff] }
 0x2a0   :  { %3174 = vst.msk [vmem:[#allocation5 + $0x138] sm:$0xff] %vm3160_vm3, %v3139_v60 }
 0x2a2   :  { %v3460_v63 = vpop.permute.xlu0 %3459  ;;  %v3661_v2 = vld [vmem:[#allocation5 + $0x110] sm:$0xff] }
 0x2a3   :  { %3495 = vst.msk [vmem:[#allocation5 + $0x128] sm:$0xff] %vm3160_vm3, %v3460_v63  ;;  %3878 = vmatprep.mubr.f32.mxu0 %v3661_v2  ;;  %v3236_v57 = vpop.permute.xlu1 %3235 }
 0x2a4   :  { %3879 = vmatmul.mubr.f32.gmra.mrb[22].mxu0 %v3660_v46  ;;  %3271 = vst.msk [vmem:[#allocation5 + $0x138] sm:$0xff] %vm3257_vm4, %v3236_v57 }
 0x2a6   :  { %v3556_v34 = vpop.permute.xlu0 %3555 }
 0x2a7   :  { %3591 = vst.msk [vmem:[#allocation5 + $0x128] sm:$0xff] %vm3257_vm4, %v3556_v34  ;;  %v3044_v59 = vpop.permute.xlu1 %3043 }
 0x2a8   :  { %3078 = vst.msk [vmem:[#allocation5 + $0x150] sm:$0xff] %vm3063_vm2, %v3044_v59 }
 0x2aa   :  { %v3365_v4 = vpop.permute.xlu0 %3364  ;;  %v8038_v44 = vpop.f32.mrb[4].mxu1 }
 0x2ab   :  { %3399 = vst.msk [vmem:[#allocation5 + $0x140] sm:$0xff] %vm3063_vm2, %v3365_v4  ;;  %v3141_v24 = vpop.permute.xlu1 %3140  ;;  %v8040_v22 = vpop.f32.mrb[5].mxu1  ;;  %v3666_v52 = vld [vmem:[#allocation5 + $0x138] sm:$0xff] }
 0x2ac   :  { %3175 = vst.msk [vmem:[#allocation5 + $0x150] sm:$0xff] %vm3160_vm3, %v3141_v24 }
 0x2ae   :  { %v3462_v16 = vpop.permute.xlu0 %3461  ;;  %v3664_v0 = vld [vmem:[#allocation5 + $0x128] sm:$0xff] }
 0x2af   :  { %3496 = vst.msk [vmem:[#allocation5 + $0x140] sm:$0xff] %vm3160_vm3, %v3462_v16  ;;  %3883 = vmatprep.mubr.f32.mxu0 %v3664_v0  ;;  %v3238_v39 = vpop.permute.xlu1 %3237 }
 0x2b0   :  { %3884 = vmatmul.mubr.f32.gmra.mrb[24].mxu0 %v3663_v3  ;;  %3272 = vst.msk [vmem:[#allocation5 + $0x150] sm:$0xff] %vm3257_vm4, %v3238_v39 }
 0x2b2   :  { %v3558_v38 = vpop.permute.xlu0 %3557 }
 0x2b3   :  { %3592 = vst.msk [vmem:[#allocation5 + $0x140] sm:$0xff] %vm3257_vm4, %v3558_v38  ;;  %v3046_v49 = vpop.permute.xlu1 %3045 }
 0x2b4   :  { %3079 = vst.msk [vmem:[#allocation5 + $0x168] sm:$0xff] %vm3063_vm2, %v3046_v49 }
 0x2b6   :  { %v3367_v5 = vpop.permute.xlu0 %3366 }
 0x2b7   :  { %3400 = vst.msk [vmem:[#allocation5 + $0x158] sm:$0xff] %vm3063_vm2, %v3367_v5  ;;  %v3143_v54 = vpop.permute.xlu1 %3142  ;;  %v3669_v53 = vld [vmem:[#allocation5 + $0x150] sm:$0xff] }
 0x2b8   :  { %3176 = vst.msk [vmem:[#allocation5 + $0x168] sm:$0xff] %vm3160_vm3, %v3143_v54 }
 0x2ba   :  { %v3464_v18 = vpop.permute.xlu0 %3463  ;;  %v3667_v51 = vld [vmem:[#allocation5 + $0x140] sm:$0xff] }
 0x2bb   :  { %3497 = vst.msk [vmem:[#allocation5 + $0x158] sm:$0xff] %vm3160_vm3, %v3464_v18  ;;  %3888 = vmatprep.mubr.f32.mxu0 %v3667_v51  ;;  %v3240_v17 = vpop.permute.xlu1 %3239 }
 0x2bc   :  { %3889 = vmatmul.mubr.f32.gmra.mrb[26].mxu0 %v3666_v52  ;;  %3273 = vst.msk [vmem:[#allocation5 + $0x168] sm:$0xff] %vm3257_vm4, %v3240_v17 }
 0x2be   :  { %v3560_v14 = vpop.permute.xlu0 %3559 }
 0x2bf   :  { %3593 = vst.msk [vmem:[#allocation5 + $0x158] sm:$0xff] %vm3257_vm4, %v3560_v14 }
 0x2c2   :  { %v3369_v1 = vpop.permute.xlu0 %3368 }
 0x2c3   :  { %3401 = vst.msk [vmem:[#allocation5 + $0x170] sm:$0xff] %vm3063_vm2, %v3369_v1  ;;  %v5316_v45 = vpop.f32.mrb[6].mxu1  ;;  %v3672_v6 = vld [vmem:[#allocation5 + $0x168] sm:$0xff] }
 0x2c4   :  { %v4000_v15 = vpop.f32.mrb[7].mxu1 }
 0x2c6   :  { %v3466_v20 = vpop.permute.xlu0 %3465  ;;  %v3670_v29 = vld [vmem:[#allocation5 + $0x158] sm:$0xff] }
 0x2c7   :  { %3498 = vst.msk [vmem:[#allocation5 + $0x170] sm:$0xff] %vm3160_vm3, %v3466_v20  ;;  %3893 = vmatprep.mubr.f32.mxu0 %v3670_v29  ;;  %v8053_v35 = vpop.f32.mrb[8].mxu1  ;;  %v4198_v29 = vlaneseq }
 0x2c8   :  { %3894 = vmatmul.mubr.f32.gmra.mrb[28].mxu0 %v3669_v53  ;;  %v4010_v47 = vpop.f32.mrb[9].mxu1  ;;  %v8090_v53 = vld [vmem:[%s8693_s4] ss:$0 sm:$0xff] }
 0x2ca   :  { %v3562_v33 = vpop.permute.xlu0 %3561 }
 0x2cb   :  { %3594 = vst.msk [vmem:[#allocation5 + $0x170] sm:$0xff] %vm3257_vm4, %v3562_v33  ;;  %v8056_v36 = vpop.f32.mrb[10].mxu1 }
 0x2cc   :  { %v8058_v62 = vpop.f32.mrb[11].mxu1 }
 0x2d0   :  { %v8060_v10 = vpop.f32.mrb[12].mxu1 }
 0x2d1   :  { %v8062_v19 = vpop.f32.mrb[13].mxu1 }
 0x2d2   :  { %v3673_v25 = vld [vmem:[#allocation5 + $0x170] sm:$0xff] }
 0x2d3   :  { %3898 = vmatprep.mubr.f32.mxu0 %v3673_v25  ;;  %v4199_v25 = vshrl.u32 %v4198_v29, 7 }
 0x2d4   :  { %3899 = vmatmul.mubr.f32.gmra.mrb[30].mxu0 %v3672_v6  ;;  %v5072_v7 = vpop.f32.mrb[0].mxu0 }
 0x2d5   :  { %v5073_v43 = vpop.f32.mrb[1].mxu0 }
 0x2d6   :  { %v5074_v48 = vadd.f32 %v5073_v43, %v5072_v7 }
 0x2d8   :  { %v3971_v26 = vadd.f32 %v5074_v48, %v7994_v9  ;;  %v5075_v23 = vpop.f32.mrb[2].mxu0 }
 0x2d9   :  { %v5076_v58 = vpop.f32.mrb[3].mxu0 }
 0x2da   :  { %4050 = vst.msk [vmem:[#allocation6] sm:$0xff] %vm4049_vm5, %v3971_v26  ;;  %v5077_v11 = vadd.f32 %v5076_v58, %v5075_v23 }
 0x2dc   :  { %v3976_v41 = vadd.f32 %v7990_v28, %v5077_v11 }
 0x2de   :  { %4051 = vst.msk [vmem:[#allocation6 + $0x8] sm:$0xff] %vm4049_vm5, %v3976_v41 }
 0x2e1   :  { %v4066_v38 = vld [vmem:[#allocation6] ss:$2 sm:$0xf]  ;;  %v4098_v49 = vld [vmem:[#allocation6 + $0x1] ss:$2 sm:$0xf] }
 0x2e2   :  { %v4129_v18 = vmax.f32 %v4066_v38, %v4098_v49 }
 0x2e4   :  { %v4146_v1 = vsel %vm4145_vm6, %v4129_v18, -inf  ;;  %v4440_v18 = vld [vmem:[%s8694_s5 + $0x28] sm:$0xff] }
 0x2e5   :  { %v4100_v39 = vld [vmem:[#allocation6 + $0x9] ss:$2 sm:$0xf] }
 0x2e6   :  { %v5078_v21 = vpop.f32.mrb[4].mxu0 }
 0x2e7   :  { %v5079_v40 = vpop.f32.mrb[5].mxu0 }
 0x2e8   :  { %v5080_v27 = vadd.f32 %v5079_v40, %v5078_v21 }
 0x2ea   :  { %v3981_v30 = vadd.f32 %v5080_v27, %v8018_v31 }
 0x2ec   :  { %4052 = vst.msk [vmem:[#allocation6 + $0x10] sm:$0xff] %vm4049_vm5, %v3981_v30 }
 0x2f8   :  { %v5081_v32 = vpop.f32.mrb[6].mxu0 }
 0x2f9   :  { %v5082_v37 = vpop.f32.mrb[7].mxu0 }
 0x2fa   :  { %v5083_v8 = vadd.f32 %v5082_v37, %v5081_v32 }
 0x2fc   :  { %v3986_v9 = vadd.f32 %v8015_v50, %v5083_v8 }
 0x2fe   :  { %4053 = vst.msk [vmem:[#allocation6 + $0x18] sm:$0xff] %vm4049_vm5, %v3986_v9 }
 0x305   :  { %v4072_v27 = vld [vmem:[#allocation6 + $0x18] ss:$2 sm:$0xf]  ;;  %v4104_v8 = vld [vmem:[#allocation6 + $0x19] ss:$2 sm:$0xf] }
 0x309   :  { %v8074_v55 = vpop.f32.mrb[14].mxu1 }
 0x30a   :  { %v8076_v31 = vpop.f32.mrb[15].mxu1 }
 0x30e   :  { %v5084_v42 = vpop.f32.mrb[8].mxu0 }
 0x30f   :  { %v5085_v13 = vpop.f32.mrb[9].mxu0 }
 0x310   :  { %v5086_v12 = vadd.f32 %v5085_v13, %v5084_v42  ;;  %v4070_v42 = vld [vmem:[#allocation6 + $0x10] ss:$2 sm:$0xf]  ;;  %v4102_v13 = vld [vmem:[#allocation6 + $0x11] ss:$2 sm:$0xf] }
 0x312   :  { %v3991_v28 = vadd.f32 %v5086_v12, %v8040_v22  ;;  %v4451_v12 = vld [vmem:[%s8694_s5 + $0x80] sm:$0xff] }
 0x314   :  { %4054 = vst.msk [vmem:[#allocation6 + $0x20] sm:$0xff] %vm4049_vm5, %v3991_v28  ;;  %v4435_v28 = vld [vmem:[%s8694_s5] sm:$0xff] }
 0x323   :  { %v5087_v56 = vpop.f32.mrb[10].mxu0 }
 0x324   :  { %v5088_v61 = vpop.f32.mrb[11].mxu0 }
 0x325   :  { %v5089_v60 = vadd.f32 %v5088_v61, %v5087_v56  ;;  %v4132_v61 = vmax.f32 %v4072_v27, %v4104_v8 }
 0x327   :  { %v3996_v63 = vadd.f32 %v8038_v44, %v5089_v60  ;;  %v4068_v44 = vld [vmem:[#allocation6 + $0x8] ss:$2 sm:$0xf] }
 0x328   :  { %v4130_v5 = vmax.f32 %v4068_v44, %v4100_v39  ;;  %v4439_v39 = vld [vmem:[%s8694_s5 + $0x20] sm:$0xff] }
 0x329   :  { %4055 = vst.msk [vmem:[#allocation6 + $0x28] sm:$0xff] %vm4049_vm5, %v3996_v63  ;;  %v4436_v63 = vld [vmem:[%s8694_s5 + $0x8] sm:$0xff] }
 0x32a   :  { %v4147_v17 = vsel %vm4145_vm6, %v4130_v5, -inf  ;;  %v4150_v5 = vsel %vm4145_vm6, %v4132_v61, -inf }
 0x33b   :  { %v5090_v50 = vpop.f32.mrb[12].mxu0 }
 0x33c   :  { %v5091_v2 = vpop.f32.mrb[13].mxu0 }
 0x33d   :  { %v5092_v46 = vadd.f32 %v5091_v2, %v5090_v50  ;;  %v4453_v50 = vld [vmem:[%s8694_s5 + $0x90] sm:$0xff]  ;;  %v4454_v2 = vld [vmem:[%s8694_s5 + $0x98] sm:$0xff] }
 0x33f   :  { %v4001_v57 = vadd.f32 %v5092_v46, %v4000_v15  ;;  %v5627_v15 = vmov 1983009808  }
 0x340   :  { %v4196_v20 = vunpack.c.l.s4 %v5627_v15 }
 0x341   :  { %4056 = vst.msk [vmem:[#allocation6 + $0x30] sm:$0xff] %vm4049_vm5, %v4001_v57  ;;  %v4131_v57 = vmax.f32 %v4070_v42, %v4102_v13 }
 0x342   :  { %v4197_v33 = vunpack.c.0.s8 %v4196_v20 }
 0x344   :  { %v8093_v58 = vsub.s32 %v4197_v33, %v4199_v25  ;;  %v5414_v25 = vpack.c.bf16 %v4440_v18, %v4439_v39  ;;  %v4106_v18 = vld [vmem:[#allocation6 + $0x21] ss:$2 sm:$0xf] }
 0x347   :  { %v5093_v34 = vpop.f32.mrb[14].mxu0 }
 0x348   :  { %v5094_v59 = vpop.f32.mrb[15].mxu0 }
 0x349   :  { %v5095_v4 = vadd.f32 %v5094_v59, %v5093_v34  ;;  %v5406_v34 = vpack.c.bf16 %v4436_v63, %v4435_v28  ;;  %v5408_v59 = vpack.c.bf16 %v4454_v2, %v4453_v50 }
 0x34b   :  { %v4006_v24 = vadd.f32 %v5316_v45, %v5095_v4  ;;  %v4148_v45 = vmax.f32 %v4146_v1, %v4147_v17  ;;  %v4437_v4 = vld [vmem:[%s8694_s5 + $0x10] sm:$0xff]  ;;  %v4149_v1 = vsel %vm4145_vm6, %v4131_v57, -inf }
 0x34c   :  { %v4151_v33 = vmax.f32 %v4149_v1, %v4150_v5 }
 0x34d   :  { %4057 = vst.msk [vmem:[#allocation6 + $0x38] sm:$0xff] %vm4049_vm5, %v4006_v24  ;;  %v4438_v24 = vld [vmem:[%s8694_s5 + $0x18] sm:$0xff] }
 0x34e   :  { %v5410_v44 = vpack.c.bf16 %v4438_v24, %v4437_v4  ;;  %v4178_v28 = vadd.f32 %v8090_v53, %v4151_v33 }
 0x350   :  { %v4186_v4 = vmax.f32 %v4178_v28, 0.0 }
 0x353   :  { %v5096_v16 = vpop.f32.mrb[16].mxu0 }
 0x354   :  { %v5097_v0 = vpop.f32.mrb[17].mxu0 }
 0x355   :  { %v5098_v22 = vadd.f32 %v5097_v0, %v5096_v16  ;;  %v4455_v16 = vld [vmem:[%s8694_s5 + $0xa0] sm:$0xff] }
 0x357   :  { %v4011_v3 = vadd.f32 %v5098_v22, %v4010_v47  ;;  %v4177_v47 = vadd.f32 %v8090_v53, %v4148_v45  ;;  %v4456_v22 = vld [vmem:[%s8694_s5 + $0xa8] sm:$0xff] }
 0x359   :  { %4058 = vst.msk [vmem:[#allocation6 + $0x40] sm:$0xff] %vm4049_vm5, %v4011_v3  ;;  %v4185_v23 = vmax.f32 %v4177_v47, 0.0 }
 0x35b   :  { %v4201_v37 = vrot.slane %v4185_v23, %v8093_v58  ;;  %v4442_v23 = vld [vmem:[%s8694_s5 + $0x38] sm:$0xff] }
 0x35d   :  { %v8119_v46 = vcombine.high %v4201_v37, %v4201_v37  ;;  %v4225_v3 = vrot.slane %v4201_v37, 1 }
 0x35f   :  { %v5099_v54 = vpop.f32.mrb[18].mxu0 }
 0x360   :  { %v5100_v51 = vpop.f32.mrb[19].mxu0  ;;  %v4082_v6 = vld [vmem:[#allocation6 + $0x40] ss:$2 sm:$0xf] }
 0x361   :  { %v5101_v52 = vadd.f32 %v5100_v51, %v5099_v54  ;;  %v4114_v7 = vld [vmem:[#allocation6 + $0x41] ss:$2 sm:$0xf]  ;;  %v5412_v54 = vpack.c.bf16 %v4456_v22, %v4455_v16  ;;  %v4457_v51 = vld [vmem:[%s8694_s5 + $0xb0] sm:$0xff] }
 0x362   :  { %v4137_v26 = vmax.f32 %v4082_v6, %v4114_v7 }
 0x363   :  { %v4016_v14 = vadd.f32 %v8053_v35, %v5101_v52  ;;  %v4458_v52 = vld [vmem:[%s8694_s5 + $0xb8] sm:$0xff] }
 0x364   :  { %v4158_v30 = vsel %vm4145_vm6, %v4137_v26, -inf  ;;  %v5416_v6 = vpack.c.bf16 %v4458_v52, %v4457_v51  ;;  %v4441_v26 = vld [vmem:[%s8694_s5 + $0x30] sm:$0xff] }
 0x365   :  { %4059 = vst.msk [vmem:[#allocation6 + $0x48] sm:$0xff] %vm4049_vm5, %v4016_v14  ;;  %v4248_v14 = vrot.slane %v8119_v46, 1  ;;  %v4461_v51 = vld [vmem:[%s8694_s5 + $0xd0] sm:$0xff] }
 0x366   :  { %v4445_v52 = vld [vmem:[%s8694_s5 + $0x50] sm:$0xff] }
 0x36b   :  { %v5102_v35 = vpop.f32.mrb[20].mxu0 }
 0x36c   :  { %v5103_v43 = vpop.f32.mrb[21].mxu0  ;;  %v4084_v48 = vld [vmem:[#allocation6 + $0x48] ss:$2 sm:$0xf] }
 0x36d   :  { %v5104_v11 = vadd.f32 %v5103_v43, %v5102_v35  ;;  %v4116_v41 = vld [vmem:[#allocation6 + $0x49] ss:$2 sm:$0xf] }
 0x36e   :  { %v4138_v21 = vmax.f32 %v4084_v48, %v4116_v41 }
 0x36f   :  { %v4021_v40 = vadd.f32 %v5104_v11, %v8058_v62  ;;  %v4452_v62 = vld [vmem:[%s8694_s5 + $0x88] sm:$0xff] }
 0x370   :  { %v4159_v32 = vsel %vm4145_vm6, %v4138_v21, -inf  ;;  %v5404_v60 = vpack.c.bf16 %v4452_v62, %v4451_v12  ;;  %v4459_v21 = vld [vmem:[%s8694_s5 + $0xc0] sm:$0xff]  ;;  %v4444_v62 = vld [vmem:[%s8694_s5 + $0x48] sm:$0xff] }
 0x371   :  { %4060 = vst.msk [vmem:[#allocation6 + $0x50] sm:$0xff] %vm4049_vm5, %v4021_v40  ;;  %v4160_v9 = vmax.f32 %v4158_v30, %v4159_v32  ;;  %v4460_v40 = vld [vmem:[%s8694_s5 + $0xc8] sm:$0xff]  ;;  %v4443_v12 = vld [vmem:[%s8694_s5 + $0x40] sm:$0xff] }
 0x372   :  { %5405 = vmatprep.subr.bf16.mxu1 %v5404_v60  ;;  %v5420_v13 = vpack.c.bf16 %v4460_v40, %v4459_v21  ;;  %v5422_v2 = vpack.c.bf16 %v4444_v62, %v4443_v12 }
 0x373   :  { %v4181_v56 = vadd.f32 %v8090_v53, %v4160_v9  ;;  %5407 = vmatpush3.bf16.msra.mxu1 %v5406_v34  ;;  %v5418_v9 = vpack.c.bf16 %v4442_v23, %v4441_v26 }
 0x374   :  { %5409 = vmatprep.subr.bf16.mxu1 %v5408_v59 }
 0x375   :  { %v4189_v0 = vmax.f32 %v4181_v56, 0.0 }
 0x377   :  { %v5105_v38 = vpop.f32.mrb[22].mxu0  ;;  %v4208_v49 = vrot.slane %v4189_v0, %v8093_v58  ;;  %5411 = vmatpush3.bf16.msra.mxu1 %v5410_v44 }
 0x378   :  { %v5106_v17 = vpop.f32.mrb[23].mxu0  ;;  %5413 = vmatprep.subr.bf16.mxu1 %v5412_v54  ;;  %v4086_v61 = vld [vmem:[#allocation6 + $0x50] ss:$2 sm:$0xf] }
 0x379   :  { %v5107_v45 = vadd.f32 %v5106_v17, %v5105_v38  ;;  %v4228_v15 = vsel %vm4214_vm7, %v4208_v49, %v4225_v3  ;;  %v4238_v20 = vcombine.high %v4208_v49, %v4208_v49  ;;  %v4213_v29 = vrot.slane %v4208_v49, 7  ;;  %v4118_v60 = vld [vmem:[#allocation6 + $0x51] ss:$2 sm:$0xf] }
 0x37a   :  { %v4229_v47 = vsel %vm4216_vm8, %v4208_v49, %v4228_v15  ;;  %v4139_v59 = vmax.f32 %v4086_v61, %v4118_v60  ;;  %v4076_v3 = vld [vmem:[#allocation6 + $0x28] ss:$2 sm:$0xf]  ;;  %v4267_v38 = vrot.slane %v4186_v4, %v8093_v58  ;;  %v4074_v54 = vld [vmem:[#allocation6 + $0x20] ss:$2 sm:$0xf] }
 0x37b   :  { %v4026_v7 = vadd.f32 %v8056_v36, %v5107_v45  ;;  %v4230_v35 = vsel %vm4218_vm9, %v4208_v49, %v4229_v47  ;;  %v4251_v43 = vsel %vm4214_vm7, %v4238_v20, %v4248_v14  ;;  %v4215_v48 = vsel %vm4214_vm7, %v4213_v29, %v4201_v37  ;;  %5415 = vmatpush3.bf16.msra.mxu1 %v5414_v25  ;;  %v4446_v45 = vld [vmem:[%s8694_s5 + $0x58] sm:$0xff]  ;;  %v4463_v15 = vld [vmem:[%s8694_s5 + $0xe0] sm:$0xff] }
 0x37c   :  { %v4231_v11 = vsel %vm4220_vm10, %v4208_v49, %v4230_v35  ;;  %v4252_v41 = vsel %vm4216_vm8, %v4238_v20, %v4251_v43  ;;  %v4217_v36 = vsel %vm4216_vm8, %v4213_v29, %v4215_v48  ;;  %v4241_v32 = vrot.slane %v4238_v20, 7  ;;  %5417 = vmatprep.subr.bf16.mxu1 %v5416_v6  ;;  %v4108_v49 = vld [vmem:[#allocation6 + $0x29] ss:$2 sm:$0xf]  ;;  %v4447_v6 = vld [vmem:[%s8694_s5 + $0x60] sm:$0xff]  ;;  %v4465_v35 = vld [vmem:[%s8694_s5 + $0xf0] sm:$0xff] }
 0x37d   :  { %4061 = vst.msk [vmem:[#allocation6 + $0x58] sm:$0xff] %vm4049_vm5, %v4026_v7  ;;  %4232 = vrot.lane.b32.xlu0 %v4231_v11, %s5625_s17  ;;  %v4253_v27 = vsel %vm4218_vm9, %v4238_v20, %v4252_v41  ;;  %v4219_v30 = vsel %vm4218_vm9, %v4213_v29, %v4217_v36  ;;  %v4161_v44 = vsel %vm4145_vm6, %v4139_v59, -inf  ;;  %v4134_v14 = vmax.f32 %v4076_v3, %v4108_v49  ;;  %v4448_v7 = vld [vmem:[%s8694_s5 + $0x68] sm:$0xff]  ;;  %v4466_v48 = vld [vmem:[%s8694_s5 + $0xf8] sm:$0xff]  ;;  %v4515_v11 = vld [vmem:[%s8694_s5 + $0x280] sm:$0xff] }
 0x37e   :  { %v4254_v37 = vsel %vm4220_vm10, %v4238_v20, %v4253_v27  ;;  %v4221_v8 = vsel %vm4220_vm10, %v4213_v29, %v4219_v30  ;;  %v4242_v42 = vsel %vm4214_vm7, %v4241_v32, %v8119_v46  ;;  %v4464_v20 = vld [vmem:[%s8694_s5 + $0xe8] sm:$0xff]  ;;  %v4295_v29 = vcombine.high %v4267_v38, %v4267_v38  ;;  %v4499_v36 = vld [vmem:[%s8694_s5 + $0x200] sm:$0xff] }
 0x37f   :  { %4255 = vrot.lane.b32.xlu1 %v4254_v37, %s5625_s17  ;;  %4224 = vst.msk [vmem:[#allocation7] sm:$0x3] %vm4223_vm11, %v4221_v8  ;;  %v4243_v56 = vsel %vm4216_vm8, %v4241_v32, %v4242_v42  ;;  %5419 = vmatpush3.bf16.msra.mxu1 %v5418_v9  ;;  %v4133_v47 = vmax.f32 %v4074_v54, %v4106_v18  ;;  %v4284_v26 = vrot.slane %v4267_v38, 1  ;;  %v4516_v41 = vld [vmem:[%s8694_s5 + $0x288] sm:$0xff]  ;;  %v4153_v27 = vsel %vm4145_vm6, %v4134_v14, -inf  ;;  %v4450_v37 = vld [vmem:[%s8694_s5 + $0x78] sm:$0xff] }
 0x380   :  { %v4244_v63 = vsel %vm4218_vm9, %v4241_v32, %v4243_v56  ;;  %5421 = vmatprep.subr.bf16.mxu1 %v5420_v13  ;;  %v5426_v33 = vpack.c.bf16 %v4446_v45, %v4445_v52  ;;  %v5428_v25 = vpack.c.bf16 %v4464_v20, %v4463_v15  ;;  %v5430_v23 = vpack.c.bf16 %v4448_v7, %v4447_v6  ;;  %v4500_v9 = vld [vmem:[%s8694_s5 + $0x208] sm:$0xff]  ;;  %v4501_v7 = vld [vmem:[%s8694_s5 + $0x210] sm:$0xff] }
 0x381   :  { %v4245_v50 = vsel %vm4220_vm10, %v4241_v32, %v4244_v63  ;;  %v5432_v30 = vpack.c.bf16 %v4466_v48, %v4465_v35  ;;  %v4449_v32 = vld [vmem:[%s8694_s5 + $0x70] sm:$0xff]  ;;  %v5468_v8 = vpack.c.bf16 %v4516_v41, %v4515_v11  ;;  %v4306_v13 = vrot.slane %v4295_v29, 1  ;;  %v4502_v35 = vld [vmem:[%s8694_s5 + $0x218] sm:$0xff] }
 0x382   :  { %4247 = vst.msk [vmem:[#allocation7 + $0x2] sm:$0x3] %vm4223_vm11, %v4245_v50  ;;  %v4152_v12 = vsel %vm4145_vm6, %v4133_v47, -inf  ;;  %v5470_v62 = vpack.c.bf16 %v4500_v9, %v4499_v36  ;;  %v4518_v47 = vld [vmem:[%s8694_s5 + $0x298] sm:$0xff]  ;;  %v5474_v48 = vpack.c.bf16 %v4502_v35, %v4501_v7  ;;  %v4519_v9 = vld [vmem:[%s8694_s5 + $0x2a0] sm:$0xff] }
 0x383   :  { %v5108_v46 = vpop.f32.mrb[24].mxu0  ;;  %5423 = vmatpush3.bf16.msra.mxu1 %v5422_v2  ;;  %5469 = vmatprep.subr.bf16.mxu0 %v5468_v8  ;;  %v4154_v50 = vmax.f32 %v4152_v12, %v4153_v27  ;;  %v5434_v2 = vpack.c.bf16 %v4450_v37, %v4449_v32  ;;  %v4078_v27 = vld [vmem:[#allocation6 + $0x30] ss:$2 sm:$0xf] }
 0x384   :  { %v5109_v57 = vpop.f32.mrb[25].mxu0  ;;  %v4088_v34 = vld [vmem:[#allocation6 + $0x58] ss:$2 sm:$0xf]  ;;  %5471 = vmatpush3.bf16.msra.mxu0 %v5470_v62 }
 0x385   :  { %v5110_v24 = vadd.f32 %v5109_v57, %v5108_v46  ;;  %v4120_v16 = vld [vmem:[#allocation6 + $0x59] ss:$2 sm:$0xf]  ;;  %v4179_v49 = vadd.f32 %v8090_v53, %v4154_v50 }
 0x386   :  { %v4140_v0 = vmax.f32 %v4088_v34, %v4120_v16 }
 0x387   :  { %v4031_v22 = vadd.f32 %v5110_v24, %v8062_v19  ;;  %v4462_v19 = vld [vmem:[%s8694_s5 + $0xd8] sm:$0xff] }
 0x388   :  { %v4162_v39 = vsel %vm4145_vm6, %v4140_v0, -inf  ;;  %v5424_v1 = vpack.c.bf16 %v4462_v19, %v4461_v51 }
 0x389   :  { %4062 = vst.msk [vmem:[#allocation6 + $0x60] sm:$0xff] %vm4049_vm5, %v4031_v22  ;;  %v4163_v5 = vmax.f32 %v4161_v44, %v4162_v39  ;;  %v4483_v39 = vld [vmem:[%s8694_s5 + $0x180] sm:$0xff] }
 0x38a   :  { %5425 = vmatprep.subr.bf16.mxu1 %v5424_v1  ;;  %v4187_v1 = vmax.f32 %v4179_v49, 0.0 }
 0x38b   :  { %v4182_v17 = vadd.f32 %v8090_v53, %v4163_v5  ;;  %5427 = vmatpush3.bf16.msra.mxu1 %v5426_v33 }
 0x38c   :  { %5429 = vmatprep.subr.bf16.mxu1 %v5428_v25  ;;  %v4325_v36 = vrot.slane %v4187_v1, %v8093_v58 }
 0x38d   :  { %v4190_v43 = vmax.f32 %v4182_v17, 0.0 }
 0x38e   :  { %v4353_v8 = vcombine.high %v4325_v36, %v4325_v36 }
 0x38f   :  { %v5111_v21 = vpop.f32.mrb[26].mxu0  ;;  %v4274_v40 = vrot.slane %v4190_v43, %v8093_v58  ;;  %5431 = vmatpush3.bf16.msra.mxu1 %v5430_v23  ;;  %v4080_v23 = vld [vmem:[#allocation6 + $0x38] ss:$2 sm:$0xf] }
 0x390   :  { %v5112_v42 = vpop.f32.mrb[27].mxu0  ;;  %5433 = vmatprep.subr.bf16.mxu1 %v5432_v30  ;;  %v4090_v51 = vld [vmem:[#allocation6 + $0x60] ss:$2 sm:$0xf] }
 0x391   :  { %v5113_v28 = vadd.f32 %v5112_v42, %v5111_v21  ;;  %v4287_v56 = vsel %vm4214_vm7, %v4274_v40, %v4284_v26  ;;  %v4296_v61 = vcombine.high %v4274_v40, %v4274_v40  ;;  %v4277_v60 = vrot.slane %v4274_v40, 7  ;;  %v4122_v19 = vld [vmem:[#allocation6 + $0x61] ss:$2 sm:$0xf]  ;;  %v4520_v42 = vld [vmem:[%s8694_s5 + $0x2a8] sm:$0xff] }
 0x392   :  { %v4288_v63 = vsel %vm4216_vm8, %v4274_v40, %v4287_v56  ;;  %v4141_v20 = vmax.f32 %v4090_v51, %v4122_v19  ;;  %v4112_v21 = vld [vmem:[#allocation6 + $0x39] ss:$2 sm:$0xf]  ;;  %v4110_v30 = vld [vmem:[#allocation6 + $0x31] ss:$2 sm:$0xf]  ;;  %v5476_v62 = vpack.c.bf16 %v4520_v42, %v4519_v9 }
 0x393   :  { %v4036_v46 = vadd.f32 %v8060_v10, %v5113_v28  ;;  %v4289_v57 = vsel %vm4218_vm9, %v4274_v40, %v4288_v63  ;;  %v4309_v34 = vsel %vm4214_vm7, %v4296_v61, %v4306_v13  ;;  %v4278_v59 = vsel %vm4214_vm7, %v4277_v60, %v4267_v38  ;;  %5435 = vmatpush3.bf16.msra.mxu1 %v5434_v2  ;;  %v4484_v38 = vld [vmem:[%s8694_s5 + $0x188] sm:$0xff]  ;;  %v4503_v13 = vld [vmem:[%s8694_s5 + $0x220] sm:$0xff]  ;;  %v4526_v9 = vld [vmem:[%s8694_s5 + $0x2d8] sm:$0xff] }
 0x394   :  { %v4290_v4 = vsel %vm4220_vm10, %v4274_v40, %v4289_v57  ;;  %v4310_v24 = vsel %vm4216_vm8, %v4296_v61, %v4309_v34  ;;  %v4279_v16 = vsel %vm4216_vm8, %v4277_v60, %v4278_v59  ;;  %v4299_v22 = vrot.slane %v4296_v61, 7  ;;  %v4504_v28 = vld [vmem:[%s8694_s5 + $0x228] sm:$0xff] }
 0x395   :  { %4063 = vst.msk [vmem:[#allocation6 + $0x68] sm:$0xff] %vm4049_vm5, %v4036_v46  ;;  %4291 = vrot.lane.b32.xlu0 %v4290_v4, %s5625_s17  ;;  %v4311_v0 = vsel %vm4218_vm9, %v4296_v61, %v4310_v24  ;;  %v4280_v10 = vsel %vm4218_vm9, %v4277_v60, %v4279_v16  ;;  %v5436_v54 = vpack.c.bf16 %v4484_v38, %v4483_v39  ;;  %v4164_v11 = vsel %vm4145_vm6, %v4141_v20, -inf }
 0x396   :  { %v4312_v3 = vsel %vm4220_vm10, %v4296_v61, %v4311_v0  ;;  %v4281_v44 = vsel %vm4220_vm10, %v4277_v60, %v4280_v10  ;;  %v4300_v5 = vsel %vm4214_vm7, %v4299_v22, %v4295_v29  ;;  %v4517_v29 = vld [vmem:[%s8694_s5 + $0x290] sm:$0xff]  ;;  %v4136_v37 = vmax.f32 %v4080_v23, %v4112_v21  ;;  %v4523_v23 = vld [vmem:[%s8694_s5 + $0x2c0] sm:$0xff]  ;;  %v4508_v21 = vld [vmem:[%s8694_s5 + $0x248] sm:$0xff] }
 0x397   :  { %4313 = vrot.lane.b32.xlu1 %v4312_v3, %s5625_s17  ;;  %4283 = vst.msk [vmem:[#allocation7 + $0x4] sm:$0x3] %vm4223_vm11, %v4281_v44  ;;  %v4301_v18 = vsel %vm4216_vm8, %v4299_v22, %v4300_v5  ;;  %5437 = vmatprep.subr.bf16.mxu1 %v5436_v54  ;;  %v5472_v6 = vpack.c.bf16 %v4518_v47, %v4517_v29  ;;  %v4342_v63 = vrot.slane %v4325_v36, 1  ;;  %v4364_v46 = vrot.slane %v4353_v8, 1  ;;  %v4521_v5 = vld [vmem:[%s8694_s5 + $0x2b0] sm:$0xff] }
 0x398   :  { %v4302_v52 = vsel %vm4218_vm9, %v4299_v22, %v4301_v18  ;;  %v5478_v56 = vpack.c.bf16 %v4504_v28, %v4503_v13  ;;  %v4156_v50 = vsel %vm4145_vm6, %v4136_v37, -inf  ;;  %v4505_v54 = vld [vmem:[%s8694_s5 + $0x230] sm:$0xff]  ;;  %v4510_v28 = vld [vmem:[%s8694_s5 + $0x258] sm:$0xff] }
 0x399   :  { %v4303_v17 = vsel %vm4220_vm10, %v4299_v22, %v4302_v52  ;;  %5473 = vmatprep.subr.bf16.mxu0 %v5472_v6 }
 0x39a   :  { %4305 = vst.msk [vmem:[#allocation7 + $0x6] sm:$0x3] %vm4223_vm11, %v4303_v17  ;;  %5475 = vmatpush3.bf16.msra.mxu0 %v5474_v48  ;;  %v4506_v17 = vld [vmem:[%s8694_s5 + $0x238] sm:$0xff] }
 0x39b   :  { %v5114_v14 = vpop.f32.mrb[28].mxu0  ;;  %5477 = vmatprep.subr.bf16.mxu0 %v5476_v62  ;;  %v4509_v62 = vld [vmem:[%s8694_s5 + $0x250] sm:$0xff] }
 0x39c   :  { %v5115_v45 = vpop.f32.mrb[29].mxu0  ;;  %v4092_v15 = vld [vmem:[#allocation6 + $0x68] ss:$2 sm:$0xf] }
 0x39d   :  { %v5116_v33 = vadd.f32 %v5115_v45, %v5114_v14  ;;  %v4124_v25 = vld [vmem:[#allocation6 + $0x69] ss:$2 sm:$0xf]  ;;  %v5482_v45 = vpack.c.bf16 %v4506_v17, %v4505_v54 }
 0x39e   :  { %v4142_v43 = vmax.f32 %v4092_v15, %v4124_v25  ;;  %5479 = vmatpush3.bf16.msra.mxu0 %v5478_v56  ;;  %v5490_v56 = vpack.c.bf16 %v4510_v28, %v4509_v62 }
 0x39f   :  { %v4041_v26 = vadd.f32 %v5116_v33, %v8076_v31  ;;  %v4135_v31 = vmax.f32 %v4078_v27, %v4110_v30 }
 0x3a0   :  { %v4165_v41 = vsel %vm4145_vm6, %v4142_v43, -inf }
 0x3a1   :  { %4064 = vst.msk [vmem:[#allocation6 + $0x70] sm:$0xff] %vm4049_vm5, %v4041_v26  ;;  %v4166_v40 = vmax.f32 %v4164_v11, %v4165_v41  ;;  %v4155_v57 = vsel %vm4145_vm6, %v4135_v31, -inf  ;;  %v4524_v11 = vld [vmem:[%s8694_s5 + $0x2c8] sm:$0xff]  ;;  %v4507_v41 = vld [vmem:[%s8694_s5 + $0x240] sm:$0xff] }
 0x3a2   :  { %v4157_v0 = vmax.f32 %v4155_v57, %v4156_v50  ;;  %v5486_v30 = vpack.c.bf16 %v4508_v21, %v4507_v41 }
 0x3a3   :  { %v4183_v32 = vadd.f32 %v8090_v53, %v4166_v40 }
 0x3a4   :  { %v4180_v15 = vadd.f32 %v8090_v53, %v4157_v0  ;;  %v4529_v0 = vld [vmem:[%s8694_s5 + $0x2f0] sm:$0xff] }
 0x3a5   :  { %v4191_v12 = vmax.f32 %v4183_v32, 0.0 }
 0x3a6   :  { %v4188_v35 = vmax.f32 %v4180_v15, 0.0 }
 0x3a7   :  { %v5117_v61 = vpop.f32.mrb[30].mxu0  ;;  %v4332_v60 = vrot.slane %v4191_v12, %v8093_v58 }
 0x3a8   :  { %v5118_v2 = vpop.f32.mrb[31].mxu0  ;;  %v4094_v29 = vld [vmem:[#allocation6 + $0x70] ss:$2 sm:$0xf]  ;;  %v4383_v37 = vrot.slane %v4188_v35, %v8093_v58  ;;  %v4468_v35 = vld [vmem:[%s8694_s5 + $0x108] sm:$0xff] }
 0x3a9   :  { %v5119_v34 = vadd.f32 %v5118_v2, %v5117_v61  ;;  %v4345_v59 = vsel %vm4214_vm7, %v4332_v60, %v4342_v63  ;;  %v4354_v4 = vcombine.high %v4332_v60, %v4332_v60  ;;  %v4335_v24 = vrot.slane %v4332_v60, 7  ;;  %v4126_v47 = vld [vmem:[#allocation6 + $0x71] ss:$2 sm:$0xf]  ;;  %v4528_v61 = vld [vmem:[%s8694_s5 + $0x2e8] sm:$0xff] }
 0x3aa   :  { %v4346_v16 = vsel %vm4216_vm8, %v4332_v60, %v4345_v59  ;;  %v4143_v7 = vmax.f32 %v4094_v29, %v4126_v47  ;;  %v4411_v12 = vcombine.high %v4383_v37, %v4383_v37  ;;  %v4400_v63 = vrot.slane %v4383_v37, 1  ;;  %v4511_v59 = vld [vmem:[%s8694_s5 + $0x260] sm:$0xff] }
 0x3ab   :  { %v4046_v10 = vadd.f32 %v8074_v55, %v5119_v34  ;;  %v4347_v22 = vsel %vm4218_vm9, %v4332_v60, %v4346_v16  ;;  %v4367_v3 = vsel %vm4214_vm7, %v4354_v4, %v4364_v46  ;;  %v4336_v44 = vsel %vm4214_vm7, %v4335_v24, %v4325_v36  ;;  %v4522_v55 = vld [vmem:[%s8694_s5 + $0x2b8] sm:$0xff] }
 0x3ac   :  { %v4348_v39 = vsel %vm4220_vm10, %v4332_v60, %v4347_v22  ;;  %v4368_v38 = vsel %vm4216_vm8, %v4354_v4, %v4367_v3  ;;  %v4337_v49 = vsel %vm4216_vm8, %v4335_v24, %v4336_v44  ;;  %v4357_v19 = vrot.slane %v4354_v4, 7 }
 0x3ad   :  { %4065 = vst.msk [vmem:[#allocation6 + $0x78] sm:$0xff] %vm4049_vm5, %v4046_v10  ;;  %4349 = vrot.lane.b32.xlu0 %v4348_v39, %s5625_s17  ;;  %v4369_v18 = vsel %vm4218_vm9, %v4354_v4, %v4368_v38  ;;  %v4338_v51 = vsel %vm4218_vm9, %v4335_v24, %v4337_v49  ;;  %v5480_v52 = vpack.c.bf16 %v4522_v55, %v4521_v5  ;;  %v4167_v40 = vsel %vm4145_vm6, %v4143_v7, -inf  ;;  %v4530_v10 = vld [vmem:[%s8694_s5 + $0x2f8] sm:$0xff]  ;;  %v4467_v7 = vld [vmem:[%s8694_s5 + $0x100] sm:$0xff] }
 0x3ae   :  { %v4370_v14 = vsel %vm4220_vm10, %v4354_v4, %v4369_v18  ;;  %v4339_v1 = vsel %vm4220_vm10, %v4335_v24, %v4338_v51  ;;  %v4358_v20 = vsel %vm4214_vm7, %v4357_v19, %v4353_v8  ;;  %v5484_v36 = vpack.c.bf16 %v4524_v11, %v4523_v23  ;;  %v4525_v8 = vld [vmem:[%s8694_s5 + $0x2d0] sm:$0xff]  ;;  %v4512_v4 = vld [vmem:[%s8694_s5 + $0x268] sm:$0xff]  ;;  %v4486_v23 = vld [vmem:[%s8694_s5 + $0x198] sm:$0xff] }
 0x3af   :  { %4371 = vrot.lane.b32.xlu1 %v4370_v14, %s5625_s17  ;;  %4341 = vst.msk [vmem:[#allocation7 + $0x8] sm:$0x3] %vm4223_vm11, %v4339_v1  ;;  %5481 = vmatprep.subr.bf16.mxu0 %v5480_v52  ;;  %v4359_v33 = vsel %vm4216_vm8, %v4357_v19, %v4358_v20  ;;  %v5488_v42 = vpack.c.bf16 %v4526_v9, %v4525_v8  ;;  %v4422_v57 = vrot.slane %v4411_v12, 1  ;;  %v4514_v52 = vld [vmem:[%s8694_s5 + $0x278] sm:$0xff]  ;;  %v4471_v9 = vld [vmem:[%s8694_s5 + $0x120] sm:$0xff] }
 0x3b0   :  { %5483 = vmatpush3.bf16.msra.mxu0 %v5482_v45  ;;  %v4360_v25 = vsel %vm4218_vm9, %v4357_v19, %v4359_v33  ;;  %v5494_v16 = vpack.c.bf16 %v4512_v4, %v4511_v59  ;;  %v5496_v51 = vpack.c.bf16 %v4530_v10, %v4529_v0  ;;  %v5438_v41 = vpack.c.bf16 %v4468_v35, %v4467_v7  ;;  %v4493_v59 = vld [vmem:[%s8694_s5 + $0x1d0] sm:$0xff]  ;;  %v4494_v4 = vld [vmem:[%s8694_s5 + $0x1d8] sm:$0xff]  ;;  %v4551_v35 = vld [vmem:[%s8694_s5 + $0x3a0] sm:$0xff] }
 0x3b1   :  { %v4361_v6 = vsel %vm4220_vm10, %v4357_v19, %v4360_v25  ;;  %5485 = vmatprep.subr.bf16.mxu0 %v5484_v36  ;;  %v4513_v19 = vld [vmem:[%s8694_s5 + $0x270] sm:$0xff]  ;;  %v4478_v10 = vld [vmem:[%s8694_s5 + $0x158] sm:$0xff] }
 0x3b2   :  { %4363 = vst.msk [vmem:[#allocation7 + $0xa] sm:$0x3] %vm4223_vm11, %v4361_v6  ;;  %v5498_v15 = vpack.c.bf16 %v4514_v52, %v4513_v19  ;;  %v4477_v0 = vld [vmem:[%s8694_s5 + $0x150] sm:$0xff]  ;;  %v4482_v19 = vld [vmem:[%s8694_s5 + $0x178] sm:$0xff]  ;;  %v4547_v52 = vld [vmem:[%s8694_s5 + $0x380] sm:$0xff] }
 0x3b4   :  { %v4096_v43 = vld [vmem:[#allocation6 + $0x78] ss:$2 sm:$0xf]  ;;  %v4128_v48 = vld [vmem:[#allocation6 + $0x79] ss:$2 sm:$0xf]  ;;  %5487 = vmatpush3.bf16.msra.mxu0 %v5486_v30 }
 0x3b5   :  { %v4144_v26 = vmax.f32 %v4096_v43, %v4128_v48  ;;  %5489 = vmatprep.subr.bf16.mxu0 %v5488_v42  ;;  %v4472_v42 = vld [vmem:[%s8694_s5 + $0x128] sm:$0xff] }
 0x3b6   :  { %v5446_v62 = vpack.c.bf16 %v4472_v42, %v4471_v9 }
 0x3b7   :  { %v4168_v27 = vsel %vm4145_vm6, %v4144_v26, -inf  ;;  %v4485_v26 = vld [vmem:[%s8694_s5 + $0x190] sm:$0xff] }
 0x3b8   :  { %v4169_v32 = vmax.f32 %v4167_v40, %v4168_v27  ;;  %5491 = vmatpush3.bf16.msra.mxu0 %v5490_v56  ;;  %v5440_v21 = vpack.c.bf16 %v4486_v23, %v4485_v26  ;;  %v4469_v40 = vld [vmem:[%s8694_s5 + $0x110] sm:$0xff]  ;;  %v4470_v27 = vld [vmem:[%s8694_s5 + $0x118] sm:$0xff] }
 0x3b9   :  { %v5442_v8 = vpack.c.bf16 %v4470_v27, %v4469_v40  ;;  %v4473_v56 = vld [vmem:[%s8694_s5 + $0x130] sm:$0xff] }
 0x3ba   :  { %v4184_v31 = vadd.f32 %v8090_v53, %v4169_v32  ;;  %v4527_v53 = vld [vmem:[%s8694_s5 + $0x2e0] sm:$0xff] }
 0x3bb   :  { %v5492_v50 = vpack.c.bf16 %v4528_v61, %v4527_v53  ;;  %v4487_v32 = vld [vmem:[%s8694_s5 + $0x1a0] sm:$0xff]  ;;  %v4474_v53 = vld [vmem:[%s8694_s5 + $0x138] sm:$0xff] }
 0x3bc   :  { %v4192_v13 = vmax.f32 %v4184_v31, 0.0  ;;  %v4491_v61 = vld [vmem:[%s8694_s5 + $0x1c0] sm:$0xff] }
 0x3bd   :  { %5493 = vmatprep.subr.bf16.mxu0 %v5492_v50  ;;  %v5450_v50 = vpack.c.bf16 %v4474_v53, %v4473_v56  ;;  %v4557_v56 = vld [vmem:[%s8694_s5 + $0x3d0] sm:$0xff]  ;;  %v4558_v53 = vld [vmem:[%s8694_s5 + $0x3d8] sm:$0xff] }
 0x3be   :  { %v4390_v60 = vrot.slane %v4192_v13, %v8093_v58  ;;  %5495 = vmatpush3.bf16.msra.mxu0 %v5494_v16  ;;  %v4489_v13 = vld [vmem:[%s8694_s5 + $0x1b0] sm:$0xff]  ;;  %v5456_v16 = vpack.c.bf16 %v4494_v4, %v4493_v59 }
 0x3bf   :  { %5497 = vmatprep.subr.bf16.mxu0 %v5496_v51  ;;  %v4481_v51 = vld [vmem:[%s8694_s5 + $0x170] sm:$0xff] }
 0x3c0   :  { %v4403_v2 = vsel %vm4214_vm7, %v4390_v60, %v4400_v63  ;;  %v4412_v46 = vcombine.high %v4390_v60, %v4390_v60  ;;  %v4393_v34 = vrot.slane %v4390_v60, 7 }
 0x3c1   :  { %v4404_v24 = vsel %vm4216_vm8, %v4390_v60, %v4403_v2 }
 0x3c2   :  { %v4405_v22 = vsel %vm4218_vm9, %v4390_v60, %v4404_v24  ;;  %v4425_v3 = vsel %vm4214_vm7, %v4412_v46, %v4422_v57  ;;  %v4394_v44 = vsel %vm4214_vm7, %v4393_v34, %v4383_v37  ;;  %v4415_v39 = vrot.slane %v4412_v46, 7  ;;  %5499 = vmatpush3.bf16.msra.mxu0 %v5498_v15  ;;  %v4488_v37 = vld [vmem:[%s8694_s5 + $0x1a8] sm:$0xff]  ;;  %v4475_v57 = vld [vmem:[%s8694_s5 + $0x140] sm:$0xff] }
 0x3c3   :  { %v4406_v38 = vsel %vm4220_vm10, %v4390_v60, %v4405_v22  ;;  %v4426_v49 = vsel %vm4216_vm8, %v4412_v46, %v4425_v3  ;;  %v4395_v5 = vsel %vm4216_vm8, %v4393_v34, %v4394_v44  ;;  %v5444_v31 = vpack.c.bf16 %v4488_v37, %v4487_v32  ;;  %v4492_v60 = vld [vmem:[%s8694_s5 + $0x1c8] sm:$0xff]  ;;  %v4495_v22 = vld [vmem:[%s8694_s5 + $0x1e0] sm:$0xff]  ;;  %v4538_v32 = vld [vmem:[%s8694_s5 + $0x338] sm:$0xff] }
 0x3c4   :  { %4407 = vrot.lane.b32.xlu0 %v4406_v38, %s5625_s17  ;;  %v4427_v55 = vsel %vm4218_vm9, %v4412_v46, %v4426_v49  ;;  %v4396_v54 = vsel %vm4218_vm9, %v4393_v34, %v4395_v5  ;;  %v4416_v18 = vsel %vm4214_vm7, %v4415_v39, %v4411_v12  ;;  %v4490_v12 = vld [vmem:[%s8694_s5 + $0x1b8] sm:$0xff]  ;;  %v4496_v3 = vld [vmem:[%s8694_s5 + $0x1e8] sm:$0xff]  ;;  %v5458_v44 = vpack.c.bf16 %v4478_v10, %v4477_v0  ;;  %v4479_v38 = vld [vmem:[%s8694_s5 + $0x160] sm:$0xff] }
 0x3c5   :  { %v4428_v17 = vsel %vm4220_vm10, %v4412_v46, %v4427_v55  ;;  %v4397_v14 = vsel %vm4220_vm10, %v4393_v34, %v4396_v54  ;;  %v4417_v1 = vsel %vm4216_vm8, %v4415_v39, %v4416_v18  ;;  %v5448_v28 = vpack.c.bf16 %v4490_v12, %v4489_v13  ;;  %v4476_v34 = vld [vmem:[%s8694_s5 + $0x148] sm:$0xff]  ;;  %v4497_v5 = vld [vmem:[%s8694_s5 + $0x1f0] sm:$0xff]  ;;  %v4498_v55 = vld [vmem:[%s8694_s5 + $0x1f8] sm:$0xff] }
 0x3c6   :  { %4429 = vrot.lane.b32.xlu1 %v4428_v17, %s5625_s17  ;;  %4399 = vst.msk [vmem:[#allocation7 + $0xc] sm:$0x3] %vm4223_vm11, %v4397_v14  ;;  %v4418_v45 = vsel %vm4218_vm9, %v4415_v39, %v4417_v1  ;;  %v5452_v46 = vpack.c.bf16 %v4492_v60, %v4491_v61  ;;  %v5454_v24 = vpack.c.bf16 %v4476_v34, %v4475_v57  ;;  %v4480_v49 = vld [vmem:[%s8694_s5 + $0x168] sm:$0xff]  ;;  %v4555_v37 = vld [vmem:[%s8694_s5 + $0x3c0] sm:$0xff]  ;;  %v4542_v57 = vld [vmem:[%s8694_s5 + $0x358] sm:$0xff] }
 0x3c7   :  { %v4419_v20 = vsel %vm4220_vm10, %v4415_v39, %v4418_v45  ;;  %v5460_v39 = vpack.c.bf16 %v4496_v3, %v4495_v22  ;;  %v5462_v54 = vpack.c.bf16 %v4480_v49, %v4479_v38  ;;  %v5464_v18 = vpack.c.bf16 %v4498_v55, %v4497_v5  ;;  %v4548_v17 = vld [vmem:[%s8694_s5 + $0x388] sm:$0xff]  ;;  %v4531_v45 = vld [vmem:[%s8694_s5 + $0x300] sm:$0xff]  ;;  %v4561_v0 = vld [vmem:[%s8694_s5 + $0x3f0] sm:$0xff] }
 0x3c8   :  { %4421 = vst.msk [vmem:[#allocation7 + $0xe] sm:$0x3] %vm4223_vm11, %v4419_v20  ;;  %v5466_v14 = vpack.c.bf16 %v4482_v19, %v4481_v51  ;;  %v5500_v1 = vpack.c.bf16 %v4548_v17, %v4547_v52  ;;  %v4532_v15 = vld [vmem:[%s8694_s5 + $0x308] sm:$0xff]  ;;  %v4549_v20 = vld [vmem:[%s8694_s5 + $0x390] sm:$0xff]  ;;  %v4539_v12 = vld [vmem:[%s8694_s5 + $0x340] sm:$0xff] }
 0x3c9   :  { %v4559_v34 = vld [vmem:[%s8694_s5 + $0x3e0] sm:$0xff]  ;;  %v4562_v10 = vld [vmem:[%s8694_s5 + $0x3f8] sm:$0xff]  ;;  %v4896_v5 = vld [vmem:[%s8696_s7 + $0x8] sm:$0xff] }
 0x3ca   :  { %v5528_v3 = vpack.c.bf16 %v4562_v10, %v4561_v0  ;;  %v4895_v49 = vld [vmem:[%s8696_s7] sm:$0xff]  ;;  %v4897_v55 = vld [vmem:[%s8696_s7 + $0x10] sm:$0xff]  ;;  %v4898_v51 = vld [vmem:[%s8696_s7 + $0x18] sm:$0xff] }
 0x3cb   :  { %v5536_v19 = vpack.c.bf16 %v4898_v51, %v4897_v55  ;;  %v4899_v52 = vld [vmem:[%s8696_s7 + $0x20] sm:$0xff]  ;;  %v4900_v17 = vld [vmem:[%s8696_s7 + $0x28] sm:$0xff] }
 0x3ef   :  { %v4233_v29 = vpop.permute.xlu0 %4232 }
 0x3f0   :  { %4236 = vst.msk [vmem:[#allocation7] sm:$0x3] %vm4235_vm12, %v4233_v29  ;;  %v4550_v29 = vld [vmem:[%s8694_s5 + $0x398] sm:$0xff] }
 0x3f1   :  { %v4256_v47 = vpop.permute.xlu1 %4255 }
 0x3f2   :  { %4258 = vst.msk [vmem:[#allocation7 + $0x2] sm:$0x3] %vm4235_vm12, %v4256_v47  ;;  %v5502_v47 = vpack.c.bf16 %v4532_v15, %v4531_v45  ;;  %v4902_v45 = vld [vmem:[%s8696_s7 + $0x38] sm:$0xff]  ;;  %v4903_v15 = vld [vmem:[%s8696_s7 + $0x40] sm:$0xff] }
 0x407   :  { %v4292_v33 = vpop.permute.xlu0 %4291 }
 0x408   :  { %4294 = vst.msk [vmem:[#allocation7 + $0x4] sm:$0x3] %vm4235_vm12, %v4292_v33  ;;  %v5504_v33 = vpack.c.bf16 %v4550_v29, %v4549_v20  ;;  %v4904_v29 = vld [vmem:[%s8696_s7 + $0x48] sm:$0xff] }
 0x409   :  { %v4314_v25 = vpop.permute.xlu1 %4313 }
 0x40a   :  { %4316 = vst.msk [vmem:[#allocation7 + $0x6] sm:$0x3] %vm4235_vm12, %v4314_v25  ;;  %v4533_v25 = vld [vmem:[%s8694_s5 + $0x310] sm:$0xff] }
 0x411   :  { %v4433_v6 = vld [vmem:[#allocation7] sm:$0xff] }
 0x412   :  { %v4579_v43 = vrot.slane %v4433_v6, %v8093_v58  ;;  %v4572_v48 = vcombine.high %v4433_v6, %v4433_v6  ;;  %v4534_v6 = vld [vmem:[%s8694_s5 + $0x318] sm:$0xff] }
 0x413   :  { %v5506_v26 = vpack.c.bf16 %v4534_v6, %v4533_v25  ;;  %v4906_v25 = vld [vmem:[%s8696_s7 + $0x58] sm:$0xff] }
 0x414   :  { %v4587_v11 = vcombine.high %v4579_v43, %v4579_v43  ;;  %v8436_v36 = vrot.slane %v4572_v48, %v8093_v58 }
 0x416   :  { %4678 = vmatprep.mubr.f32.mxu1 %v4587_v11  ;;  %v4588_v30 = vcombine.high %v8436_v36, %v8436_v36  ;;  %v4535_v11 = vld [vmem:[%s8694_s5 + $0x320] sm:$0xff] }
 0x417   :  { %4679 = vmatmul.mubr.f32.vlgmr.msra.gmra.mrb[16].mxu1 %v4579_v43  ;;  %v4552_v43 = vld [vmem:[%s8694_s5 + $0x3a8] sm:$0xff] }
 0x418   :  { %5439 = vmatpush3.bf16.msra.mxu1 %v5438_v41  ;;  %4748 = vmatprep.mubr.f32.mxu1 %v4588_v30  ;;  %v5508_v23 = vpack.c.bf16 %v4552_v43, %v4551_v35  ;;  %v4536_v41 = vld [vmem:[%s8694_s5 + $0x328] sm:$0xff]  ;;  %v4537_v30 = vld [vmem:[%s8694_s5 + $0x330] sm:$0xff] }
 0x419   :  { %5441 = vmatprep.subr.bf16.mxu1 %v5440_v21  ;;  %v4554_v21 = vld [vmem:[%s8694_s5 + $0x3b8] sm:$0xff]  ;;  %v5510_v40 = vpack.c.bf16 %v4536_v41, %v4535_v11  ;;  %v4908_v35 = vld [vmem:[%s8696_s7 + $0x68] sm:$0xff]  ;;  %v4909_v43 = vld [vmem:[%s8696_s7 + $0x70] sm:$0xff] }
 0x41c   :  { %5443 = vmatpush3.bf16.msra.mxu1 %v5442_v8  ;;  %v4556_v8 = vld [vmem:[%s8694_s5 + $0x3c8] sm:$0xff] }
 0x41d   :  { %5445 = vmatprep.subr.bf16.mxu1 %v5444_v31  ;;  %v5514_v31 = vpack.c.bf16 %v4538_v32, %v4537_v30  ;;  %v5516_v13 = vpack.c.bf16 %v4556_v8, %v4555_v37 }
 0x41f   :  { %v4350_v63 = vpop.permute.xlu0 %4349 }
 0x420   :  { %4352 = vst.msk [vmem:[#allocation7 + $0x8] sm:$0x3] %vm4235_vm12, %v4350_v63  ;;  %5447 = vmatpush3.bf16.msra.mxu1 %v5446_v62  ;;  %v4540_v62 = vld [vmem:[%s8694_s5 + $0x348] sm:$0xff] }
 0x421   :  { %v4372_v2 = vpop.permute.xlu1 %4371  ;;  %5449 = vmatprep.subr.bf16.mxu1 %v5448_v28  ;;  %v5518_v63 = vpack.c.bf16 %v4540_v62, %v4539_v12 }
 0x422   :  { %4374 = vst.msk [vmem:[#allocation7 + $0xa] sm:$0x3] %vm4235_vm12, %v4372_v2  ;;  %v5520_v2 = vpack.c.bf16 %v4558_v53, %v4557_v56 }
 0x424   :  { %5451 = vmatpush3.bf16.msra.mxu1 %v5450_v50 }
 0x425   :  { %5453 = vmatprep.subr.bf16.mxu1 %v5452_v46  ;;  %v4541_v46 = vld [vmem:[%s8694_s5 + $0x350] sm:$0xff] }
 0x426   :  { %v5522_v59 = vpack.c.bf16 %v4542_v57, %v4541_v46 }
 0x428   :  { %5455 = vmatpush3.bf16.msra.mxu1 %v5454_v24  ;;  %v4543_v24 = vld [vmem:[%s8694_s5 + $0x360] sm:$0xff] }
 0x429   :  { %5457 = vmatprep.subr.bf16.mxu1 %v5456_v16  ;;  %v4544_v16 = vld [vmem:[%s8694_s5 + $0x368] sm:$0xff] }
 0x42a   :  { %v5526_v22 = vpack.c.bf16 %v4544_v16, %v4543_v24 }
 0x42c   :  { %5459 = vmatpush3.bf16.msra.mxu1 %v5458_v44  ;;  %v4545_v44 = vld [vmem:[%s8694_s5 + $0x370] sm:$0xff] }
 0x42d   :  { %5461 = vmatprep.subr.bf16.mxu1 %v5460_v39  ;;  %v4546_v39 = vld [vmem:[%s8694_s5 + $0x378] sm:$0xff] }
 0x42e   :  { %v5530_v38 = vpack.c.bf16 %v4546_v39, %v4545_v44 }
 0x430   :  { %5463 = vmatpush3.bf16.msra.mxu1 %v5462_v54  ;;  %v5628_v54 = vmov 0.0|0.0  }
 0x431   :  { %5465 = vmatprep.subr.bf16.mxu1 %v5464_v18  ;;  %5532 = vmatprep.subr.bf16.mxu0 %v5628_v54  ;;  %v5533_v18 = vpack.c.bf16 %v4896_v5, %v4895_v49 }
 0x434   :  { %5467 = vmatpush3.bf16.msra.mxu1 %v5466_v14  ;;  %v5539_v14 = vpack.c.bf16 %v4900_v17, %v4899_v52 }
 0x435   :  { %5501 = vmatprep.subr.bf16.mxu1 %v5500_v1  ;;  %v4901_v1 = vld [vmem:[%s8696_s7 + $0x30] sm:$0xff] }
 0x436   :  { %v4408_v7 = vpop.permute.xlu0 %4407  ;;  %v5542_v20 = vpack.c.bf16 %v4902_v45, %v4901_v1 }
 0x437   :  { %4749 = vmatmul.mubr.f32.vlgmr.msra.gmra.mrb[18].mxu1 %v8436_v36  ;;  %4410 = vst.msk [vmem:[#allocation7 + $0xc] sm:$0x3] %vm4235_vm12, %v4408_v7  ;;  %v4553_v36 = vld [vmem:[%s8694_s5 + $0x3b0] sm:$0xff]  ;;  %v4907_v7 = vld [vmem:[%s8696_s7 + $0x60] sm:$0xff] }
 0x438   :  { %5503 = vmatpush3.bf16.msra.mxu1 %v5502_v47  ;;  %v4430_v48 = vpop.permute.xlu1 %4429  ;;  %v5512_v27 = vpack.c.bf16 %v4554_v21, %v4553_v36  ;;  %v5545_v47 = vpack.c.bf16 %v4904_v29, %v4903_v15 }
 0x439   :  { %4432 = vst.msk [vmem:[#allocation7 + $0xe] sm:$0x3] %vm4235_vm12, %v4430_v48  ;;  %5505 = vmatprep.subr.bf16.mxu1 %v5504_v33  ;;  %v4905_v33 = vld [vmem:[%s8696_s7 + $0x50] sm:$0xff]  ;;  %v5551_v48 = vpack.c.bf16 %v4908_v35, %v4907_v7 }
 0x43a   :  { %v5548_v6 = vpack.c.bf16 %v4906_v25, %v4905_v33 }
 0x43c   :  { %5507 = vmatpush3.bf16.msra.mxu1 %v5506_v26  ;;  %v4910_v26 = vld [vmem:[%s8696_s7 + $0x78] sm:$0xff] }
 0x43d   :  { %5509 = vmatprep.subr.bf16.mxu1 %v5508_v23  ;;  %v8719_v23 = vmov 0.0   ;;  %v5554_v11 = vpack.c.bf16 %v4910_v26, %v4909_v43 }
 0x440   :  { %5511 = vmatpush3.bf16.msra.mxu1 %v5510_v40  ;;  %v4434_v9 = vld [vmem:[#allocation7 + $0x8] sm:$0xff]  ;;  %v5038_v40 = vld [vmem:[%s8695_s6] ss:$0 sm:$0xff]  ;;  %s5630_s6 = smov [#allocation8]  }
 0x441   :  { %5513 = vmatprep.subr.bf16.mxu1 %v5512_v27  ;;  %v4596_v42 = vrot.slane %v4434_v9, %v8093_v58  ;;  %v4589_v28 = vcombine.high %v4434_v9, %v4434_v9  ;;  %s4995_s26 = sshll.u32 %s5630_s6, 4  ;;  %s4996_s26 = int_to_ptr.vmem [resolvable:$true] %s4995_s26 }
 0x442   :  { %s5598_s27 = scalar_lea.vmem %s4996_s26, 32  ;;  %p5603_p1 = scmp.lt.s32.totalorder %s4996_s26, %s4996_s26 }
 0x443   :  { %v4604_v61 = vcombine.high %v4596_v42, %v4596_v42  ;;  %v4603_v60 = vrot.slane %v4589_v28, %v8093_v58  ;;  %v4560_v58 = vld [vmem:[%s8694_s5 + $0x3e8] sm:$0xff]  ;;  %p5599_p0 = scmp.ne.s32.totalorder %s4996_s26, %s5598_s27  ;;  %p5604_p2 = scmp.lt.s32.totalorder %s5598_s27, %s5598_s27 }
 0x444   :  { %5515 = vmatpush3.bf16.msra.mxu1 %v5514_v31  ;;  %v5524_v4 = vpack.c.bf16 %v4560_v58, %v4559_v34 }
 0x445   :  { %4818 = vmatprep.mubr.f32.mxu0 %v4604_v61  ;;  %5517 = vmatprep.subr.bf16.mxu1 %v5516_v13  ;;  %v4605_v50 = vcombine.high %v4603_v60, %v4603_v60  ;;  %v5039_v61 = vld [vmem:[%s8697_s8] ss:$0 sm:$0xff]  ;;  %p5605_p3 = por %p5604_p2, %p5603_p1 }
 0x446   :  { %4819 = vmatmul.mubr.f32.vlgmr.msra.gmra.mrb[32].mxu0 %v4596_v42 }
 0x447   :  { %4888 = vmatprep.mubr.f32.mxu1 %v4605_v50  ;;  %5534 = vmatpush3.bf16.msra.mxu0 %v5533_v18  ;;  %p5606_p4 = pnand %p5605_p3, %p5599_p0 }
 0x448   :  { %5519 = vmatpush3.bf16.msra.mxu1 %v5518_v63  ;;  %5535 = vmatprep.subr.bf16.mxu0 %v5628_v54 }
 0x449   :  { %5521 = vmatprep.subr.bf16.mxu1 %v5520_v2  ;;  %5361 = vmatprep.mubr.msk.f32.mxu0 %vm5629_vm13, %v8719_v23 }
 0x44b   :  { %5537 = vmatpush3.bf16.msra.mxu0 %v5536_v19 }
 0x44c   :  { %5523 = vmatpush3.bf16.msra.mxu1 %v5522_v59  ;;  %5538 = vmatprep.subr.bf16.mxu0 %v5628_v54 }
 0x44d   :  { %5525 = vmatprep.subr.bf16.mxu1 %v5524_v4 }
 0x44f   :  { %5540 = vmatpush3.bf16.msra.mxu0 %v5539_v14 }
 0x450   :  { %5527 = vmatpush3.bf16.msra.mxu1 %v5526_v22  ;;  %5541 = vmatprep.subr.bf16.mxu0 %v5628_v54 }
 0x451   :  { %5529 = vmatprep.subr.bf16.mxu1 %v5528_v3 }
 0x453   :  { %5543 = vmatpush3.bf16.msra.mxu0 %v5542_v20 }
 0x454   :  { %5531 = vmatpush3.bf16.msra.mxu1 %v5530_v38  ;;  %5544 = vmatprep.subr.bf16.mxu0 %v5628_v54 }
 0x457   :  { %4889 = vmatmul.mubr.f32.vlgmr.msra.gmra.mrb[20].mxu1 %v4603_v60  ;;  %5546 = vmatpush3.bf16.msra.mxu0 %v5545_v47 }
 0x458   :  { %5547 = vmatprep.subr.bf16.mxu0 %v5628_v54 }
 0x45b   :  { %5549 = vmatpush3.bf16.msra.mxu0 %v5548_v6 }
 0x45c   :  { %5550 = vmatprep.subr.bf16.mxu0 %v5628_v54 }
 0x45f   :  { %5552 = vmatpush3.bf16.msra.mxu0 %v5551_v48 }
 0x460   :  { %5553 = vmatprep.subr.bf16.mxu0 %v5628_v54 }
 0x463   :  { %5555 = vmatpush3.bf16.msra.mxu0 %v5554_v11 }
 0x4ea   :  { %v5172_v41 = vpop.f32.mrb[16].mxu1 }
 0x4eb   :  { %v5173_v36 = vpop.f32.mrb[17].mxu1 }
 0x4ec   :  { %v5174_v21 = vadd.f32 %v5173_v36, %v5172_v41 }
 0x4ee   :  { %v4681_v32 = vadd.f32 %v5174_v21, %v5038_v40 }
 0x50a   :  { %v5207_v27 = vpop.f32.mrb[18].mxu1 }
 0x50b   :  { %v5208_v30 = vpop.f32.mrb[19].mxu1 }
 0x50c   :  { %v5209_v37 = vadd.f32 %v5208_v30, %v5207_v27 }
 0x50e   :  { %v4751_v8 = vadd.f32 %v5209_v37, %v4681_v32 }
 0x519   :  { %v5242_v31 = vpop.f32.mrb[32].mxu0 }
 0x51a   :  { %v5243_v9 = vpop.f32.mrb[33].mxu0 }
 0x51b   :  { %v5244_v42 = vadd.f32 %v5243_v9, %v5242_v31 }
 0x51d   :  { %v4821_v13 = vadd.f32 %v5244_v42, %v4751_v8 }
 0x52a   :  { %v5277_v12 = vpop.f32.mrb[20].mxu1 }
 0x52b   :  { %v5278_v62 = vpop.f32.mrb[21].mxu1 }
 0x52c   :  { %v5279_v28 = vadd.f32 %v5278_v62, %v5277_v12 }
 0x52e   :  { %v4891_v56 = vadd.f32 %v5279_v28, %v4821_v13 }
 0x530   :  { %v4894_v53 = vmax.f32 %v4891_v56, 0.0 }
 0x532   :  { %5362 = vmatmul.mubr.f32.vlgmr.msra.gmra.mrb[34].mxu0 %v4894_v53 }
 0x605   :  { %v4984_v60 = vpop.f32.mrb[34].mxu0 }
 0x606   :  { %v4985_v63 = vadd.f32 %v5039_v61, %v4984_v60  ;;  %v5363_v50 = vpop.f32.mrb[35].mxu0 }
 0x608   :  { %4988 = vst.msk [vmem:[#allocation8] sm:$0x3] %vm4223_vm11, %v4985_v63 }
 0x609   :  { %5609 = shalt.err (!%p5606_p4)
}
 0x60a   :  { %s5610_s10 = scalar_lea.hbm %s8698_s9, 32 }
 0x60b   :  { %p5611_p5 = scmp.ne.s32.totalorder %s8698_s9, %s5610_s10  ;;  %p5614_p6 = scmp.lt.u32.totalorder %s5610_s10, %s8698_s9 }
 0x60d   :  { %p5616_p7 = pnand %p5614_p6, %p5611_p5 }
 0x60f   :  { %5619 = shalt.err (!%p5616_p7)
}
 0x610   :  { %4998 = dma.vmem_to_hbm [thread:$0]  %s4996_s26, 32, %s8698_s9, [#allocation9]  }
 0x611   :  { %5620 = dma.done.wait [#allocation9], 32  }
 0x612   :  { %5621 = vsyncadd [#allocation9], 4294967264 }
 0x613   :  { %5002 = vsyncpa [#allocation9], 1 }

</bundles_post_ra>
